<compile_context>
chip_gen: v6e
topology: v6e:2x2x1
jax: 0.10.0
libtpu: 0.0.40
codegen_flags: <defaults>
</compile_context>

<pallas_src>
import functools

import numpy as np
import jax
import jax.numpy as jnp
from jax import lax
from jax.experimental import pallas as pl
from jax.experimental.pallas import tpu as pltpu

_ROW_TILE = 256          # row tile for the matmul kernels
_LN_EPS = 1e-6
_INV_SQRT2 = float(1.0 / np.sqrt(2.0))

# static conv geometry (kernel, stride, pad) per downsample — kept out of the
# params pytree so jit does not trace over it.
DS_CFG = ((7, 4, 2), (3, 2, 1), (3, 2, 1), (3, 2, 1))

_PARALLEL = pltpu.CompilerParams(dimension_semantics=("parallel",))


def _round_up(n, m):
    return ((n + m - 1) // m) * m


# ----------------------------- Pallas kernels ------------------------------

def _layernorm_f32(x, g, b, eps):
    # channels_first LayerNorm (per spatial position over channels, biased var)
    mu = jnp.mean(x, axis=-1, keepdims=True)
    xc = x - mu
    var = jnp.mean(xc * xc, axis=-1, keepdims=True)
    return xc * lax.rsqrt(var + eps) * g + b


def _embed_kernel(x_ref, w_ref, b_ref, g_ref, beta_ref, o_ref, *, eps):
    # PatchEmbedding: conv-as-matmul (bf16 operands, f32 accumulate) + bias,
    # fused with the channels_first LayerNorm.
    acc = jnp.dot(x_ref[...], w_ref[...], preferred_element_type=jnp.float32)
    acc = acc + b_ref[...]
    y = _layernorm_f32(acc, g_ref[...], beta_ref[...], eps)
    o_ref[...] = y.astype(o_ref.dtype)


def _pool_kernel(x_ref, g_ref, b_ref, o_ref, *, H, W, eps):
    # Fused token mixer: out = x + AvgPool3x3(norm1(x), count_include_pad=False) - norm1(x)
    # x_ref holds a zero-padded (1, H+2, W+2, C) block; shifts are static slices.
    # TODO(synk): pool_size is hard-wired to 3 (the module default); other sizes
    # would need a generalized shift/count loop.
    x = x_ref[0].astype(jnp.float32)                        # (H+2, W+2, C)
    xn = _layernorm_f32(x, g_ref[...], b_ref[...], eps)

    # zero out the LN values on the padded border (they must not contribute)
    ri = lax.broadcasted_iota(jnp.int32, (H + 2, W + 2, 1), 0)
    ci = lax.broadcasted_iota(jnp.int32, (H + 2, W + 2, 1), 1)
    valid = ((ri >= 1) & (ri <= H) & (ci >= 1) & (ci <= W)).astype(jnp.float32)
    xs = xn * valid

    # separable 3x3 box sum: 2x3 shifted adds (pure VPU work)
    rows = (lax.slice_in_dim(xs, 0, H, axis=0)
            + lax.slice_in_dim(xs, 1, H + 1, axis=0)
            + lax.slice_in_dim(xs, 2, H + 2, axis=0))        # (H, W+2, C)
    box = (lax.slice_in_dim(rows, 0, W, axis=1)
           + lax.slice_in_dim(rows, 1, W + 1, axis=1)
           + lax.slice_in_dim(rows, 2, W + 2, axis=1))       # (H, W, C)

    # per-pixel count of valid neighbours (count_include_pad=False divisor)
    ii = lax.broadcasted_iota(jnp.int32, (H, W, 1), 0)
    jj = lax.broadcasted_iota(jnp.int32, (H, W, 1), 1)
    rcnt = 3.0 - (ii == 0).astype(jnp.float32) - (ii == H - 1).astype(jnp.float32)
    ccnt = 3.0 - (jj == 0).astype(jnp.float32) - (jj == W - 1).astype(jnp.float32)
    pooled = box / (rcnt * ccnt)

    x_in = x[1:H + 1, 1:W + 1, :]
    xn_in = xn[1:H + 1, 1:W + 1, :]
    o_ref[0] = (x_in + pooled - xn_in).astype(o_ref.dtype)


def _mlp1_kernel(x_ref, g_ref, b_ref, w_ref, wb_ref, o_ref, *, eps):
    # Fused: norm2 -> fc1 (1x1 conv as matmul) -> exact-erf GELU.
    x = x_ref[...].astype(jnp.float32)
    xn = _layernorm_f32(x, g_ref[...], b_ref[...], eps)
    acc = jnp.dot(xn.astype(jnp.bfloat16), w_ref[...],
                  preferred_element_type=jnp.float32) + wb_ref[...]
    acc = 0.5 * acc * (1.0 + lax.erf(acc * _INV_SQRT2))
    o_ref[...] = acc.astype(o_ref.dtype)


def _mlp2_kernel(h_ref, w_ref, b_ref, r_ref, o_ref):
    # Fused: fc2 + bias + residual add (Dropout(p=0) is the identity).
    acc = jnp.dot(h_ref[...], w_ref[...], preferred_element_type=jnp.float32)
    o_ref[...] = (acc + b_ref[...] + r_ref[...].astype(jnp.float32)).astype(o_ref.dtype)


def _head_kernel(x_ref, w_ref, b_ref, o_ref):
    # Fused: global spatial mean + classifier matmul for the whole batch.
    xm = jnp.mean(x_ref[...].astype(jnp.float32), axis=1)    # (B, C)
    o_ref[...] = jnp.dot(xm.astype(jnp.bfloat16), w_ref[...],
                         preferred_element_type=jnp.float32) + b_ref[...]


# ----------------------------- kernel wrappers ------------------------------

def _row_grid(N):
    tile = N if N <= _ROW_TILE else _ROW_TILE
    return tile, (pl.cdiv(N, tile),)


def patch_embed(x2d, w, b, g, beta):
    """x2d: (N, K) bf16 patches; w: (K, Cout) bf16; b/g/beta: (1, Cout) f32."""
    N, K = x2d.shape
    Cout = w.shape[1]
    tile, grid = _row_grid(N)
    return pl.pallas_call(
        functools.partial(_embed_kernel, eps=_LN_EPS),
        out_shape=jax.ShapeDtypeStruct((N, Cout), jnp.bfloat16),
        grid=grid,
        in_specs=[pl.BlockSpec((tile, K), lambda i: (i, 0)),
                  pl.BlockSpec((K, Cout), lambda i: (0, 0)),
                  pl.BlockSpec((1, Cout), lambda i: (0, 0)),
                  pl.BlockSpec((1, Cout), lambda i: (0, 0)),
                  pl.BlockSpec((1, Cout), lambda i: (0, 0))],
        out_specs=pl.BlockSpec((tile, Cout), lambda i: (i, 0)),
        compiler_params=_PARALLEL,
    )(x2d, w, b, g, beta)


def pool_block(x4, g, b):
    """Fused norm1 + 3x3 avgpool(count_include_pad=False) - norm1 + residual.

    x4: (B, H, W, C) bf16; g/b: (1, C) f32.
    """
    B, H, W, C = x4.shape
    xp = jnp.pad(x4, ((0, 0), (1, 1), (1, 1), (0, 0)))       # zero spatial border
    return pl.pallas_call(
        functools.partial(_pool_kernel, H=H, W=W, eps=_LN_EPS),
        out_shape=jax.ShapeDtypeStruct((B, H, W, C), jnp.bfloat16),
        grid=(B,),
        in_specs=[pl.BlockSpec((1, H + 2, W + 2, C), lambda i: (i, 0, 0, 0)),
                  pl.BlockSpec((1, C), lambda i: (0, 0)),
                  pl.BlockSpec((1, C), lambda i: (0, 0))],
        out_specs=pl.BlockSpec((1, H, W, C), lambda i: (i, 0, 0, 0)),
        compiler_params=_PARALLEL,
    )(xp, g, b)


def mlp_fc1(x2d, g, b, w, wb):
    N, C = x2d.shape
    Hd = w.shape[1]
    tile, grid = _row_grid(N)
    return pl.pallas_call(
        functools.partial(_mlp1_kernel, eps=_LN_EPS),
        out_shape=jax.ShapeDtypeStruct((N, Hd), jnp.bfloat16),
        grid=grid,
        in_specs=[pl.BlockSpec((tile, C), lambda i: (i, 0)),
                  pl.BlockSpec((1, C), lambda i: (0, 0)),
                  pl.BlockSpec((1, C), lambda i: (0, 0)),
                  pl.BlockSpec((C, Hd), lambda i: (0, 0)),
                  pl.BlockSpec((1, Hd), lambda i: (0, 0))],
        out_specs=pl.BlockSpec((tile, Hd), lambda i: (i, 0)),
        compiler_params=_PARALLEL,
    )(x2d, g, b, w, wb)


def mlp_fc2(h2d, w, wb, residual):
    N, Hd = h2d.shape
    C = w.shape[1]
    tile, grid = _row_grid(N)
    return pl.pallas_call(
        _mlp2_kernel,
        out_shape=jax.ShapeDtypeStruct((N, C), jnp.bfloat16),
        grid=grid,
        in_specs=[pl.BlockSpec((tile, Hd), lambda i: (i, 0)),
                  pl.BlockSpec((Hd, C), lambda i: (0, 0)),
                  pl.BlockSpec((1, C), lambda i: (0, 0)),
                  pl.BlockSpec((tile, C), lambda i: (i, 0))],
        out_specs=pl.BlockSpec((tile, C), lambda i: (i, 0)),
        compiler_params=_PARALLEL,
    )(h2d, w, wb, residual)


def head_forward(x3d, w, b):
    """x3d: (B, HW, C) bf16; w: (C, num_classes) bf16; b: (1, num_classes) f32."""
    B, HW, C = x3d.shape
    NC = w.shape[1]
    return pl.pallas_call(
        _head_kernel,
        out_shape=jax.ShapeDtypeStruct((B, NC), jnp.float32),
        grid=(1,),
        in_specs=[pl.BlockSpec((B, HW, C), lambda i: (0, 0, 0)),
                  pl.BlockSpec((C, NC), lambda i: (0, 0)),
                  pl.BlockSpec((1, NC), lambda i: (0, 0))],
        out_specs=pl.BlockSpec((B, NC), lambda i: (0, 0)),
    )(x3d, w, b)


# ------------------------------- glue (JAX) --------------------------------

def extract_patches(x, ksize, stride, pad):
    """im2col: x (B,H,W,Cin) -> (B,Ho,Wo,k*k*Cin), element order (kh, kw, cin)."""
    B, H, W, Cin = x.shape
    Ho = (H + 2 * pad - ksize) // stride + 1
    Wo = (W + 2 * pad - ksize) // stride + 1
    xp = jnp.pad(x, ((0, 0), (pad, pad), (pad, pad), (0, 0)))
    cols = []
    for kh in range(ksize):
        for kw in range(ksize):
            sl = xp[:, kh:kh + stride * (Ho - 1) + 1:stride,
                    kw:kw + stride * (Wo - 1) + 1:stride, :]
            cols.append(sl)
    return jnp.concatenate(cols, axis=-1), Ho, Wo


def init_params(key, embedding_dims, mlp_ratios, layers, num_classes, in_ch=3):
    params = {'downsamples': [], 'stages': []}
    cins = [in_ch] + list(embedding_dims[:3])
    for i, (ks, st, pd) in enumerate(DS_CFG):
        cin, cout = cins[i], embedding_dims[i]
        key, k1, k2 = jax.random.split(key, 3)
        w = jax.random.normal(k1, (cout, cin, ks, ks), jnp.float32) * 0.05
        bias = jax.random.normal(k2, (cout,), jnp.float32) * 0.05
        # (Cout,Cin,kh,kw) -> (kh,kw,Cin,Cout) -> (k*k*Cin, Cout) matching im2col order
        wmat = jnp.transpose(w, (2, 3, 1, 0)).reshape(ks * ks * cin, cout)
        kpad = _round_up(ks * ks * cin, 8)               # align K for the MXU
        if kpad > wmat.shape[0]:
            wmat = jnp.pad(wmat, ((0, kpad - wmat.shape[0]), (0, 0)))
        params['downsamples'].append(dict(
            wmat=wmat.astype(jnp.bfloat16),
            bias=bias.reshape(1, cout),
            ln_w=jnp.ones((1, cout), jnp.float32),
            ln_b=jnp.zeros((1, cout), jnp.float32)))
    for i in range(4):
        dims = embedding_dims[i]
        hidden = int(dims * mlp_ratios[i])
        blocks = []
        for _ in range(layers[i]):
            key, k1, k2, k3, k4 = jax.random.split(key, 5)
            fc1_w = jax.random.normal(k1, (hidden, dims), jnp.float32) * 0.05
            fc1_b = jax.random.normal(k2, (hidden,), jnp.float32) * 0.05
            fc2_w = jax.random.normal(k3, (dims, hidden), jnp.float32) * 0.05
            fc2_b = jax.random.normal(k4, (dims,), jnp.float32) * 0.05
            blocks.append(dict(
                n1_w=jnp.ones((1, dims), jnp.float32),
                n1_b=jnp.zeros((1, dims), jnp.float32),
                n2_w=jnp.ones((1, dims), jnp.float32),
                n2_b=jnp.zeros((1, dims), jnp.float32),
                fc1_w=fc1_w.T.astype(jnp.bfloat16), fc1_b=fc1_b.reshape(1, hidden),
                fc2_w=fc2_w.T.astype(jnp.bfloat16), fc2_b=fc2_b.reshape(1, dims)))
        params['stages'].append(blocks)
    key, k1, k2 = jax.random.split(key, 3)
    head_w = jax.random.normal(k1, (num_classes, embedding_dims[-1]), jnp.float32) * 0.05
    head_b = jax.random.normal(k2, (num_classes,), jnp.float32) * 0.05
    params['head_w_t'] = head_w.T.astype(jnp.bfloat16)
    params['head_b'] = head_b.reshape(1, num_classes)
    return params


def poolformer_forward(params, x_nchw, ds_cfg=DS_CFG):
    # NCHW (PyTorch convention) -> NHWC internal layout, bf16 activations
    x = jnp.transpose(x_nchw, (0, 2, 3, 1)).astype(jnp.bfloat16)
    B = x.shape[0]
    Ho = Wo = C = None
    for i in range(4):
        ks, st, pd = ds_cfg[i]
        ds = params['downsamples'][i]
        # --- PatchEmbedding: conv as im2col + fused matmul/bias/LayerNorm ---
        patches, Ho, Wo = extract_patches(x, ks, st, pd)
        kkc = patches.shape[-1]
        p2 = patches.reshape(B * Ho * Wo, kkc)
        kpad = ds['wmat'].shape[0]
        if kpad > kkc:
            p2 = jnp.pad(p2, ((0, 0), (0, kpad - kkc)))
        y = patch_embed(p2, ds['wmat'], ds['bias'], ds['ln_w'], ds['ln_b'])
        C = y.shape[-1]
        x4 = y.reshape(B, Ho, Wo, C)
        # --- stage of PoolFormer Blocks (3 fused kernels per block) ---
        for blk in params['stages'][i]:
            x4 = pool_block(x4, blk['n1_w'], blk['n1_b'])
            xf = x4.reshape(B * Ho * Wo, C)
            h = mlp_fc1(xf, blk['n2_w'], blk['n2_b'], blk['fc1_w'], blk['fc1_b'])
            xf = mlp_fc2(h, blk['fc2_w'], blk['fc2_b'], xf)
            x4 = xf.reshape(B, Ho, Wo, C)
        x = x4
    # --- global mean pool + classifier head (single batched kernel) ---
    return head_forward(x.reshape(B, Ho * Wo, C), params['head_w_t'], params['head_b'])


# ---------------------------------- main ------------------------------------

if __name__ == "__main__":
    embedding_dims = [8, 16, 32, 64]
    mlp_ratios = [4, 4, 4, 4]
    layers = [1, 1, 1, 1]
    num_classes = 10

    key = jax.random.PRNGKey(0)
    key_in, key_p = jax.random.split(key)
    x = jax.random.normal(key_in, (2, 3, 32, 32), jnp.float32)  # NCHW like PyTorch

    params = init_params(key_p, embedding_dims, mlp_ratios, layers, num_classes)

    forward = jax.jit(poolformer_forward)
    out = jax.block_until_ready(forward(params, x))

    assert out.shape == (2, num_classes), out.shape
    assert bool(jnp.all(jnp.isfinite(out)))
    print("KERNEL_OK")
</pallas_src>

<mosaic_0001>
module attributes {stable_mosaic.version = 11 : i64} {
  func.func @_embed_kernel(%arg0: i32, %arg1: memref<128x152xbf16, #tpu.memory_space<vmem>>, %arg2: memref<152x8xbf16, #tpu.memory_space<vmem>>, %arg3: memref<1x8xf32, #tpu.memory_space<vmem>>, %arg4: memref<1x8xf32, #tpu.memory_space<vmem>>, %arg5: memref<1x8xf32, #tpu.memory_space<vmem>>, %arg6: memref<128x8xbf16, #tpu.memory_space<vmem>>) attributes {dimension_semantics = [#tpu.dimension_semantics<parallel>], iteration_bounds = array<i64: 1>, scalar_prefetch = 0 : i64, scratch_operands = 0 : i64, tpu.core_type = #tpu.core_type<tc>, window_params = [{transform_indices = @transform_0, window_bounds = array<i64: 128, 152>}, {pipeline_mode = #tpu.pipeline_mode<synchronous>, transform_indices = @transform_1, window_bounds = array<i64: 152, 8>}, {pipeline_mode = #tpu.pipeline_mode<synchronous>, transform_indices = @transform_2, window_bounds = array<i64: 1, 8>}, {pipeline_mode = #tpu.pipeline_mode<synchronous>, transform_indices = @transform_3, window_bounds = array<i64: 1, 8>}, {pipeline_mode = #tpu.pipeline_mode<synchronous>, transform_indices = @transform_4, window_bounds = array<i64: 1, 8>}, {transform_indices = @transform_5, window_bounds = array<i64: 128, 8>}]} {
    %c0 = arith.constant 0 : index
    %c0_0 = arith.constant 0 : index
    %0 = vector.load %arg1[%c0, %c0_0] : memref<128x152xbf16, #tpu.memory_space<vmem>>, vector<128x152xbf16>
    %c0_1 = arith.constant 0 : index
    %c0_2 = arith.constant 0 : index
    %1 = vector.load %arg2[%c0_1, %c0_2] : memref<152x8xbf16, #tpu.memory_space<vmem>>, vector<152x8xbf16>
    %cst = arith.constant dense<0.000000e+00> : vector<128x8xf32>
    %2 = tpu.matmul %0, %1, %cst {dimension_numbers = #tpu.dot_dimension_numbers<[1], [0], [0], [1], [0, 0, 1, 1], [], []>} : vector<128x152xbf16>, vector<152x8xbf16>, vector<128x8xf32> -> vector<128x8xf32>
    %c0_3 = arith.constant 0 : index
    %c0_4 = arith.constant 0 : index
    %3 = vector.load %arg3[%c0_3, %c0_4] : memref<1x8xf32, #tpu.memory_space<vmem>>, vector<1x8xf32>
    %4 = vector.broadcast %3 : vector<1x8xf32> to vector<128x8xf32>
    %5 = arith.addf %2, %4 : vector<128x8xf32>
    %c0_5 = arith.constant 0 : index
    %c0_6 = arith.constant 0 : index
    %6 = vector.load %arg4[%c0_5, %c0_6] : memref<1x8xf32, #tpu.memory_space<vmem>>, vector<1x8xf32>
    %c0_7 = arith.constant 0 : index
    %c0_8 = arith.constant 0 : index
    %7 = vector.load %arg5[%c0_7, %c0_8] : memref<1x8xf32, #tpu.memory_space<vmem>>, vector<1x8xf32>
    %cst_9 = arith.constant dense<0.000000e+00> : vector<128xf32>
    %8 = vector.multi_reduction <add>, %5, %cst_9 [1] : vector<128x8xf32> to vector<128xf32>
    %9 = vector.shape_cast %8 : vector<128xf32> to vector<128x1xf32>
    %cst_10 = arith.constant 8.000000e+00 : f32
    %10 = vector.broadcast %cst_10 : f32 to vector<128x1xf32>
    %11 = arith.divf %9, %10 : vector<128x1xf32>
    %12 = vector.broadcast %11 : vector<128x1xf32> to vector<128x8xf32>
    %13 = arith.subf %5, %12 : vector<128x8xf32>
    %14 = arith.mulf %13, %13 : vector<128x8xf32>
    %cst_11 = arith.constant dense<0.000000e+00> : vector<128xf32>
    %15 = vector.multi_reduction <add>, %14, %cst_11 [1] : vector<128x8xf32> to vector<128xf32>
    %16 = vector.shape_cast %15 : vector<128xf32> to vector<128x1xf32>
    %cst_12 = arith.constant 8.000000e+00 : f32
    %17 = vector.broadcast %cst_12 : f32 to vector<128x1xf32>
    %18 = arith.divf %16, %17 : vector<128x1xf32>
    %cst_13 = arith.constant 9.99999997E-7 : f32
    %19 = vector.broadcast %cst_13 : f32 to vector<128x1xf32>
    %20 = arith.addf %18, %19 : vector<128x1xf32>
    %21 = math.rsqrt %20 : vector<128x1xf32>
    %22 = vector.broadcast %21 : vector<128x1xf32> to vector<128x8xf32>
    %23 = arith.mulf %13, %22 : vector<128x8xf32>
    %24 = vector.broadcast %6 : vector<1x8xf32> to vector<128x8xf32>
    %25 = arith.mulf %23, %24 : vector<128x8xf32>
    %26 = vector.broadcast %7 : vector<1x8xf32> to vector<128x8xf32>
    %27 = arith.addf %25, %26 : vector<128x8xf32>
    %28 = arith.truncf %27 : vector<128x8xf32> to vector<128x8xbf16>
    %c0_14 = arith.constant 0 : index
    %c0_15 = arith.constant 0 : index
    %29 = vector.load %arg6[%c0_14, %c0_15] : memref<128x8xbf16, #tpu.memory_space<vmem>>, vector<128x8xbf16>
    tpu.vector_store %arg6[%c0_14, %c0_15], %28 {strides = array<i32>} : memref<128x8xbf16, #tpu.memory_space<vmem>>, vector<128x8xbf16>,
    return
  }
  func.func @transform_0(%arg0: i32) -> (i32, i32) {
    %c0_i32 = arith.constant 0 : i32
    %c0_i32_0 = arith.constant 0 : i32
    return %arg0, %c0_i32 : i32, i32
  }
  func.func @transform_1(%arg0: i32) -> (i32, i32) {
    %c0_i32 = arith.constant 0 : i32
    %c0_i32_0 = arith.constant 0 : i32
    %c0_i32_1 = arith.constant 0 : i32
    return %c0_i32, %c0_i32_0 : i32, i32
  }
  func.func @transform_2(%arg0: i32) -> (i32, i32) {
    %c0_i32 = arith.constant 0 : i32
    %c0_i32_0 = arith.constant 0 : i32
    %c0_i32_1 = arith.constant 0 : i32
    return %c0_i32, %c0_i32_0 : i32, i32
  }
  func.func @transform_3(%arg0: i32) -> (i32, i32) {
    %c0_i32 = arith.constant 0 : i32
    %c0_i32_0 = arith.constant 0 : i32
    %c0_i32_1 = arith.constant 0 : i32
    return %c0_i32, %c0_i32_0 : i32, i32
  }
  func.func @transform_4(%arg0: i32) -> (i32, i32) {
    %c0_i32 = arith.constant 0 : i32
    %c0_i32_0 = arith.constant 0 : i32
    %c0_i32_1 = arith.constant 0 : i32
    return %c0_i32, %c0_i32_0 : i32, i32
  }
  func.func @transform_5(%arg0: i32) -> (i32, i32) {
    %c0_i32 = arith.constant 0 : i32
    %c0_i32_0 = arith.constant 0 : i32
    return %arg0, %c0_i32 : i32, i32
  }
}

module attributes {stable_mosaic.version = 11 : i64} {
  func.func @_pool_kernel(%arg0: i32, %arg1: memref<1x10x10x8xbf16, #tpu.memory_space<vmem>>, %arg2: memref<1x8xf32, #tpu.memory_space<vmem>>, %arg3: memref<1x8xf32, #tpu.memory_space<vmem>>, %arg4: memref<1x8x8x8xbf16, #tpu.memory_space<vmem>>) attributes {dimension_semantics = [#tpu.dimension_semantics<parallel>], iteration_bounds = array<i64: 2>, scalar_prefetch = 0 : i64, scratch_operands = 0 : i64, tpu.core_type = #tpu.core_type<tc>, window_params = [{transform_indices = @transform_0, window_bounds = array<i64: 1, 10, 10, 8>}, {pipeline_mode = #tpu.pipeline_mode<synchronous>, transform_indices = @transform_1, window_bounds = array<i64: 1, 8>}, {pipeline_mode = #tpu.pipeline_mode<synchronous>, transform_indices = @transform_2, window_bounds = array<i64: 1, 8>}, {transform_indices = @transform_3, window_bounds = array<i64: 1, 8, 8, 8>}]} {
    %c0 = arith.constant 0 : index
    %c0_0 = arith.constant 0 : index
    %c0_1 = arith.constant 0 : index
    %c0_2 = arith.constant 0 : index
    %0 = vector.load %arg1[%c0, %c0_0, %c0_1, %c0_2] : memref<1x10x10x8xbf16, #tpu.memory_space<vmem>>, vector<1x10x10x8xbf16>
    %1 = vector.shape_cast %0 : vector<1x10x10x8xbf16> to vector<10x10x8xbf16>
    %2 = arith.extf %1 : vector<10x10x8xbf16> to vector<10x10x8xf32>
    %c0_3 = arith.constant 0 : index
    %c0_4 = arith.constant 0 : index
    %3 = vector.load %arg2[%c0_3, %c0_4] : memref<1x8xf32, #tpu.memory_space<vmem>>, vector<1x8xf32>
    %c0_5 = arith.constant 0 : index
    %c0_6 = arith.constant 0 : index
    %4 = vector.load %arg3[%c0_5, %c0_6] : memref<1x8xf32, #tpu.memory_space<vmem>>, vector<1x8xf32>
    %cst = arith.constant dense<0.000000e+00> : vector<10x10xf32>
    %5 = vector.multi_reduction <add>, %2, %cst [2] : vector<10x10x8xf32> to vector<10x10xf32>
    %6 = vector.shape_cast %5 : vector<10x10xf32> to vector<10x10x1xf32>
    %cst_7 = arith.constant 8.000000e+00 : f32
    %7 = vector.broadcast %cst_7 : f32 to vector<10x10x1xf32>
    %8 = arith.divf %6, %7 : vector<10x10x1xf32>
    %9 = vector.broadcast %8 : vector<10x10x1xf32> to vector<10x10x8xf32>
    %10 = arith.subf %2, %9 : vector<10x10x8xf32>
    %11 = arith.mulf %10, %10 : vector<10x10x8xf32>
    %cst_8 = arith.constant dense<0.000000e+00> : vector<10x10xf32>
    %12 = vector.multi_reduction <add>, %11, %cst_8 [2] : vector<10x10x8xf32> to vector<10x10xf32>
    %13 = vector.shape_cast %12 : vector<10x10xf32> to vector<10x10x1xf32>
    %cst_9 = arith.constant 8.000000e+00 : f32
    %14 = vector.broadcast %cst_9 : f32 to vector<10x10x1xf32>
    %15 = arith.divf %13, %14 : vector<10x10x1xf32>
    %cst_10 = arith.constant 9.99999997E-7 : f32
    %16 = vector.broadcast %cst_10 : f32 to vector<10x10x1xf32>
    %17 = arith.addf %15, %16 : vector<10x10x1xf32>
    %18 = math.rsqrt %17 : vector<10x10x1xf32>
    %19 = vector.broadcast %18 : vector<10x10x1xf32> to vector<10x10x8xf32>
    %20 = arith.mulf %10, %19 : vector<10x10x8xf32>
    %21 = vector.shape_cast %3 : vector<1x8xf32> to vector<1x1x8xf32>
    %22 = vector.broadcast %21 : vector<1x1x8xf32> to vector<10x10x8xf32>
    %23 = arith.mulf %20, %22 : vector<10x10x8xf32>
    %24 = vector.shape_cast %4 : vector<1x8xf32> to vector<1x1x8xf32>
    %25 = vector.broadcast %24 : vector<1x1x8xf32> to vector<10x10x8xf32>
    %26 = arith.addf %23, %25 : vector<10x10x8xf32>
    %27 = tpu.iota {dimensions = array<i32: 0>} : vector<10x10x1xi32>
    %28 = tpu.iota {dimensions = array<i32: 1>} : vector<10x10x1xi32>
    %c1_i32 = arith.constant 1 : i32
    %29 = vector.broadcast %c1_i32 : i32 to vector<10x10x1xi32>
    %30 = arith.cmpi sge, %27, %29 : vector<10x10x1xi32>
    %c8_i32 = arith.constant 8 : i32
    %31 = vector.broadcast %c8_i32 : i32 to vector<10x10x1xi32>
    %32 = arith.cmpi sle, %27, %31 : vector<10x10x1xi32>
    %33 = arith.andi %30, %32 : vector<10x10x1xi1>
    %c1_i32_11 = arith.constant 1 : i32
    %34 = vector.broadcast %c1_i32_11 : i32 to vector<10x10x1xi32>
    %35 = arith.cmpi sge, %28, %34 : vector<10x10x1xi32>
    %36 = arith.andi %33, %35 : vector<10x10x1xi1>
    %c8_i32_12 = arith.constant 8 : i32
    %37 = vector.broadcast %c8_i32_12 : i32 to vector<10x10x1xi32>
    %38 = arith.cmpi sle, %28, %37 : vector<10x10x1xi32>
    %39 = arith.andi %36, %38 : vector<10x10x1xi1>
    %40 = arith.extui %39 : vector<10x10x1xi1> to vector<10x10x1xi32>
    %41 = arith.sitofp %40 : vector<10x10x1xi32> to vector<10x10x1xf32>
    %42 = vector.broadcast %41 : vector<10x10x1xf32> to vector<10x10x8xf32>
    %43 = arith.mulf %26, %42 : vector<10x10x8xf32>
    %44 = vector.extract_strided_slice %43 {offsets = [0, 0, 0], sizes = [8, 10, 8], strides = [1, 1, 1]} : vector<10x10x8xf32> to vector<8x10x8xf32>
    %45 = vector.extract_strided_slice %43 {offsets = [1, 0, 0], sizes = [8, 10, 8], strides = [1, 1, 1]} : vector<10x10x8xf32> to vector<8x10x8xf32>
    %46 = arith.addf %44, %45 : vector<8x10x8xf32>
    %47 = vector.extract_strided_slice %43 {offsets = [2, 0, 0], sizes = [8, 10, 8], strides = [1, 1, 1]} : vector<10x10x8xf32> to vector<8x10x8xf32>
    %48 = arith.addf %46, %47 : vector<8x10x8xf32>
    %49 = vector.extract_strided_slice %48 {offsets = [0, 0, 0], sizes = [8, 8, 8], strides = [1, 1, 1]} : vector<8x10x8xf32> to vector<8x8x8xf32>
    %50 = vector.extract_strided_slice %48 {offsets = [0, 1, 0], sizes = [8, 8, 8], strides = [1, 1, 1]} : vector<8x10x8xf32> to vector<8x8x8xf32>
    %51 = arith.addf %49, %50 : vector<8x8x8xf32>
    %52 = vector.extract_strided_slice %48 {offsets = [0, 2, 0], sizes = [8, 8, 8], strides = [1, 1, 1]} : vector<8x10x8xf32> to vector<8x8x8xf32>
    %53 = arith.addf %51, %52 : vector<8x8x8xf32>
    %54 = tpu.iota {dimensions = array<i32: 0>} : vector<8x8x1xi32>
    %55 = tpu.iota {dimensions = array<i32: 1>} : vector<8x8x1xi32>
    %c0_i32 = arith.constant 0 : i32
    %56 = vector.broadcast %c0_i32 : i32 to vector<8x8x1xi32>
    %57 = arith.cmpi eq, %54, %56 : vector<8x8x1xi32>
    %58 = arith.extui %57 : vector<8x8x1xi1> to vector<8x8x1xi32>
    %59 = arith.sitofp %58 : vector<8x8x1xi32> to vector<8x8x1xf32>
    %cst_13 = arith.constant 3.000000e+00 : f32
    %60 = vector.broadcast %cst_13 : f32 to vector<8x8x1xf32>
    %61 = arith.subf %60, %59 : vector<8x8x1xf32>
    %c7_i32 = arith.constant 7 : i32
    %62 = vector.broadcast %c7_i32 : i32 to vector<8x8x1xi32>
    %63 = arith.cmpi eq, %54, %62 : vector<8x8x1xi32>
    %64 = arith.extui %63 : vector<8x8x1xi1> to vector<8x8x1xi32>
    %65 = arith.sitofp %64 : vector<8x8x1xi32> to vector<8x8x1xf32>
    %66 = arith.subf %61, %65 : vector<8x8x1xf32>
    %c0_i32_14 = arith.constant 0 : i32
    %67 = vector.broadcast %c0_i32_14 : i32 to vector<8x8x1xi32>
    %68 = arith.cmpi eq, %55, %67 : vector<8x8x1xi32>
    %69 = arith.extui %68 : vector<8x8x1xi1> to vector<8x8x1xi32>
    %70 = arith.sitofp %69 : vector<8x8x1xi32> to vector<8x8x1xf32>
    %cst_15 = arith.constant 3.000000e+00 : f32
    %71 = vector.broadcast %cst_15 : f32 to vector<8x8x1xf32>
    %72 = arith.subf %71, %70 : vector<8x8x1xf32>
    %c7_i32_16 = arith.constant 7 : i32
    %73 = vector.broadcast %c7_i32_16 : i32 to vector<8x8x1xi32>
    %74 = arith.cmpi eq, %55, %73 : vector<8x8x1xi32>
    %75 = arith.extui %74 : vector<8x8x1xi1> to vector<8x8x1xi32>
    %76 = arith.sitofp %75 : vector<8x8x1xi32> to vector<8x8x1xf32>
    %77 = arith.subf %72, %76 : vector<8x8x1xf32>
    %78 = arith.mulf %66, %77 : vector<8x8x1xf32>
    %79 = vector.broadcast %78 : vector<8x8x1xf32> to vector<8x8x8xf32>
    %80 = arith.divf %53, %79 : vector<8x8x8xf32>
    %81 = vector.extract_strided_slice %2 {offsets = [1, 1, 0], sizes = [8, 8, 8], strides = [1, 1, 1]} : vector<10x10x8xf32> to vector<8x8x8xf32>
    %82 = vector.extract_strided_slice %26 {offsets = [1, 1, 0], sizes = [8, 8, 8], strides = [1, 1, 1]} : vector<10x10x8xf32> to vector<8x8x8xf32>
    %83 = arith.addf %81, %80 : vector<8x8x8xf32>
    %84 = arith.subf %83, %82 : vector<8x8x8xf32>
    %85 = arith.truncf %84 : vector<8x8x8xf32> to vector<8x8x8xbf16>
    %c0_17 = arith.constant 0 : index
    %c0_18 = arith.constant 0 : index
    %c0_19 = arith.constant 0 : index
    %c0_20 = arith.constant 0 : index
    %86 = vector.load %arg4[%c0_17, %c0_18, %c0_19, %c0_20] : memref<1x8x8x8xbf16, #tpu.memory_space<vmem>>, vector<1x8x8x8xbf16>
    %87 = vector.shape_cast %86 : vector<1x8x8x8xbf16> to vector<8x8x8xbf16>
    %88 = vector.shape_cast %85 : vector<8x8x8xbf16> to vector<1x8x8x8xbf16>
    tpu.vector_store %arg4[%c0_17, %c0_18, %c0_19, %c0_20], %88 {strides = array<i32>} : memref<1x8x8x8xbf16, #tpu.memory_space<vmem>>, vector<1x8x8x8xbf16>,
    return
  }
  func.func @transform_0(%arg0: i32) -> (i32, i32, i32, i32) {
    %c0_i32 = arith.constant 0 : i32
    %c0_i32_0 = arith.constant 0 : i32
    %c0_i32_1 = arith.constant 0 : i32
    %c0_i32_2 = arith.constant 0 : i32
    return %arg0, %c0_i32, %c0_i32_0, %c0_i32_1 : i32, i32, i32, i32
  }
  func.func @transform_1(%arg0: i32) -> (i32, i32) {
    %c0_i32 = arith.constant 0 : i32
    %c0_i32_0 = arith.constant 0 : i32
    %c0_i32_1 = arith.constant 0 : i32
    return %c0_i32, %c0_i32_0 : i32, i32
  }
  func.func @transform_2(%arg0: i32) -> (i32, i32) {
    %c0_i32 = arith.constant 0 : i32
    %c0_i32_0 = arith.constant 0 : i32
    %c0_i32_1 = arith.constant 0 : i32
    return %c0_i32, %c0_i32_0 : i32, i32
  }
  func.func @transform_3(%arg0: i32) -> (i32, i32, i32, i32) {
    %c0_i32 = arith.constant 0 : i32
    %c0_i32_0 = arith.constant 0 : i32
    %c0_i32_1 = arith.constant 0 : i32
    %c0_i32_2 = arith.constant 0 : i32
    return %arg0, %c0_i32, %c0_i32_0, %c0_i32_1 : i32, i32, i32, i32
  }
}

module attributes {stable_mosaic.version = 11 : i64} {
  func.func @_mlp1_kernel(%arg0: i32, %arg1: memref<128x8xbf16, #tpu.memory_space<vmem>>, %arg2: memref<1x8xf32, #tpu.memory_space<vmem>>, %arg3: memref<1x8xf32, #tpu.memory_space<vmem>>, %arg4: memref<8x32xbf16, #tpu.memory_space<vmem>>, %arg5: memref<1x32xf32, #tpu.memory_space<vmem>>, %arg6: memref<128x32xbf16, #tpu.memory_space<vmem>>) attributes {dimension_semantics = [#tpu.dimension_semantics<parallel>], iteration_bounds = array<i64: 1>, scalar_prefetch = 0 : i64, scratch_operands = 0 : i64, tpu.core_type = #tpu.core_type<tc>, window_params = [{transform_indices = @transform_0, window_bounds = array<i64: 128, 8>}, {pipeline_mode = #tpu.pipeline_mode<synchronous>, transform_indices = @transform_1, window_bounds = array<i64: 1, 8>}, {pipeline_mode = #tpu.pipeline_mode<synchronous>, transform_indices = @transform_2, window_bounds = array<i64: 1, 8>}, {pipeline_mode = #tpu.pipeline_mode<synchronous>, transform_indices = @transform_3, window_bounds = array<i64: 8, 32>}, {pipeline_mode = #tpu.pipeline_mode<synchronous>, transform_indices = @transform_4, window_bounds = array<i64: 1, 32>}, {transform_indices = @transform_5, window_bounds = array<i64: 128, 32>}]} {
    %c0 = arith.constant 0 : index
    %c0_0 = arith.constant 0 : index
    %0 = vector.load %arg1[%c0, %c0_0] : memref<128x8xbf16, #tpu.memory_space<vmem>>, vector<128x8xbf16>
    %1 = arith.extf %0 : vector<128x8xbf16> to vector<128x8xf32>
    %c0_1 = arith.constant 0 : index
    %c0_2 = arith.constant 0 : index
    %2 = vector.load %arg2[%c0_1, %c0_2] : memref<1x8xf32, #tpu.memory_space<vmem>>, vector<1x8xf32>
    %c0_3 = arith.constant 0 : index
    %c0_4 = arith.constant 0 : index
    %3 = vector.load %arg3[%c0_3, %c0_4] : memref<1x8xf32, #tpu.memory_space<vmem>>, vector<1x8xf32>
    %cst = arith.constant dense<0.000000e+00> : vector<128xf32>
    %4 = vector.multi_reduction <add>, %1, %cst [1] : vector<128x8xf32> to vector<128xf32>
    %5 = vector.shape_cast %4 : vector<128xf32> to vector<128x1xf32>
    %cst_5 = arith.constant 8.000000e+00 : f32
    %6 = vector.broadcast %cst_5 : f32 to vector<128x1xf32>
    %7 = arith.divf %5, %6 : vector<128x1xf32>
    %8 = vector.broadcast %7 : vector<128x1xf32> to vector<128x8xf32>
    %9 = arith.subf %1, %8 : vector<128x8xf32>
    %10 = arith.mulf %9, %9 : vector<128x8xf32>
    %cst_6 = arith.constant dense<0.000000e+00> : vector<128xf32>
    %11 = vector.multi_reduction <add>, %10, %cst_6 [1] : vector<128x8xf32> to vector<128xf32>
    %12 = vector.shape_cast %11 : vector<128xf32> to vector<128x1xf32>
    %cst_7 = arith.constant 8.000000e+00 : f32
    %13 = vector.broadcast %cst_7 : f32 to vector<128x1xf32>
    %14 = arith.divf %12, %13 : vector<128x1xf32>
    %cst_8 = arith.constant 9.99999997E-7 : f32
    %15 = vector.broadcast %cst_8 : f32 to vector<128x1xf32>
    %16 = arith.addf %14, %15 : vector<128x1xf32>
    %17 = math.rsqrt %16 : vector<128x1xf32>
    %18 = vector.broadcast %17 : vector<128x1xf32> to vector<128x8xf32>
    %19 = arith.mulf %9, %18 : vector<128x8xf32>
    %20 = vector.broadcast %2 : vector<1x8xf32> to vector<128x8xf32>
    %21 = arith.mulf %19, %20 : vector<128x8xf32>
    %22 = vector.broadcast %3 : vector<1x8xf32> to vector<128x8xf32>
    %23 = arith.addf %21, %22 : vector<128x8xf32>
    %24 = arith.truncf %23 : vector<128x8xf32> to vector<128x8xbf16>
    %c0_9 = arith.constant 0 : index
    %c0_10 = arith.constant 0 : index
    %25 = vector.load %arg4[%c0_9, %c0_10] : memref<8x32xbf16, #tpu.memory_space<vmem>>, vector<8x32xbf16>
    %cst_11 = arith.constant dense<0.000000e+00> : vector<128x32xf32>
    %26 = tpu.matmul %24, %25, %cst_11 {dimension_numbers = #tpu.dot_dimension_numbers<[1], [0], [0], [1], [0, 0, 1, 1], [], []>} : vector<128x8xbf16>, vector<8x32xbf16>, vector<128x32xf32> -> vector<128x32xf32>
    %c0_12 = arith.constant 0 : index
    %c0_13 = arith.constant 0 : index
    %27 = vector.load %arg5[%c0_12, %c0_13] : memref<1x32xf32, #tpu.memory_space<vmem>>, vector<1x32xf32>
    %28 = vector.broadcast %27 : vector<1x32xf32> to vector<128x32xf32>
    %29 = arith.addf %26, %28 : vector<128x32xf32>
    %cst_14 = arith.constant 5.000000e-01 : f32
    %30 = vector.broadcast %cst_14 : f32 to vector<128x32xf32>
    %31 = arith.mulf %30, %29 : vector<128x32xf32>
    %cst_15 = arith.constant 0.707106769 : f32
    %32 = vector.broadcast %cst_15 : f32 to vector<128x32xf32>
    %33 = arith.mulf %29, %32 : vector<128x32xf32>
    %34 = math.erf %33 : vector<128x32xf32>
    %cst_16 = arith.constant 1.000000e+00 : f32
    %35 = vector.broadcast %cst_16 : f32 to vector<128x32xf32>
    %36 = arith.addf %35, %34 : vector<128x32xf32>
    %37 = arith.mulf %31, %36 : vector<128x32xf32>
    %38 = arith.truncf %37 : vector<128x32xf32> to vector<128x32xbf16>
    %c0_17 = arith.constant 0 : index
    %c0_18 = arith.constant 0 : index
    %39 = vector.load %arg6[%c0_17, %c0_18] : memref<128x32xbf16, #tpu.memory_space<vmem>>, vector<128x32xbf16>
    tpu.vector_store %arg6[%c0_17, %c0_18], %38 {strides = array<i32>} : memref<128x32xbf16, #tpu.memory_space<vmem>>, vector<128x32xbf16>,
    return
  }
  func.func @transform_0(%arg0: i32) -> (i32, i32) {
    %c0_i32 = arith.constant 0 : i32
    %c0_i32_0 = arith.constant 0 : i32
    return %arg0, %c0_i32 : i32, i32
  }
  func.func @transform_1(%arg0: i32) -> (i32, i32) {
    %c0_i32 = arith.constant 0 : i32
    %c0_i32_0 = arith.constant 0 : i32
    %c0_i32_1 = arith.constant 0 : i32
    return %c0_i32, %c0_i32_0 : i32, i32
  }
  func.func @transform_2(%arg0: i32) -> (i32, i32) {
    %c0_i32 = arith.constant 0 : i32
    %c0_i32_0 = arith.constant 0 : i32
    %c0_i32_1 = arith.constant 0 : i32
    return %c0_i32, %c0_i32_0 : i32, i32
  }
  func.func @transform_3(%arg0: i32) -> (i32, i32) {
    %c0_i32 = arith.constant 0 : i32
    %c0_i32_0 = arith.constant 0 : i32
    %c0_i32_1 = arith.constant 0 : i32
    return %c0_i32, %c0_i32_0 : i32, i32
  }
  func.func @transform_4(%arg0: i32) -> (i32, i32) {
    %c0_i32 = arith.constant 0 : i32
    %c0_i32_0 = arith.constant 0 : i32
    %c0_i32_1 = arith.constant 0 : i32
    return %c0_i32, %c0_i32_0 : i32, i32
  }
  func.func @transform_5(%arg0: i32) -> (i32, i32) {
    %c0_i32 = arith.constant 0 : i32
    %c0_i32_0 = arith.constant 0 : i32
    return %arg0, %c0_i32 : i32, i32
  }
}

module attributes {stable_mosaic.version = 11 : i64} {
  func.func @_mlp2_kernel(%arg0: i32, %arg1: memref<128x32xbf16, #tpu.memory_space<vmem>>, %arg2: memref<32x8xbf16, #tpu.memory_space<vmem>>, %arg3: memref<1x8xf32, #tpu.memory_space<vmem>>, %arg4: memref<128x8xbf16, #tpu.memory_space<vmem>>, %arg5: memref<128x8xbf16, #tpu.memory_space<vmem>>) attributes {dimension_semantics = [#tpu.dimension_semantics<parallel>], iteration_bounds = array<i64: 1>, scalar_prefetch = 0 : i64, scratch_operands = 0 : i64, tpu.core_type = #tpu.core_type<tc>, window_params = [{transform_indices = @transform_0, window_bounds = array<i64: 128, 32>}, {pipeline_mode = #tpu.pipeline_mode<synchronous>, transform_indices = @transform_1, window_bounds = array<i64: 32, 8>}, {pipeline_mode = #tpu.pipeline_mode<synchronous>, transform_indices = @transform_2, window_bounds = array<i64: 1, 8>}, {transform_indices = @transform_3, window_bounds = array<i64: 128, 8>}, {transform_indices = @transform_4, window_bounds = array<i64: 128, 8>}]} {
    %c0 = arith.constant 0 : index
    %c0_0 = arith.constant 0 : index
    %0 = vector.load %arg1[%c0, %c0_0] : memref<128x32xbf16, #tpu.memory_space<vmem>>, vector<128x32xbf16>
    %c0_1 = arith.constant 0 : index
    %c0_2 = arith.constant 0 : index
    %1 = vector.load %arg2[%c0_1, %c0_2] : memref<32x8xbf16, #tpu.memory_space<vmem>>, vector<32x8xbf16>
    %cst = arith.constant dense<0.000000e+00> : vector<128x8xf32>
    %2 = tpu.matmul %0, %1, %cst {dimension_numbers = #tpu.dot_dimension_numbers<[1], [0], [0], [1], [0, 0, 1, 1], [], []>} : vector<128x32xbf16>, vector<32x8xbf16>, vector<128x8xf32> -> vector<128x8xf32>
    %c0_3 = arith.constant 0 : index
    %c0_4 = arith.constant 0 : index
    %3 = vector.load %arg3[%c0_3, %c0_4] : memref<1x8xf32, #tpu.memory_space<vmem>>, vector<1x8xf32>
    %4 = vector.broadcast %3 : vector<1x8xf32> to vector<128x8xf32>
    %5 = arith.addf %2, %4 : vector<128x8xf32>
    %c0_5 = arith.constant 0 : index
    %c0_6 = arith.constant 0 : index
    %6 = vector.load %arg4[%c0_5, %c0_6] : memref<128x8xbf16, #tpu.memory_space<vmem>>, vector<128x8xbf16>
    %7 = arith.extf %6 : vector<128x8xbf16> to vector<128x8xf32>
    %8 = arith.addf %5, %7 : vector<128x8xf32>
    %9 = arith.truncf %8 : vector<128x8xf32> to vector<128x8xbf16>
    %c0_7 = arith.constant 0 : index
    %c0_8 = arith.constant 0 : index
    %10 = vector.load %arg5[%c0_7, %c0_8] : memref<128x8xbf16, #tpu.memory_space<vmem>>, vector<128x8xbf16>
    tpu.vector_store %arg5[%c0_7, %c0_8], %9 {strides = array<i32>} : memref<128x8xbf16, #tpu.memory_space<vmem>>, vector<128x8xbf16>,
    return
  }
  func.func @transform_0(%arg0: i32) -> (i32, i32) {
    %c0_i32 = arith.constant 0 : i32
    %c0_i32_0 = arith.constant 0 : i32
    return %arg0, %c0_i32 : i32, i32
  }
  func.func @transform_1(%arg0: i32) -> (i32, i32) {
    %c0_i32 = arith.constant 0 : i32
    %c0_i32_0 = arith.constant 0 : i32
    %c0_i32_1 = arith.constant 0 : i32
    return %c0_i32, %c0_i32_0 : i32, i32
  }
  func.func @transform_2(%arg0: i32) -> (i32, i32) {
    %c0_i32 = arith.constant 0 : i32
    %c0_i32_0 = arith.constant 0 : i32
    %c0_i32_1 = arith.constant 0 : i32
    return %c0_i32, %c0_i32_0 : i32, i32
  }
  func.func @transform_3(%arg0: i32) -> (i32, i32) {
    %c0_i32 = arith.constant 0 : i32
    %c0_i32_0 = arith.constant 0 : i32
    return %arg0, %c0_i32 : i32, i32
  }
  func.func @transform_4(%arg0: i32) -> (i32, i32) {
    %c0_i32 = arith.constant 0 : i32
    %c0_i32_0 = arith.constant 0 : i32
    return %arg0, %c0_i32 : i32, i32
  }
}

module attributes {stable_mosaic.version = 11 : i64} {
  func.func @_embed_kernel(%arg0: i32, %arg1: memref<32x72xbf16, #tpu.memory_space<vmem>>, %arg2: memref<72x16xbf16, #tpu.memory_space<vmem>>, %arg3: memref<1x16xf32, #tpu.memory_space<vmem>>, %arg4: memref<1x16xf32, #tpu.memory_space<vmem>>, %arg5: memref<1x16xf32, #tpu.memory_space<vmem>>, %arg6: memref<32x16xbf16, #tpu.memory_space<vmem>>) attributes {dimension_semantics = [#tpu.dimension_semantics<parallel>], iteration_bounds = array<i64: 1>, scalar_prefetch = 0 : i64, scratch_operands = 0 : i64, tpu.core_type = #tpu.core_type<tc>, window_params = [{transform_indices = @transform_0, window_bounds = array<i64: 32, 72>}, {pipeline_mode = #tpu.pipeline_mode<synchronous>, transform_indices = @transform_1, window_bounds = array<i64: 72, 16>}, {pipeline_mode = #tpu.pipeline_mode<synchronous>, transform_indices = @transform_2, window_bounds = array<i64: 1, 16>}, {pipeline_mode = #tpu.pipeline_mode<synchronous>, transform_indices = @transform_3, window_bounds = array<i64: 1, 16>}, {pipeline_mode = #tpu.pipeline_mode<synchronous>, transform_indices = @transform_4, window_bounds = array<i64: 1, 16>}, {transform_indices = @transform_5, window_bounds = array<i64: 32, 16>}]} {
    %c0 = arith.constant 0 : index
    %c0_0 = arith.constant 0 : index
    %0 = vector.load %arg1[%c0, %c0_0] : memref<32x72xbf16, #tpu.memory_space<vmem>>, vector<32x72xbf16>
    %c0_1 = arith.constant 0 : index
    %c0_2 = arith.constant 0 : index
    %1 = vector.load %arg2[%c0_1, %c0_2] : memref<72x16xbf16, #tpu.memory_space<vmem>>, vector<72x16xbf16>
    %cst = arith.constant dense<0.000000e+00> : vector<32x16xf32>
    %2 = tpu.matmul %0, %1, %cst {dimension_numbers = #tpu.dot_dimension_numbers<[1], [0], [0], [1], [0, 0, 1, 1], [], []>} : vector<32x72xbf16>, vector<72x16xbf16>, vector<32x16xf32> -> vector<32x16xf32>
    %c0_3 = arith.constant 0 : index
    %c0_4 = arith.constant 0 : index
    %3 = vector.load %arg3[%c0_3, %c0_4] : memref<1x16xf32, #tpu.memory_space<vmem>>, vector<1x16xf32>
    %4 = vector.broadcast %3 : vector<1x16xf32> to vector<32x16xf32>
    %5 = arith.addf %2, %4 : vector<32x16xf32>
    %c0_5 = arith.constant 0 : index
    %c0_6 = arith.constant 0 : index
    %6 = vector.load %arg4[%c0_5, %c0_6] : memref<1x16xf32, #tpu.memory_space<vmem>>, vector<1x16xf32>
    %c0_7 = arith.constant 0 : index
    %c0_8 = arith.constant 0 : index
    %7 = vector.load %arg5[%c0_7, %c0_8] : memref<1x16xf32, #tpu.memory_space<vmem>>, vector<1x16xf32>
    %cst_9 = arith.constant dense<0.000000e+00> : vector<32xf32>
    %8 = vector.multi_reduction <add>, %5, %cst_9 [1] : vector<32x16xf32> to vector<32xf32>
    %9 = vector.shape_cast %8 : vector<32xf32> to vector<32x1xf32>
    %cst_10 = arith.constant 1.600000e+01 : f32
    %10 = vector.broadcast %cst_10 : f32 to vector<32x1xf32>
    %11 = arith.divf %9, %10 : vector<32x1xf32>
    %12 = vector.broadcast %11 : vector<32x1xf32> to vector<32x16xf32>
    %13 = arith.subf %5, %12 : vector<32x16xf32>
    %14 = arith.mulf %13, %13 : vector<32x16xf32>
    %cst_11 = arith.constant dense<0.000000e+00> : vector<32xf32>
    %15 = vector.multi_reduction <add>, %14, %cst_11 [1] : vector<32x16xf32> to vector<32xf32>
    %16 = vector.shape_cast %15 : vector<32xf32> to vector<32x1xf32>
    %cst_12 = arith.constant 1.600000e+01 : f32
    %17 = vector.broadcast %cst_12 : f32 to vector<32x1xf32>
    %18 = arith.divf %16, %17 : vector<32x1xf32>
    %cst_13 = arith.constant 9.99999997E-7 : f32
    %19 = vector.broadcast %cst_13 : f32 to vector<32x1xf32>
    %20 = arith.addf %18, %19 : vector<32x1xf32>
    %21 = math.rsqrt %20 : vector<32x1xf32>
    %22 = vector.broadcast %21 : vector<32x1xf32> to vector<32x16xf32>
    %23 = arith.mulf %13, %22 : vector<32x16xf32>
    %24 = vector.broadcast %6 : vector<1x16xf32> to vector<32x16xf32>
    %25 = arith.mulf %23, %24 : vector<32x16xf32>
    %26 = vector.broadcast %7 : vector<1x16xf32> to vector<32x16xf32>
    %27 = arith.addf %25, %26 : vector<32x16xf32>
    %28 = arith.truncf %27 : vector<32x16xf32> to vector<32x16xbf16>
    %c0_14 = arith.constant 0 : index
    %c0_15 = arith.constant 0 : index
    %29 = vector.load %arg6[%c0_14, %c0_15] : memref<32x16xbf16, #tpu.memory_space<vmem>>, vector<32x16xbf16>
    tpu.vector_store %arg6[%c0_14, %c0_15], %28 {strides = array<i32>} : memref<32x16xbf16, #tpu.memory_space<vmem>>, vector<32x16xbf16>,
    return
  }
  func.func @transform_0(%arg0: i32) -> (i32, i32) {
    %c0_i32 = arith.constant 0 : i32
    %c0_i32_0 = arith.constant 0 : i32
    return %arg0, %c0_i32 : i32, i32
  }
  func.func @transform_1(%arg0: i32) -> (i32, i32) {
    %c0_i32 = arith.constant 0 : i32
    %c0_i32_0 = arith.constant 0 : i32
    %c0_i32_1 = arith.constant 0 : i32
    return %c0_i32, %c0_i32_0 : i32, i32
  }
  func.func @transform_2(%arg0: i32) -> (i32, i32) {
    %c0_i32 = arith.constant 0 : i32
    %c0_i32_0 = arith.constant 0 : i32
    %c0_i32_1 = arith.constant 0 : i32
    return %c0_i32, %c0_i32_0 : i32, i32
  }
  func.func @transform_3(%arg0: i32) -> (i32, i32) {
    %c0_i32 = arith.constant 0 : i32
    %c0_i32_0 = arith.constant 0 : i32
    %c0_i32_1 = arith.constant 0 : i32
    return %c0_i32, %c0_i32_0 : i32, i32
  }
  func.func @transform_4(%arg0: i32) -> (i32, i32) {
    %c0_i32 = arith.constant 0 : i32
    %c0_i32_0 = arith.constant 0 : i32
    %c0_i32_1 = arith.constant 0 : i32
    return %c0_i32, %c0_i32_0 : i32, i32
  }
  func.func @transform_5(%arg0: i32) -> (i32, i32) {
    %c0_i32 = arith.constant 0 : i32
    %c0_i32_0 = arith.constant 0 : i32
    return %arg0, %c0_i32 : i32, i32
  }
}

module attributes {stable_mosaic.version = 11 : i64} {
  func.func @_pool_kernel(%arg0: i32, %arg1: memref<1x6x6x16xbf16, #tpu.memory_space<vmem>>, %arg2: memref<1x16xf32, #tpu.memory_space<vmem>>, %arg3: memref<1x16xf32, #tpu.memory_space<vmem>>, %arg4: memref<1x4x4x16xbf16, #tpu.memory_space<vmem>>) attributes {dimension_semantics = [#tpu.dimension_semantics<parallel>], iteration_bounds = array<i64: 2>, scalar_prefetch = 0 : i64, scratch_operands = 0 : i64, tpu.core_type = #tpu.core_type<tc>, window_params = [{transform_indices = @transform_0, window_bounds = array<i64: 1, 6, 6, 16>}, {pipeline_mode = #tpu.pipeline_mode<synchronous>, transform_indices = @transform_1, window_bounds = array<i64: 1, 16>}, {pipeline_mode = #tpu.pipeline_mode<synchronous>, transform_indices = @transform_2, window_bounds = array<i64: 1, 16>}, {transform_indices = @transform_3, window_bounds = array<i64: 1, 4, 4, 16>}]} {
    %c0 = arith.constant 0 : index
    %c0_0 = arith.constant 0 : index
    %c0_1 = arith.constant 0 : index
    %c0_2 = arith.constant 0 : index
    %0 = vector.load %arg1[%c0, %c0_0, %c0_1, %c0_2] : memref<1x6x6x16xbf16, #tpu.memory_space<vmem>>, vector<1x6x6x16xbf16>
    %1 = vector.shape_cast %0 : vector<1x6x6x16xbf16> to vector<6x6x16xbf16>
    %2 = arith.extf %1 : vector<6x6x16xbf16> to vector<6x6x16xf32>
    %c0_3 = arith.constant 0 : index
    %c0_4 = arith.constant 0 : index
    %3 = vector.load %arg2[%c0_3, %c0_4] : memref<1x16xf32, #tpu.memory_space<vmem>>, vector<1x16xf32>
    %c0_5 = arith.constant 0 : index
    %c0_6 = arith.constant 0 : index
    %4 = vector.load %arg3[%c0_5, %c0_6] : memref<1x16xf32, #tpu.memory_space<vmem>>, vector<1x16xf32>
    %cst = arith.constant dense<0.000000e+00> : vector<6x6xf32>
    %5 = vector.multi_reduction <add>, %2, %cst [2] : vector<6x6x16xf32> to vector<6x6xf32>
    %6 = vector.shape_cast %5 : vector<6x6xf32> to vector<6x6x1xf32>
    %cst_7 = arith.constant 1.600000e+01 : f32
    %7 = vector.broadcast %cst_7 : f32 to vector<6x6x1xf32>
    %8 = arith.divf %6, %7 : vector<6x6x1xf32>
    %9 = vector.broadcast %8 : vector<6x6x1xf32> to vector<6x6x16xf32>
    %10 = arith.subf %2, %9 : vector<6x6x16xf32>
    %11 = arith.mulf %10, %10 : vector<6x6x16xf32>
    %cst_8 = arith.constant dense<0.000000e+00> : vector<6x6xf32>
    %12 = vector.multi_reduction <add>, %11, %cst_8 [2] : vector<6x6x16xf32> to vector<6x6xf32>
    %13 = vector.shape_cast %12 : vector<6x6xf32> to vector<6x6x1xf32>
    %cst_9 = arith.constant 1.600000e+01 : f32
    %14 = vector.broadcast %cst_9 : f32 to vector<6x6x1xf32>
    %15 = arith.divf %13, %14 : vector<6x6x1xf32>
    %cst_10 = arith.constant 9.99999997E-7 : f32
    %16 = vector.broadcast %cst_10 : f32 to vector<6x6x1xf32>
    %17 = arith.addf %15, %16 : vector<6x6x1xf32>
    %18 = math.rsqrt %17 : vector<6x6x1xf32>
    %19 = vector.broadcast %18 : vector<6x6x1xf32> to vector<6x6x16xf32>
    %20 = arith.mulf %10, %19 : vector<6x6x16xf32>
    %21 = vector.shape_cast %3 : vector<1x16xf32> to vector<1x1x16xf32>
    %22 = vector.broadcast %21 : vector<1x1x16xf32> to vector<6x6x16xf32>
    %23 = arith.mulf %20, %22 : vector<6x6x16xf32>
    %24 = vector.shape_cast %4 : vector<1x16xf32> to vector<1x1x16xf32>
    %25 = vector.broadcast %24 : vector<1x1x16xf32> to vector<6x6x16xf32>
    %26 = arith.addf %23, %25 : vector<6x6x16xf32>
    %27 = tpu.iota {dimensions = array<i32: 0>} : vector<6x6x1xi32>
    %28 = tpu.iota {dimensions = array<i32: 1>} : vector<6x6x1xi32>
    %c1_i32 = arith.constant 1 : i32
    %29 = vector.broadcast %c1_i32 : i32 to vector<6x6x1xi32>
    %30 = arith.cmpi sge, %27, %29 : vector<6x6x1xi32>
    %c4_i32 = arith.constant 4 : i32
    %31 = vector.broadcast %c4_i32 : i32 to vector<6x6x1xi32>
    %32 = arith.cmpi sle, %27, %31 : vector<6x6x1xi32>
    %33 = arith.andi %30, %32 : vector<6x6x1xi1>
    %c1_i32_11 = arith.constant 1 : i32
    %34 = vector.broadcast %c1_i32_11 : i32 to vector<6x6x1xi32>
    %35 = arith.cmpi sge, %28, %34 : vector<6x6x1xi32>
    %36 = arith.andi %33, %35 : vector<6x6x1xi1>
    %c4_i32_12 = arith.constant 4 : i32
    %37 = vector.broadcast %c4_i32_12 : i32 to vector<6x6x1xi32>
    %38 = arith.cmpi sle, %28, %37 : vector<6x6x1xi32>
    %39 = arith.andi %36, %38 : vector<6x6x1xi1>
    %40 = arith.extui %39 : vector<6x6x1xi1> to vector<6x6x1xi32>
    %41 = arith.sitofp %40 : vector<6x6x1xi32> to vector<6x6x1xf32>
    %42 = vector.broadcast %41 : vector<6x6x1xf32> to vector<6x6x16xf32>
    %43 = arith.mulf %26, %42 : vector<6x6x16xf32>
    %44 = vector.extract_strided_slice %43 {offsets = [0, 0, 0], sizes = [4, 6, 16], strides = [1, 1, 1]} : vector<6x6x16xf32> to vector<4x6x16xf32>
    %45 = vector.extract_strided_slice %43 {offsets = [1, 0, 0], sizes = [4, 6, 16], strides = [1, 1, 1]} : vector<6x6x16xf32> to vector<4x6x16xf32>
    %46 = arith.addf %44, %45 : vector<4x6x16xf32>
    %47 = vector.extract_strided_slice %43 {offsets = [2, 0, 0], sizes = [4, 6, 16], strides = [1, 1, 1]} : vector<6x6x16xf32> to vector<4x6x16xf32>
    %48 = arith.addf %46, %47 : vector<4x6x16xf32>
    %49 = vector.extract_strided_slice %48 {offsets = [0, 0, 0], sizes = [4, 4, 16], strides = [1, 1, 1]} : vector<4x6x16xf32> to vector<4x4x16xf32>
    %50 = vector.extract_strided_slice %48 {offsets = [0, 1, 0], sizes = [4, 4, 16], strides = [1, 1, 1]} : vector<4x6x16xf32> to vector<4x4x16xf32>
    %51 = arith.addf %49, %50 : vector<4x4x16xf32>
    %52 = vector.extract_strided_slice %48 {offsets = [0, 2, 0], sizes = [4, 4, 16], strides = [1, 1, 1]} : vector<4x6x16xf32> to vector<4x4x16xf32>
    %53 = arith.addf %51, %52 : vector<4x4x16xf32>
    %54 = tpu.iota {dimensions = array<i32: 0>} : vector<4x4x1xi32>
    %55 = tpu.iota {dimensions = array<i32: 1>} : vector<4x4x1xi32>
    %c0_i32 = arith.constant 0 : i32
    %56 = vector.broadcast %c0_i32 : i32 to vector<4x4x1xi32>
    %57 = arith.cmpi eq, %54, %56 : vector<4x4x1xi32>
    %58 = arith.extui %57 : vector<4x4x1xi1> to vector<4x4x1xi32>
    %59 = arith.sitofp %58 : vector<4x4x1xi32> to vector<4x4x1xf32>
    %cst_13 = arith.constant 3.000000e+00 : f32
    %60 = vector.broadcast %cst_13 : f32 to vector<4x4x1xf32>
    %61 = arith.subf %60, %59 : vector<4x4x1xf32>
    %c3_i32 = arith.constant 3 : i32
    %62 = vector.broadcast %c3_i32 : i32 to vector<4x4x1xi32>
    %63 = arith.cmpi eq, %54, %62 : vector<4x4x1xi32>
    %64 = arith.extui %63 : vector<4x4x1xi1> to vector<4x4x1xi32>
    %65 = arith.sitofp %64 : vector<4x4x1xi32> to vector<4x4x1xf32>
    %66 = arith.subf %61, %65 : vector<4x4x1xf32>
    %c0_i32_14 = arith.constant 0 : i32
    %67 = vector.broadcast %c0_i32_14 : i32 to vector<4x4x1xi32>
    %68 = arith.cmpi eq, %55, %67 : vector<4x4x1xi32>
    %69 = arith.extui %68 : vector<4x4x1xi1> to vector<4x4x1xi32>
    %70 = arith.sitofp %69 : vector<4x4x1xi32> to vector<4x4x1xf32>
    %cst_15 = arith.constant 3.000000e+00 : f32
    %71 = vector.broadcast %cst_15 : f32 to vector<4x4x1xf32>
    %72 = arith.subf %71, %70 : vector<4x4x1xf32>
    %c3_i32_16 = arith.constant 3 : i32
    %73 = vector.broadcast %c3_i32_16 : i32 to vector<4x4x1xi32>
    %74 = arith.cmpi eq, %55, %73 : vector<4x4x1xi32>
    %75 = arith.extui %74 : vector<4x4x1xi1> to vector<4x4x1xi32>
    %76 = arith.sitofp %75 : vector<4x4x1xi32> to vector<4x4x1xf32>
    %77 = arith.subf %72, %76 : vector<4x4x1xf32>
    %78 = arith.mulf %66, %77 : vector<4x4x1xf32>
    %79 = vector.broadcast %78 : vector<4x4x1xf32> to vector<4x4x16xf32>
    %80 = arith.divf %53, %79 : vector<4x4x16xf32>
    %81 = vector.extract_strided_slice %2 {offsets = [1, 1, 0], sizes = [4, 4, 16], strides = [1, 1, 1]} : vector<6x6x16xf32> to vector<4x4x16xf32>
    %82 = vector.extract_strided_slice %26 {offsets = [1, 1, 0], sizes = [4, 4, 16], strides = [1, 1, 1]} : vector<6x6x16xf32> to vector<4x4x16xf32>
    %83 = arith.addf %81, %80 : vector<4x4x16xf32>
    %84 = arith.subf %83, %82 : vector<4x4x16xf32>
    %85 = arith.truncf %84 : vector<4x4x16xf32> to vector<4x4x16xbf16>
    %c0_17 = arith.constant 0 : index
    %c0_18 = arith.constant 0 : index
    %c0_19 = arith.constant 0 : index
    %c0_20 = arith.constant 0 : index
    %86 = vector.load %arg4[%c0_17, %c0_18, %c0_19, %c0_20] : memref<1x4x4x16xbf16, #tpu.memory_space<vmem>>, vector<1x4x4x16xbf16>
    %87 = vector.shape_cast %86 : vector<1x4x4x16xbf16> to vector<4x4x16xbf16>
    %88 = vector.shape_cast %85 : vector<4x4x16xbf16> to vector<1x4x4x16xbf16>
    tpu.vector_store %arg4[%c0_17, %c0_18, %c0_19, %c0_20], %88 {strides = array<i32>} : memref<1x4x4x16xbf16, #tpu.memory_space<vmem>>, vector<1x4x4x16xbf16>,
    return
  }
  func.func @transform_0(%arg0: i32) -> (i32, i32, i32, i32) {
    %c0_i32 = arith.constant 0 : i32
    %c0_i32_0 = arith.constant 0 : i32
    %c0_i32_1 = arith.constant 0 : i32
    %c0_i32_2 = arith.constant 0 : i32
    return %arg0, %c0_i32, %c0_i32_0, %c0_i32_1 : i32, i32, i32, i32
  }
  func.func @transform_1(%arg0: i32) -> (i32, i32) {
    %c0_i32 = arith.constant 0 : i32
    %c0_i32_0 = arith.constant 0 : i32
    %c0_i32_1 = arith.constant 0 : i32
    return %c0_i32, %c0_i32_0 : i32, i32
  }
  func.func @transform_2(%arg0: i32) -> (i32, i32) {
    %c0_i32 = arith.constant 0 : i32
    %c0_i32_0 = arith.constant 0 : i32
    %c0_i32_1 = arith.constant 0 : i32
    return %c0_i32, %c0_i32_0 : i32, i32
  }
  func.func @transform_3(%arg0: i32) -> (i32, i32, i32, i32) {
    %c0_i32 = arith.constant 0 : i32
    %c0_i32_0 = arith.constant 0 : i32
    %c0_i32_1 = arith.constant 0 : i32
    %c0_i32_2 = arith.constant 0 : i32
    return %arg0, %c0_i32, %c0_i32_0, %c0_i32_1 : i32, i32, i32, i32
  }
}

module attributes {stable_mosaic.version = 11 : i64} {
  func.func @_mlp1_kernel(%arg0: i32, %arg1: memref<32x16xbf16, #tpu.memory_space<vmem>>, %arg2: memref<1x16xf32, #tpu.memory_space<vmem>>, %arg3: memref<1x16xf32, #tpu.memory_space<vmem>>, %arg4: memref<16x64xbf16, #tpu.memory_space<vmem>>, %arg5: memref<1x64xf32, #tpu.memory_space<vmem>>, %arg6: memref<32x64xbf16, #tpu.memory_space<vmem>>) attributes {dimension_semantics = [#tpu.dimension_semantics<parallel>], iteration_bounds = array<i64: 1>, scalar_prefetch = 0 : i64, scratch_operands = 0 : i64, tpu.core_type = #tpu.core_type<tc>, window_params = [{transform_indices = @transform_0, window_bounds = array<i64: 32, 16>}, {pipeline_mode = #tpu.pipeline_mode<synchronous>, transform_indices = @transform_1, window_bounds = array<i64: 1, 16>}, {pipeline_mode = #tpu.pipeline_mode<synchronous>, transform_indices = @transform_2, window_bounds = array<i64: 1, 16>}, {pipeline_mode = #tpu.pipeline_mode<synchronous>, transform_indices = @transform_3, window_bounds = array<i64: 16, 64>}, {pipeline_mode = #tpu.pipeline_mode<synchronous>, transform_indices = @transform_4, window_bounds = array<i64: 1, 64>}, {transform_indices = @transform_5, window_bounds = array<i64: 32, 64>}]} {
    %c0 = arith.constant 0 : index
    %c0_0 = arith.constant 0 : index
    %0 = vector.load %arg1[%c0, %c0_0] : memref<32x16xbf16, #tpu.memory_space<vmem>>, vector<32x16xbf16>
    %1 = arith.extf %0 : vector<32x16xbf16> to vector<32x16xf32>
    %c0_1 = arith.constant 0 : index
    %c0_2 = arith.constant 0 : index
    %2 = vector.load %arg2[%c0_1, %c0_2] : memref<1x16xf32, #tpu.memory_space<vmem>>, vector<1x16xf32>
    %c0_3 = arith.constant 0 : index
    %c0_4 = arith.constant 0 : index
    %3 = vector.load %arg3[%c0_3, %c0_4] : memref<1x16xf32, #tpu.memory_space<vmem>>, vector<1x16xf32>
    %cst = arith.constant dense<0.000000e+00> : vector<32xf32>
    %4 = vector.multi_reduction <add>, %1, %cst [1] : vector<32x16xf32> to vector<32xf32>
    %5 = vector.shape_cast %4 : vector<32xf32> to vector<32x1xf32>
    %cst_5 = arith.constant 1.600000e+01 : f32
    %6 = vector.broadcast %cst_5 : f32 to vector<32x1xf32>
    %7 = arith.divf %5, %6 : vector<32x1xf32>
    %8 = vector.broadcast %7 : vector<32x1xf32> to vector<32x16xf32>
    %9 = arith.subf %1, %8 : vector<32x16xf32>
    %10 = arith.mulf %9, %9 : vector<32x16xf32>
    %cst_6 = arith.constant dense<0.000000e+00> : vector<32xf32>
    %11 = vector.multi_reduction <add>, %10, %cst_6 [1] : vector<32x16xf32> to vector<32xf32>
    %12 = vector.shape_cast %11 : vector<32xf32> to vector<32x1xf32>
    %cst_7 = arith.constant 1.600000e+01 : f32
    %13 = vector.broadcast %cst_7 : f32 to vector<32x1xf32>
    %14 = arith.divf %12, %13 : vector<32x1xf32>
    %cst_8 = arith.constant 9.99999997E-7 : f32
    %15 = vector.broadcast %cst_8 : f32 to vector<32x1xf32>
    %16 = arith.addf %14, %15 : vector<32x1xf32>
    %17 = math.rsqrt %16 : vector<32x1xf32>
    %18 = vector.broadcast %17 : vector<32x1xf32> to vector<32x16xf32>
    %19 = arith.mulf %9, %18 : vector<32x16xf32>
    %20 = vector.broadcast %2 : vector<1x16xf32> to vector<32x16xf32>
    %21 = arith.mulf %19, %20 : vector<32x16xf32>
    %22 = vector.broadcast %3 : vector<1x16xf32> to vector<32x16xf32>
    %23 = arith.addf %21, %22 : vector<32x16xf32>
    %24 = arith.truncf %23 : vector<32x16xf32> to vector<32x16xbf16>
    %c0_9 = arith.constant 0 : index
    %c0_10 = arith.constant 0 : index
    %25 = vector.load %arg4[%c0_9, %c0_10] : memref<16x64xbf16, #tpu.memory_space<vmem>>, vector<16x64xbf16>
    %cst_11 = arith.constant dense<0.000000e+00> : vector<32x64xf32>
    %26 = tpu.matmul %24, %25, %cst_11 {dimension_numbers = #tpu.dot_dimension_numbers<[1], [0], [0], [1], [0, 0, 1, 1], [], []>} : vector<32x16xbf16>, vector<16x64xbf16>, vector<32x64xf32> -> vector<32x64xf32>
    %c0_12 = arith.constant 0 : index
    %c0_13 = arith.constant 0 : index
    %27 = vector.load %arg5[%c0_12, %c0_13] : memref<1x64xf32, #tpu.memory_space<vmem>>, vector<1x64xf32>
    %28 = vector.broadcast %27 : vector<1x64xf32> to vector<32x64xf32>
    %29 = arith.addf %26, %28 : vector<32x64xf32>
    %cst_14 = arith.constant 5.000000e-01 : f32
    %30 = vector.broadcast %cst_14 : f32 to vector<32x64xf32>
    %31 = arith.mulf %30, %29 : vector<32x64xf32>
    %cst_15 = arith.constant 0.707106769 : f32
    %32 = vector.broadcast %cst_15 : f32 to vector<32x64xf32>
    %33 = arith.mulf %29, %32 : vector<32x64xf32>
    %34 = math.erf %33 : vector<32x64xf32>
    %cst_16 = arith.constant 1.000000e+00 : f32
    %35 = vector.broadcast %cst_16 : f32 to vector<32x64xf32>
    %36 = arith.addf %35, %34 : vector<32x64xf32>
    %37 = arith.mulf %31, %36 : vector<32x64xf32>
    %38 = arith.truncf %37 : vector<32x64xf32> to vector<32x64xbf16>
    %c0_17 = arith.constant 0 : index
    %c0_18 = arith.constant 0 : index
    %39 = vector.load %arg6[%c0_17, %c0_18] : memref<32x64xbf16, #tpu.memory_space<vmem>>, vector<32x64xbf16>
    tpu.vector_store %arg6[%c0_17, %c0_18], %38 {strides = array<i32>} : memref<32x64xbf16, #tpu.memory_space<vmem>>, vector<32x64xbf16>,
    return
  }
  func.func @transform_0(%arg0: i32) -> (i32, i32) {
    %c0_i32 = arith.constant 0 : i32
    %c0_i32_0 = arith.constant 0 : i32
    return %arg0, %c0_i32 : i32, i32
  }
  func.func @transform_1(%arg0: i32) -> (i32, i32) {
    %c0_i32 = arith.constant 0 : i32
    %c0_i32_0 = arith.constant 0 : i32
    %c0_i32_1 = arith.constant 0 : i32
    return %c0_i32, %c0_i32_0 : i32, i32
  }
  func.func @transform_2(%arg0: i32) -> (i32, i32) {
    %c0_i32 = arith.constant 0 : i32
    %c0_i32_0 = arith.constant 0 : i32
    %c0_i32_1 = arith.constant 0 : i32
    return %c0_i32, %c0_i32_0 : i32, i32
  }
  func.func @transform_3(%arg0: i32) -> (i32, i32) {
    %c0_i32 = arith.constant 0 : i32
    %c0_i32_0 = arith.constant 0 : i32
    %c0_i32_1 = arith.constant 0 : i32
    return %c0_i32, %c0_i32_0 : i32, i32
  }
  func.func @transform_4(%arg0: i32) -> (i32, i32) {
    %c0_i32 = arith.constant 0 : i32
    %c0_i32_0 = arith.constant 0 : i32
    %c0_i32_1 = arith.constant 0 : i32
    return %c0_i32, %c0_i32_0 : i32, i32
  }
  func.func @transform_5(%arg0: i32) -> (i32, i32) {
    %c0_i32 = arith.constant 0 : i32
    %c0_i32_0 = arith.constant 0 : i32
    return %arg0, %c0_i32 : i32, i32
  }
}

module attributes {stable_mosaic.version = 11 : i64} {
  func.func @_mlp2_kernel(%arg0: i32, %arg1: memref<32x64xbf16, #tpu.memory_space<vmem>>, %arg2: memref<64x16xbf16, #tpu.memory_space<vmem>>, %arg3: memref<1x16xf32, #tpu.memory_space<vmem>>, %arg4: memref<32x16xbf16, #tpu.memory_space<vmem>>, %arg5: memref<32x16xbf16, #tpu.memory_space<vmem>>) attributes {dimension_semantics = [#tpu.dimension_semantics<parallel>], iteration_bounds = array<i64: 1>, scalar_prefetch = 0 : i64, scratch_operands = 0 : i64, tpu.core_type = #tpu.core_type<tc>, window_params = [{transform_indices = @transform_0, window_bounds = array<i64: 32, 64>}, {pipeline_mode = #tpu.pipeline_mode<synchronous>, transform_indices = @transform_1, window_bounds = array<i64: 64, 16>}, {pipeline_mode = #tpu.pipeline_mode<synchronous>, transform_indices = @transform_2, window_bounds = array<i64: 1, 16>}, {transform_indices = @transform_3, window_bounds = array<i64: 32, 16>}, {transform_indices = @transform_4, window_bounds = array<i64: 32, 16>}]} {
    %c0 = arith.constant 0 : index
    %c0_0 = arith.constant 0 : index
    %0 = vector.load %arg1[%c0, %c0_0] : memref<32x64xbf16, #tpu.memory_space<vmem>>, vector<32x64xbf16>
    %c0_1 = arith.constant 0 : index
    %c0_2 = arith.constant 0 : index
    %1 = vector.load %arg2[%c0_1, %c0_2] : memref<64x16xbf16, #tpu.memory_space<vmem>>, vector<64x16xbf16>
    %cst = arith.constant dense<0.000000e+00> : vector<32x16xf32>
    %2 = tpu.matmul %0, %1, %cst {dimension_numbers = #tpu.dot_dimension_numbers<[1], [0], [0], [1], [0, 0, 1, 1], [], []>} : vector<32x64xbf16>, vector<64x16xbf16>, vector<32x16xf32> -> vector<32x16xf32>
    %c0_3 = arith.constant 0 : index
    %c0_4 = arith.constant 0 : index
    %3 = vector.load %arg3[%c0_3, %c0_4] : memref<1x16xf32, #tpu.memory_space<vmem>>, vector<1x16xf32>
    %4 = vector.broadcast %3 : vector<1x16xf32> to vector<32x16xf32>
    %5 = arith.addf %2, %4 : vector<32x16xf32>
    %c0_5 = arith.constant 0 : index
    %c0_6 = arith.constant 0 : index
    %6 = vector.load %arg4[%c0_5, %c0_6] : memref<32x16xbf16, #tpu.memory_space<vmem>>, vector<32x16xbf16>
    %7 = arith.extf %6 : vector<32x16xbf16> to vector<32x16xf32>
    %8 = arith.addf %5, %7 : vector<32x16xf32>
    %9 = arith.truncf %8 : vector<32x16xf32> to vector<32x16xbf16>
    %c0_7 = arith.constant 0 : index
    %c0_8 = arith.constant 0 : index
    %10 = vector.load %arg5[%c0_7, %c0_8] : memref<32x16xbf16, #tpu.memory_space<vmem>>, vector<32x16xbf16>
    tpu.vector_store %arg5[%c0_7, %c0_8], %9 {strides = array<i32>} : memref<32x16xbf16, #tpu.memory_space<vmem>>, vector<32x16xbf16>,
    return
  }
  func.func @transform_0(%arg0: i32) -> (i32, i32) {
    %c0_i32 = arith.constant 0 : i32
    %c0_i32_0 = arith.constant 0 : i32
    return %arg0, %c0_i32 : i32, i32
  }
  func.func @transform_1(%arg0: i32) -> (i32, i32) {
    %c0_i32 = arith.constant 0 : i32
    %c0_i32_0 = arith.constant 0 : i32
    %c0_i32_1 = arith.constant 0 : i32
    return %c0_i32, %c0_i32_0 : i32, i32
  }
  func.func @transform_2(%arg0: i32) -> (i32, i32) {
    %c0_i32 = arith.constant 0 : i32
    %c0_i32_0 = arith.constant 0 : i32
    %c0_i32_1 = arith.constant 0 : i32
    return %c0_i32, %c0_i32_0 : i32, i32
  }
  func.func @transform_3(%arg0: i32) -> (i32, i32) {
    %c0_i32 = arith.constant 0 : i32
    %c0_i32_0 = arith.constant 0 : i32
    return %arg0, %c0_i32 : i32, i32
  }
  func.func @transform_4(%arg0: i32) -> (i32, i32) {
    %c0_i32 = arith.constant 0 : i32
    %c0_i32_0 = arith.constant 0 : i32
    return %arg0, %c0_i32 : i32, i32
  }
}

module attributes {stable_mosaic.version = 11 : i64} {
  func.func @_embed_kernel(%arg0: i32, %arg1: memref<8x144xbf16, #tpu.memory_space<vmem>>, %arg2: memref<144x32xbf16, #tpu.memory_space<vmem>>, %arg3: memref<1x32xf32, #tpu.memory_space<vmem>>, %arg4: memref<1x32xf32, #tpu.memory_space<vmem>>, %arg5: memref<1x32xf32, #tpu.memory_space<vmem>>, %arg6: memref<8x32xbf16, #tpu.memory_space<vmem>>) attributes {dimension_semantics = [#tpu.dimension_semantics<parallel>], iteration_bounds = array<i64: 1>, scalar_prefetch = 0 : i64, scratch_operands = 0 : i64, tpu.core_type = #tpu.core_type<tc>, window_params = [{transform_indices = @transform_0, window_bounds = array<i64: 8, 144>}, {pipeline_mode = #tpu.pipeline_mode<synchronous>, transform_indices = @transform_1, window_bounds = array<i64: 144, 32>}, {pipeline_mode = #tpu.pipeline_mode<synchronous>, transform_indices = @transform_2, window_bounds = array<i64: 1, 32>}, {pipeline_mode = #tpu.pipeline_mode<synchronous>, transform_indices = @transform_3, window_bounds = array<i64: 1, 32>}, {pipeline_mode = #tpu.pipeline_mode<synchronous>, transform_indices = @transform_4, window_bounds = array<i64: 1, 32>}, {transform_indices = @transform_5, window_bounds = array<i64: 8, 32>}]} {
    %c0 = arith.constant 0 : index
    %c0_0 = arith.constant 0 : index
    %0 = vector.load %arg1[%c0, %c0_0] : memref<8x144xbf16, #tpu.memory_space<vmem>>, vector<8x144xbf16>
    %c0_1 = arith.constant 0 : index
    %c0_2 = arith.constant 0 : index
    %1 = vector.load %arg2[%c0_1, %c0_2] : memref<144x32xbf16, #tpu.memory_space<vmem>>, vector<144x32xbf16>
    %cst = arith.constant dense<0.000000e+00> : vector<8x32xf32>
    %2 = tpu.matmul %0, %1, %cst {dimension_numbers = #tpu.dot_dimension_numbers<[1], [0], [0], [1], [0, 0, 1, 1], [], []>} : vector<8x144xbf16>, vector<144x32xbf16>, vector<8x32xf32> -> vector<8x32xf32>
    %c0_3 = arith.constant 0 : index
    %c0_4 = arith.constant 0 : index
    %3 = vector.load %arg3[%c0_3, %c0_4] : memref<1x32xf32, #tpu.memory_space<vmem>>, vector<1x32xf32>
    %4 = vector.broadcast %3 : vector<1x32xf32> to vector<8x32xf32>
    %5 = arith.addf %2, %4 : vector<8x32xf32>
    %c0_5 = arith.constant 0 : index
    %c0_6 = arith.constant 0 : index
    %6 = vector.load %arg4[%c0_5, %c0_6] : memref<1x32xf32, #tpu.memory_space<vmem>>, vector<1x32xf32>
    %c0_7 = arith.constant 0 : index
    %c0_8 = arith.constant 0 : index
    %7 = vector.load %arg5[%c0_7, %c0_8] : memref<1x32xf32, #tpu.memory_space<vmem>>, vector<1x32xf32>
    %cst_9 = arith.constant dense<0.000000e+00> : vector<8xf32>
    %8 = vector.multi_reduction <add>, %5, %cst_9 [1] : vector<8x32xf32> to vector<8xf32>
    %9 = vector.shape_cast %8 : vector<8xf32> to vector<8x1xf32>
    %cst_10 = arith.constant 3.200000e+01 : f32
    %10 = vector.broadcast %cst_10 : f32 to vector<8x1xf32>
    %11 = arith.divf %9, %10 : vector<8x1xf32>
    %12 = vector.broadcast %11 : vector<8x1xf32> to vector<8x32xf32>
    %13 = arith.subf %5, %12 : vector<8x32xf32>
    %14 = arith.mulf %13, %13 : vector<8x32xf32>
    %cst_11 = arith.constant dense<0.000000e+00> : vector<8xf32>
    %15 = vector.multi_reduction <add>, %14, %cst_11 [1] : vector<8x32xf32> to vector<8xf32>
    %16 = vector.shape_cast %15 : vector<8xf32> to vector<8x1xf32>
    %cst_12 = arith.constant 3.200000e+01 : f32
    %17 = vector.broadcast %cst_12 : f32 to vector<8x1xf32>
    %18 = arith.divf %16, %17 : vector<8x1xf32>
    %cst_13 = arith.constant 9.99999997E-7 : f32
    %19 = vector.broadcast %cst_13 : f32 to vector<8x1xf32>
    %20 = arith.addf %18, %19 : vector<8x1xf32>
    %21 = math.rsqrt %20 : vector<8x1xf32>
    %22 = vector.broadcast %21 : vector<8x1xf32> to vector<8x32xf32>
    %23 = arith.mulf %13, %22 : vector<8x32xf32>
    %24 = vector.broadcast %6 : vector<1x32xf32> to vector<8x32xf32>
    %25 = arith.mulf %23, %24 : vector<8x32xf32>
    %26 = vector.broadcast %7 : vector<1x32xf32> to vector<8x32xf32>
    %27 = arith.addf %25, %26 : vector<8x32xf32>
    %28 = arith.truncf %27 : vector<8x32xf32> to vector<8x32xbf16>
    %c0_14 = arith.constant 0 : index
    %c0_15 = arith.constant 0 : index
    %29 = vector.load %arg6[%c0_14, %c0_15] : memref<8x32xbf16, #tpu.memory_space<vmem>>, vector<8x32xbf16>
    tpu.vector_store %arg6[%c0_14, %c0_15], %28 {strides = array<i32>} : memref<8x32xbf16, #tpu.memory_space<vmem>>, vector<8x32xbf16>,
    return
  }
  func.func @transform_0(%arg0: i32) -> (i32, i32) {
    %c0_i32 = arith.constant 0 : i32
    %c0_i32_0 = arith.constant 0 : i32
    return %arg0, %c0_i32 : i32, i32
  }
  func.func @transform_1(%arg0: i32) -> (i32, i32) {
    %c0_i32 = arith.constant 0 : i32
    %c0_i32_0 = arith.constant 0 : i32
    %c0_i32_1 = arith.constant 0 : i32
    return %c0_i32, %c0_i32_0 : i32, i32
  }
  func.func @transform_2(%arg0: i32) -> (i32, i32) {
    %c0_i32 = arith.constant 0 : i32
    %c0_i32_0 = arith.constant 0 : i32
    %c0_i32_1 = arith.constant 0 : i32
    return %c0_i32, %c0_i32_0 : i32, i32
  }
  func.func @transform_3(%arg0: i32) -> (i32, i32) {
    %c0_i32 = arith.constant 0 : i32
    %c0_i32_0 = arith.constant 0 : i32
    %c0_i32_1 = arith.constant 0 : i32
    return %c0_i32, %c0_i32_0 : i32, i32
  }
  func.func @transform_4(%arg0: i32) -> (i32, i32) {
    %c0_i32 = arith.constant 0 : i32
    %c0_i32_0 = arith.constant 0 : i32
    %c0_i32_1 = arith.constant 0 : i32
    return %c0_i32, %c0_i32_0 : i32, i32
  }
  func.func @transform_5(%arg0: i32) -> (i32, i32) {
    %c0_i32 = arith.constant 0 : i32
    %c0_i32_0 = arith.constant 0 : i32
    return %arg0, %c0_i32 : i32, i32
  }
}

module attributes {stable_mosaic.version = 11 : i64} {
  func.func @_pool_kernel(%arg0: i32, %arg1: memref<1x4x4x32xbf16, #tpu.memory_space<vmem>>, %arg2: memref<1x32xf32, #tpu.memory_space<vmem>>, %arg3: memref<1x32xf32, #tpu.memory_space<vmem>>, %arg4: memref<1x2x2x32xbf16, #tpu.memory_space<vmem>>) attributes {dimension_semantics = [#tpu.dimension_semantics<parallel>], iteration_bounds = array<i64: 2>, scalar_prefetch = 0 : i64, scratch_operands = 0 : i64, tpu.core_type = #tpu.core_type<tc>, window_params = [{transform_indices = @transform_0, window_bounds = array<i64: 1, 4, 4, 32>}, {pipeline_mode = #tpu.pipeline_mode<synchronous>, transform_indices = @transform_1, window_bounds = array<i64: 1, 32>}, {pipeline_mode = #tpu.pipeline_mode<synchronous>, transform_indices = @transform_2, window_bounds = array<i64: 1, 32>}, {transform_indices = @transform_3, window_bounds = array<i64: 1, 2, 2, 32>}]} {
    %c0 = arith.constant 0 : index
    %c0_0 = arith.constant 0 : index
    %c0_1 = arith.constant 0 : index
    %c0_2 = arith.constant 0 : index
    %0 = vector.load %arg1[%c0, %c0_0, %c0_1, %c0_2] : memref<1x4x4x32xbf16, #tpu.memory_space<vmem>>, vector<1x4x4x32xbf16>
    %1 = vector.shape_cast %0 : vector<1x4x4x32xbf16> to vector<4x4x32xbf16>
    %2 = arith.extf %1 : vector<4x4x32xbf16> to vector<4x4x32xf32>
    %c0_3 = arith.constant 0 : index
    %c0_4 = arith.constant 0 : index
    %3 = vector.load %arg2[%c0_3, %c0_4] : memref<1x32xf32, #tpu.memory_space<vmem>>, vector<1x32xf32>
    %c0_5 = arith.constant 0 : index
    %c0_6 = arith.constant 0 : index
    %4 = vector.load %arg3[%c0_5, %c0_6] : memref<1x32xf32, #tpu.memory_space<vmem>>, vector<1x32xf32>
    %cst = arith.constant dense<0.000000e+00> : vector<4x4xf32>
    %5 = vector.multi_reduction <add>, %2, %cst [2] : vector<4x4x32xf32> to vector<4x4xf32>
    %6 = vector.shape_cast %5 : vector<4x4xf32> to vector<4x4x1xf32>
    %cst_7 = arith.constant 3.200000e+01 : f32
    %7 = vector.broadcast %cst_7 : f32 to vector<4x4x1xf32>
    %8 = arith.divf %6, %7 : vector<4x4x1xf32>
    %9 = vector.broadcast %8 : vector<4x4x1xf32> to vector<4x4x32xf32>
    %10 = arith.subf %2, %9 : vector<4x4x32xf32>
    %11 = arith.mulf %10, %10 : vector<4x4x32xf32>
    %cst_8 = arith.constant dense<0.000000e+00> : vector<4x4xf32>
    %12 = vector.multi_reduction <add>, %11, %cst_8 [2] : vector<4x4x32xf32> to vector<4x4xf32>
    %13 = vector.shape_cast %12 : vector<4x4xf32> to vector<4x4x1xf32>
    %cst_9 = arith.constant 3.200000e+01 : f32
    %14 = vector.broadcast %cst_9 : f32 to vector<4x4x1xf32>
    %15 = arith.divf %13, %14 : vector<4x4x1xf32>
    %cst_10 = arith.constant 9.99999997E-7 : f32
    %16 = vector.broadcast %cst_10 : f32 to vector<4x4x1xf32>
    %17 = arith.addf %15, %16 : vector<4x4x1xf32>
    %18 = math.rsqrt %17 : vector<4x4x1xf32>
    %19 = vector.broadcast %18 : vector<4x4x1xf32> to vector<4x4x32xf32>
    %20 = arith.mulf %10, %19 : vector<4x4x32xf32>
    %21 = vector.shape_cast %3 : vector<1x32xf32> to vector<1x1x32xf32>
    %22 = vector.broadcast %21 : vector<1x1x32xf32> to vector<4x4x32xf32>
    %23 = arith.mulf %20, %22 : vector<4x4x32xf32>
    %24 = vector.shape_cast %4 : vector<1x32xf32> to vector<1x1x32xf32>
    %25 = vector.broadcast %24 : vector<1x1x32xf32> to vector<4x4x32xf32>
    %26 = arith.addf %23, %25 : vector<4x4x32xf32>
    %27 = tpu.iota {dimensions = array<i32: 0>} : vector<4x4x1xi32>
    %28 = tpu.iota {dimensions = array<i32: 1>} : vector<4x4x1xi32>
    %c1_i32 = arith.constant 1 : i32
    %29 = vector.broadcast %c1_i32 : i32 to vector<4x4x1xi32>
    %30 = arith.cmpi sge, %27, %29 : vector<4x4x1xi32>
    %c2_i32 = arith.constant 2 : i32
    %31 = vector.broadcast %c2_i32 : i32 to vector<4x4x1xi32>
    %32 = arith.cmpi sle, %27, %31 : vector<4x4x1xi32>
    %33 = arith.andi %30, %32 : vector<4x4x1xi1>
    %c1_i32_11 = arith.constant 1 : i32
    %34 = vector.broadcast %c1_i32_11 : i32 to vector<4x4x1xi32>
    %35 = arith.cmpi sge, %28, %34 : vector<4x4x1xi32>
    %36 = arith.andi %33, %35 : vector<4x4x1xi1>
    %c2_i32_12 = arith.constant 2 : i32
    %37 = vector.broadcast %c2_i32_12 : i32 to vector<4x4x1xi32>
    %38 = arith.cmpi sle, %28, %37 : vector<4x4x1xi32>
    %39 = arith.andi %36, %38 : vector<4x4x1xi1>
    %40 = arith.extui %39 : vector<4x4x1xi1> to vector<4x4x1xi32>
    %41 = arith.sitofp %40 : vector<4x4x1xi32> to vector<4x4x1xf32>
    %42 = vector.broadcast %41 : vector<4x4x1xf32> to vector<4x4x32xf32>
    %43 = arith.mulf %26, %42 : vector<4x4x32xf32>
    %44 = vector.extract_strided_slice %43 {offsets = [0, 0, 0], sizes = [2, 4, 32], strides = [1, 1, 1]} : vector<4x4x32xf32> to vector<2x4x32xf32>
    %45 = vector.extract_strided_slice %43 {offsets = [1, 0, 0], sizes = [2, 4, 32], strides = [1, 1, 1]} : vector<4x4x32xf32> to vector<2x4x32xf32>
    %46 = arith.addf %44, %45 : vector<2x4x32xf32>
    %47 = vector.extract_strided_slice %43 {offsets = [2, 0, 0], sizes = [2, 4, 32], strides = [1, 1, 1]} : vector<4x4x32xf32> to vector<2x4x32xf32>
    %48 = arith.addf %46, %47 : vector<2x4x32xf32>
    %49 = vector.extract_strided_slice %48 {offsets = [0, 0, 0], sizes = [2, 2, 32], strides = [1, 1, 1]} : vector<2x4x32xf32> to vector<2x2x32xf32>
    %50 = vector.extract_strided_slice %48 {offsets = [0, 1, 0], sizes = [2, 2, 32], strides = [1, 1, 1]} : vector<2x4x32xf32> to vector<2x2x32xf32>
    %51 = arith.addf %49, %50 : vector<2x2x32xf32>
    %52 = vector.extract_strided_slice %48 {offsets = [0, 2, 0], sizes = [2, 2, 32], strides = [1, 1, 1]} : vector<2x4x32xf32> to vector<2x2x32xf32>
    %53 = arith.addf %51, %52 : vector<2x2x32xf32>
    %54 = tpu.iota {dimensions = array<i32: 0>} : vector<2x2x1xi32>
    %55 = tpu.iota {dimensions = array<i32: 1>} : vector<2x2x1xi32>
    %c0_i32 = arith.constant 0 : i32
    %56 = vector.broadcast %c0_i32 : i32 to vector<2x2x1xi32>
    %57 = arith.cmpi eq, %54, %56 : vector<2x2x1xi32>
    %58 = arith.extui %57 : vector<2x2x1xi1> to vector<2x2x1xi32>
    %59 = arith.sitofp %58 : vector<2x2x1xi32> to vector<2x2x1xf32>
    %cst_13 = arith.constant 3.000000e+00 : f32
    %60 = vector.broadcast %cst_13 : f32 to vector<2x2x1xf32>
    %61 = arith.subf %60, %59 : vector<2x2x1xf32>
    %c1_i32_14 = arith.constant 1 : i32
    %62 = vector.broadcast %c1_i32_14 : i32 to vector<2x2x1xi32>
    %63 = arith.cmpi eq, %54, %62 : vector<2x2x1xi32>
    %64 = arith.extui %63 : vector<2x2x1xi1> to vector<2x2x1xi32>
    %65 = arith.sitofp %64 : vector<2x2x1xi32> to vector<2x2x1xf32>
    %66 = arith.subf %61, %65 : vector<2x2x1xf32>
    %c0_i32_15 = arith.constant 0 : i32
    %67 = vector.broadcast %c0_i32_15 : i32 to vector<2x2x1xi32>
    %68 = arith.cmpi eq, %55, %67 : vector<2x2x1xi32>
    %69 = arith.extui %68 : vector<2x2x1xi1> to vector<2x2x1xi32>
    %70 = arith.sitofp %69 : vector<2x2x1xi32> to vector<2x2x1xf32>
    %cst_16 = arith.constant 3.000000e+00 : f32
    %71 = vector.broadcast %cst_16 : f32 to vector<2x2x1xf32>
    %72 = arith.subf %71, %70 : vector<2x2x1xf32>
    %c1_i32_17 = arith.constant 1 : i32
    %73 = vector.broadcast %c1_i32_17 : i32 to vector<2x2x1xi32>
    %74 = arith.cmpi eq, %55, %73 : vector<2x2x1xi32>
    %75 = arith.extui %74 : vector<2x2x1xi1> to vector<2x2x1xi32>
    %76 = arith.sitofp %75 : vector<2x2x1xi32> to vector<2x2x1xf32>
    %77 = arith.subf %72, %76 : vector<2x2x1xf32>
    %78 = arith.mulf %66, %77 : vector<2x2x1xf32>
    %79 = vector.broadcast %78 : vector<2x2x1xf32> to vector<2x2x32xf32>
    %80 = arith.divf %53, %79 : vector<2x2x32xf32>
    %81 = vector.extract_strided_slice %2 {offsets = [1, 1, 0], sizes = [2, 2, 32], strides = [1, 1, 1]} : vector<4x4x32xf32> to vector<2x2x32xf32>
    %82 = vector.extract_strided_slice %26 {offsets = [1, 1, 0], sizes = [2, 2, 32], strides = [1, 1, 1]} : vector<4x4x32xf32> to vector<2x2x32xf32>
    %83 = arith.addf %81, %80 : vector<2x2x32xf32>
    %84 = arith.subf %83, %82 : vector<2x2x32xf32>
    %85 = arith.truncf %84 : vector<2x2x32xf32> to vector<2x2x32xbf16>
    %c0_18 = arith.constant 0 : index
    %c0_19 = arith.constant 0 : index
    %c0_20 = arith.constant 0 : index
    %c0_21 = arith.constant 0 : index
    %86 = vector.load %arg4[%c0_18, %c0_19, %c0_20, %c0_21] : memref<1x2x2x32xbf16, #tpu.memory_space<vmem>>, vector<1x2x2x32xbf16>
    %87 = vector.shape_cast %86 : vector<1x2x2x32xbf16> to vector<2x2x32xbf16>
    %88 = vector.shape_cast %85 : vector<2x2x32xbf16> to vector<1x2x2x32xbf16>
    tpu.vector_store %arg4[%c0_18, %c0_19, %c0_20, %c0_21], %88 {strides = array<i32>} : memref<1x2x2x32xbf16, #tpu.memory_space<vmem>>, vector<1x2x2x32xbf16>,
    return
  }
  func.func @transform_0(%arg0: i32) -> (i32, i32, i32, i32) {
    %c0_i32 = arith.constant 0 : i32
    %c0_i32_0 = arith.constant 0 : i32
    %c0_i32_1 = arith.constant 0 : i32
    %c0_i32_2 = arith.constant 0 : i32
    return %arg0, %c0_i32, %c0_i32_0, %c0_i32_1 : i32, i32, i32, i32
  }
  func.func @transform_1(%arg0: i32) -> (i32, i32) {
    %c0_i32 = arith.constant 0 : i32
    %c0_i32_0 = arith.constant 0 : i32
    %c0_i32_1 = arith.constant 0 : i32
    return %c0_i32, %c0_i32_0 : i32, i32
  }
  func.func @transform_2(%arg0: i32) -> (i32, i32) {
    %c0_i32 = arith.constant 0 : i32
    %c0_i32_0 = arith.constant 0 : i32
    %c0_i32_1 = arith.constant 0 : i32
    return %c0_i32, %c0_i32_0 : i32, i32
  }
  func.func @transform_3(%arg0: i32) -> (i32, i32, i32, i32) {
    %c0_i32 = arith.constant 0 : i32
    %c0_i32_0 = arith.constant 0 : i32
    %c0_i32_1 = arith.constant 0 : i32
    %c0_i32_2 = arith.constant 0 : i32
    return %arg0, %c0_i32, %c0_i32_0, %c0_i32_1 : i32, i32, i32, i32
  }
}

module attributes {stable_mosaic.version = 11 : i64} {
  func.func @_mlp1_kernel(%arg0: i32, %arg1: memref<8x32xbf16, #tpu.memory_space<vmem>>, %arg2: memref<1x32xf32, #tpu.memory_space<vmem>>, %arg3: memref<1x32xf32, #tpu.memory_space<vmem>>, %arg4: memref<32x128xbf16, #tpu.memory_space<vmem>>, %arg5: memref<1x128xf32, #tpu.memory_space<vmem>>, %arg6: memref<8x128xbf16, #tpu.memory_space<vmem>>) attributes {dimension_semantics = [#tpu.dimension_semantics<parallel>], iteration_bounds = array<i64: 1>, scalar_prefetch = 0 : i64, scratch_operands = 0 : i64, tpu.core_type = #tpu.core_type<tc>, window_params = [{transform_indices = @transform_0, window_bounds = array<i64: 8, 32>}, {pipeline_mode = #tpu.pipeline_mode<synchronous>, transform_indices = @transform_1, window_bounds = array<i64: 1, 32>}, {pipeline_mode = #tpu.pipeline_mode<synchronous>, transform_indices = @transform_2, window_bounds = array<i64: 1, 32>}, {pipeline_mode = #tpu.pipeline_mode<synchronous>, transform_indices = @transform_3, window_bounds = array<i64: 32, 128>}, {pipeline_mode = #tpu.pipeline_mode<synchronous>, transform_indices = @transform_4, window_bounds = array<i64: 1, 128>}, {transform_indices = @transform_5, window_bounds = array<i64: 8, 128>}]} {
    %c0 = arith.constant 0 : index
    %c0_0 = arith.constant 0 : index
    %0 = vector.load %arg1[%c0, %c0_0] : memref<8x32xbf16, #tpu.memory_space<vmem>>, vector<8x32xbf16>
    %1 = arith.extf %0 : vector<8x32xbf16> to vector<8x32xf32>
    %c0_1 = arith.constant 0 : index
    %c0_2 = arith.constant 0 : index
    %2 = vector.load %arg2[%c0_1, %c0_2] : memref<1x32xf32, #tpu.memory_space<vmem>>, vector<1x32xf32>
    %c0_3 = arith.constant 0 : index
    %c0_4 = arith.constant 0 : index
    %3 = vector.load %arg3[%c0_3, %c0_4] : memref<1x32xf32, #tpu.memory_space<vmem>>, vector<1x32xf32>
    %cst = arith.constant dense<0.000000e+00> : vector<8xf32>
    %4 = vector.multi_reduction <add>, %1, %cst [1] : vector<8x32xf32> to vector<8xf32>
    %5 = vector.shape_cast %4 : vector<8xf32> to vector<8x1xf32>
    %cst_5 = arith.constant 3.200000e+01 : f32
    %6 = vector.broadcast %cst_5 : f32 to vector<8x1xf32>
    %7 = arith.divf %5, %6 : vector<8x1xf32>
    %8 = vector.broadcast %7 : vector<8x1xf32> to vector<8x32xf32>
    %9 = arith.subf %1, %8 : vector<8x32xf32>
    %10 = arith.mulf %9, %9 : vector<8x32xf32>
    %cst_6 = arith.constant dense<0.000000e+00> : vector<8xf32>
    %11 = vector.multi_reduction <add>, %10, %cst_6 [1] : vector<8x32xf32> to vector<8xf32>
    %12 = vector.shape_cast %11 : vector<8xf32> to vector<8x1xf32>
    %cst_7 = arith.constant 3.200000e+01 : f32
    %13 = vector.broadcast %cst_7 : f32 to vector<8x1xf32>
    %14 = arith.divf %12, %13 : vector<8x1xf32>
    %cst_8 = arith.constant 9.99999997E-7 : f32
    %15 = vector.broadcast %cst_8 : f32 to vector<8x1xf32>
    %16 = arith.addf %14, %15 : vector<8x1xf32>
    %17 = math.rsqrt %16 : vector<8x1xf32>
    %18 = vector.broadcast %17 : vector<8x1xf32> to vector<8x32xf32>
    %19 = arith.mulf %9, %18 : vector<8x32xf32>
    %20 = vector.broadcast %2 : vector<1x32xf32> to vector<8x32xf32>
    %21 = arith.mulf %19, %20 : vector<8x32xf32>
    %22 = vector.broadcast %3 : vector<1x32xf32> to vector<8x32xf32>
    %23 = arith.addf %21, %22 : vector<8x32xf32>
    %24 = arith.truncf %23 : vector<8x32xf32> to vector<8x32xbf16>
    %c0_9 = arith.constant 0 : index
    %c0_10 = arith.constant 0 : index
    %25 = vector.load %arg4[%c0_9, %c0_10] : memref<32x128xbf16, #tpu.memory_space<vmem>>, vector<32x128xbf16>
    %cst_11 = arith.constant dense<0.000000e+00> : vector<8x128xf32>
    %26 = tpu.matmul %24, %25, %cst_11 {dimension_numbers = #tpu.dot_dimension_numbers<[1], [0], [0], [1], [0, 0, 1, 1], [], []>} : vector<8x32xbf16>, vector<32x128xbf16>, vector<8x128xf32> -> vector<8x128xf32>
    %c0_12 = arith.constant 0 : index
    %c0_13 = arith.constant 0 : index
    %27 = vector.load %arg5[%c0_12, %c0_13] : memref<1x128xf32, #tpu.memory_space<vmem>>, vector<1x128xf32>
    %28 = vector.broadcast %27 : vector<1x128xf32> to vector<8x128xf32>
    %29 = arith.addf %26, %28 : vector<8x128xf32>
    %cst_14 = arith.constant 5.000000e-01 : f32
    %30 = vector.broadcast %cst_14 : f32 to vector<8x128xf32>
    %31 = arith.mulf %30, %29 : vector<8x128xf32>
    %cst_15 = arith.constant 0.707106769 : f32
    %32 = vector.broadcast %cst_15 : f32 to vector<8x128xf32>
    %33 = arith.mulf %29, %32 : vector<8x128xf32>
    %34 = math.erf %33 : vector<8x128xf32>
    %cst_16 = arith.constant 1.000000e+00 : f32
    %35 = vector.broadcast %cst_16 : f32 to vector<8x128xf32>
    %36 = arith.addf %35, %34 : vector<8x128xf32>
    %37 = arith.mulf %31, %36 : vector<8x128xf32>
    %38 = arith.truncf %37 : vector<8x128xf32> to vector<8x128xbf16>
    %c0_17 = arith.constant 0 : index
    %c0_18 = arith.constant 0 : index
    %39 = vector.load %arg6[%c0_17, %c0_18] : memref<8x128xbf16, #tpu.memory_space<vmem>>, vector<8x128xbf16>
    tpu.vector_store %arg6[%c0_17, %c0_18], %38 {strides = array<i32>} : memref<8x128xbf16, #tpu.memory_space<vmem>>, vector<8x128xbf16>,
    return
  }
  func.func @transform_0(%arg0: i32) -> (i32, i32) {
    %c0_i32 = arith.constant 0 : i32
    %c0_i32_0 = arith.constant 0 : i32
    return %arg0, %c0_i32 : i32, i32
  }
  func.func @transform_1(%arg0: i32) -> (i32, i32) {
    %c0_i32 = arith.constant 0 : i32
    %c0_i32_0 = arith.constant 0 : i32
    %c0_i32_1 = arith.constant 0 : i32
    return %c0_i32, %c0_i32_0 : i32, i32
  }
  func.func @transform_2(%arg0: i32) -> (i32, i32) {
    %c0_i32 = arith.constant 0 : i32
    %c0_i32_0 = arith.constant 0 : i32
    %c0_i32_1 = arith.constant 0 : i32
    return %c0_i32, %c0_i32_0 : i32, i32
  }
  func.func @transform_3(%arg0: i32) -> (i32, i32) {
    %c0_i32 = arith.constant 0 : i32
    %c0_i32_0 = arith.constant 0 : i32
    %c0_i32_1 = arith.constant 0 : i32
    return %c0_i32, %c0_i32_0 : i32, i32
  }
  func.func @transform_4(%arg0: i32) -> (i32, i32) {
    %c0_i32 = arith.constant 0 : i32
    %c0_i32_0 = arith.constant 0 : i32
    %c0_i32_1 = arith.constant 0 : i32
    return %c0_i32, %c0_i32_0 : i32, i32
  }
  func.func @transform_5(%arg0: i32) -> (i32, i32) {
    %c0_i32 = arith.constant 0 : i32
    %c0_i32_0 = arith.constant 0 : i32
    return %arg0, %c0_i32 : i32, i32
  }
}

module attributes {stable_mosaic.version = 11 : i64} {
  func.func @_mlp2_kernel(%arg0: i32, %arg1: memref<8x128xbf16, #tpu.memory_space<vmem>>, %arg2: memref<128x32xbf16, #tpu.memory_space<vmem>>, %arg3: memref<1x32xf32, #tpu.memory_space<vmem>>, %arg4: memref<8x32xbf16, #tpu.memory_space<vmem>>, %arg5: memref<8x32xbf16, #tpu.memory_space<vmem>>) attributes {dimension_semantics = [#tpu.dimension_semantics<parallel>], iteration_bounds = array<i64: 1>, scalar_prefetch = 0 : i64, scratch_operands = 0 : i64, tpu.core_type = #tpu.core_type<tc>, window_params = [{transform_indices = @transform_0, window_bounds = array<i64: 8, 128>}, {pipeline_mode = #tpu.pipeline_mode<synchronous>, transform_indices = @transform_1, window_bounds = array<i64: 128, 32>}, {pipeline_mode = #tpu.pipeline_mode<synchronous>, transform_indices = @transform_2, window_bounds = array<i64: 1, 32>}, {transform_indices = @transform_3, window_bounds = array<i64: 8, 32>}, {transform_indices = @transform_4, window_bounds = array<i64: 8, 32>}]} {
    %c0 = arith.constant 0 : index
    %c0_0 = arith.constant 0 : index
    %0 = vector.load %arg1[%c0, %c0_0] : memref<8x128xbf16, #tpu.memory_space<vmem>>, vector<8x128xbf16>
    %c0_1 = arith.constant 0 : index
    %c0_2 = arith.constant 0 : index
    %1 = vector.load %arg2[%c0_1, %c0_2] : memref<128x32xbf16, #tpu.memory_space<vmem>>, vector<128x32xbf16>
    %cst = arith.constant dense<0.000000e+00> : vector<8x32xf32>
    %2 = tpu.matmul %0, %1, %cst {dimension_numbers = #tpu.dot_dimension_numbers<[1], [0], [0], [1], [0, 0, 1, 1], [], []>} : vector<8x128xbf16>, vector<128x32xbf16>, vector<8x32xf32> -> vector<8x32xf32>
    %c0_3 = arith.constant 0 : index
    %c0_4 = arith.constant 0 : index
    %3 = vector.load %arg3[%c0_3, %c0_4] : memref<1x32xf32, #tpu.memory_space<vmem>>, vector<1x32xf32>
    %4 = vector.broadcast %3 : vector<1x32xf32> to vector<8x32xf32>
    %5 = arith.addf %2, %4 : vector<8x32xf32>
    %c0_5 = arith.constant 0 : index
    %c0_6 = arith.constant 0 : index
    %6 = vector.load %arg4[%c0_5, %c0_6] : memref<8x32xbf16, #tpu.memory_space<vmem>>, vector<8x32xbf16>
    %7 = arith.extf %6 : vector<8x32xbf16> to vector<8x32xf32>
    %8 = arith.addf %5, %7 : vector<8x32xf32>
    %9 = arith.truncf %8 : vector<8x32xf32> to vector<8x32xbf16>
    %c0_7 = arith.constant 0 : index
    %c0_8 = arith.constant 0 : index
    %10 = vector.load %arg5[%c0_7, %c0_8] : memref<8x32xbf16, #tpu.memory_space<vmem>>, vector<8x32xbf16>
    tpu.vector_store %arg5[%c0_7, %c0_8], %9 {strides = array<i32>} : memref<8x32xbf16, #tpu.memory_space<vmem>>, vector<8x32xbf16>,
    return
  }
  func.func @transform_0(%arg0: i32) -> (i32, i32) {
    %c0_i32 = arith.constant 0 : i32
    %c0_i32_0 = arith.constant 0 : i32
    return %arg0, %c0_i32 : i32, i32
  }
  func.func @transform_1(%arg0: i32) -> (i32, i32) {
    %c0_i32 = arith.constant 0 : i32
    %c0_i32_0 = arith.constant 0 : i32
    %c0_i32_1 = arith.constant 0 : i32
    return %c0_i32, %c0_i32_0 : i32, i32
  }
  func.func @transform_2(%arg0: i32) -> (i32, i32) {
    %c0_i32 = arith.constant 0 : i32
    %c0_i32_0 = arith.constant 0 : i32
    %c0_i32_1 = arith.constant 0 : i32
    return %c0_i32, %c0_i32_0 : i32, i32
  }
  func.func @transform_3(%arg0: i32) -> (i32, i32) {
    %c0_i32 = arith.constant 0 : i32
    %c0_i32_0 = arith.constant 0 : i32
    return %arg0, %c0_i32 : i32, i32
  }
  func.func @transform_4(%arg0: i32) -> (i32, i32) {
    %c0_i32 = arith.constant 0 : i32
    %c0_i32_0 = arith.constant 0 : i32
    return %arg0, %c0_i32 : i32, i32
  }
}

module attributes {stable_mosaic.version = 11 : i64} {
  func.func @_embed_kernel(%arg0: i32, %arg1: memref<2x288xbf16, #tpu.memory_space<vmem>>, %arg2: memref<288x64xbf16, #tpu.memory_space<vmem>>, %arg3: memref<1x64xf32, #tpu.memory_space<vmem>>, %arg4: memref<1x64xf32, #tpu.memory_space<vmem>>, %arg5: memref<1x64xf32, #tpu.memory_space<vmem>>, %arg6: memref<2x64xbf16, #tpu.memory_space<vmem>>) attributes {dimension_semantics = [#tpu.dimension_semantics<parallel>], iteration_bounds = array<i64: 1>, scalar_prefetch = 0 : i64, scratch_operands = 0 : i64, tpu.core_type = #tpu.core_type<tc>, window_params = [{transform_indices = @transform_0, window_bounds = array<i64: 2, 288>}, {pipeline_mode = #tpu.pipeline_mode<synchronous>, transform_indices = @transform_1, window_bounds = array<i64: 288, 64>}, {pipeline_mode = #tpu.pipeline_mode<synchronous>, transform_indices = @transform_2, window_bounds = array<i64: 1, 64>}, {pipeline_mode = #tpu.pipeline_mode<synchronous>, transform_indices = @transform_3, window_bounds = array<i64: 1, 64>}, {pipeline_mode = #tpu.pipeline_mode<synchronous>, transform_indices = @transform_4, window_bounds = array<i64: 1, 64>}, {transform_indices = @transform_5, window_bounds = array<i64: 2, 64>}]} {
    %c0 = arith.constant 0 : index
    %c0_0 = arith.constant 0 : index
    %0 = vector.load %arg1[%c0, %c0_0] : memref<2x288xbf16, #tpu.memory_space<vmem>>, vector<2x288xbf16>
    %c0_1 = arith.constant 0 : index
    %c0_2 = arith.constant 0 : index
    %1 = vector.load %arg2[%c0_1, %c0_2] : memref<288x64xbf16, #tpu.memory_space<vmem>>, vector<288x64xbf16>
    %cst = arith.constant dense<0.000000e+00> : vector<2x64xf32>
    %2 = tpu.matmul %0, %1, %cst {dimension_numbers = #tpu.dot_dimension_numbers<[1], [0], [0], [1], [0, 0, 1, 1], [], []>} : vector<2x288xbf16>, vector<288x64xbf16>, vector<2x64xf32> -> vector<2x64xf32>
    %c0_3 = arith.constant 0 : index
    %c0_4 = arith.constant 0 : index
    %3 = vector.load %arg3[%c0_3, %c0_4] : memref<1x64xf32, #tpu.memory_space<vmem>>, vector<1x64xf32>
    %4 = vector.broadcast %3 : vector<1x64xf32> to vector<2x64xf32>
    %5 = arith.addf %2, %4 : vector<2x64xf32>
    %c0_5 = arith.constant 0 : index
    %c0_6 = arith.constant 0 : index
    %6 = vector.load %arg4[%c0_5, %c0_6] : memref<1x64xf32, #tpu.memory_space<vmem>>, vector<1x64xf32>
    %c0_7 = arith.constant 0 : index
    %c0_8 = arith.constant 0 : index
    %7 = vector.load %arg5[%c0_7, %c0_8] : memref<1x64xf32, #tpu.memory_space<vmem>>, vector<1x64xf32>
    %cst_9 = arith.constant dense<0.000000e+00> : vector<2xf32>
    %8 = vector.multi_reduction <add>, %5, %cst_9 [1] : vector<2x64xf32> to vector<2xf32>
    %9 = vector.shape_cast %8 : vector<2xf32> to vector<2x1xf32>
    %cst_10 = arith.constant 6.400000e+01 : f32
    %10 = vector.broadcast %cst_10 : f32 to vector<2x1xf32>
    %11 = arith.divf %9, %10 : vector<2x1xf32>
    %12 = vector.broadcast %11 : vector<2x1xf32> to vector<2x64xf32>
    %13 = arith.subf %5, %12 : vector<2x64xf32>
    %14 = arith.mulf %13, %13 : vector<2x64xf32>
    %cst_11 = arith.constant dense<0.000000e+00> : vector<2xf32>
    %15 = vector.multi_reduction <add>, %14, %cst_11 [1] : vector<2x64xf32> to vector<2xf32>
    %16 = vector.shape_cast %15 : vector<2xf32> to vector<2x1xf32>
    %cst_12 = arith.constant 6.400000e+01 : f32
    %17 = vector.broadcast %cst_12 : f32 to vector<2x1xf32>
    %18 = arith.divf %16, %17 : vector<2x1xf32>
    %cst_13 = arith.constant 9.99999997E-7 : f32
    %19 = vector.broadcast %cst_13 : f32 to vector<2x1xf32>
    %20 = arith.addf %18, %19 : vector<2x1xf32>
    %21 = math.rsqrt %20 : vector<2x1xf32>
    %22 = vector.broadcast %21 : vector<2x1xf32> to vector<2x64xf32>
    %23 = arith.mulf %13, %22 : vector<2x64xf32>
    %24 = vector.broadcast %6 : vector<1x64xf32> to vector<2x64xf32>
    %25 = arith.mulf %23, %24 : vector<2x64xf32>
    %26 = vector.broadcast %7 : vector<1x64xf32> to vector<2x64xf32>
    %27 = arith.addf %25, %26 : vector<2x64xf32>
    %28 = arith.truncf %27 : vector<2x64xf32> to vector<2x64xbf16>
    %c0_14 = arith.constant 0 : index
    %c0_15 = arith.constant 0 : index
    %29 = vector.load %arg6[%c0_14, %c0_15] : memref<2x64xbf16, #tpu.memory_space<vmem>>, vector<2x64xbf16>
    tpu.vector_store %arg6[%c0_14, %c0_15], %28 {strides = array<i32>} : memref<2x64xbf16, #tpu.memory_space<vmem>>, vector<2x64xbf16>,
    return
  }
  func.func @transform_0(%arg0: i32) -> (i32, i32) {
    %c0_i32 = arith.constant 0 : i32
    %c0_i32_0 = arith.constant 0 : i32
    return %arg0, %c0_i32 : i32, i32
  }
  func.func @transform_1(%arg0: i32) -> (i32, i32) {
    %c0_i32 = arith.constant 0 : i32
    %c0_i32_0 = arith.constant 0 : i32
    %c0_i32_1 = arith.constant 0 : i32
    return %c0_i32, %c0_i32_0 : i32, i32
  }
  func.func @transform_2(%arg0: i32) -> (i32, i32) {
    %c0_i32 = arith.constant 0 : i32
    %c0_i32_0 = arith.constant 0 : i32
    %c0_i32_1 = arith.constant 0 : i32
    return %c0_i32, %c0_i32_0 : i32, i32
  }
  func.func @transform_3(%arg0: i32) -> (i32, i32) {
    %c0_i32 = arith.constant 0 : i32
    %c0_i32_0 = arith.constant 0 : i32
    %c0_i32_1 = arith.constant 0 : i32
    return %c0_i32, %c0_i32_0 : i32, i32
  }
  func.func @transform_4(%arg0: i32) -> (i32, i32) {
    %c0_i32 = arith.constant 0 : i32
    %c0_i32_0 = arith.constant 0 : i32
    %c0_i32_1 = arith.constant 0 : i32
    return %c0_i32, %c0_i32_0 : i32, i32
  }
  func.func @transform_5(%arg0: i32) -> (i32, i32) {
    %c0_i32 = arith.constant 0 : i32
    %c0_i32_0 = arith.constant 0 : i32
    return %arg0, %c0_i32 : i32, i32
  }
}

module attributes {stable_mosaic.version = 11 : i64} {
  func.func @_mlp1_kernel(%arg0: i32, %arg1: memref<2x64xbf16, #tpu.memory_space<vmem>>, %arg2: memref<1x64xf32, #tpu.memory_space<vmem>>, %arg3: memref<1x64xf32, #tpu.memory_space<vmem>>, %arg4: memref<64x256xbf16, #tpu.memory_space<vmem>>, %arg5: memref<1x256xf32, #tpu.memory_space<vmem>>, %arg6: memref<2x256xbf16, #tpu.memory_space<vmem>>) attributes {dimension_semantics = [#tpu.dimension_semantics<parallel>], iteration_bounds = array<i64: 1>, scalar_prefetch = 0 : i64, scratch_operands = 0 : i64, tpu.core_type = #tpu.core_type<tc>, window_params = [{transform_indices = @transform_0, window_bounds = array<i64: 2, 64>}, {pipeline_mode = #tpu.pipeline_mode<synchronous>, transform_indices = @transform_1, window_bounds = array<i64: 1, 64>}, {pipeline_mode = #tpu.pipeline_mode<synchronous>, transform_indices = @transform_2, window_bounds = array<i64: 1, 64>}, {pipeline_mode = #tpu.pipeline_mode<synchronous>, transform_indices = @transform_3, window_bounds = array<i64: 64, 256>}, {pipeline_mode = #tpu.pipeline_mode<synchronous>, transform_indices = @transform_4, window_bounds = array<i64: 1, 256>}, {transform_indices = @transform_5, window_bounds = array<i64: 2, 256>}]} {
    %c0 = arith.constant 0 : index
    %c0_0 = arith.constant 0 : index
    %0 = vector.load %arg1[%c0, %c0_0] : memref<2x64xbf16, #tpu.memory_space<vmem>>, vector<2x64xbf16>
    %1 = arith.extf %0 : vector<2x64xbf16> to vector<2x64xf32>
    %c0_1 = arith.constant 0 : index
    %c0_2 = arith.constant 0 : index
    %2 = vector.load %arg2[%c0_1, %c0_2] : memref<1x64xf32, #tpu.memory_space<vmem>>, vector<1x64xf32>
    %c0_3 = arith.constant 0 : index
    %c0_4 = arith.constant 0 : index
    %3 = vector.load %arg3[%c0_3, %c0_4] : memref<1x64xf32, #tpu.memory_space<vmem>>, vector<1x64xf32>
    %cst = arith.constant dense<0.000000e+00> : vector<2xf32>
    %4 = vector.multi_reduction <add>, %1, %cst [1] : vector<2x64xf32> to vector<2xf32>
    %5 = vector.shape_cast %4 : vector<2xf32> to vector<2x1xf32>
    %cst_5 = arith.constant 6.400000e+01 : f32
    %6 = vector.broadcast %cst_5 : f32 to vector<2x1xf32>
    %7 = arith.divf %5, %6 : vector<2x1xf32>
    %8 = vector.broadcast %7 : vector<2x1xf32> to vector<2x64xf32>
    %9 = arith.subf %1, %8 : vector<2x64xf32>
    %10 = arith.mulf %9, %9 : vector<2x64xf32>
    %cst_6 = arith.constant dense<0.000000e+00> : vector<2xf32>
    %11 = vector.multi_reduction <add>, %10, %cst_6 [1] : vector<2x64xf32> to vector<2xf32>
    %12 = vector.shape_cast %11 : vector<2xf32> to vector<2x1xf32>
    %cst_7 = arith.constant 6.400000e+01 : f32
    %13 = vector.broadcast %cst_7 : f32 to vector<2x1xf32>
    %14 = arith.divf %12, %13 : vector<2x1xf32>
    %cst_8 = arith.constant 9.99999997E-7 : f32
    %15 = vector.broadcast %cst_8 : f32 to vector<2x1xf32>
    %16 = arith.addf %14, %15 : vector<2x1xf32>
    %17 = math.rsqrt %16 : vector<2x1xf32>
    %18 = vector.broadcast %17 : vector<2x1xf32> to vector<2x64xf32>
    %19 = arith.mulf %9, %18 : vector<2x64xf32>
    %20 = vector.broadcast %2 : vector<1x64xf32> to vector<2x64xf32>
    %21 = arith.mulf %19, %20 : vector<2x64xf32>
    %22 = vector.broadcast %3 : vector<1x64xf32> to vector<2x64xf32>
    %23 = arith.addf %21, %22 : vector<2x64xf32>
    %24 = arith.truncf %23 : vector<2x64xf32> to vector<2x64xbf16>
    %c0_9 = arith.constant 0 : index
    %c0_10 = arith.constant 0 : index
    %25 = vector.load %arg4[%c0_9, %c0_10] : memref<64x256xbf16, #tpu.memory_space<vmem>>, vector<64x256xbf16>
    %cst_11 = arith.constant dense<0.000000e+00> : vector<2x256xf32>
    %26 = tpu.matmul %24, %25, %cst_11 {dimension_numbers = #tpu.dot_dimension_numbers<[1], [0], [0], [1], [0, 0, 1, 1], [], []>} : vector<2x64xbf16>, vector<64x256xbf16>, vector<2x256xf32> -> vector<2x256xf32>
    %c0_12 = arith.constant 0 : index
    %c0_13 = arith.constant 0 : index
    %27 = vector.load %arg5[%c0_12, %c0_13] : memref<1x256xf32, #tpu.memory_space<vmem>>, vector<1x256xf32>
    %28 = vector.broadcast %27 : vector<1x256xf32> to vector<2x256xf32>
    %29 = arith.addf %26, %28 : vector<2x256xf32>
    %cst_14 = arith.constant 5.000000e-01 : f32
    %30 = vector.broadcast %cst_14 : f32 to vector<2x256xf32>
    %31 = arith.mulf %30, %29 : vector<2x256xf32>
    %cst_15 = arith.constant 0.707106769 : f32
    %32 = vector.broadcast %cst_15 : f32 to vector<2x256xf32>
    %33 = arith.mulf %29, %32 : vector<2x256xf32>
    %34 = math.erf %33 : vector<2x256xf32>
    %cst_16 = arith.constant 1.000000e+00 : f32
    %35 = vector.broadcast %cst_16 : f32 to vector<2x256xf32>
    %36 = arith.addf %35, %34 : vector<2x256xf32>
    %37 = arith.mulf %31, %36 : vector<2x256xf32>
    %38 = arith.truncf %37 : vector<2x256xf32> to vector<2x256xbf16>
    %c0_17 = arith.constant 0 : index
    %c0_18 = arith.constant 0 : index
    %39 = vector.load %arg6[%c0_17, %c0_18] : memref<2x256xbf16, #tpu.memory_space<vmem>>, vector<2x256xbf16>
    tpu.vector_store %arg6[%c0_17, %c0_18], %38 {strides = array<i32>} : memref<2x256xbf16, #tpu.memory_space<vmem>>, vector<2x256xbf16>,
    return
  }
  func.func @transform_0(%arg0: i32) -> (i32, i32) {
    %c0_i32 = arith.constant 0 : i32
    %c0_i32_0 = arith.constant 0 : i32
    return %arg0, %c0_i32 : i32, i32
  }
  func.func @transform_1(%arg0: i32) -> (i32, i32) {
    %c0_i32 = arith.constant 0 : i32
    %c0_i32_0 = arith.constant 0 : i32
    %c0_i32_1 = arith.constant 0 : i32
    return %c0_i32, %c0_i32_0 : i32, i32
  }
  func.func @transform_2(%arg0: i32) -> (i32, i32) {
    %c0_i32 = arith.constant 0 : i32
    %c0_i32_0 = arith.constant 0 : i32
    %c0_i32_1 = arith.constant 0 : i32
    return %c0_i32, %c0_i32_0 : i32, i32
  }
  func.func @transform_3(%arg0: i32) -> (i32, i32) {
    %c0_i32 = arith.constant 0 : i32
    %c0_i32_0 = arith.constant 0 : i32
    %c0_i32_1 = arith.constant 0 : i32
    return %c0_i32, %c0_i32_0 : i32, i32
  }
  func.func @transform_4(%arg0: i32) -> (i32, i32) {
    %c0_i32 = arith.constant 0 : i32
    %c0_i32_0 = arith.constant 0 : i32
    %c0_i32_1 = arith.constant 0 : i32
    return %c0_i32, %c0_i32_0 : i32, i32
  }
  func.func @transform_5(%arg0: i32) -> (i32, i32) {
    %c0_i32 = arith.constant 0 : i32
    %c0_i32_0 = arith.constant 0 : i32
    return %arg0, %c0_i32 : i32, i32
  }
}

module attributes {stable_mosaic.version = 11 : i64} {
  func.func @_pool_kernel(%arg0: i32, %arg1: memref<1x3x3x64xbf16, #tpu.memory_space<vmem>>, %arg2: memref<1x64xf32, #tpu.memory_space<vmem>>, %arg3: memref<1x64xf32, #tpu.memory_space<vmem>>, %arg4: memref<1x1x1x64xbf16, #tpu.memory_space<vmem>>) attributes {dimension_semantics = [#tpu.dimension_semantics<parallel>], iteration_bounds = array<i64: 2>, scalar_prefetch = 0 : i64, scratch_operands = 0 : i64, tpu.core_type = #tpu.core_type<tc>, window_params = [{transform_indices = @transform_0, window_bounds = array<i64: 1, 3, 3, 64>}, {pipeline_mode = #tpu.pipeline_mode<synchronous>, transform_indices = @transform_1, window_bounds = array<i64: 1, 64>}, {pipeline_mode = #tpu.pipeline_mode<synchronous>, transform_indices = @transform_2, window_bounds = array<i64: 1, 64>}, {transform_indices = @transform_3, window_bounds = array<i64: 1, 1, 1, 64>}]} {
    %c0 = arith.constant 0 : index
    %c0_0 = arith.constant 0 : index
    %c0_1 = arith.constant 0 : index
    %c0_2 = arith.constant 0 : index
    %0 = vector.load %arg1[%c0, %c0_0, %c0_1, %c0_2] : memref<1x3x3x64xbf16, #tpu.memory_space<vmem>>, vector<1x3x3x64xbf16>
    %1 = vector.shape_cast %0 : vector<1x3x3x64xbf16> to vector<3x3x64xbf16>
    %2 = arith.extf %1 : vector<3x3x64xbf16> to vector<3x3x64xf32>
    %c0_3 = arith.constant 0 : index
    %c0_4 = arith.constant 0 : index
    %3 = vector.load %arg2[%c0_3, %c0_4] : memref<1x64xf32, #tpu.memory_space<vmem>>, vector<1x64xf32>
    %c0_5 = arith.constant 0 : index
    %c0_6 = arith.constant 0 : index
    %4 = vector.load %arg3[%c0_5, %c0_6] : memref<1x64xf32, #tpu.memory_space<vmem>>, vector<1x64xf32>
    %cst = arith.constant dense<0.000000e+00> : vector<3x3xf32>
    %5 = vector.multi_reduction <add>, %2, %cst [2] : vector<3x3x64xf32> to vector<3x3xf32>
    %6 = vector.shape_cast %5 : vector<3x3xf32> to vector<3x3x1xf32>
    %cst_7 = arith.constant 6.400000e+01 : f32
    %7 = vector.broadcast %cst_7 : f32 to vector<3x3x1xf32>
    %8 = arith.divf %6, %7 : vector<3x3x1xf32>
    %9 = vector.broadcast %8 : vector<3x3x1xf32> to vector<3x3x64xf32>
    %10 = arith.subf %2, %9 : vector<3x3x64xf32>
    %11 = arith.mulf %10, %10 : vector<3x3x64xf32>
    %cst_8 = arith.constant dense<0.000000e+00> : vector<3x3xf32>
    %12 = vector.multi_reduction <add>, %11, %cst_8 [2] : vector<3x3x64xf32> to vector<3x3xf32>
    %13 = vector.shape_cast %12 : vector<3x3xf32> to vector<3x3x1xf32>
    %cst_9 = arith.constant 6.400000e+01 : f32
    %14 = vector.broadcast %cst_9 : f32 to vector<3x3x1xf32>
    %15 = arith.divf %13, %14 : vector<3x3x1xf32>
    %cst_10 = arith.constant 9.99999997E-7 : f32
    %16 = vector.broadcast %cst_10 : f32 to vector<3x3x1xf32>
    %17 = arith.addf %15, %16 : vector<3x3x1xf32>
    %18 = math.rsqrt %17 : vector<3x3x1xf32>
    %19 = vector.broadcast %18 : vector<3x3x1xf32> to vector<3x3x64xf32>
    %20 = arith.mulf %10, %19 : vector<3x3x64xf32>
    %21 = vector.shape_cast %3 : vector<1x64xf32> to vector<1x1x64xf32>
    %22 = vector.broadcast %21 : vector<1x1x64xf32> to vector<3x3x64xf32>
    %23 = arith.mulf %20, %22 : vector<3x3x64xf32>
    %24 = vector.shape_cast %4 : vector<1x64xf32> to vector<1x1x64xf32>
    %25 = vector.broadcast %24 : vector<1x1x64xf32> to vector<3x3x64xf32>
    %26 = arith.addf %23, %25 : vector<3x3x64xf32>
    %27 = tpu.iota {dimensions = array<i32: 0>} : vector<3x3x1xi32>
    %28 = tpu.iota {dimensions = array<i32: 1>} : vector<3x3x1xi32>
    %c1_i32 = arith.constant 1 : i32
    %29 = vector.broadcast %c1_i32 : i32 to vector<3x3x1xi32>
    %30 = arith.cmpi sge, %27, %29 : vector<3x3x1xi32>
    %c1_i32_11 = arith.constant 1 : i32
    %31 = vector.broadcast %c1_i32_11 : i32 to vector<3x3x1xi32>
    %32 = arith.cmpi sle, %27, %31 : vector<3x3x1xi32>
    %33 = arith.andi %30, %32 : vector<3x3x1xi1>
    %c1_i32_12 = arith.constant 1 : i32
    %34 = vector.broadcast %c1_i32_12 : i32 to vector<3x3x1xi32>
    %35 = arith.cmpi sge, %28, %34 : vector<3x3x1xi32>
    %36 = arith.andi %33, %35 : vector<3x3x1xi1>
    %c1_i32_13 = arith.constant 1 : i32
    %37 = vector.broadcast %c1_i32_13 : i32 to vector<3x3x1xi32>
    %38 = arith.cmpi sle, %28, %37 : vector<3x3x1xi32>
    %39 = arith.andi %36, %38 : vector<3x3x1xi1>
    %40 = arith.extui %39 : vector<3x3x1xi1> to vector<3x3x1xi32>
    %41 = arith.sitofp %40 : vector<3x3x1xi32> to vector<3x3x1xf32>
    %42 = vector.broadcast %41 : vector<3x3x1xf32> to vector<3x3x64xf32>
    %43 = arith.mulf %26, %42 : vector<3x3x64xf32>
    %44 = vector.extract_strided_slice %43 {offsets = [0, 0, 0], sizes = [1, 3, 64], strides = [1, 1, 1]} : vector<3x3x64xf32> to vector<1x3x64xf32>
    %45 = vector.extract_strided_slice %43 {offsets = [1, 0, 0], sizes = [1, 3, 64], strides = [1, 1, 1]} : vector<3x3x64xf32> to vector<1x3x64xf32>
    %46 = arith.addf %44, %45 : vector<1x3x64xf32>
    %47 = vector.extract_strided_slice %43 {offsets = [2, 0, 0], sizes = [1, 3, 64], strides = [1, 1, 1]} : vector<3x3x64xf32> to vector<1x3x64xf32>
    %48 = arith.addf %46, %47 : vector<1x3x64xf32>
    %49 = vector.extract_strided_slice %48 {offsets = [0, 0, 0], sizes = [1, 1, 64], strides = [1, 1, 1]} : vector<1x3x64xf32> to vector<1x1x64xf32>
    %50 = vector.extract_strided_slice %48 {offsets = [0, 1, 0], sizes = [1, 1, 64], strides = [1, 1, 1]} : vector<1x3x64xf32> to vector<1x1x64xf32>
    %51 = arith.addf %49, %50 : vector<1x1x64xf32>
    %52 = vector.extract_strided_slice %48 {offsets = [0, 2, 0], sizes = [1, 1, 64], strides = [1, 1, 1]} : vector<1x3x64xf32> to vector<1x1x64xf32>
    %53 = arith.addf %51, %52 : vector<1x1x64xf32>
    %54 = tpu.iota {dimensions = array<i32: 0>} : vector<1x1x1xi32>
    %55 = tpu.iota {dimensions = array<i32: 1>} : vector<1x1x1xi32>
    %c0_i32 = arith.constant 0 : i32
    %56 = vector.broadcast %c0_i32 : i32 to vector<1x1x1xi32>
    %57 = arith.cmpi eq, %54, %56 : vector<1x1x1xi32>
    %58 = arith.extui %57 : vector<1x1x1xi1> to vector<1x1x1xi32>
    %59 = arith.sitofp %58 : vector<1x1x1xi32> to vector<1x1x1xf32>
    %cst_14 = arith.constant 3.000000e+00 : f32
    %60 = vector.broadcast %cst_14 : f32 to vector<1x1x1xf32>
    %61 = arith.subf %60, %59 : vector<1x1x1xf32>
    %c0_i32_15 = arith.constant 0 : i32
    %62 = vector.broadcast %c0_i32_15 : i32 to vector<1x1x1xi32>
    %63 = arith.cmpi eq, %54, %62 : vector<1x1x1xi32>
    %64 = arith.extui %63 : vector<1x1x1xi1> to vector<1x1x1xi32>
    %65 = arith.sitofp %64 : vector<1x1x1xi32> to vector<1x1x1xf32>
    %66 = arith.subf %61, %65 : vector<1x1x1xf32>
    %c0_i32_16 = arith.constant 0 : i32
    %67 = vector.broadcast %c0_i32_16 : i32 to vector<1x1x1xi32>
    %68 = arith.cmpi eq, %55, %67 : vector<1x1x1xi32>
    %69 = arith.extui %68 : vector<1x1x1xi1> to vector<1x1x1xi32>
    %70 = arith.sitofp %69 : vector<1x1x1xi32> to vector<1x1x1xf32>
    %cst_17 = arith.constant 3.000000e+00 : f32
    %71 = vector.broadcast %cst_17 : f32 to vector<1x1x1xf32>
    %72 = arith.subf %71, %70 : vector<1x1x1xf32>
    %c0_i32_18 = arith.constant 0 : i32
    %73 = vector.broadcast %c0_i32_18 : i32 to vector<1x1x1xi32>
    %74 = arith.cmpi eq, %55, %73 : vector<1x1x1xi32>
    %75 = arith.extui %74 : vector<1x1x1xi1> to vector<1x1x1xi32>
    %76 = arith.sitofp %75 : vector<1x1x1xi32> to vector<1x1x1xf32>
    %77 = arith.subf %72, %76 : vector<1x1x1xf32>
    %78 = arith.mulf %66, %77 : vector<1x1x1xf32>
    %79 = vector.broadcast %78 : vector<1x1x1xf32> to vector<1x1x64xf32>
    %80 = arith.divf %53, %79 : vector<1x1x64xf32>
    %81 = vector.extract_strided_slice %2 {offsets = [1, 1, 0], sizes = [1, 1, 64], strides = [1, 1, 1]} : vector<3x3x64xf32> to vector<1x1x64xf32>
    %82 = vector.extract_strided_slice %26 {offsets = [1, 1, 0], sizes = [1, 1, 64], strides = [1, 1, 1]} : vector<3x3x64xf32> to vector<1x1x64xf32>
    %83 = arith.addf %81, %80 : vector<1x1x64xf32>
    %84 = arith.subf %83, %82 : vector<1x1x64xf32>
    %85 = arith.truncf %84 : vector<1x1x64xf32> to vector<1x1x64xbf16>
    %c0_19 = arith.constant 0 : index
    %c0_20 = arith.constant 0 : index
    %c0_21 = arith.constant 0 : index
    %c0_22 = arith.constant 0 : index
    %86 = vector.load %arg4[%c0_19, %c0_20, %c0_21, %c0_22] : memref<1x1x1x64xbf16, #tpu.memory_space<vmem>>, vector<1x1x1x64xbf16>
    %87 = vector.shape_cast %86 : vector<1x1x1x64xbf16> to vector<1x1x64xbf16>
    %88 = vector.shape_cast %85 : vector<1x1x64xbf16> to vector<1x1x1x64xbf16>
    tpu.vector_store %arg4[%c0_19, %c0_20, %c0_21, %c0_22], %88 {strides = array<i32>} : memref<1x1x1x64xbf16, #tpu.memory_space<vmem>>, vector<1x1x1x64xbf16>,
    return
  }
  func.func @transform_0(%arg0: i32) -> (i32, i32, i32, i32) {
    %c0_i32 = arith.constant 0 : i32
    %c0_i32_0 = arith.constant 0 : i32
    %c0_i32_1 = arith.constant 0 : i32
    %c0_i32_2 = arith.constant 0 : i32
    return %arg0, %c0_i32, %c0_i32_0, %c0_i32_1 : i32, i32, i32, i32
  }
  func.func @transform_1(%arg0: i32) -> (i32, i32) {
    %c0_i32 = arith.constant 0 : i32
    %c0_i32_0 = arith.constant 0 : i32
    %c0_i32_1 = arith.constant 0 : i32
    return %c0_i32, %c0_i32_0 : i32, i32
  }
  func.func @transform_2(%arg0: i32) -> (i32, i32) {
    %c0_i32 = arith.constant 0 : i32
    %c0_i32_0 = arith.constant 0 : i32
    %c0_i32_1 = arith.constant 0 : i32
    return %c0_i32, %c0_i32_0 : i32, i32
  }
  func.func @transform_3(%arg0: i32) -> (i32, i32, i32, i32) {
    %c0_i32 = arith.constant 0 : i32
    %c0_i32_0 = arith.constant 0 : i32
    %c0_i32_1 = arith.constant 0 : i32
    %c0_i32_2 = arith.constant 0 : i32
    return %arg0, %c0_i32, %c0_i32_0, %c0_i32_1 : i32, i32, i32, i32
  }
}

module attributes {stable_mosaic.version = 11 : i64} {
  func.func @_mlp2_kernel(%arg0: i32, %arg1: memref<2x256xbf16, #tpu.memory_space<vmem>>, %arg2: memref<256x64xbf16, #tpu.memory_space<vmem>>, %arg3: memref<1x64xf32, #tpu.memory_space<vmem>>, %arg4: memref<2x64xbf16, #tpu.memory_space<vmem>>, %arg5: memref<2x64xbf16, #tpu.memory_space<vmem>>) attributes {dimension_semantics = [#tpu.dimension_semantics<parallel>], iteration_bounds = array<i64: 1>, scalar_prefetch = 0 : i64, scratch_operands = 0 : i64, tpu.core_type = #tpu.core_type<tc>, window_params = [{transform_indices = @transform_0, window_bounds = array<i64: 2, 256>}, {pipeline_mode = #tpu.pipeline_mode<synchronous>, transform_indices = @transform_1, window_bounds = array<i64: 256, 64>}, {pipeline_mode = #tpu.pipeline_mode<synchronous>, transform_indices = @transform_2, window_bounds = array<i64: 1, 64>}, {transform_indices = @transform_3, window_bounds = array<i64: 2, 64>}, {transform_indices = @transform_4, window_bounds = array<i64: 2, 64>}]} {
    %c0 = arith.constant 0 : index
    %c0_0 = arith.constant 0 : index
    %0 = vector.load %arg1[%c0, %c0_0] : memref<2x256xbf16, #tpu.memory_space<vmem>>, vector<2x256xbf16>
    %c0_1 = arith.constant 0 : index
    %c0_2 = arith.constant 0 : index
    %1 = vector.load %arg2[%c0_1, %c0_2] : memref<256x64xbf16, #tpu.memory_space<vmem>>, vector<256x64xbf16>
    %cst = arith.constant dense<0.000000e+00> : vector<2x64xf32>
    %2 = tpu.matmul %0, %1, %cst {dimension_numbers = #tpu.dot_dimension_numbers<[1], [0], [0], [1], [0, 0, 1, 1], [], []>} : vector<2x256xbf16>, vector<256x64xbf16>, vector<2x64xf32> -> vector<2x64xf32>
    %c0_3 = arith.constant 0 : index
    %c0_4 = arith.constant 0 : index
    %3 = vector.load %arg3[%c0_3, %c0_4] : memref<1x64xf32, #tpu.memory_space<vmem>>, vector<1x64xf32>
    %4 = vector.broadcast %3 : vector<1x64xf32> to vector<2x64xf32>
    %5 = arith.addf %2, %4 : vector<2x64xf32>
    %c0_5 = arith.constant 0 : index
    %c0_6 = arith.constant 0 : index
    %6 = vector.load %arg4[%c0_5, %c0_6] : memref<2x64xbf16, #tpu.memory_space<vmem>>, vector<2x64xbf16>
    %7 = arith.extf %6 : vector<2x64xbf16> to vector<2x64xf32>
    %8 = arith.addf %5, %7 : vector<2x64xf32>
    %9 = arith.truncf %8 : vector<2x64xf32> to vector<2x64xbf16>
    %c0_7 = arith.constant 0 : index
    %c0_8 = arith.constant 0 : index
    %10 = vector.load %arg5[%c0_7, %c0_8] : memref<2x64xbf16, #tpu.memory_space<vmem>>, vector<2x64xbf16>
    tpu.vector_store %arg5[%c0_7, %c0_8], %9 {strides = array<i32>} : memref<2x64xbf16, #tpu.memory_space<vmem>>, vector<2x64xbf16>,
    return
  }
  func.func @transform_0(%arg0: i32) -> (i32, i32) {
    %c0_i32 = arith.constant 0 : i32
    %c0_i32_0 = arith.constant 0 : i32
    return %arg0, %c0_i32 : i32, i32
  }
  func.func @transform_1(%arg0: i32) -> (i32, i32) {
    %c0_i32 = arith.constant 0 : i32
    %c0_i32_0 = arith.constant 0 : i32
    %c0_i32_1 = arith.constant 0 : i32
    return %c0_i32, %c0_i32_0 : i32, i32
  }
  func.func @transform_2(%arg0: i32) -> (i32, i32) {
    %c0_i32 = arith.constant 0 : i32
    %c0_i32_0 = arith.constant 0 : i32
    %c0_i32_1 = arith.constant 0 : i32
    return %c0_i32, %c0_i32_0 : i32, i32
  }
  func.func @transform_3(%arg0: i32) -> (i32, i32) {
    %c0_i32 = arith.constant 0 : i32
    %c0_i32_0 = arith.constant 0 : i32
    return %arg0, %c0_i32 : i32, i32
  }
  func.func @transform_4(%arg0: i32) -> (i32, i32) {
    %c0_i32 = arith.constant 0 : i32
    %c0_i32_0 = arith.constant 0 : i32
    return %arg0, %c0_i32 : i32, i32
  }
}

module attributes {stable_mosaic.version = 11 : i64} {
  func.func @_head_kernel(%arg0: i32, %arg1: memref<2x1x64xbf16, #tpu.memory_space<vmem>>, %arg2: memref<64x10xbf16, #tpu.memory_space<vmem>>, %arg3: memref<1x10xf32, #tpu.memory_space<vmem>>, %arg4: memref<2x10xf32, #tpu.memory_space<vmem>>) attributes {dimension_semantics = [#tpu.dimension_semantics<arbitrary>], iteration_bounds = array<i64: 1>, scalar_prefetch = 0 : i64, scratch_operands = 0 : i64, tpu.core_type = #tpu.core_type<tc>, window_params = [{pipeline_mode = #tpu.pipeline_mode<synchronous>, transform_indices = @transform_0, window_bounds = array<i64: 2, 1, 64>}, {pipeline_mode = #tpu.pipeline_mode<synchronous>, transform_indices = @transform_1, window_bounds = array<i64: 64, 10>}, {pipeline_mode = #tpu.pipeline_mode<synchronous>, transform_indices = @transform_2, window_bounds = array<i64: 1, 10>}, {pipeline_mode = #tpu.pipeline_mode<synchronous>, transform_indices = @transform_3, window_bounds = array<i64: 2, 10>}]} {
    %c0 = arith.constant 0 : index
    %c0_0 = arith.constant 0 : index
    %c0_1 = arith.constant 0 : index
    %0 = vector.load %arg1[%c0, %c0_0, %c0_1] : memref<2x1x64xbf16, #tpu.memory_space<vmem>>, vector<2x1x64xbf16>
    %1 = arith.extf %0 : vector<2x1x64xbf16> to vector<2x1x64xf32>
    %cst = arith.constant dense<0.000000e+00> : vector<2x64xf32>
    %2 = vector.multi_reduction <add>, %1, %cst [1] : vector<2x1x64xf32> to vector<2x64xf32>
    %cst_2 = arith.constant 1.000000e+00 : f32
    %3 = vector.broadcast %cst_2 : f32 to vector<2x64xf32>
    %4 = arith.divf %2, %3 : vector<2x64xf32>
    %5 = arith.truncf %4 : vector<2x64xf32> to vector<2x64xbf16>
    %c0_3 = arith.constant 0 : index
    %c0_4 = arith.constant 0 : index
    %6 = vector.load %arg2[%c0_3, %c0_4] : memref<64x10xbf16, #tpu.memory_space<vmem>>, vector<64x10xbf16>
    %cst_5 = arith.constant dense<0.000000e+00> : vector<2x10xf32>
    %7 = tpu.matmul %5, %6, %cst_5 {dimension_numbers = #tpu.dot_dimension_numbers<[1], [0], [0], [1], [0, 0, 1, 1], [], []>} : vector<2x64xbf16>, vector<64x10xbf16>, vector<2x10xf32> -> vector<2x10xf32>
    %c0_6 = arith.constant 0 : index
    %c0_7 = arith.constant 0 : index
    %8 = vector.load %arg3[%c0_6, %c0_7] : memref<1x10xf32, #tpu.memory_space<vmem>>, vector<1x10xf32>
    %9 = vector.broadcast %8 : vector<1x10xf32> to vector<2x10xf32>
    %10 = arith.addf %7, %9 : vector<2x10xf32>
    %c0_8 = arith.constant 0 : index
    %c0_9 = arith.constant 0 : index
    %11 = vector.load %arg4[%c0_8, %c0_9] : memref<2x10xf32, #tpu.memory_space<vmem>>, vector<2x10xf32>
    tpu.vector_store %arg4[%c0_8, %c0_9], %10 {strides = array<i32>} : memref<2x10xf32, #tpu.memory_space<vmem>>, vector<2x10xf32>,
    return
  }
  func.func @transform_0(%arg0: i32) -> (i32, i32, i32) {
    %c0_i32 = arith.constant 0 : i32
    %c0_i32_0 = arith.constant 0 : i32
    %c0_i32_1 = arith.constant 0 : i32
    %c0_i32_2 = arith.constant 0 : i32
    return %c0_i32, %c0_i32_0, %c0_i32_1 : i32, i32, i32
  }
  func.func @transform_1(%arg0: i32) -> (i32, i32) {
    %c0_i32 = arith.constant 0 : i32
    %c0_i32_0 = arith.constant 0 : i32
    %c0_i32_1 = arith.constant 0 : i32
    return %c0_i32, %c0_i32_0 : i32, i32
  }
  func.func @transform_2(%arg0: i32) -> (i32, i32) {
    %c0_i32 = arith.constant 0 : i32
    %c0_i32_0 = arith.constant 0 : i32
    %c0_i32_1 = arith.constant 0 : i32
    return %c0_i32, %c0_i32_0 : i32, i32
  }
  func.func @transform_3(%arg0: i32) -> (i32, i32) {
    %c0_i32 = arith.constant 0 : i32
    %c0_i32_0 = arith.constant 0 : i32
    %c0_i32_1 = arith.constant 0 : i32
    return %c0_i32, %c0_i32_0 : i32, i32
  }
}

</mosaic_0001>

<bundles_post_ra>
// kernel: poolformer_forward.20
= control target key start
LH: loop header
LB: loop body
LE: loop exit
PB: predicated region body
PF: predicated region fallthrough
CT: control target
= control target key end

     0   :  { %vm97_vm0 = vcmask 261120   ;;  %vm331_vm1 = vcmask 60416   ;;  %s674_s1 = inlined_call_operand.vmem [shape: bf16[32,8], index: 1, kind: input, shape index: {}]   ;;  %s675_s0 = inlined_call_operand.vmem [shape: bf16[128,32], index: 0, kind: input, shape index: {}]   ;;  %s676_s3 = inlined_call_operand.vmem [shape: bf16[128,8], index: 3, kind: input, shape index: {}]   ;;  %s677_s2 = inlined_call_operand.vmem [shape: f32[1,8], index: 2, kind: input, shape index: {}]   ;;  %s678_s4 = inlined_call_operand.vmem [shape: bf16[128,8], index: 4, kind: output, shape index: {}]  }
   0x1   :  { %v476_v0 = vld [vmem:[%s674_s1 + $0x8] sm:$0xff]   ;;  %v477_v1 = vld [vmem:[%s674_s1] sm:$0xff]   ;;  %v482_v6 = vld [vmem:[%s675_s0 + $0x10] sm:$0xff]  }
   0x2   :  { %452 = vmatprep.subr.bf16.mxu0 %v476_v0  ;;  %472 = vmatprep.subr.bf16.mxu1 %v476_v0  ;;  %v478_v2 = vld [vmem:[%s675_s0] sm:$0xff]   ;;  %v480_v4 = vld [vmem:[%s675_s0 + $0x8] sm:$0xff]   ;;  %v483_v7 = vld [vmem:[%s675_s0 + $0x30] sm:$0xff]  }
   0x3   :  { %453 = vmatpush3.bf16.msra.mxu0 %v476_v0  ;;  %474 = vmatpush3.bf16.msra.mxu1 %v476_v0  ;;  %v479_v3 = vld [vmem:[%s675_s0 + $0x20] sm:$0xff]   ;;  %v481_v5 = vld [vmem:[%s675_s0 + $0x28] sm:$0xff]   ;;  %v484_v8 = vld [vmem:[%s675_s0 + $0x18] sm:$0xff]  }
   0x4   :  { %454 = vmatprep.subr.bf16.mxu0 %v477_v1  ;;  %473 = vmatprep.subr.bf16.mxu1 %v477_v1  ;;  %v485_v9 = vld [vmem:[%s675_s0 + $0x38] sm:$0xff]   ;;  %v435_v10 = vld [vmem:[%s676_s3 + $0x8] sm:$0xff]   ;;  %v558_v12 = vld [vmem:[%s677_s2] ss:$0 sm:$0xff] }
   0x5   :  { %456 = vmatprep.mubr.msk.bf16.mxu0 %vm97_vm0, %v478_v2  ;;  %464 = vmatprep.mubr.msk.bf16.mxu1 %vm97_vm0, %v479_v3  ;;  %v439_v11 = vld [vmem:[%s676_s3 + $0x28] sm:$0xff]   ;;  %v404_v13 = vld [vmem:[%s676_s3] sm:$0xff]   ;;  %v409_v15 = vunpack.c.l.bf16 %v435_v10  ;;  %v573_v29 = vld [vmem:[%s676_s3 + $0x18] sm:$0xff]   ;;  %v410_v32 = vunpack.c.h.bf16 %v435_v10 }
   0x6   :  { %v438_v14 = vld [vmem:[%s676_s3 + $0x20] sm:$0xff]   ;;  %v425_v16 = vunpack.c.l.bf16 %v439_v11  ;;  %v405_v21 = vunpack.c.l.bf16 %v404_v13  ;;  %v578_v30 = vld [vmem:[%s676_s3 + $0x38] sm:$0xff]   ;;  %v426_v34 = vunpack.c.h.bf16 %v439_v11  ;;  %v406_v35 = vunpack.c.h.bf16 %v404_v13  ;;  %v583_v41 = vld [vmem:[%s676_s3 + $0x10] sm:$0xff]  }
   0x7   :  { %455 = vmatpush3.bf16.msra.mxu0 %v477_v1  ;;  %475 = vmatpush3.bf16.msra.mxu1 %v477_v1  ;;  %v421_v22 = vunpack.c.l.bf16 %v438_v14  ;;  %v422_v36 = vunpack.c.h.bf16 %v438_v14  ;;  %v588_v42 = vld [vmem:[%s676_s3 + $0x30] sm:$0xff]   ;;  %v417_v47 = vunpack.c.l.bf16 %v573_v29  ;;  %v433_v48 = vunpack.c.l.bf16 %v578_v30 }
   0x8   :  { %v413_v57 = vunpack.c.l.bf16 %v583_v41  ;;  %v429_v58 = vunpack.c.l.bf16 %v588_v42  ;;  %v418_v3 = vunpack.c.h.bf16 %v573_v29  ;;  %v414_v14 = vunpack.c.h.bf16 %v583_v41 }
   0xa   :  { %457 = vmatmul.mubr.msk.bf16.vlgmr.msra.gmra.mxu0 %vm97_vm0, %v480_v4  ;;  %465 = vmatmul.mubr.msk.bf16.vlgmr.msra.gmra.mxu1 %vm97_vm0, %v481_v5  ;;  %v434_v4 = vunpack.c.h.bf16 %v578_v30 }
   0xb   :  { %460 = vmatprep.mubr.msk.bf16.mxu0 %vm97_vm0, %v482_v6  ;;  %468 = vmatprep.mubr.msk.bf16.mxu1 %vm97_vm0, %v483_v7 }
  0x12   :  { %461 = vmatmul.mubr.msk.bf16.gmra.mxu0 %vm97_vm0, %v484_v8  ;;  %469 = vmatmul.mubr.msk.bf16.gmra.mxu1 %vm97_vm0, %v485_v9 }
  0xca   :  { %v458_v17 = vpop.f32.mrf.mxu0  ;;  %v466_v18 = vpop.f32.mrf.mxu1 }
  0xcb   :  { %v165_v19 = vadd.f32 %v458_v17, %v558_v12  ;;  %v197_v20 = vadd.f32 %v466_v18, %v558_v12 }
  0xcc   :  { %v156_v23 = vpop.f32.mrf.mxu0  ;;  %v188_v24 = vpop.f32.mrf.mxu1 }
  0xcd   :  { %v253_v25 = vadd.f32 %v409_v15, %v165_v19  ;;  %v261_v26 = vadd.f32 %v425_v16, %v197_v20  ;;  %v157_v27 = vadd.f32 %v558_v12, %v156_v23  ;;  %v189_v28 = vadd.f32 %v558_v12, %v188_v24 }
  0xce   :  { %v459_v31 = vpop.f32.mrf.mxu0  ;;  %v467_v33 = vpop.f32.mrf.mxu1  ;;  %v430_v15 = vunpack.c.h.bf16 %v588_v42 }
  0xcf   :  { %v389_v37 = vpack.c.bf16 %v253_v25, %v253_v25  ;;  %v397_v38 = vpack.c.bf16 %v261_v26, %v261_v26  ;;  %v251_v39 = vadd.f32 %v405_v21, %v157_v27  ;;  %v259_v40 = vadd.f32 %v421_v22, %v189_v28 }
  0xd0   :  { %v168_v43 = vadd.f32 %v459_v31, %v558_v12  ;;  %v200_v44 = vadd.f32 %v467_v33, %v558_v12  ;;  %v159_v45 = vpop.f32.mrf.mxu0  ;;  %v191_v46 = vpop.f32.mrf.mxu1 }
  0xd1   :  { %334 = vst.msk [vmem:[%s678_s4 + $0x8] sm:$0xf] %vm331_vm1, %v389_v37  ;;  %342 = vst.msk [vmem:[%s678_s4 + $0x28] sm:$0xf] %vm331_vm1, %v397_v38  ;;  %v387_v49 = vpack.c.bf16 %v251_v39, %v251_v39  ;;  %v395_v50 = vpack.c.bf16 %v259_v40, %v259_v40  ;;  %v160_v51 = vadd.f32 %v558_v12, %v159_v45 }
  0xd2   :  { %v192_v52 = vadd.f32 %v558_v12, %v191_v46  ;;  %v254_v53 = vadd.f32 %v410_v32, %v168_v43  ;;  %v262_v54 = vadd.f32 %v426_v34, %v200_v44  ;;  %v462_v55 = vpop.f32.mrf.mxu0  ;;  %v470_v56 = vpop.f32.mrf.mxu1 }
  0xd3   :  { %332 = vst.msk [vmem:[%s678_s4] sm:$0xf] %vm331_vm1, %v387_v49  ;;  %340 = vst.msk [vmem:[%s678_s4 + $0x20] sm:$0xf] %vm331_vm1, %v395_v50  ;;  %v252_v59 = vadd.f32 %v406_v35, %v160_v51  ;;  %v181_v61 = vadd.f32 %v462_v55, %v558_v12  ;;  %v213_v62 = vadd.f32 %v470_v56, %v558_v12 }
  0xd4   :  { %v260_v60 = vadd.f32 %v422_v36, %v192_v52  ;;  %v390_v63 = vpack.c.bf16 %v254_v53, %v254_v53  ;;  %v398_v0 = vpack.c.bf16 %v262_v54, %v262_v54  ;;  %v172_v1 = vpop.f32.mrf.mxu0  ;;  %v204_v2 = vpop.f32.mrf.mxu1 }
  0xd5   :  { %v388_v5 = vpack.c.bf16 %v252_v59, %v252_v59  ;;  %v257_v7 = vadd.f32 %v417_v47, %v181_v61  ;;  %v265_v8 = vadd.f32 %v433_v48, %v213_v62  ;;  %v173_v9 = vadd.f32 %v558_v12, %v172_v1 }
  0xd6   :  { %v396_v6 = vpack.c.bf16 %v260_v60, %v260_v60  ;;  %335 = vst.msk [vmem:[%s678_s4 + $0xc] sm:$0xf] %vm331_vm1, %v390_v63  ;;  %343 = vst.msk [vmem:[%s678_s4 + $0x2c] sm:$0xf] %vm331_vm1, %v398_v0  ;;  %v205_v10 = vadd.f32 %v558_v12, %v204_v2  ;;  %v463_v11 = vpop.f32.mrf.mxu0  ;;  %v471_v13 = vpop.f32.mrf.mxu1 }
  0xd7   :  { %333 = vst.msk [vmem:[%s678_s4 + $0x4] sm:$0xf] %vm331_vm1, %v388_v5  ;;  %v393_v16 = vpack.c.bf16 %v257_v7, %v257_v7  ;;  %v401_v17 = vpack.c.bf16 %v265_v8, %v265_v8  ;;  %v184_v18 = vadd.f32 %v463_v11, %v558_v12  ;;  %v216_v19 = vadd.f32 %v471_v13, %v558_v12 }
  0xd8   :  { %341 = vst.msk [vmem:[%s678_s4 + $0x24] sm:$0xf] %vm331_vm1, %v396_v6  ;;  %v255_v20 = vadd.f32 %v413_v57, %v173_v9  ;;  %v263_v21 = vadd.f32 %v429_v58, %v205_v10  ;;  %v175_v22 = vpop.f32.mrf.mxu0  ;;  %v207_v23 = vpop.f32.mrf.mxu1 }
  0xd9   :  { %338 = vst.msk [vmem:[%s678_s4 + $0x18] sm:$0xf] %vm331_vm1, %v393_v16  ;;  %346 = vst.msk [vmem:[%s678_s4 + $0x38] sm:$0xf] %vm331_vm1, %v401_v17  ;;  %v258_v24 = vadd.f32 %v418_v3, %v184_v18  ;;  %v266_v25 = vadd.f32 %v434_v4, %v216_v19  ;;  %v176_v26 = vadd.f32 %v558_v12, %v175_v22 }
  0xda   :  { %v208_v27 = vadd.f32 %v558_v12, %v207_v23  ;;  %v391_v28 = vpack.c.bf16 %v255_v20, %v255_v20  ;;  %v399_v29 = vpack.c.bf16 %v263_v21, %v263_v21 }
  0xdb   :  { %v394_v30 = vpack.c.bf16 %v258_v24, %v258_v24  ;;  %v402_v31 = vpack.c.bf16 %v266_v25, %v266_v25  ;;  %v256_v32 = vadd.f32 %v414_v14, %v176_v26 }
  0xdc   :  { %v264_v33 = vadd.f32 %v430_v15, %v208_v27  ;;  %336 = vst.msk [vmem:[%s678_s4 + $0x10] sm:$0xf] %vm331_vm1, %v391_v28  ;;  %344 = vst.msk [vmem:[%s678_s4 + $0x30] sm:$0xf] %vm331_vm1, %v399_v29 }
  0xdd   :  { %339 = vst.msk [vmem:[%s678_s4 + $0x1c] sm:$0xf] %vm331_vm1, %v394_v30  ;;  %347 = vst.msk [vmem:[%s678_s4 + $0x3c] sm:$0xf] %vm331_vm1, %v402_v31  ;;  %v392_v12 = vpack.c.bf16 %v256_v32, %v256_v32 }
  0xde   :  { %v400_v34 = vpack.c.bf16 %v264_v33, %v264_v33 }
  0xdf   :  { %337 = vst.msk [vmem:[%s678_s4 + $0x14] sm:$0xf] %vm331_vm1, %v392_v12 }
  0xe0   :  { %345 = vst.msk [vmem:[%s678_s4 + $0x34] sm:$0xf] %vm331_vm1, %v400_v34 }

// kernel: poolformer_forward.19
= control target key start
LH: loop header
LB: loop body
LE: loop exit
PB: predicated region body
PF: predicated region fallthrough
CT: control target
= control target key end

     0   :  { %vm55_vm0 = vcmask 64512   ;;  %vm349_vm1 = vcmask 1043456   ;;  %vm594_vm2 = vcmask 257024   ;;  %s1204_s0 = inlined_call_operand.vmem [shape: bf16[128,8], index: 0, kind: input, shape index: {}]   ;;  %s1205_s3 = inlined_call_operand.vmem [shape: bf16[8,32], index: 3, kind: input, shape index: {}]   ;;  %s1206_s1 = inlined_call_operand.vmem [shape: f32[1,8], index: 1, kind: input, shape index: {}]   ;;  %s1207_s2 = inlined_call_operand.vmem [shape: f32[1,8], index: 2, kind: input, shape index: {}]   ;;  %s1208_s4 = inlined_call_operand.vmem [shape: f32[1,32], index: 4, kind: input, shape index: {}]   ;;  %s1209_s5 = inlined_call_operand.vmem [shape: bf16[128,32], index: 5, kind: output, shape index: {}]  }
   0x1   :  { %v825_v0 = vld [vmem:[%s1204_s0] sm:$0xff]   ;;  %v839_v6 = vld [vmem:[%s1204_s0 + $0x8] sm:$0xff]   ;;  %v867_v18 = vld [vmem:[%s1204_s0 + $0x10] sm:$0xff]  }
   0x2   :  { %v830_v1 = vld [vmem:[%s1204_s0 + $0x20] sm:$0xff]   ;;  %v660_v2 = vunpack.c.l.bf16 %v825_v0  ;;  %v661_v4 = vunpack.c.h.bf16 %v825_v0  ;;  %v664_v11 = vunpack.c.l.bf16 %v839_v6  ;;  %v665_v12 = vunpack.c.h.bf16 %v839_v6  ;;  %v854_v13 = vld [vmem:[%s1204_s0 + $0x28] sm:$0xff]   ;;  %v880_v23 = vld [vmem:[%s1204_s0 + $0x30] sm:$0xff]  }
   0x3   :  { %v676_v3 = vunpack.c.l.bf16 %v830_v1  ;;  %v677_v5 = vunpack.c.h.bf16 %v830_v1  ;;  %v680_v16 = vunpack.c.l.bf16 %v854_v13  ;;  %v681_v17 = vunpack.c.h.bf16 %v854_v13  ;;  %v893_v28 = vld [vmem:[%s1204_s0 + $0x18] sm:$0xff]  }
   0x4   :  { %v56_v7 = vsel %vm55_vm0, %v660_v2, 0.0  ;;  %v59_v9 = vsel %vm55_vm0, %v661_v4, 0.0  ;;  %v62_v14 = vsel %vm55_vm0, %v664_v11, 0.0  ;;  %v65_v15 = vsel %vm55_vm0, %v665_v12, 0.0  ;;  %v906_v33 = vld [vmem:[%s1204_s0 + $0x38] sm:$0xff]  }
   0x5   :  { %v80_v8 = vsel %vm55_vm0, %v676_v3, 0.0  ;;  %57 = vadd.xlane.f32.xlu0 %v56_v7  ;;  %v83_v10 = vsel %vm55_vm0, %v677_v5, 0.0  ;;  %v86_v19 = vsel %vm55_vm0, %v680_v16, 0.0  ;;  %v89_v20 = vsel %vm55_vm0, %v681_v17, 0.0 }
   0x6   :  { %81 = vadd.xlane.f32.xlu1 %v80_v8  ;;  %v668_v21 = vunpack.c.l.bf16 %v867_v18  ;;  %v669_v22 = vunpack.c.h.bf16 %v867_v18  ;;  %v684_v26 = vunpack.c.l.bf16 %v880_v23  ;;  %v685_v27 = vunpack.c.h.bf16 %v880_v23 }
   0x7   :  { %v672_v31 = vunpack.c.l.bf16 %v893_v28  ;;  %v673_v32 = vunpack.c.h.bf16 %v893_v28  ;;  %v688_v36 = vunpack.c.l.bf16 %v906_v33  ;;  %v689_v37 = vunpack.c.h.bf16 %v906_v33 }
   0x8   :  { %v68_v24 = vsel %vm55_vm0, %v668_v21, 0.0  ;;  %v71_v25 = vsel %vm55_vm0, %v669_v22, 0.0  ;;  %v92_v29 = vsel %vm55_vm0, %v684_v26, 0.0  ;;  %v95_v30 = vsel %vm55_vm0, %v685_v27, 0.0 }
   0x9   :  { %60 = vadd.xlane.f32.xlu0 %v59_v9  ;;  %v74_v34 = vsel %vm55_vm0, %v672_v31, 0.0  ;;  %v77_v35 = vsel %vm55_vm0, %v673_v32, 0.0  ;;  %v98_v38 = vsel %vm55_vm0, %v688_v36, 0.0  ;;  %v101_v39 = vsel %vm55_vm0, %v689_v37, 0.0 }
   0xa   :  { %84 = vadd.xlane.f32.xlu1 %v83_v10 }
   0xd   :  { %63 = vadd.xlane.f32.xlu0 %v62_v14 }
   0xe   :  { %66 = vadd.xlane.f32.xlu1 %v65_v15 }
  0x11   :  { %87 = vadd.xlane.f32.xlu0 %v86_v19 }
  0x12   :  { %90 = vadd.xlane.f32.xlu1 %v89_v20 }
  0x15   :  { %69 = vadd.xlane.f32.xlu0 %v68_v24 }
  0x16   :  { %72 = vadd.xlane.f32.xlu1 %v71_v25 }
  0x19   :  { %93 = vadd.xlane.f32.xlu0 %v92_v29 }
  0x1a   :  { %96 = vadd.xlane.f32.xlu1 %v95_v30 }
  0x1d   :  { %75 = vadd.xlane.f32.xlu0 %v74_v34 }
  0x1e   :  { %78 = vadd.xlane.f32.xlu1 %v77_v35 }
  0x21   :  { %99 = vadd.xlane.f32.xlu0 %v98_v38 }
  0x22   :  { %102 = vadd.xlane.f32.xlu1 %v101_v39 }
  0x8e   :  { %v58_v40 = vpop.xlane.xlu0 %57 }
  0x8f   :  { %v82_v41 = vpop.xlane.xlu1 %81  ;;  %v105_v42 = vmul.f32 0.125, %v58_v40 }
  0x90   :  { %v113_v43 = vmul.f32 0.125, %v82_v41 }
  0x91   :  { %v922_v44 = vsub.f32 %v660_v2, %v105_v42 }
  0x92   :  { %v924_v45 = vsub.f32 %v676_v3, %v113_v43  ;;  %v61_v46 = vpop.xlane.xlu0 %60 }
  0x93   :  { %v85_v47 = vpop.xlane.xlu1 %84  ;;  %v106_v48 = vmul.f32 0.125, %v61_v46  ;;  %v137_v50 = vmul.f32 %v922_v44, %v922_v44 }
  0x94   :  { %v114_v49 = vmul.f32 0.125, %v85_v47  ;;  %v145_v51 = vmul.f32 %v924_v45, %v924_v45 }
  0x95   :  { %v932_v52 = vsub.f32 %v661_v4, %v106_v48  ;;  %v153_v54 = vsel %vm55_vm0, %v137_v50, 0.0 }
  0x96   :  { %v936_v53 = vsub.f32 %v677_v5, %v114_v49  ;;  %154 = vadd.xlane.f32.xlu0 %v153_v54  ;;  %v64_v55 = vpop.xlane.xlu0 %63  ;;  %v177_v57 = vsel %vm55_vm0, %v145_v51, 0.0 }
  0x97   :  { %v67_v56 = vpop.xlane.xlu1 %66  ;;  %v107_v58 = vmul.f32 0.125, %v64_v55  ;;  %v138_v60 = vmul.f32 %v932_v52, %v932_v52 }
  0x98   :  { %v108_v59 = vmul.f32 0.125, %v67_v56  ;;  %v146_v61 = vmul.f32 %v936_v53, %v936_v53 }
  0x99   :  { %v946_v62 = vsub.f32 %v664_v11, %v107_v58  ;;  %v156_v0 = vsel %vm55_vm0, %v138_v60, 0.0 }
  0x9a   :  { %v950_v63 = vsub.f32 %v665_v12, %v108_v59  ;;  %178 = vadd.xlane.f32.xlu0 %v177_v57  ;;  %157 = vadd.xlane.f32.xlu1 %v156_v0  ;;  %v88_v1 = vpop.xlane.xlu0 %87  ;;  %v180_v3 = vsel %vm55_vm0, %v146_v61, 0.0 }
  0x9b   :  { %v91_v2 = vpop.xlane.xlu1 %90  ;;  %v115_v4 = vmul.f32 0.125, %v88_v1  ;;  %v139_v7 = vmul.f32 %v946_v62, %v946_v62 }
  0x9c   :  { %v116_v5 = vmul.f32 0.125, %v91_v2  ;;  %v140_v8 = vmul.f32 %v950_v63, %v950_v63 }
  0x9d   :  { %v960_v6 = vsub.f32 %v680_v16, %v115_v4  ;;  %v159_v10 = vsel %vm55_vm0, %v139_v7, 0.0 }
  0x9e   :  { %v964_v9 = vsub.f32 %v681_v17, %v116_v5  ;;  %181 = vadd.xlane.f32.xlu1 %v180_v3  ;;  %160 = vadd.xlane.f32.xlu0 %v159_v10  ;;  %v70_v11 = vpop.xlane.xlu0 %69  ;;  %v162_v14 = vsel %vm55_vm0, %v140_v8, 0.0 }
  0x9f   :  { %v73_v12 = vpop.xlane.xlu1 %72  ;;  %v109_v15 = vmul.f32 0.125, %v70_v11  ;;  %v147_v20 = vmul.f32 %v960_v6, %v960_v6 }
  0xa0   :  { %v110_v19 = vmul.f32 0.125, %v73_v12  ;;  %v148_v16 = vmul.f32 %v964_v9, %v964_v9 }
  0xa1   :  { %v974_v13 = vsub.f32 %v668_v21, %v109_v15  ;;  %v183_v24 = vsel %vm55_vm0, %v147_v20, 0.0 }
  0xa2   :  { %v978_v17 = vsub.f32 %v669_v22, %v110_v19  ;;  %163 = vadd.xlane.f32.xlu1 %v162_v14  ;;  %184 = vadd.xlane.f32.xlu0 %v183_v24  ;;  %v94_v25 = vpop.xlane.xlu0 %93  ;;  %v186_v30 = vsel %vm55_vm0, %v148_v16, 0.0 }
  0xa3   :  { %v97_v29 = vpop.xlane.xlu1 %96  ;;  %v117_v34 = vmul.f32 0.125, %v94_v25  ;;  %v141_v38 = vmul.f32 %v974_v13, %v974_v13 }
  0xa4   :  { %v118_v35 = vmul.f32 0.125, %v97_v29  ;;  %v142_v21 = vmul.f32 %v978_v17, %v978_v17 }
  0xa5   :  { %v988_v18 = vsub.f32 %v684_v26, %v117_v34  ;;  %v165_v39 = vsel %vm55_vm0, %v141_v38, 0.0 }
  0xa6   :  { %v992_v22 = vsub.f32 %v685_v27, %v118_v35  ;;  %187 = vadd.xlane.f32.xlu1 %v186_v30  ;;  %166 = vadd.xlane.f32.xlu0 %v165_v39  ;;  %v76_v40 = vpop.xlane.xlu0 %75  ;;  %v168_v42 = vsel %vm55_vm0, %v142_v21, 0.0 }
  0xa7   :  { %v79_v41 = vpop.xlane.xlu1 %78  ;;  %v111_v43 = vmul.f32 0.125, %v76_v40  ;;  %v149_v47 = vmul.f32 %v988_v18, %v988_v18 }
  0xa8   :  { %v112_v46 = vmul.f32 0.125, %v79_v41  ;;  %v150_v26 = vmul.f32 %v992_v22, %v992_v22 }
  0xa9   :  { %v1002_v23 = vsub.f32 %v672_v31, %v111_v43  ;;  %v189_v48 = vsel %vm55_vm0, %v149_v47, 0.0  ;;  %v1036_v43 = vld [vmem:[%s1206_s1] ss:$0 sm:$0xff] }
  0xaa   :  { %v1006_v27 = vsub.f32 %v673_v32, %v112_v46  ;;  %169 = vadd.xlane.f32.xlu1 %v168_v42  ;;  %190 = vadd.xlane.f32.xlu0 %v189_v48  ;;  %v100_v49 = vpop.xlane.xlu0 %99  ;;  %v192_v51 = vsel %vm55_vm0, %v150_v26, 0.0 }
  0xab   :  { %v103_v50 = vpop.xlane.xlu1 %102  ;;  %v119_v54 = vmul.f32 0.125, %v100_v49  ;;  %v143_v56 = vmul.f32 %v1002_v23, %v1002_v23 }
  0xac   :  { %v120_v55 = vmul.f32 0.125, %v103_v50  ;;  %v144_v31 = vmul.f32 %v1006_v27, %v1006_v27 }
  0xad   :  { %v1016_v28 = vsub.f32 %v688_v36, %v119_v54  ;;  %v171_v57 = vsel %vm55_vm0, %v143_v56, 0.0  ;;  %v317_v36 = vld [vmem:[%s1205_s3] sm:$0xf] }
  0xae   :  { %v1020_v32 = vsub.f32 %v689_v37, %v120_v55  ;;  %193 = vadd.xlane.f32.xlu1 %v192_v51  ;;  %172 = vadd.xlane.f32.xlu0 %v171_v57  ;;  %v174_v58 = vsel %vm55_vm0, %v144_v31, 0.0  ;;  %v351_v37 = vsel %vm349_vm1, %v317_v36, 0  ;;  %v1043_v31 = vld [vmem:[%s1207_s2] ss:$0 sm:$0xff] }
  0xaf   :  { %v151_v59 = vmul.f32 %v1016_v28, %v1016_v28  ;;  %726 = vmatprep.subr.msk.bf16.mxu0 %vm349_vm1, %v317_v36  ;;  %727 = vmatprep.subr.msk.bf16.mxu1 %vm349_vm1, %v317_v36 }
  0xb0   :  { %v152_v60 = vmul.f32 %v1020_v32, %v1020_v32  ;;  %707 = vmatpush3.bf16.msra.mxu0 %v351_v37  ;;  %725 = vmatpush3.bf16.msra.mxu1 %v351_v37 }
  0xb1   :  { %v195_v61 = vsel %vm55_vm0, %v151_v59, 0.0 }
  0xb2   :  { %175 = vadd.xlane.f32.xlu1 %v174_v58  ;;  %196 = vadd.xlane.f32.xlu0 %v195_v61  ;;  %v198_v33 = vsel %vm55_vm0, %v152_v60, 0.0 }
  0xb6   :  { %199 = vadd.xlane.f32.xlu1 %v198_v33 }
 0x11f   :  { %v155_v0 = vpop.xlane.xlu0 %154 }
 0x120   :  { %v201_v1 = vmul.f32 0.125, %v155_v0 }
 0x122   :  { %v217_v2 = vadd.f32 1e-06, %v201_v1 }
 0x123   :  { %v158_v3 = vpop.xlane.xlu1 %157  ;;  %v179_v4 = vpop.xlane.xlu0 %178 }
 0x124   :  { %728 = vrsqrt.f32 %v217_v2  ;;  %v202_v5 = vmul.f32 0.125, %v158_v3  ;;  %v209_v7 = vmul.f32 0.125, %v179_v4 }
 0x126   :  { %v218_v8 = vadd.f32 1e-06, %v202_v5  ;;  %v225_v10 = vadd.f32 1e-06, %v209_v7 }
 0x127   :  { %v182_v11 = vpop.xlane.xlu1 %181  ;;  %v161_v12 = vpop.xlane.xlu0 %160 }
 0x128   :  { %730 = vrsqrt.f32 %v218_v8  ;;  %v210_v14 = vmul.f32 0.125, %v182_v11  ;;  %v203_v15 = vmul.f32 0.125, %v161_v12 }
 0x129   :  { %732 = vrsqrt.f32 %v225_v10 }
 0x12a   :  { %v226_v19 = vadd.f32 1e-06, %v210_v14  ;;  %v219_v20 = vadd.f32 1e-06, %v203_v15 }
 0x12b   :  { %v164_v16 = vpop.xlane.xlu1 %163  ;;  %v185_v24 = vpop.xlane.xlu0 %184 }
 0x12c   :  { %734 = vrsqrt.f32 %v226_v19  ;;  %v204_v25 = vmul.f32 0.125, %v164_v16  ;;  %v211_v29 = vmul.f32 0.125, %v185_v24 }
 0x12d   :  { %736 = vrsqrt.f32 %v219_v20 }
 0x12e   :  { %v220_v30 = vadd.f32 1e-06, %v204_v25  ;;  %v227_v34 = vadd.f32 1e-06, %v211_v29 }
 0x12f   :  { %v188_v35 = vpop.xlane.xlu1 %187  ;;  %v167_v38 = vpop.xlane.xlu0 %166 }
 0x130   :  { %738 = vrsqrt.f32 %v220_v30  ;;  %v212_v21 = vmul.f32 0.125, %v188_v35  ;;  %v205_v39 = vmul.f32 0.125, %v167_v38 }
 0x131   :  { %v729_v40 = vpop.eup %728  ;;  %740 = vrsqrt.f32 %v227_v34 }
 0x132   :  { %v228_v41 = vadd.f32 1e-06, %v212_v21  ;;  %v221_v42 = vadd.f32 1e-06, %v205_v39  ;;  %v249_v46 = vmul.f32 %v729_v40, %v922_v44 }
 0x133   :  { %v170_v47 = vpop.xlane.xlu1 %169  ;;  %v191_v26 = vpop.xlane.xlu0 %190 }
 0x134   :  { %742 = vrsqrt.f32 %v228_v41  ;;  %v206_v48 = vmul.f32 0.125, %v170_v47  ;;  %v213_v49 = vmul.f32 0.125, %v191_v26  ;;  %v271_v51 = vmul.f32 %v1036_v43, %v249_v46 }
 0x135   :  { %v731_v50 = vpop.eup %730  ;;  %744 = vrsqrt.f32 %v221_v42 }
 0x136   :  { %v733_v54 = vpop.eup %732  ;;  %v222_v55 = vadd.f32 1e-06, %v206_v48  ;;  %v229_v56 = vadd.f32 1e-06, %v213_v49  ;;  %v250_v57 = vmul.f32 %v731_v50, %v932_v52  ;;  %v293_v37 = vadd.f32 %v1043_v31, %v271_v51 }
 0x137   :  { %v194_v44 = vpop.xlane.xlu1 %193  ;;  %v173_v58 = vpop.xlane.xlu0 %172  ;;  %v257_v59 = vmul.f32 %v733_v54, %v924_v45 }
 0x138   :  { %746 = vrsqrt.f32 %v222_v55  ;;  %v214_v60 = vmul.f32 0.125, %v194_v44  ;;  %v207_v61 = vmul.f32 0.125, %v173_v58  ;;  %v272_v33 = vmul.f32 %v1036_v43, %v250_v57 }
 0x139   :  { %v735_v36 = vpop.eup %734  ;;  %748 = vrsqrt.f32 %v229_v56  ;;  %v279_v45 = vmul.f32 %v1036_v43, %v257_v59 }
 0x13a   :  { %v737_v0 = vpop.eup %736  ;;  %v230_v1 = vadd.f32 1e-06, %v214_v60  ;;  %v223_v2 = vadd.f32 1e-06, %v207_v61  ;;  %v294_v3 = vadd.f32 %v1043_v31, %v272_v33  ;;  %v258_v52 = vmul.f32 %v735_v36, %v936_v53 }
 0x13b   :  { %v176_v4 = vpop.xlane.xlu1 %175  ;;  %v197_v5 = vpop.xlane.xlu0 %196  ;;  %v251_v7 = vmul.f32 %v737_v0, %v946_v62  ;;  %v301_v62 = vadd.f32 %v1043_v31, %v279_v45 }
 0x13c   :  { %750 = vrsqrt.f32 %v230_v1  ;;  %v208_v8 = vmul.f32 0.125, %v176_v4  ;;  %v215_v10 = vmul.f32 0.125, %v197_v5  ;;  %v309_v11 = vpack.c.bf16 %v294_v3, %v293_v37 }
 0x13d   :  { %v739_v12 = vpop.eup %738  ;;  %752 = vrsqrt.f32 %v223_v2  ;;  %v280_v14 = vmul.f32 %v1036_v43, %v258_v52  ;;  %v273_v15 = vmul.f32 %v1036_v43, %v251_v7 }
 0x13e   :  { %v741_v19 = vpop.eup %740  ;;  %v224_v20 = vadd.f32 1e-06, %v208_v8  ;;  %v231_v16 = vadd.f32 1e-06, %v215_v10  ;;  %708 = vmatprep.mubr.msk.bf16.mxu0 %vm55_vm0, %v309_v11  ;;  %v252_v53 = vmul.f32 %v739_v12, %v950_v63  ;;  %v1102_v12 = vld [vmem:[%s1208_s4] ss:$0 sm:$0xff] }
 0x13f   :  { %v200_v24 = vpop.xlane.xlu1 %199  ;;  %v302_v25 = vadd.f32 %v1043_v31, %v280_v14  ;;  %v259_v29 = vmul.f32 %v741_v19, %v960_v6  ;;  %v295_v21 = vadd.f32 %v1043_v31, %v273_v15 }
 0x140   :  { %754 = vrsqrt.f32 %v224_v20  ;;  %v216_v30 = vmul.f32 0.125, %v200_v24  ;;  %v274_v34 = vmul.f32 %v1036_v43, %v252_v53 }
 0x141   :  { %v743_v35 = vpop.eup %742  ;;  %756 = vrsqrt.f32 %v231_v16  ;;  %v313_v38 = vpack.c.bf16 %v302_v25, %v301_v62  ;;  %v281_v42 = vmul.f32 %v1036_v43, %v259_v29 }
 0x142   :  { %v745_v39 = vpop.eup %744  ;;  %v232_v40 = vadd.f32 1e-06, %v216_v30  ;;  %v296_v63 = vadd.f32 %v1043_v31, %v274_v34  ;;  %v260_v41 = vmul.f32 %v743_v35, %v964_v9 }
 0x143   :  { %716 = vmatprep.mubr.msk.bf16.mxu1 %vm55_vm0, %v313_v38  ;;  %v253_v6 = vmul.f32 %v745_v39, %v974_v13  ;;  %v303_v49 = vadd.f32 %v1043_v31, %v281_v42 }
 0x144   :  { %758 = vrsqrt.f32 %v232_v40  ;;  %v310_v46 = vpack.c.bf16 %v296_v63, %v295_v21  ;;  %v282_v47 = vmul.f32 %v1036_v43, %v260_v41 }
 0x145   :  { %v747_v26 = vpop.eup %746  ;;  %v275_v51 = vmul.f32 %v1036_v43, %v253_v6 }
 0x146   :  { %v749_v48 = vpop.eup %748  ;;  %709 = vmatmul.mubr.msk.bf16.vlgmr.msra.gmra.mxu0 %vm55_vm0, %v310_v46  ;;  %v304_v50 = vadd.f32 %v1043_v31, %v282_v47  ;;  %v254_v9 = vmul.f32 %v747_v26, %v978_v17 }
 0x147   :  { %v261_v54 = vmul.f32 %v749_v48, %v988_v18  ;;  %v297_v44 = vadd.f32 %v1043_v31, %v275_v51 }
 0x148   :  { %v314_v55 = vpack.c.bf16 %v304_v50, %v303_v49  ;;  %v276_v13 = vmul.f32 %v1036_v43, %v254_v9 }
 0x149   :  { %v751_v56 = vpop.eup %750  ;;  %v283_v60 = vmul.f32 %v1036_v43, %v261_v54 }
 0x14a   :  { %v753_v57 = vpop.eup %752  ;;  %717 = vmatmul.mubr.msk.bf16.vlgmr.msra.gmra.mxu1 %vm55_vm0, %v314_v55  ;;  %v298_v58 = vadd.f32 %v1043_v31, %v276_v13  ;;  %v262_v59 = vmul.f32 %v751_v56, %v992_v22 }
 0x14b   :  { %v255_v17 = vmul.f32 %v753_v57, %v1002_v23  ;;  %v305_v37 = vadd.f32 %v1043_v31, %v283_v60 }
 0x14c   :  { %v311_v61 = vpack.c.bf16 %v298_v58, %v297_v44  ;;  %v284_v18 = vmul.f32 %v1036_v43, %v262_v59 }
 0x14d   :  { %v755_v33 = vpop.eup %754  ;;  %v277_v2 = vmul.f32 %v1036_v43, %v255_v17 }
 0x14e   :  { %v757_v36 = vpop.eup %756  ;;  %712 = vmatprep.mubr.msk.bf16.mxu0 %vm55_vm0, %v311_v61  ;;  %v306_v0 = vadd.f32 %v1043_v31, %v284_v18  ;;  %v256_v1 = vmul.f32 %v755_v33, %v1006_v27 }
 0x14f   :  { %v263_v22 = vmul.f32 %v757_v36, %v1016_v28  ;;  %v299_v4 = vadd.f32 %v1043_v31, %v277_v2 }
 0x150   :  { %v315_v3 = vpack.c.bf16 %v306_v0, %v305_v37  ;;  %v278_v23 = vmul.f32 %v1036_v43, %v256_v1 }
 0x151   :  { %v759_v52 = vpop.eup %758  ;;  %v285_v7 = vmul.f32 %v1036_v43, %v263_v22 }
 0x152   :  { %720 = vmatprep.mubr.msk.bf16.mxu1 %vm55_vm0, %v315_v3  ;;  %v300_v5 = vadd.f32 %v1043_v31, %v278_v23  ;;  %v264_v45 = vmul.f32 %v759_v52, %v1020_v32 }
 0x153   :  { %v307_v28 = vadd.f32 %v1043_v31, %v285_v7 }
 0x154   :  { %v312_v8 = vpack.c.bf16 %v300_v5, %v299_v4  ;;  %v286_v27 = vmul.f32 %v1036_v43, %v264_v45 }
 0x156   :  { %713 = vmatmul.mubr.msk.bf16.gmra.mxu0 %vm55_vm0, %v312_v8  ;;  %v308_v10 = vadd.f32 %v1043_v31, %v286_v27 }
 0x158   :  { %v316_v11 = vpack.c.bf16 %v308_v10, %v307_v28 }
 0x15a   :  { %721 = vmatmul.mubr.msk.bf16.gmra.mxu1 %vm55_vm0, %v316_v11 }
 0x206   :  { %v710_v32 = vpop.f32.mrf.mxu0 }
 0x207   :  { %v396_v14 = vadd.f32 %v710_v32, %v1102_v12 }
 0x208   :  { %v387_v15 = vpop.f32.mrf.mxu0 }
 0x209   :  { %v468_v19 = vmul.f32 0.70710677, %v396_v14  ;;  %v388_v43 = vadd.f32 %v1102_v12, %v387_v15  ;;  %v452_v49 = vmul.f32 0.5, %v396_v14 }
 0x20a   :  { %v711_v20 = vpop.f32.mrf.mxu0  ;;  %v718_v16 = vpop.f32.mrf.mxu1 }
 0x20b   :  { %760 = verf.f32 %v468_v19  ;;  %v466_v53 = vmul.f32 0.70710677, %v388_v43  ;;  %v399_v31 = vadd.f32 %v711_v20, %v1102_v12  ;;  %v428_v24 = vadd.f32 %v718_v16, %v1102_v12 }
 0x20c   :  { %v390_v62 = vpop.f32.mrf.mxu0  ;;  %v419_v25 = vpop.f32.mrf.mxu1  ;;  %v450_v55 = vmul.f32 0.5, %v388_v43 }
 0x20d   :  { %762 = verf.f32 %v466_v53  ;;  %v469_v29 = vmul.f32 0.70710677, %v399_v31  ;;  %v391_v30 = vadd.f32 %v1102_v12, %v390_v62  ;;  %v476_v34 = vmul.f32 0.70710677, %v428_v24 }
 0x20e   :  { %v420_v35 = vadd.f32 %v1102_v12, %v419_v25  ;;  %v719_v38 = vpop.f32.mrf.mxu1  ;;  %v453_v13 = vmul.f32 0.5, %v399_v31  ;;  %v460_v59 = vmul.f32 0.5, %v428_v24 }
 0x20f   :  { %764 = verf.f32 %v469_v29  ;;  %v467_v21 = vmul.f32 0.70710677, %v391_v30  ;;  %v431_v39 = vadd.f32 %v719_v38, %v1102_v12  ;;  %v451_v17 = vmul.f32 0.5, %v391_v30 }
 0x210   :  { %766 = verf.f32 %v476_v34  ;;  %v474_v40 = vmul.f32 0.70710677, %v420_v35  ;;  %v422_v63 = vpop.f32.mrf.mxu1  ;;  %v458_v3 = vmul.f32 0.5, %v420_v35 }
 0x211   :  { %768 = verf.f32 %v467_v21  ;;  %v477_v41 = vmul.f32 0.70710677, %v431_v39  ;;  %v423_v42 = vadd.f32 %v1102_v12, %v422_v63  ;;  %v461_v10 = vmul.f32 0.5, %v431_v39 }
 0x212   :  { %770 = verf.f32 %v474_v40 }
 0x213   :  { %772 = verf.f32 %v477_v41  ;;  %v475_v6 = vmul.f32 0.70710677, %v423_v42  ;;  %v459_v16 = vmul.f32 0.5, %v423_v42 }
 0x215   :  { %774 = verf.f32 %v475_v6 }
 0x216   :  { %v714_v46 = vpop.f32.mrf.mxu0 }
 0x217   :  { %v1113_v47 = vadd.f32 %v714_v46, %v1102_v12 }
 0x218   :  { %v761_v26 = vpop.eup %760  ;;  %v403_v48 = vpop.f32.mrf.mxu0 }
 0x219   :  { %v500_v50 = vadd.f32 1.0, %v761_v26  ;;  %v472_v9 = vmul.f32 0.70710677, %v1113_v47  ;;  %v1117_v51 = vadd.f32 %v1102_v12, %v403_v48  ;;  %v456_v26 = vmul.f32 0.5, %v1113_v47 }
 0x21a   :  { %v763_v54 = vpop.eup %762  ;;  %v715_v56 = vpop.f32.mrf.mxu0 }
 0x21b   :  { %v722_v57 = vpop.f32.mrf.mxu1  ;;  %v516_v44 = vmul.f32 %v500_v50, %v452_v49  ;;  %v498_v58 = vadd.f32 1.0, %v763_v54  ;;  %776 = verf.f32 %v472_v9  ;;  %v470_v61 = vmul.f32 0.70710677, %v1117_v51 }
 0x21c   :  { %v765_v60 = vpop.eup %764  ;;  %v1121_v18 = vadd.f32 %v715_v56, %v1102_v12  ;;  %v1124_v33 = vadd.f32 %v722_v57, %v1102_v12  ;;  %v406_v36 = vpop.f32.mrf.mxu0  ;;  %v454_v9 = vmul.f32 0.5, %v1117_v51 }
 0x21d   :  { %v435_v37 = vpop.f32.mrf.mxu1  ;;  %v767_v0 = vpop.eup %766  ;;  %v644_v1 = vpack.c.bf16 %v516_v44, %v516_v44  ;;  %v514_v2 = vmul.f32 %v498_v58, %v450_v55  ;;  %v501_v22 = vadd.f32 1.0, %v765_v60  ;;  %778 = verf.f32 %v470_v61 }
 0x21e   :  { %v769_v23 = vpop.eup %768  ;;  %v508_v52 = vadd.f32 1.0, %v767_v0  ;;  %v473_v4 = vmul.f32 0.70710677, %v1121_v18  ;;  %v1128_v5 = vadd.f32 %v1102_v12, %v406_v36  ;;  %v480_v15 = vmul.f32 0.70710677, %v1124_v33 }
 0x21f   :  { %v723_v45 = vpop.f32.mrf.mxu1  ;;  %v771_v7 = vpop.eup %770  ;;  %597 = vst.msk [vmem:[%s1209_s5 + $0x8] sm:$0xf] %vm594_vm2, %v644_v1  ;;  %v642_v8 = vpack.c.bf16 %v514_v2, %v514_v2  ;;  %v517_v27 = vmul.f32 %v501_v22, %v453_v13  ;;  %v499_v28 = vadd.f32 1.0, %v769_v23  ;;  %v436_v35 = vadd.f32 %v1102_v12, %v435_v37 }
 0x220   :  { %v773_v11 = vpop.eup %772  ;;  %v524_v32 = vmul.f32 %v508_v52, %v460_v59  ;;  %v506_v14 = vadd.f32 1.0, %v771_v7  ;;  %780 = verf.f32 %v473_v4  ;;  %v471_v25 = vmul.f32 0.70710677, %v1128_v5 }
 0x221   :  { %595 = vst.msk [vmem:[%s1209_s5] sm:$0xf] %vm594_vm2, %v642_v8  ;;  %v645_v19 = vpack.c.bf16 %v517_v27, %v517_v27  ;;  %v515_v43 = vmul.f32 %v499_v28, %v451_v17  ;;  %v509_v20 = vadd.f32 1.0, %v773_v11  ;;  %v438_v53 = vpop.f32.mrf.mxu1  ;;  %782 = verf.f32 %v480_v15 }
 0x222   :  { %v775_v31 = vpop.eup %774  ;;  %v652_v24 = vpack.c.bf16 %v524_v32, %v524_v32  ;;  %v522_v62 = vmul.f32 %v506_v14, %v458_v3  ;;  %784 = verf.f32 %v471_v25  ;;  %v447_v21 = vadd.f32 %v723_v45, %v1102_v12 }
 0x223   :  { %598 = vst.msk [vmem:[%s1209_s5 + $0xc] sm:$0xf] %vm594_vm2, %v645_v19  ;;  %v643_v29 = vpack.c.bf16 %v515_v43, %v515_v43  ;;  %v525_v30 = vmul.f32 %v509_v20, %v461_v10  ;;  %v507_v34 = vadd.f32 1.0, %v775_v31  ;;  %v439_v39 = vadd.f32 %v1102_v12, %v438_v53 }
 0x224   :  { %605 = vst.msk [vmem:[%s1209_s5 + $0x28] sm:$0xf] %vm594_vm2, %v652_v24  ;;  %v650_v38 = vpack.c.bf16 %v522_v62, %v522_v62  ;;  %v478_v41 = vmul.f32 0.70710677, %v436_v35  ;;  %v481_v42 = vmul.f32 0.70710677, %v447_v21 }
 0x225   :  { %596 = vst.msk [vmem:[%s1209_s5 + $0x4] sm:$0xf] %vm594_vm2, %v643_v29  ;;  %v653_v40 = vpack.c.bf16 %v525_v30, %v525_v30  ;;  %v523_v63 = vmul.f32 %v507_v34, %v459_v16  ;;  %v479_v6 = vmul.f32 0.70710677, %v439_v39  ;;  %v457_v57 = vmul.f32 0.5, %v1121_v18 }
 0x226   :  { %603 = vst.msk [vmem:[%s1209_s5 + $0x20] sm:$0xf] %vm594_vm2, %v650_v38  ;;  %786 = verf.f32 %v478_v41  ;;  %v464_v60 = vmul.f32 0.5, %v1124_v33  ;;  %v455_v36 = vmul.f32 0.5, %v1128_v5  ;;  %v462_v22 = vmul.f32 0.5, %v436_v35 }
 0x227   :  { %606 = vst.msk [vmem:[%s1209_s5 + $0x2c] sm:$0xf] %vm594_vm2, %v653_v40  ;;  %v651_v12 = vpack.c.bf16 %v523_v63, %v523_v63  ;;  %788 = verf.f32 %v481_v42  ;;  %v465_v4 = vmul.f32 0.5, %v447_v21  ;;  %v463_v7 = vmul.f32 0.5, %v439_v39 }
 0x228   :  { %v777_v46 = vpop.eup %776  ;;  %790 = verf.f32 %v479_v6 }
 0x229   :  { %604 = vst.msk [vmem:[%s1209_s5 + $0x24] sm:$0xf] %vm594_vm2, %v651_v12  ;;  %v504_v48 = vadd.f32 1.0, %v777_v46 }
 0x22a   :  { %v779_v49 = vpop.eup %778 }
 0x22b   :  { %v520_v50 = vmul.f32 %v504_v48, %v456_v26  ;;  %v502_v54 = vadd.f32 1.0, %v779_v49 }
 0x22d   :  { %v781_v55 = vpop.eup %780  ;;  %v648_v13 = vpack.c.bf16 %v520_v50, %v520_v50  ;;  %v518_v56 = vmul.f32 %v502_v54, %v454_v9 }
 0x22e   :  { %v505_v44 = vadd.f32 1.0, %v781_v55  ;;  %v783_v58 = vpop.eup %782 }
 0x22f   :  { %601 = vst.msk [vmem:[%s1209_s5 + $0x18] sm:$0xf] %vm594_vm2, %v648_v13  ;;  %v646_v47 = vpack.c.bf16 %v518_v56, %v518_v56  ;;  %v512_v17 = vadd.f32 1.0, %v783_v58  ;;  %v785_v61 = vpop.eup %784 }
 0x230   :  { %v521_v59 = vmul.f32 %v505_v44, %v457_v57  ;;  %v503_v37 = vadd.f32 1.0, %v785_v61 }
 0x231   :  { %599 = vst.msk [vmem:[%s1209_s5 + $0x10] sm:$0xf] %vm594_vm2, %v646_v47  ;;  %v528_v18 = vmul.f32 %v512_v17, %v464_v60 }
 0x232   :  { %v649_v51 = vpack.c.bf16 %v521_v59, %v521_v59  ;;  %v519_v33 = vmul.f32 %v503_v37, %v455_v36 }
 0x233   :  { %v787_v0 = vpop.eup %786  ;;  %v656_v1 = vpack.c.bf16 %v528_v18, %v528_v18 }
 0x234   :  { %602 = vst.msk [vmem:[%s1209_s5 + $0x1c] sm:$0xf] %vm594_vm2, %v649_v51  ;;  %v789_v2 = vpop.eup %788  ;;  %v510_v3 = vadd.f32 1.0, %v787_v0  ;;  %v647_v52 = vpack.c.bf16 %v519_v33, %v519_v33 }
 0x235   :  { %v791_v23 = vpop.eup %790  ;;  %609 = vst.msk [vmem:[%s1209_s5 + $0x38] sm:$0xf] %vm594_vm2, %v656_v1  ;;  %v513_v5 = vadd.f32 1.0, %v789_v2 }
 0x236   :  { %v526_v45 = vmul.f32 %v510_v3, %v462_v22  ;;  %v511_v8 = vadd.f32 1.0, %v791_v23  ;;  %600 = vst.msk [vmem:[%s1209_s5 + $0x14] sm:$0xf] %vm594_vm2, %v647_v52 }
 0x237   :  { %v529_v27 = vmul.f32 %v513_v5, %v465_v4 }
 0x238   :  { %v654_v28 = vpack.c.bf16 %v526_v45, %v526_v45  ;;  %v527_v10 = vmul.f32 %v511_v8, %v463_v7 }
 0x239   :  { %v657_v11 = vpack.c.bf16 %v529_v27, %v529_v27 }
 0x23a   :  { %607 = vst.msk [vmem:[%s1209_s5 + $0x30] sm:$0xf] %vm594_vm2, %v654_v28  ;;  %v655_v32 = vpack.c.bf16 %v527_v10, %v527_v10 }
 0x23b   :  { %610 = vst.msk [vmem:[%s1209_s5 + $0x3c] sm:$0xf] %vm594_vm2, %v657_v11 }
 0x23c   :  { %608 = vst.msk [vmem:[%s1209_s5 + $0x34] sm:$0xf] %vm594_vm2, %v655_v32 }

// kernel: poolformer_forward.17
= control target key start
LH: loop header
LB: loop body
LE: loop exit
PB: predicated region body
PF: predicated region fallthrough
CT: control target
= control target key end

     0   :  { %v815_v0 = vmov 0   ;;  %vm192_vm0 = vcmask 195584   ;;  %vm217_vm1 = vcmask 1043456   ;;  %vm320_vm2 = vcmask 64512   ;;  %s1235_s1 = inlined_call_operand.vmem [shape: bf16[152,8], index: 1, kind: input, shape index: {}]   ;;  %s1236_s0 = inlined_call_operand.vmem [shape: bf16[128,152], index: 0, kind: input, shape index: {}]   ;;  %s1237_s2 = inlined_call_operand.vmem [shape: f32[1,8], index: 2, kind: input, shape index: {}]   ;;  %s1238_s3 = inlined_call_operand.vmem [shape: f32[1,8], index: 3, kind: input, shape index: {}]   ;;  %s1239_s4 = inlined_call_operand.vmem [shape: f32[1,8], index: 4, kind: input, shape index: {}]   ;;  %s1240_s5 = inlined_call_operand.vmem [shape: bf16[128,8], index: 5, kind: output, shape index: {}]  }
   0x1   :  { %221 = vmatprep.subr.bf16.mxu0 %v815_v0  ;;  %728 = vmatprep.subr.bf16.mxu1 %v815_v0  ;;  %v749_v1 = vld [vmem:[%s1235_s1 + $0x38] sm:$0xff]   ;;  %v750_v2 = vld [vmem:[%s1235_s1 + $0x30] sm:$0xff]   ;;  %v751_v3 = vld [vmem:[%s1235_s1 + $0x28] sm:$0xff]   ;;  %vm638_vm3 = vcmask 60416  }
   0x2   :  { %222 = vmatpush1.bf16.msra.mxu0 %v749_v1  ;;  %738 = vmatpush1.bf16.msra.mxu1 %v749_v1  ;;  %v752_v4 = vld [vmem:[%s1235_s1 + $0x20] sm:$0xff]   ;;  %v753_v7 = vld [vmem:[%s1235_s1 + $0x18] sm:$0xff]   ;;  %v754_v8 = vld [vmem:[%s1235_s1 + $0x10] sm:$0xff]  }
   0x3   :  { %223 = vmatprep.subr.bf16.mxu0 %v815_v0  ;;  %729 = vmatprep.subr.bf16.mxu1 %v815_v0  ;;  %v761_v5 = vld [vmem:[%s1236_s0 + $0x4] ss:$8 sps:$4 sm:$0xff]   ;;  %v757_v11 = vld [vmem:[%s1235_s1 + $0x48] ss:$0 sps:$4 sm:$0xff]   ;;  %v765_v16 = vld [vmem:[%s1236_s0 + $0x14] ss:$8 sps:$4 sm:$0xff]  }
   0x4   :  { %686 = vmatprep.mubr.msk.bf16.mxu0 %vm192_vm0, %v761_v5  ;;  %v764_v6 = vld [vmem:[%s1236_s0 + $0x44] ss:$8 sps:$4 sm:$0xff]   ;;  %v219_v12 = vsel %vm217_vm1, %v757_v11, 0  ;;  %v759_v14 = vld [vmem:[%s1236_s0] ss:$8 sps:$4 sm:$0xff]  }
   0x5   :  { %690 = vmatprep.mubr.msk.bf16.mxu1 %vm192_vm0, %v764_v6  ;;  %v755_v9 = vld [vmem:[%s1235_s1 + $0x8] sm:$0xff]   ;;  %v756_v10 = vld [vmem:[%s1235_s1] sm:$0xff]   ;;  %v768_v17 = vld [vmem:[%s1236_s0 + $0x54] ss:$8 sps:$4 sm:$0xff]  }
   0x6   :  { %224 = vmatpush1.bf16.msra.mxu0 %v750_v2  ;;  %739 = vmatpush1.bf16.msra.mxu1 %v750_v2  ;;  %v758_v13 = vld [vmem:[%s1235_s1 + $0x40] sm:$0xff]   ;;  %v767_v18 = vld [vmem:[%s1236_s0 + $0x10] ss:$8 sps:$4 sm:$0xff]   ;;  %v777_v24 = vld [vmem:[%s1236_s0 + $0x34] ss:$8 sps:$4 sm:$0xff]  }
   0x7   :  { %225 = vmatprep.subr.bf16.mxu0 %v815_v0  ;;  %730 = vmatprep.subr.bf16.mxu1 %v815_v0  ;;  %v762_v15 = vld [vmem:[%s1236_s0 + $0x40] ss:$8 sps:$4 sm:$0xff]   ;;  %v770_v19 = vld [vmem:[%s1236_s0 + $0x50] ss:$8 sps:$4 sm:$0xff]   ;;  %v771_v20 = vld [vmem:[%s1236_s0 + $0x24] ss:$8 sps:$4 sm:$0xff]  }
   0x8   :  { %v774_v21 = vld [vmem:[%s1236_s0 + $0x64] ss:$8 sps:$4 sm:$0xff]   ;;  %v773_v22 = vld [vmem:[%s1236_s0 + $0x20] ss:$8 sps:$4 sm:$0xff]   ;;  %v780_v25 = vld [vmem:[%s1236_s0 + $0x74] ss:$8 sps:$4 sm:$0xff]  }
   0x9   :  { %v776_v23 = vld [vmem:[%s1236_s0 + $0x60] ss:$8 sps:$4 sm:$0xff]   ;;  %v779_v26 = vld [vmem:[%s1236_s0 + $0x30] ss:$8 sps:$4 sm:$0xff]  }
   0xa   :  { %226 = vmatpush1.bf16.msra.mxu0 %v751_v3  ;;  %740 = vmatpush1.bf16.msra.mxu1 %v751_v3  ;;  %v782_v27 = vld [vmem:[%s1236_s0 + $0x70] ss:$8 sps:$4 sm:$0xff]   ;;  %v935_v28 = vld [vmem:[%s1237_s2] ss:$0 sm:$0xff] }
   0xb   :  { %227 = vmatprep.subr.bf16.mxu0 %v815_v0  ;;  %731 = vmatprep.subr.bf16.mxu1 %v815_v0 }
   0xe   :  { %228 = vmatpush1.bf16.msra.mxu0 %v752_v4  ;;  %741 = vmatpush1.bf16.msra.mxu1 %v752_v4 }
   0xf   :  { %229 = vmatprep.subr.bf16.mxu0 %v815_v0  ;;  %732 = vmatprep.subr.bf16.mxu1 %v815_v0 }
  0x12   :  { %230 = vmatpush1.bf16.msra.mxu0 %v753_v7  ;;  %742 = vmatpush1.bf16.msra.mxu1 %v753_v7 }
  0x13   :  { %231 = vmatprep.subr.bf16.mxu0 %v815_v0  ;;  %733 = vmatprep.subr.bf16.mxu1 %v815_v0 }
  0x16   :  { %232 = vmatpush1.bf16.msra.mxu0 %v754_v8  ;;  %743 = vmatpush1.bf16.msra.mxu1 %v754_v8 }
  0x17   :  { %233 = vmatprep.subr.bf16.mxu0 %v815_v0  ;;  %734 = vmatprep.subr.bf16.mxu1 %v815_v0 }
  0x1a   :  { %234 = vmatpush1.bf16.msra.mxu0 %v755_v9  ;;  %744 = vmatpush1.bf16.msra.mxu1 %v755_v9 }
  0x1b   :  { %235 = vmatprep.subr.bf16.mxu0 %v815_v0  ;;  %735 = vmatprep.subr.bf16.mxu1 %v815_v0 }
  0x1e   :  { %236 = vmatpush1.bf16.msra.mxu0 %v756_v10  ;;  %745 = vmatpush1.bf16.msra.mxu1 %v756_v10 }
  0x1f   :  { %249 = vmatprep.subr.bf16.mxu0 %v815_v0  ;;  %736 = vmatprep.subr.bf16.mxu1 %v815_v0 }
  0x22   :  { %250 = vmatpush2.bf16.msra.mxu0 %v219_v12  ;;  %746 = vmatpush2.bf16.msra.mxu1 %v219_v12 }
  0x23   :  { %251 = vmatprep.subr.bf16.mxu0 %v815_v0  ;;  %737 = vmatprep.subr.bf16.mxu1 %v815_v0 }
  0x26   :  { %252 = vmatpush2.bf16.msra.mxu0 %v758_v13  ;;  %747 = vmatpush2.bf16.msra.mxu1 %v758_v13 }
  0x29   :  { %254 = vmatmul.mubr.bf16.vlgmr.msra.gmra.mxu0 %v759_v14  ;;  %286 = vmatmul.mubr.bf16.vlgmr.msra.gmra.mxu1 %v762_v15 }
  0x2a   :  { %687 = vmatprep.mubr.msk.bf16.mxu0 %vm192_vm0, %v765_v16  ;;  %691 = vmatprep.mubr.msk.bf16.mxu1 %vm192_vm0, %v768_v17 }
  0x31   :  { %262 = vmatmul.mubr.bf16.gmra.mxu0 %v767_v18  ;;  %294 = vmatmul.mubr.bf16.gmra.mxu1 %v770_v19 }
  0x32   :  { %688 = vmatprep.mubr.msk.bf16.mxu0 %vm192_vm0, %v771_v20  ;;  %692 = vmatprep.mubr.msk.bf16.mxu1 %vm192_vm0, %v774_v21 }
  0x39   :  { %270 = vmatmul.mubr.bf16.gmra.mxu0 %v773_v22  ;;  %302 = vmatmul.mubr.bf16.gmra.mxu1 %v776_v23 }
  0x3a   :  { %689 = vmatprep.mubr.msk.bf16.mxu0 %vm192_vm0, %v777_v24  ;;  %693 = vmatprep.mubr.msk.bf16.mxu1 %vm192_vm0, %v780_v25 }
  0x41   :  { %278 = vmatmul.mubr.bf16.gmra.mxu0 %v779_v26  ;;  %310 = vmatmul.mubr.bf16.gmra.mxu1 %v782_v27 }
  0xe9   :  { %v255_v29 = vpop.f32.mrf.mxu0  ;;  %v287_v30 = vpop.f32.mrf.mxu1 }
  0xea   :  { %v938_v31 = vadd.f32 %v935_v28, %v255_v29  ;;  %v941_v32 = vadd.f32 %v935_v28, %v287_v30 }
  0xeb   :  { %v257_v33 = vpop.f32.mrf.mxu0  ;;  %v289_v34 = vpop.f32.mrf.mxu1 }
  0xec   :  { %v321_v35 = vsel %vm320_vm2, %v938_v31, 0.0  ;;  %v345_v39 = vsel %vm320_vm2, %v941_v32, 0.0 }
  0xed   :  { %v258_v36 = vpop.f32.mrf.mxu0  ;;  %v290_v37 = vpop.f32.mrf.mxu1  ;;  %322 = vadd.xlane.f32.xlu0 %v321_v35 }
  0xee   :  { %v946_v38 = vadd.f32 %v935_v28, %v290_v37  ;;  %v951_v42 = vadd.f32 %v935_v28, %v258_v36 }
  0xef   :  { %v260_v40 = vpop.f32.mrf.mxu0  ;;  %v292_v41 = vpop.f32.mrf.mxu1 }
  0xf0   :  { %v348_v43 = vsel %vm320_vm2, %v946_v38, 0.0  ;;  %v324_v51 = vsel %vm320_vm2, %v951_v42, 0.0 }
  0xf1   :  { %349 = vadd.xlane.f32.xlu1 %v348_v43  ;;  %v263_v44 = vpop.f32.mrf.mxu0  ;;  %346 = vadd.xlane.f32.xlu0 %v345_v39  ;;  %v295_v45 = vpop.f32.mrf.mxu1 }
  0xf2   :  { %v956_v46 = vadd.f32 %v935_v28, %v263_v44  ;;  %v959_v47 = vadd.f32 %v935_v28, %v295_v45 }
  0xf3   :  { %v265_v48 = vpop.f32.mrf.mxu0  ;;  %v297_v49 = vpop.f32.mrf.mxu1 }
  0xf4   :  { %v327_v50 = vsel %vm320_vm2, %v956_v46, 0.0  ;;  %v351_v56 = vsel %vm320_vm2, %v959_v47, 0.0 }
  0xf5   :  { %v266_v52 = vpop.f32.mrf.mxu0  ;;  %328 = vadd.xlane.f32.xlu1 %v327_v50  ;;  %325 = vadd.xlane.f32.xlu0 %v324_v51  ;;  %v298_v53 = vpop.f32.mrf.mxu1 }
  0xf6   :  { %v966_v54 = vadd.f32 %v935_v28, %v266_v52  ;;  %v969_v55 = vadd.f32 %v935_v28, %v298_v53 }
  0xf7   :  { %v268_v57 = vpop.f32.mrf.mxu0  ;;  %v300_v58 = vpop.f32.mrf.mxu1 }
  0xf8   :  { %v330_v59 = vsel %vm320_vm2, %v966_v54, 0.0  ;;  %v354_v0 = vsel %vm320_vm2, %v969_v55, 0.0 }
  0xf9   :  { %v271_v60 = vpop.f32.mrf.mxu0  ;;  %331 = vadd.xlane.f32.xlu1 %v330_v59  ;;  %352 = vadd.xlane.f32.xlu0 %v351_v56  ;;  %v303_v61 = vpop.f32.mrf.mxu1 }
  0xfa   :  { %v976_v62 = vadd.f32 %v935_v28, %v271_v60  ;;  %v979_v63 = vadd.f32 %v935_v28, %v303_v61 }
  0xfb   :  { %v273_v1 = vpop.f32.mrf.mxu0  ;;  %v305_v2 = vpop.f32.mrf.mxu1 }
  0xfc   :  { %v333_v3 = vsel %vm320_vm2, %v976_v62, 0.0  ;;  %v357_v8 = vsel %vm320_vm2, %v979_v63, 0.0 }
  0xfd   :  { %v274_v4 = vpop.f32.mrf.mxu0  ;;  %355 = vadd.xlane.f32.xlu1 %v354_v0  ;;  %334 = vadd.xlane.f32.xlu0 %v333_v3  ;;  %v306_v5 = vpop.f32.mrf.mxu1 }
  0xfe   :  { %v986_v6 = vadd.f32 %v935_v28, %v274_v4  ;;  %v989_v7 = vadd.f32 %v935_v28, %v306_v5 }
  0xff   :  { %v276_v9 = vpop.f32.mrf.mxu0  ;;  %v308_v10 = vpop.f32.mrf.mxu1 }
 0x100   :  { %v336_v11 = vsel %vm320_vm2, %v986_v6, 0.0  ;;  %v360_v16 = vsel %vm320_vm2, %v989_v7, 0.0 }
 0x101   :  { %v279_v12 = vpop.f32.mrf.mxu0  ;;  %337 = vadd.xlane.f32.xlu1 %v336_v11  ;;  %358 = vadd.xlane.f32.xlu0 %v357_v8  ;;  %v311_v13 = vpop.f32.mrf.mxu1 }
 0x102   :  { %v996_v14 = vadd.f32 %v935_v28, %v279_v12  ;;  %v999_v15 = vadd.f32 %v935_v28, %v311_v13 }
 0x103   :  { %v281_v17 = vpop.f32.mrf.mxu0  ;;  %v313_v18 = vpop.f32.mrf.mxu1 }
 0x104   :  { %v339_v19 = vsel %vm320_vm2, %v996_v14, 0.0  ;;  %v363_v24 = vsel %vm320_vm2, %v999_v15, 0.0 }
 0x105   :  { %v282_v20 = vpop.f32.mrf.mxu0  ;;  %361 = vadd.xlane.f32.xlu1 %v360_v16  ;;  %340 = vadd.xlane.f32.xlu0 %v339_v19  ;;  %v314_v21 = vpop.f32.mrf.mxu1 }
 0x106   :  { %v1006_v22 = vadd.f32 %v935_v28, %v282_v20  ;;  %v1009_v23 = vadd.f32 %v935_v28, %v314_v21 }
 0x107   :  { %v284_v25 = vpop.f32.mrf.mxu0  ;;  %v316_v26 = vpop.f32.mrf.mxu1 }
 0x108   :  { %v342_v27 = vsel %vm320_vm2, %v1006_v22, 0.0  ;;  %v366_v29 = vsel %vm320_vm2, %v1009_v23, 0.0 }
 0x109   :  { %343 = vadd.xlane.f32.xlu1 %v342_v27  ;;  %364 = vadd.xlane.f32.xlu0 %v363_v24 }
 0x10d   :  { %367 = vadd.xlane.f32.xlu1 %v366_v29 }
 0x176   :  { %v323_v30 = vpop.xlane.xlu0 %322 }
 0x177   :  { %v370_v33 = vmul.f32 0.125, %v323_v30 }
 0x179   :  { %v1018_v34 = vsub.f32 %v938_v31, %v370_v33 }
 0x17a   :  { %v350_v28 = vpop.xlane.xlu1 %349  ;;  %v347_v35 = vpop.xlane.xlu0 %346 }
 0x17b   :  { %v378_v36 = vmul.f32 0.125, %v347_v35  ;;  %v402_v37 = vmul.f32 %v1018_v34, %v1018_v34  ;;  %v379_v39 = vmul.f32 0.125, %v350_v28 }
 0x17d   :  { %v1023_v40 = vsub.f32 %v941_v32, %v378_v36  ;;  %v418_v41 = vsel %vm320_vm2, %v402_v37, 0.0  ;;  %v1029_v49 = vsub.f32 %v946_v38, %v379_v39 }
 0x17e   :  { %v329_v43 = vpop.xlane.xlu1 %328  ;;  %419 = vadd.xlane.f32.xlu0 %v418_v41  ;;  %v326_v44 = vpop.xlane.xlu0 %325 }
 0x17f   :  { %v372_v45 = vmul.f32 0.125, %v329_v43  ;;  %v371_v48 = vmul.f32 0.125, %v326_v44  ;;  %v410_v31 = vmul.f32 %v1023_v40, %v1023_v40 }
 0x181   :  { %v1032_v50 = vsub.f32 %v956_v46, %v372_v45  ;;  %v1035_v51 = vsub.f32 %v951_v42, %v371_v48  ;;  %v442_v32 = vsel %vm320_vm2, %v410_v31, 0.0  ;;  %v411_v46 = vmul.f32 %v1029_v49, %v1029_v49 }
 0x182   :  { %v332_v52 = vpop.xlane.xlu1 %331  ;;  %443 = vadd.xlane.f32.xlu0 %v442_v32  ;;  %v353_v53 = vpop.xlane.xlu0 %352 }
 0x183   :  { %v373_v56 = vmul.f32 0.125, %v332_v52  ;;  %v380_v57 = vmul.f32 0.125, %v353_v53  ;;  %v404_v58 = vmul.f32 %v1032_v50, %v1032_v50  ;;  %v403_v38 = vmul.f32 %v1035_v51, %v1035_v51 }
 0x184   :  { %v445_v8 = vsel %vm320_vm2, %v411_v46, 0.0 }
 0x185   :  { %v1045_v59 = vsub.f32 %v966_v54, %v373_v56  ;;  %v1048_v42 = vsub.f32 %v959_v47, %v380_v57  ;;  %v424_v60 = vsel %vm320_vm2, %v404_v58, 0.0  ;;  %v421_v61 = vsel %vm320_vm2, %v403_v38, 0.0 }
 0x186   :  { %v356_v0 = vpop.xlane.xlu1 %355  ;;  %425 = vadd.xlane.f32.xlu0 %v424_v60  ;;  %422 = vadd.xlane.f32.xlu1 %v421_v61  ;;  %v335_v1 = vpop.xlane.xlu0 %334 }
 0x187   :  { %v381_v2 = vmul.f32 0.125, %v356_v0  ;;  %v374_v3 = vmul.f32 0.125, %v335_v1  ;;  %v412_v4 = vmul.f32 %v1048_v42, %v1048_v42  ;;  %v405_v54 = vmul.f32 %v1045_v59, %v1045_v59 }
 0x189   :  { %v1057_v5 = vsub.f32 %v969_v55, %v381_v2  ;;  %v1060_v47 = vsub.f32 %v976_v62, %v374_v3  ;;  %v448_v9 = vsel %vm320_vm2, %v412_v4, 0.0  ;;  %v427_v17 = vsel %vm320_vm2, %v405_v54, 0.0 }
 0x18a   :  { %v338_v10 = vpop.xlane.xlu1 %337  ;;  %446 = vadd.xlane.f32.xlu1 %v445_v8  ;;  %449 = vadd.xlane.f32.xlu0 %v448_v9  ;;  %v359_v11 = vpop.xlane.xlu0 %358 }
 0x18b   :  { %v375_v12 = vmul.f32 0.125, %v338_v10  ;;  %v382_v13 = vmul.f32 0.125, %v359_v11  ;;  %v406_v16 = vmul.f32 %v1060_v47, %v1060_v47  ;;  %v413_v19 = vmul.f32 %v1057_v5, %v1057_v5 }
 0x18d   :  { %v1068_v55 = vsub.f32 %v986_v6, %v375_v12  ;;  %v1071_v62 = vsub.f32 %v979_v63, %v382_v13  ;;  %v430_v18 = vsel %vm320_vm2, %v406_v16, 0.0  ;;  %v451_v29 = vsel %vm320_vm2, %v413_v19, 0.0 }
 0x18e   :  { %v362_v20 = vpop.xlane.xlu1 %361  ;;  %428 = vadd.xlane.f32.xlu1 %v427_v17  ;;  %431 = vadd.xlane.f32.xlu0 %v430_v18  ;;  %v341_v21 = vpop.xlane.xlu0 %340 }
 0x18f   :  { %v383_v24 = vmul.f32 0.125, %v362_v20  ;;  %v376_v25 = vmul.f32 0.125, %v341_v21  ;;  %v414_v26 = vmul.f32 %v1071_v62, %v1071_v62  ;;  %v407_v6 = vmul.f32 %v1068_v55, %v1068_v55  ;;  %v1116_v20 = vld [vmem:[%s1238_s3] ss:$0 sm:$0xff] }
 0x191   :  { %v1081_v63 = vsub.f32 %v989_v7, %v383_v24  ;;  %v1084_v27 = vsub.f32 %v996_v14, %v376_v25  ;;  %v454_v30 = vsel %vm320_vm2, %v414_v26, 0.0  ;;  %v433_v39 = vsel %vm320_vm2, %v407_v6, 0.0  ;;  %v1122_v26 = vld [vmem:[%s1239_s4] ss:$0 sm:$0xff] }
 0x192   :  { %v344_v33 = vpop.xlane.xlu1 %343  ;;  %452 = vadd.xlane.f32.xlu1 %v451_v29  ;;  %455 = vadd.xlane.f32.xlu0 %v454_v30  ;;  %v365_v28 = vpop.xlane.xlu0 %364 }
 0x193   :  { %v377_v35 = vmul.f32 0.125, %v344_v33  ;;  %v384_v36 = vmul.f32 0.125, %v365_v28  ;;  %v408_v37 = vmul.f32 %v1084_v27, %v1084_v27  ;;  %v415_v43 = vmul.f32 %v1081_v63, %v1081_v63 }
 0x195   :  { %v1092_v7 = vsub.f32 %v1006_v22, %v377_v35  ;;  %v1095_v14 = vsub.f32 %v999_v15, %v384_v36  ;;  %v436_v41 = vsel %vm320_vm2, %v408_v37, 0.0  ;;  %v457_v22 = vsel %vm320_vm2, %v415_v43, 0.0 }
 0x196   :  { %v368_v44 = vpop.xlane.xlu1 %367  ;;  %434 = vadd.xlane.f32.xlu1 %v433_v39  ;;  %437 = vadd.xlane.f32.xlu0 %v436_v41 }
 0x197   :  { %v385_v45 = vmul.f32 0.125, %v368_v44  ;;  %v416_v48 = vmul.f32 %v1095_v14, %v1095_v14  ;;  %v409_v32 = vmul.f32 %v1092_v7, %v1092_v7 }
 0x199   :  { %v1103_v31 = vsub.f32 %v1009_v23, %v385_v45  ;;  %v460_v15 = vsel %vm320_vm2, %v416_v48, 0.0  ;;  %v439_v52 = vsel %vm320_vm2, %v409_v32, 0.0 }
 0x19a   :  { %458 = vadd.xlane.f32.xlu1 %v457_v22  ;;  %461 = vadd.xlane.f32.xlu0 %v460_v15 }
 0x19b   :  { %v417_v53 = vmul.f32 %v1103_v31, %v1103_v31 }
 0x19d   :  { %v463_v56 = vsel %vm320_vm2, %v417_v53, 0.0 }
 0x19e   :  { %440 = vadd.xlane.f32.xlu1 %v439_v52 }
 0x1a2   :  { %464 = vadd.xlane.f32.xlu1 %v463_v56 }
 0x207   :  { %v420_v23 = vpop.xlane.xlu0 %419 }
 0x208   :  { %v466_v57 = vmul.f32 0.125, %v420_v23 }
 0x20a   :  { %v482_v58 = vadd.f32 1e-06, %v466_v57 }
 0x20b   :  { %v444_v38 = vpop.xlane.xlu0 %443 }
 0x20c   :  { %783 = vrsqrt.f32 %v482_v58  ;;  %v474_v46 = vmul.f32 0.125, %v444_v38 }
 0x20e   :  { %v490_v60 = vadd.f32 1e-06, %v474_v46 }
 0x20f   :  { %v423_v61 = vpop.xlane.xlu1 %422  ;;  %v426_v0 = vpop.xlane.xlu0 %425 }
 0x210   :  { %785 = vrsqrt.f32 %v490_v60  ;;  %v467_v1 = vmul.f32 0.125, %v423_v61  ;;  %v468_v2 = vmul.f32 0.125, %v426_v0 }
 0x212   :  { %v483_v3 = vadd.f32 1e-06, %v467_v1  ;;  %v484_v4 = vadd.f32 1e-06, %v468_v2 }
 0x213   :  { %v447_v54 = vpop.xlane.xlu1 %446  ;;  %v450_v8 = vpop.xlane.xlu0 %449 }
 0x214   :  { %787 = vrsqrt.f32 %v483_v3  ;;  %v475_v9 = vmul.f32 0.125, %v447_v54  ;;  %v476_v10 = vmul.f32 0.125, %v450_v8 }
 0x215   :  { %789 = vrsqrt.f32 %v484_v4 }
 0x216   :  { %v491_v11 = vadd.f32 1e-06, %v475_v9  ;;  %v492_v12 = vadd.f32 1e-06, %v476_v10 }
 0x217   :  { %v429_v13 = vpop.xlane.xlu1 %428  ;;  %v432_v16 = vpop.xlane.xlu0 %431 }
 0x218   :  { %791 = vrsqrt.f32 %v491_v11  ;;  %v469_v17 = vmul.f32 0.125, %v429_v13  ;;  %v470_v18 = vmul.f32 0.125, %v432_v16 }
 0x219   :  { %v784_v19 = vpop.eup %783  ;;  %793 = vrsqrt.f32 %v492_v12 }
 0x21a   :  { %v514_v21 = vmul.f32 %v784_v19, %v1018_v34  ;;  %v485_v24 = vadd.f32 1e-06, %v469_v17  ;;  %v486_v25 = vadd.f32 1e-06, %v470_v18 }
 0x21b   :  { %v453_v6 = vpop.xlane.xlu1 %452  ;;  %v456_v29 = vpop.xlane.xlu0 %455 }
 0x21c   :  { %v536_v30 = vmul.f32 %v1116_v20, %v514_v21  ;;  %795 = vrsqrt.f32 %v485_v24  ;;  %v477_v33 = vmul.f32 0.125, %v453_v6  ;;  %v478_v28 = vmul.f32 0.125, %v456_v29 }
 0x21d   :  { %v786_v35 = vpop.eup %785  ;;  %797 = vrsqrt.f32 %v486_v25 }
 0x21e   :  { %v558_v36 = vadd.f32 %v1122_v26, %v536_v30  ;;  %v522_v34 = vmul.f32 %v786_v35, %v1023_v40  ;;  %v493_v37 = vadd.f32 1e-06, %v477_v33  ;;  %v494_v39 = vadd.f32 1e-06, %v478_v28 }
 0x21f   :  { %v435_v41 = vpop.xlane.xlu1 %434  ;;  %v438_v43 = vpop.xlane.xlu0 %437 }
 0x220   :  { %v712_v44 = vpack.c.bf16 %v558_v36, %v558_v36  ;;  %v544_v45 = vmul.f32 %v1116_v20, %v522_v34  ;;  %799 = vrsqrt.f32 %v493_v37  ;;  %v471_v48 = vmul.f32 0.125, %v435_v41 }
 0x221   :  { %v788_v22 = vpop.eup %787  ;;  %801 = vrsqrt.f32 %v494_v39  ;;  %v472_v15 = vmul.f32 0.125, %v438_v43 }
 0x222   :  { %v790_v32 = vpop.eup %789  ;;  %639 = vst.msk [vmem:[%s1240_s5] sm:$0xf] %vm638_vm3, %v712_v44  ;;  %v566_v40 = vadd.f32 %v1122_v26, %v544_v45  ;;  %v515_v52 = vmul.f32 %v788_v22, %v1035_v51  ;;  %v487_v53 = vadd.f32 1e-06, %v471_v48 }
 0x223   :  { %v516_v56 = vmul.f32 %v790_v32, %v1032_v50  ;;  %v488_v23 = vadd.f32 1e-06, %v472_v15  ;;  %v459_v57 = vpop.xlane.xlu1 %458  ;;  %v462_v58 = vpop.xlane.xlu0 %461 }
 0x224   :  { %v720_v38 = vpack.c.bf16 %v566_v40, %v566_v40  ;;  %v537_v46 = vmul.f32 %v1116_v20, %v515_v52  ;;  %803 = vrsqrt.f32 %v487_v53  ;;  %v479_v60 = vmul.f32 0.125, %v459_v57 }
 0x225   :  { %v792_v61 = vpop.eup %791  ;;  %v538_v0 = vmul.f32 %v1116_v20, %v516_v56  ;;  %805 = vrsqrt.f32 %v488_v23  ;;  %v480_v1 = vmul.f32 0.125, %v462_v58 }
 0x226   :  { %v794_v2 = vpop.eup %793  ;;  %647 = vst.msk [vmem:[%s1240_s5 + $0x20] sm:$0xf] %vm638_vm3, %v720_v38  ;;  %v559_v50 = vadd.f32 %v1122_v26, %v537_v46  ;;  %v523_v51 = vmul.f32 %v792_v61, %v1029_v49  ;;  %v495_v3 = vadd.f32 1e-06, %v479_v60 }
 0x227   :  { %v560_v4 = vadd.f32 %v1122_v26, %v538_v0  ;;  %v524_v54 = vmul.f32 %v794_v2, %v1048_v42  ;;  %v496_v8 = vadd.f32 1e-06, %v480_v1  ;;  %v441_v9 = vpop.xlane.xlu1 %440 }
 0x228   :  { %v713_v10 = vpack.c.bf16 %v559_v50, %v559_v50  ;;  %v545_v11 = vmul.f32 %v1116_v20, %v523_v51  ;;  %807 = vrsqrt.f32 %v495_v3  ;;  %v473_v12 = vmul.f32 0.125, %v441_v9 }
 0x229   :  { %v796_v13 = vpop.eup %795  ;;  %v714_v16 = vpack.c.bf16 %v560_v4, %v560_v4  ;;  %v546_v17 = vmul.f32 %v1116_v20, %v524_v54  ;;  %809 = vrsqrt.f32 %v496_v8 }
 0x22a   :  { %v798_v18 = vpop.eup %797  ;;  %640 = vst.msk [vmem:[%s1240_s5 + $0x4] sm:$0xf] %vm638_vm3, %v713_v10  ;;  %v567_v49 = vadd.f32 %v1122_v26, %v545_v11  ;;  %v517_v42 = vmul.f32 %v796_v13, %v1045_v59  ;;  %v489_v19 = vadd.f32 1e-06, %v473_v12 }
 0x22b   :  { %641 = vst.msk [vmem:[%s1240_s5 + $0x8] sm:$0xf] %vm638_vm3, %v714_v16  ;;  %v568_v21 = vadd.f32 %v1122_v26, %v546_v17  ;;  %v518_v24 = vmul.f32 %v798_v18, %v1060_v47  ;;  %v465_v25 = vpop.xlane.xlu1 %464 }
 0x22c   :  { %v721_v6 = vpack.c.bf16 %v567_v49, %v567_v49  ;;  %v539_v29 = vmul.f32 %v1116_v20, %v517_v42  ;;  %811 = vrsqrt.f32 %v489_v19  ;;  %v481_v30 = vmul.f32 0.125, %v465_v25 }
 0x22d   :  { %v800_v33 = vpop.eup %799  ;;  %v722_v28 = vpack.c.bf16 %v568_v21, %v568_v21  ;;  %v540_v59 = vmul.f32 %v1116_v20, %v518_v24 }
 0x22e   :  { %v802_v35 = vpop.eup %801  ;;  %648 = vst.msk [vmem:[%s1240_s5 + $0x24] sm:$0xf] %vm638_vm3, %v721_v6  ;;  %v561_v36 = vadd.f32 %v1122_v26, %v539_v29  ;;  %v525_v47 = vmul.f32 %v800_v33, %v1057_v5  ;;  %v497_v34 = vadd.f32 1e-06, %v481_v30 }
 0x22f   :  { %649 = vst.msk [vmem:[%s1240_s5 + $0x28] sm:$0xf] %vm638_vm3, %v722_v28  ;;  %v562_v37 = vadd.f32 %v1122_v26, %v540_v59  ;;  %v526_v39 = vmul.f32 %v802_v35, %v1071_v62 }
 0x230   :  { %v715_v41 = vpack.c.bf16 %v561_v36, %v561_v36  ;;  %v547_v43 = vmul.f32 %v1116_v20, %v525_v47  ;;  %813 = vrsqrt.f32 %v497_v34 }
 0x231   :  { %v804_v44 = vpop.eup %803  ;;  %v716_v45 = vpack.c.bf16 %v562_v37, %v562_v37  ;;  %v548_v48 = vmul.f32 %v1116_v20, %v526_v39 }
 0x232   :  { %v806_v22 = vpop.eup %805  ;;  %642 = vst.msk [vmem:[%s1240_s5 + $0xc] sm:$0xf] %vm638_vm3, %v715_v41  ;;  %v569_v5 = vadd.f32 %v1122_v26, %v547_v43  ;;  %v519_v15 = vmul.f32 %v804_v44, %v1068_v55 }
 0x233   :  { %643 = vst.msk [vmem:[%s1240_s5 + $0x10] sm:$0xf] %vm638_vm3, %v716_v45  ;;  %v570_v62 = vadd.f32 %v1122_v26, %v548_v48  ;;  %v520_v32 = vmul.f32 %v806_v22, %v1084_v27 }
 0x234   :  { %v723_v40 = vpack.c.bf16 %v569_v5, %v569_v5  ;;  %v541_v52 = vmul.f32 %v1116_v20, %v519_v15 }
 0x235   :  { %v808_v53 = vpop.eup %807  ;;  %v724_v56 = vpack.c.bf16 %v570_v62, %v570_v62  ;;  %v542_v23 = vmul.f32 %v1116_v20, %v520_v32 }
 0x236   :  { %v810_v57 = vpop.eup %809  ;;  %650 = vst.msk [vmem:[%s1240_s5 + $0x2c] sm:$0xf] %vm638_vm3, %v723_v40  ;;  %v563_v55 = vadd.f32 %v1122_v26, %v541_v52  ;;  %v527_v58 = vmul.f32 %v808_v53, %v1081_v63 }
 0x237   :  { %651 = vst.msk [vmem:[%s1240_s5 + $0x30] sm:$0xf] %vm638_vm3, %v724_v56  ;;  %v564_v27 = vadd.f32 %v1122_v26, %v542_v23  ;;  %v528_v38 = vmul.f32 %v810_v57, %v1095_v14 }
 0x238   :  { %v717_v46 = vpack.c.bf16 %v563_v55, %v563_v55  ;;  %v549_v60 = vmul.f32 %v1116_v20, %v527_v58 }
 0x239   :  { %v812_v61 = vpop.eup %811  ;;  %v718_v0 = vpack.c.bf16 %v564_v27, %v564_v27  ;;  %v550_v1 = vmul.f32 %v1116_v20, %v528_v38 }
 0x23a   :  { %644 = vst.msk [vmem:[%s1240_s5 + $0x14] sm:$0xf] %vm638_vm3, %v717_v46  ;;  %v571_v63 = vadd.f32 %v1122_v26, %v549_v60  ;;  %v521_v2 = vmul.f32 %v812_v61, %v1092_v7 }
 0x23b   :  { %645 = vst.msk [vmem:[%s1240_s5 + $0x18] sm:$0xf] %vm638_vm3, %v718_v0  ;;  %v572_v14 = vadd.f32 %v1122_v26, %v550_v1 }
 0x23c   :  { %v725_v50 = vpack.c.bf16 %v571_v63, %v571_v63  ;;  %v543_v51 = vmul.f32 %v1116_v20, %v521_v2 }
 0x23d   :  { %v814_v3 = vpop.eup %813  ;;  %v726_v4 = vpack.c.bf16 %v572_v14, %v572_v14 }
 0x23e   :  { %652 = vst.msk [vmem:[%s1240_s5 + $0x34] sm:$0xf] %vm638_vm3, %v725_v50  ;;  %v565_v54 = vadd.f32 %v1122_v26, %v543_v51  ;;  %v529_v7 = vmul.f32 %v814_v3, %v1103_v31 }
 0x23f   :  { %653 = vst.msk [vmem:[%s1240_s5 + $0x38] sm:$0xf] %vm638_vm3, %v726_v4 }
 0x240   :  { %v719_v8 = vpack.c.bf16 %v565_v54, %v565_v54  ;;  %v551_v9 = vmul.f32 %v1116_v20, %v529_v7 }
 0x242   :  { %646 = vst.msk [vmem:[%s1240_s5 + $0x1c] sm:$0xf] %vm638_vm3, %v719_v8  ;;  %v573_v10 = vadd.f32 %v1122_v26, %v551_v9 }
 0x244   :  { %v727_v11 = vpack.c.bf16 %v573_v10, %v573_v10 }
 0x246   :  { %654 = vst.msk [vmem:[%s1240_s5 + $0x3c] sm:$0xf] %vm638_vm3, %v727_v11 }

// kernel: poolformer_forward.18
= control target key start
LH: loop header
LB: loop body
LE: loop exit
PB: predicated region body
PF: predicated region fallthrough
CT: control target
= control target key end

     0   :  { %s1153_s12 = smov 0   ;;  %s1687_s0 = inlined_call_operand.vmem [shape: bf16[2,10,10,8], index: 0, kind: input, shape index: {}]   ;;  %s1688_s1 = inlined_call_operand.vmem [shape: f32[1,8], index: 1, kind: input, shape index: {}]   ;;  %s1689_s2 = inlined_call_operand.vmem [shape: f32[1,8], index: 2, kind: input, shape index: {}]   ;;  %s1690_s3 = inlined_call_operand.vmem [shape: bf16[2,8,8,8], index: 3, kind: output, shape index: {}]  }
   0x1 LB: > { %s1021_s13 = sadd.s32 4294967295, %s1130_s12   ;;  %p1025_p0 = scmp.ge.s32.totalorder %s1130_s12, 1  ;;  %s1130_s12 = sphi %s1153_s12, %s13_s12  }
   0x2   : > { %p137_p1 = scmp.lt.s32.totalorder %s1130_s12, 3 }
   0x4   : > { %p138_p2 = pnand %p1025_p0, %p137_p1 }
   0x6   : > { %141 = sbr.rel (%p138_p2) target bundleno = 438 (0x1b6), region = 32 }
   0xb   : > { %p161_p3 = scmp.lt.s32.totalorder %s1021_s13, 1  ;;  %vm213_vm0 = vcmask 64512   ;;  %vm217_vm1 = vcmask 58368   ;;  %vm619_vm6 = vcmask 1046528   ;;  %vm660_vm7 = vcmask 1045504  }
   0xc   : > { %vm834_vm8 = vsmask.f32 3328  ;;  %vm835_vm9 = vsmask.f32 7440  ;;  %vm957_vm10 = vcmask 60416  }
   0xd   : > { %s1712_s13 = smov (!%p161_p3, %s1021_s13), 1  ;;  %vm1548_vm11 = vmor %vm834_vm8, %vm835_vm9 }
   0xe   : > { %s1070_s14 = smul.u32 80, %s1712_s13  ;;  %s1053_s22 = sshll.u32 %s1712_s13, 5 }
   0xf   : > { %s1558_s25 = scalar_lea.vmem %s1690_s3, %s1053_s22 }
  0x10   : > { %s1167_s17 = scalar_lea.vmem %s1687_s0, %s1070_s14 }
  0x11   : > { %v1170_v0 = vld [vmem:[%s1167_s17] ss:$8 sps:$4 sm:$0xff]   ;;  %v1173_v1 = vld [vmem:[%s1167_s17 + $0x4] sm:$0x1]  ;;  %v174_v2 = vld [vmem:[%s1167_s17 + $0xc] sm:$0x1] }
  0x12   : > { %v191_v3 = vunpack.c.l.bf16 %v1170_v0  ;;  %v1178_v4 = vunpack.c.h.bf16 %v1170_v0  ;;  %v192_v5 = vunpack.c.l.bf16 %v1173_v1  ;;  %v1181_v6 = vunpack.c.l.bf16 %v174_v2  ;;  %v175_v7 = vld [vmem:[%s1167_s17 + $0x10] ss:$8 sps:$4 sm:$0xff]   ;;  %v176_v8 = vld [vmem:[%s1167_s17 + $0x14] sm:$0x1]  ;;  %v178_v15 = vld [vmem:[%s1167_s17 + $0x1c] sm:$0x1] }
  0x13   : > { %v1195_v13 = vunpack.c.l.bf16 %v175_v7  ;;  %v1197_v14 = vunpack.c.l.bf16 %v176_v8  ;;  %v1204_v18 = vunpack.c.h.bf16 %v175_v7  ;;  %v1206_v19 = vunpack.c.l.bf16 %v178_v15  ;;  %v179_v20 = vld [vmem:[%s1167_s17 + $0x20] ss:$8 sps:$4 sm:$0xff]   ;;  %v180_v21 = vld [vmem:[%s1167_s17 + $0x24] sm:$0x1]  ;;  %v182_v26 = vld [vmem:[%s1167_s17 + $0x2c] sm:$0x1] }
  0x14   : > { %v214_v9 = vsel %vm213_vm0, %v191_v3, 0.0  ;;  %v221_v10 = vsel %vm213_vm0, %v1178_v4, 0.0  ;;  %v218_v11 = vsel %vm217_vm1, %v192_v5, 0.0  ;;  %v224_v12 = vsel %vm217_vm1, %v1181_v6, 0.0  ;;  %v183_v31 = vld [vmem:[%s1167_s17 + $0x30] ss:$8 sps:$4 sm:$0xff]  }
  0x15   : > { %215 = vadd.xlane.f32.xlu0 %v214_v9  ;;  %222 = vadd.xlane.f32.xlu1 %v221_v10  ;;  %v227_v16 = vsel %vm213_vm0, %v1195_v13, 0.0  ;;  %v230_v17 = vsel %vm217_vm1, %v1197_v14, 0.0  ;;  %v233_v22 = vsel %vm213_vm0, %v1204_v18, 0.0  ;;  %v236_v23 = vsel %vm217_vm1, %v1206_v19, 0.0  ;;  %v184_v32 = vld [vmem:[%s1167_s17 + $0x34] sm:$0x1] }
  0x16   : > { %v1214_v24 = vunpack.c.l.bf16 %v179_v20  ;;  %v1216_v25 = vunpack.c.l.bf16 %v180_v21  ;;  %v1223_v29 = vunpack.c.h.bf16 %v179_v20  ;;  %v1225_v30 = vunpack.c.l.bf16 %v182_v26  ;;  %v186_v37 = vld [vmem:[%s1167_s17 + $0x3c] sm:$0x1]  ;;  %v1247_v42 = vld [vmem:[%s1167_s17 + $0x40] ss:$8 sps:$4 sm:$0xff]   ;;  %v188_v43 = vld [vmem:[%s1167_s17 + $0x44] sm:$0x1] }
  0x17   : > { %v1233_v35 = vunpack.c.l.bf16 %v183_v31  ;;  %v1235_v36 = vunpack.c.l.bf16 %v184_v32  ;;  %v1242_v40 = vunpack.c.h.bf16 %v183_v31  ;;  %v1244_v41 = vunpack.c.l.bf16 %v186_v37  ;;  %v1260_v48 = vld [vmem:[%s1167_s17 + $0x4c] sm:$0x1] }
  0x18   : > { %v239_v27 = vsel %vm213_vm0, %v1214_v24, 0.0  ;;  %v242_v28 = vsel %vm217_vm1, %v1216_v25, 0.0  ;;  %v245_v33 = vsel %vm213_vm0, %v1223_v29, 0.0  ;;  %v248_v34 = vsel %vm217_vm1, %v1225_v30, 0.0 }
  0x19   : > { %219 = vadd.xlane.f32.xlu0 %v218_v11  ;;  %225 = vadd.xlane.f32.xlu1 %v224_v12  ;;  %v251_v38 = vsel %vm213_vm0, %v1233_v35, 0.0  ;;  %v254_v39 = vsel %vm217_vm1, %v1235_v36, 0.0  ;;  %1697 = vst [vmem:[#allocation2_spill] sm:$0xff] %v1242_v40  ;;  %1698 = vst [vmem:[#allocation3_spill] sm:$0xff] %v1244_v41  ;;  %v257_v44 = vsel %vm213_vm0, %v1242_v40, 0.0  ;;  %v260_v45 = vsel %vm217_vm1, %v1244_v41, 0.0 }
  0x1a   : > { %v1255_v46 = vunpack.c.l.bf16 %v1247_v42  ;;  %v1257_v47 = vunpack.c.l.bf16 %v188_v43  ;;  %v209_v51 = vunpack.c.h.bf16 %v1247_v42  ;;  %v210_v52 = vunpack.c.l.bf16 %v1260_v48 }
  0x1c   : > { %1699 = vst [vmem:[#allocation4_spill] sm:$0xff] %v1255_v46  ;;  %1700 = vst [vmem:[#allocation5_spill] sm:$0xff] %v1257_v47  ;;  %v263_v49 = vsel %vm213_vm0, %v1255_v46, 0.0  ;;  %v266_v50 = vsel %vm217_vm1, %v1257_v47, 0.0  ;;  %v269_v53 = vsel %vm213_vm0, %v209_v51, 0.0  ;;  %v272_v54 = vsel %vm217_vm1, %v210_v52, 0.0 }
  0x1d   : > { %228 = vadd.xlane.f32.xlu0 %v227_v16  ;;  %231 = vadd.xlane.f32.xlu1 %v230_v17 }
  0x21   : > { %234 = vadd.xlane.f32.xlu0 %v233_v22  ;;  %237 = vadd.xlane.f32.xlu1 %v236_v23 }
  0x25   : > { %240 = vadd.xlane.f32.xlu0 %v239_v27  ;;  %243 = vadd.xlane.f32.xlu1 %v242_v28 }
  0x29   : > { %246 = vadd.xlane.f32.xlu0 %v245_v33  ;;  %249 = vadd.xlane.f32.xlu1 %v248_v34 }
  0x2d   : > { %252 = vadd.xlane.f32.xlu0 %v251_v38  ;;  %255 = vadd.xlane.f32.xlu1 %v254_v39 }
  0x31   : > { %258 = vadd.xlane.f32.xlu0 %v257_v44  ;;  %261 = vadd.xlane.f32.xlu1 %v260_v45 }
  0x35   : > { %264 = vadd.xlane.f32.xlu0 %v263_v49  ;;  %267 = vadd.xlane.f32.xlu1 %v266_v50 }
  0x39   : > { %270 = vadd.xlane.f32.xlu0 %v269_v53  ;;  %273 = vadd.xlane.f32.xlu1 %v272_v54 }
  0x9e   : > { %v216_v55 = vpop.xlane.xlu0 %215  ;;  %v223_v56 = vpop.xlane.xlu1 %222 }
  0x9f   : > { %v276_v57 = vmul.f32 0.125, %v216_v55  ;;  %v278_v58 = vmul.f32 0.125, %v223_v56 }
  0xa1   : > { %v1276_v59 = vsub.f32 %v191_v3, %v276_v57  ;;  %v1279_v60 = vsub.f32 %v1178_v4, %v278_v58 }
  0xa2   : > { %v220_v61 = vpop.xlane.xlu0 %219  ;;  %v226_v62 = vpop.xlane.xlu1 %225 }
  0xa3   : > { %v277_v63 = vmul.f32 0.125, %v220_v61  ;;  %v279_v2 = vmul.f32 0.125, %v226_v62  ;;  %v316_v7 = vmul.f32 %v1276_v59, %v1276_v59  ;;  %v318_v8 = vmul.f32 %v1279_v60, %v1279_v60 }
  0xa5   : > { %v1287_v9 = vsub.f32 %v192_v5, %v277_v63  ;;  %v1290_v0 = vsub.f32 %v1181_v6, %v279_v2  ;;  %v336_v3 = vsel %vm213_vm0, %v316_v7, 0.0  ;;  %v342_v12 = vsel %vm213_vm0, %v318_v8, 0.0 }
  0xa6   : > { %337 = vadd.xlane.f32.xlu0 %v336_v3  ;;  %v229_v10 = vpop.xlane.xlu0 %228  ;;  %v232_v11 = vpop.xlane.xlu1 %231 }
  0xa7   : > { %v280_v15 = vmul.f32 0.125, %v229_v10  ;;  %v281_v16 = vmul.f32 0.125, %v232_v11  ;;  %v317_v17 = vmul.f32 %v1287_v9, %v1287_v9  ;;  %v319_v1 = vmul.f32 %v1290_v0, %v1290_v0 }
  0xa9   : > { %v1299_v5 = vsub.f32 %v1195_v13, %v280_v15  ;;  %v1302_v20 = vsub.f32 %v1197_v14, %v281_v16  ;;  %v339_v21 = vsel %vm217_vm1, %v317_v17, 0.0  ;;  %v345_v26 = vsel %vm217_vm1, %v319_v1, 0.0 }
  0xaa   : > { %343 = vadd.xlane.f32.xlu0 %v342_v12  ;;  %340 = vadd.xlane.f32.xlu1 %v339_v21  ;;  %v235_v22 = vpop.xlane.xlu0 %234  ;;  %v238_v23 = vpop.xlane.xlu1 %237 }
  0xab   : > { %v282_v27 = vmul.f32 0.125, %v235_v22  ;;  %v283_v28 = vmul.f32 0.125, %v238_v23  ;;  %v320_v31 = vmul.f32 %v1299_v5, %v1299_v5  ;;  %v321_v32 = vmul.f32 %v1302_v20, %v1302_v20 }
  0xad   : > { %v1311_v33 = vsub.f32 %v1204_v18, %v282_v27  ;;  %v1314_v34 = vsub.f32 %v1206_v19, %v283_v28  ;;  %v348_v37 = vsel %vm213_vm0, %v320_v31, 0.0  ;;  %v351_v43 = vsel %vm217_vm1, %v321_v32, 0.0 }
  0xae   : > { %346 = vadd.xlane.f32.xlu1 %v345_v26  ;;  %349 = vadd.xlane.f32.xlu0 %v348_v37  ;;  %v241_v38 = vpop.xlane.xlu0 %240  ;;  %v244_v39 = vpop.xlane.xlu1 %243 }
  0xaf   : > { %v284_v44 = vmul.f32 0.125, %v241_v38  ;;  %v285_v45 = vmul.f32 0.125, %v244_v39  ;;  %v322_v49 = vmul.f32 %v1311_v33, %v1311_v33  ;;  %v323_v50 = vmul.f32 %v1314_v34, %v1314_v34 }
  0xb1   : > { %v1323_v53 = vsub.f32 %v1214_v24, %v284_v44  ;;  %v1326_v54 = vsub.f32 %v1216_v25, %v285_v45  ;;  %v354_v55 = vsel %vm213_vm0, %v322_v49, 0.0  ;;  %v357_v58 = vsel %vm217_vm1, %v323_v50, 0.0 }
  0xb2   : > { %352 = vadd.xlane.f32.xlu1 %v351_v43  ;;  %355 = vadd.xlane.f32.xlu0 %v354_v55  ;;  %v247_v56 = vpop.xlane.xlu0 %246  ;;  %v250_v57 = vpop.xlane.xlu1 %249 }
  0xb3   : > { %v286_v61 = vmul.f32 0.125, %v247_v56  ;;  %v287_v62 = vmul.f32 0.125, %v250_v57  ;;  %v324_v63 = vmul.f32 %v1323_v53, %v1323_v53  ;;  %v325_v2 = vmul.f32 %v1326_v54, %v1326_v54 }
  0xb5   : > { %v1335_v7 = vsub.f32 %v1223_v29, %v286_v61  ;;  %v1338_v8 = vsub.f32 %v1225_v30, %v287_v62  ;;  %v360_v3 = vsel %vm213_vm0, %v324_v63, 0.0  ;;  %v363_v12 = vsel %vm217_vm1, %v325_v2, 0.0 }
  0xb6   : > { %358 = vadd.xlane.f32.xlu1 %v357_v58  ;;  %361 = vadd.xlane.f32.xlu0 %v360_v3  ;;  %v253_v10 = vpop.xlane.xlu0 %252  ;;  %v256_v11 = vpop.xlane.xlu1 %255 }
  0xb7   : > { %v288_v15 = vmul.f32 0.125, %v253_v10  ;;  %v289_v16 = vmul.f32 0.125, %v256_v11  ;;  %v326_v17 = vmul.f32 %v1335_v7, %v1335_v7  ;;  %v327_v1 = vmul.f32 %v1338_v8, %v1338_v8 }
  0xb9   : > { %v1347_v21 = vsub.f32 %v1233_v35, %v288_v15  ;;  %v1350_v22 = vsub.f32 %v1235_v36, %v289_v16  ;;  %v366_v23 = vsel %vm213_vm0, %v326_v17, 0.0  ;;  %v369_v28 = vsel %vm217_vm1, %v327_v1, 0.0 }
  0xba   : > { %364 = vadd.xlane.f32.xlu1 %v363_v12  ;;  %367 = vadd.xlane.f32.xlu0 %v366_v23  ;;  %v259_v26 = vpop.xlane.xlu0 %258  ;;  %v262_v27 = vpop.xlane.xlu1 %261 }
  0xbb   : > { %v290_v31 = vmul.f32 0.125, %v259_v26  ;;  %v291_v32 = vmul.f32 0.125, %v262_v27  ;;  %v328_v37 = vmul.f32 %v1347_v21, %v1347_v21  ;;  %v329_v38 = vmul.f32 %v1350_v22, %v1350_v22 }
  0xbd   : > { %v1359_v39 = vsub.f32 %v1242_v40, %v290_v31  ;;  %v1362_v43 = vsub.f32 %v1244_v41, %v291_v32  ;;  %v372_v44 = vsel %vm213_vm0, %v328_v37, 0.0  ;;  %v375_v50 = vsel %vm217_vm1, %v329_v38, 0.0 }
  0xbe   : > { %370 = vadd.xlane.f32.xlu1 %v369_v28  ;;  %373 = vadd.xlane.f32.xlu0 %v372_v44  ;;  %v265_v45 = vpop.xlane.xlu0 %264  ;;  %v268_v49 = vpop.xlane.xlu1 %267  ;;  %v528_v31 = vlaneseq }
  0xbf   : > { %v292_v55 = vmul.f32 0.125, %v265_v45  ;;  %v293_v56 = vmul.f32 0.125, %v268_v49  ;;  %v330_v57 = vmul.f32 %v1359_v39, %v1359_v39  ;;  %v331_v58 = vmul.f32 %v1362_v43, %v1362_v43 }
  0xc0   : > { %v529_v49 = vshrl.u32 %v528_v31, 7 }
  0xc1   : > { %v1371_v61 = vsub.f32 %v1255_v46, %v292_v55  ;;  %v1374_v62 = vsub.f32 %v1257_v47, %v293_v56  ;;  %v378_v63 = vsel %vm213_vm0, %v330_v57, 0.0  ;;  %v381_v10 = vsel %vm217_vm1, %v331_v58, 0.0 }
  0xc2   : > { %376 = vadd.xlane.f32.xlu1 %v375_v50  ;;  %379 = vadd.xlane.f32.xlu0 %v378_v63  ;;  %v271_v2 = vpop.xlane.xlu0 %270  ;;  %v274_v3 = vpop.xlane.xlu1 %273  ;;  %vm708_vm2 = vcmp.eq.s32.totalorder %v529_v49, 0  ;;  %vm712_vm3 = vcmp.eq.s32.totalorder %v529_v49, 7  ;;  %vm531_vm4 = vcmp.ge.s32.totalorder %v529_v49, 1 }
  0xc3   : > { %v294_v11 = vmul.f32 0.125, %v271_v2  ;;  %v295_v12 = vmul.f32 0.125, %v274_v3  ;;  %v332_v15 = vmul.f32 %v1371_v61, %v1371_v61  ;;  %v333_v16 = vmul.f32 %v1374_v62, %v1374_v62 }
  0xc5   : > { %v1384_v17 = vsub.f32 %v209_v51, %v294_v11  ;;  %v1388_v1 = vsub.f32 %v210_v52, %v295_v12  ;;  %v384_v23 = vsel %vm213_vm0, %v332_v15, 0.0  ;;  %v387_v26 = vsel %vm217_vm1, %v333_v16, 0.0 }
  0xc6   : > { %382 = vadd.xlane.f32.xlu1 %v381_v10  ;;  %385 = vadd.xlane.f32.xlu0 %v384_v23  ;;  %v1132_v12 = vmov 0.0  }
  0xc7   : > { %1701 = vst [vmem:[#allocation6_spill] sm:$0xff] %v1384_v17  ;;  %1702 = vst [vmem:[#allocation7_spill] sm:$0xff] %v1388_v1  ;;  %v334_v27 = vmul.f32 %v1384_v17, %v1384_v17  ;;  %v335_v28 = vmul.f32 %v1388_v1, %v1388_v1  ;;  %v1033_v15 = vsel %vm708_vm2, 1.0, %v1132_v12 }
  0xc9   : > { %v390_v42 = vsel %vm213_vm0, %v334_v27, 0.0  ;;  %v393_v48 = vsel %vm217_vm1, %v335_v28, 0.0  ;;  %v711_v28 = vsub.f32 3.0, %v1033_v15 }
  0xca   : > { %388 = vadd.xlane.f32.xlu1 %v387_v26  ;;  %391 = vadd.xlane.f32.xlu0 %v390_v42 }
  0xce   : > { %394 = vadd.xlane.f32.xlu1 %v393_v48 }
 0x12f   : > { %v338_v51 = vpop.xlane.xlu0 %337 }
 0x130   : > { %v396_v52 = vmul.f32 0.125, %v338_v51  ;;  %v1034_v51 = vsel %vm712_vm3, 1.0, %v1132_v12 }
 0x132   : > { %v416_v32 = vadd.f32 1e-06, %v396_v52 }
 0x133   : > { %v341_v37 = vpop.xlane.xlu1 %340  ;;  %v344_v38 = vpop.xlane.xlu0 %343 }
 0x134   : > { %1080 = vrsqrt.f32 %v416_v32  ;;  %v397_v44 = vmul.f32 0.125, %v341_v37  ;;  %v398_v45 = vmul.f32 0.125, %v344_v38 }
 0x136   : > { %v417_v50 = vadd.f32 1e-06, %v397_v44  ;;  %v418_v55 = vadd.f32 1e-06, %v398_v45  ;;  %v1402_v45 = vld [vmem:[%s1688_s1] ss:$0 sm:$0xff] }
 0x137   : > { %v347_v56 = vpop.xlane.xlu1 %346  ;;  %v350_v57 = vpop.xlane.xlu0 %349 }
 0x138   : > { %1082 = vrsqrt.f32 %v417_v50  ;;  %v399_v58 = vmul.f32 0.125, %v347_v56  ;;  %v400_v63 = vmul.f32 0.125, %v350_v57  ;;  %v530_v50 = vadd.s32 8, %v529_v49 }
 0x139   : > { %1084 = vrsqrt.f32 %v418_v55  ;;  %v715_v55 = vsub.f32 %v711_v28, %v1034_v51 }
 0x13a   : > { %v419_v2 = vadd.f32 1e-06, %v399_v58  ;;  %v420_v3 = vadd.f32 1e-06, %v400_v63  ;;  %vm538_vm5 = vcmp.le.s32.totalorder %v530_v50, 8 }
 0x13b   : > { %v353_v10 = vpop.xlane.xlu1 %352  ;;  %v356_v11 = vpop.xlane.xlu0 %355 }
 0x13c   : > { %1086 = vrsqrt.f32 %v419_v2  ;;  %v401_v16 = vmul.f32 0.125, %v353_v10  ;;  %v402_v23 = vmul.f32 0.125, %v356_v11 }
 0x13d   : > { %1088 = vrsqrt.f32 %v420_v3 }
 0x13e   : > { %v421_v26 = vadd.f32 1e-06, %v401_v16  ;;  %v422_v27 = vadd.f32 1e-06, %v402_v23  ;;  %v1409_v16 = vld [vmem:[%s1689_s2] ss:$0 sm:$0xff] }
 0x13f   : > { %v359_v42 = vpop.xlane.xlu1 %358  ;;  %v362_v48 = vpop.xlane.xlu0 %361 }
 0x140   : > { %1090 = vrsqrt.f32 %v421_v26  ;;  %v403_v52 = vmul.f32 0.125, %v359_v42  ;;  %v404_v31 = vmul.f32 0.125, %v362_v48  ;;  %v716_v26 = vmul.f32 2.0, %v715_v55 }
 0x141   : > { %v1081_v32 = vpop.eup %1080  ;;  %1092 = vrsqrt.f32 %v422_v27  ;;  %v1413_v42 = vsel %vm531_vm4, 1.0, %v1132_v12 }
 0x142   : > { %v456_v37 = vmul.f32 %v1081_v32, %v1276_v59  ;;  %v423_v38 = vadd.f32 1e-06, %v403_v52  ;;  %v424_v44 = vadd.f32 1e-06, %v404_v31  ;;  %v717_v52 = vmul.f32 3.0, %v715_v55 }
 0x143   : > { %v365_v56 = vpop.xlane.xlu1 %364  ;;  %v368_v57 = vpop.xlane.xlu0 %367 }
 0x144   : > { %1094 = vrsqrt.f32 %v423_v38  ;;  %v405_v58 = vmul.f32 0.125, %v365_v56  ;;  %v406_v63 = vmul.f32 0.125, %v368_v57  ;;  %v482_v59 = vmul.f32 %v1402_v45, %v456_v37 }
 0x145   : > { %v1083_v2 = vpop.eup %1082  ;;  %1096 = vrsqrt.f32 %v424_v44 }
 0x146   : > { %v1085_v3 = vpop.eup %1084  ;;  %v457_v10 = vmul.f32 %v1083_v2, %v1287_v9  ;;  %v425_v11 = vadd.f32 1e-06, %v405_v58  ;;  %v426_v15 = vadd.f32 1e-06, %v406_v63  ;;  %v508_v37 = vadd.f32 %v1409_v16, %v482_v59 }
 0x147   : > { %v458_v23 = vmul.f32 %v1085_v3, %v1279_v60  ;;  %v371_v27 = vpop.xlane.xlu1 %370  ;;  %v374_v28 = vpop.xlane.xlu0 %373  ;;  %v1417_v60 = vsel %vm538_vm5, 1.0, %v1132_v12 }
 0x148   : > { %v483_v49 = vmul.f32 %v1402_v45, %v457_v10  ;;  %1098 = vrsqrt.f32 %v425_v11  ;;  %v407_v48 = vmul.f32 0.125, %v371_v27  ;;  %v408_v31 = vmul.f32 0.125, %v374_v28 }
 0x149   : > { %v1087_v9 = vpop.eup %1086  ;;  %v484_v51 = vmul.f32 %v1402_v45, %v458_v23  ;;  %1100 = vrsqrt.f32 %v426_v15  ;;  %v551_v15 = vmul.f32 0.0, %v508_v37 }
 0x14a   : > { %v1089_v32 = vpop.eup %1088  ;;  %v459_v38 = vmul.f32 %v1087_v9, %v1290_v0  ;;  %v427_v44 = vadd.f32 1e-06, %v407_v48  ;;  %v509_v50 = vadd.f32 %v1409_v16, %v483_v49  ;;  %1102 = vrcp.f32 %v716_v26 }
 0x14b   : > { %v1422_v56 = vadd.f32 %v1409_v16, %v484_v51  ;;  %v460_v57 = vmul.f32 %v1089_v32, %v1299_v5  ;;  %v377_v58 = vpop.xlane.xlu1 %376  ;;  %v380_v55 = vpop.xlane.xlu0 %379  ;;  %v428_v2 = vadd.f32 1e-06, %v408_v31 }
 0x14c   : > { %v485_v63 = vmul.f32 %v1402_v45, %v459_v38  ;;  %1104 = vrsqrt.f32 %v427_v44  ;;  %v409_v3 = vmul.f32 0.125, %v377_v58  ;;  %v410_v10 = vmul.f32 0.125, %v380_v55 }
 0x14d   : > { %v1091_v12 = vpop.eup %1090  ;;  %v553_v0 = vmul.f32 %v1413_v42, %v1422_v56  ;;  %v486_v59 = vmul.f32 %v1402_v45, %v460_v57  ;;  %1106 = vrcp.f32 %v717_v52  ;;  %v552_v27 = vmul.f32 0.0, %v509_v50 }
 0x14e   : > { %v1093_v11 = vpop.eup %1092  ;;  %v1430_v5 = vadd.f32 %v1409_v16, %v485_v63  ;;  %v461_v23 = vmul.f32 %v1091_v12, %v1302_v20  ;;  %v429_v26 = vadd.f32 1e-06, %v409_v3  ;;  %v430_v48 = vadd.f32 1e-06, %v410_v10 }
 0x14f   : > { %v1434_v28 = vadd.f32 %v1409_v16, %v486_v59  ;;  %v462_v49 = vmul.f32 %v1093_v11, %v1311_v33  ;;  %v383_v9 = vpop.xlane.xlu1 %382  ;;  %v386_v51 = vpop.xlane.xlu0 %385  ;;  %1108 = vrsqrt.f32 %v428_v2  ;;  %v571_v37 = vadd.f32 %v553_v0, %v551_v15 }
 0x150   : > { %v554_v52 = vmul.f32 %v1417_v60, %v1430_v5  ;;  %v487_v31 = vmul.f32 %v1402_v45, %v461_v23  ;;  %v411_v32 = vmul.f32 0.125, %v383_v9  ;;  %v412_v50 = vmul.f32 0.125, %v386_v51 }
 0x151   : > { %v1095_v20 = vpop.eup %1094  ;;  %v555_v38 = vmul.f32 %v1413_v42, %v1434_v28  ;;  %v488_v44 = vmul.f32 %v1402_v45, %v462_v49  ;;  %1110 = vrsqrt.f32 %v429_v26 }
 0x152   : > { %v1097_v33 = vpop.eup %1096  ;;  %v1444_v57 = vadd.f32 %v1409_v16, %v487_v31  ;;  %v463_v58 = vmul.f32 %v1095_v20, %v1314_v34  ;;  %v431_v55 = vadd.f32 1e-06, %v411_v32  ;;  %1112 = vrsqrt.f32 %v430_v48 }
 0x153   : > { %v587_v63 = vadd.f32 %v571_v37, %v555_v38  ;;  %v1448_v2 = vadd.f32 %v1409_v16, %v488_v44  ;;  %v464_v3 = vmul.f32 %v1097_v33, %v1323_v53  ;;  %v572_v12 = vadd.f32 %v554_v52, %v552_v27 }
 0x154   : > { %v573_v59 = vadd.f32 %v555_v38, %v553_v0  ;;  %v556_v10 = vmul.f32 %v1417_v60, %v1444_v57  ;;  %v489_v11 = vmul.f32 %v1402_v45, %v463_v58  ;;  %1114 = vrsqrt.f32 %v431_v55 }
 0x155   : > { %v1099_v15 = vpop.eup %1098  ;;  %v557_v34 = vmul.f32 %v1413_v42, %v1448_v2  ;;  %v490_v23 = vmul.f32 %v1402_v45, %v464_v3  ;;  %v1457_v26 = vadd.f32 1e-06, %v412_v50  ;;  %v620_v9 = vrot.slane %v587_v63, 1 }
 0x156   : > { %v1101_v49 = vpop.eup %1100  ;;  %v588_v53 = vadd.f32 %v572_v12, %v556_v10  ;;  %v1460_v27 = vadd.f32 %v1409_v16, %v489_v11  ;;  %v465_v0 = vmul.f32 %v1099_v15, %v1326_v54  ;;  %v574_v48 = vadd.f32 %v556_v10, %v554_v52 }
 0x157   : > { %v589_v51 = vadd.f32 %v573_v59, %v557_v34  ;;  %v1464_v31 = vadd.f32 %v1409_v16, %v490_v23  ;;  %v466_v32 = vmul.f32 %v1101_v49, %v1335_v7  ;;  %v1467_v20 = vpop.eup %1102  ;;  %v661_v55 = vrot.slane %v587_v63, 2 }
 0x158   : > { %v621_v37 = vrot.slane %v588_v53, 1  ;;  %v662_v44 = vrot.slane %v588_v53, 2  ;;  %v558_v50 = vmul.f32 %v1417_v60, %v1460_v27  ;;  %v491_v33 = vmul.f32 %v1402_v45, %v465_v0 }
 0x159   : > { %v1105_v58 = vpop.eup %1104  ;;  %v575_v3 = vadd.f32 %v557_v34, %v555_v38  ;;  %v559_v54 = vmul.f32 %v1413_v42, %v1464_v31  ;;  %v492_v52 = vmul.f32 %v1402_v45, %v466_v32  ;;  %v623_v59 = vrot.slane %v589_v51, 1 }
 0x15a   : > { %v1475_v12 = vpop.eup %1106  ;;  %v622_v7 = vsel %vm619_vm6, %v620_v9, %v621_v37  ;;  %v664_v11 = vrot.slane %v589_v51, 2  ;;  %v590_v15 = vadd.f32 %v574_v48, %v558_v50  ;;  %v663_v49 = vsel %vm660_vm7, %v661_v55, %v662_v44 }
 0x15b   : > { %v652_v23 = vadd.f32 %v622_v7, %v587_v63  ;;  %v591_v53 = vadd.f32 %v575_v3, %v559_v54  ;;  %v1480_v0 = vadd.f32 %v1409_v16, %v491_v33  ;;  %v1483_v46 = vadd.f32 %v1409_v16, %v492_v52 }
 0x15c   : > { %v624_v38 = vrot.slane %v590_v15, 1  ;;  %v665_v47 = vrot.slane %v590_v15, 2  ;;  %v467_v32 = vmul.f32 %v1105_v58, %v1338_v8  ;;  %v1109_v41 = vpop.eup %1108  ;;  %v576_v9 = vadd.f32 %v558_v50, %v556_v10 }
 0x15d   : > { %v693_v40 = vadd.f32 %v663_v49, %v652_v23  ;;  %v577_v37 = vadd.f32 %v559_v54, %v557_v34  ;;  %v560_v63 = vmul.f32 %v1417_v60, %v1480_v0  ;;  %v626_v44 = vrot.slane %v591_v53, 1 }
 0x15e   : > { %v625_v48 = vsel %vm619_vm6, %v623_v59, %v624_v38  ;;  %v1491_v33 = vmul.f32 %v1413_v42, %v1483_v46  ;;  %v493_v55 = vmul.f32 %v1402_v45, %v467_v32  ;;  %v1111_v3 = vpop.eup %1110  ;;  %v667_v58 = vrot.slane %v591_v53, 2 }
 0x15f   : > { %v720_v52 = vmul.f32 %v1467_v20, %v693_v40  ;;  %v653_v8 = vadd.f32 %v625_v48, %v589_v51  ;;  %v592_v7 = vadd.f32 %v576_v9, %v560_v63  ;;  %v1495_v10 = vpop.eup %1112  ;;  %v666_v34 = vsel %vm660_vm7, %v664_v11, %v665_v47 }
 0x160   : > { %v593_v15 = vadd.f32 %v577_v37, %v1491_v33  ;;  %v1500_v59 = vadd.f32 %v1409_v16, %v493_v55  ;;  %v468_v23 = vmul.f32 %v1109_v41, %v1347_v21  ;;  %v578_v40 = vadd.f32 %v560_v63, %v558_v50 }
 0x161   : > { %v738_v49 = vrot.slane %v720_v52, 7  ;;  %v694_v38 = vadd.f32 %v666_v34, %v653_v8  ;;  %v627_v32 = vrot.slane %v592_v7, 1  ;;  %v668_v1 = vrot.slane %v592_v7, 2  ;;  %v1503_v17 = vpop.eup %1114 }
 0x162   : > { %v1506_v51 = vadd.f32 %v1491_v33, %v559_v54  ;;  %v1510_v47 = vmul.f32 %v1417_v60, %v1500_v59  ;;  %v494_v11 = vmul.f32 %v1402_v45, %v468_v23  ;;  %v629_v48 = vrot.slane %v593_v15, 1 }
 0x163   : > { %v754_v41 = vadd.f32 %v738_v49, %v1178_v4  ;;  %v755_v21 = vadd.f32 %v738_v49, %v1181_v6  ;;  %v722_v9 = vmul.f32 %v1475_v12, %v694_v38  ;;  %v628_v37 = vsel %vm619_vm6, %v626_v44, %v627_v32 }
 0x164   : > { %v654_v50 = vadd.f32 %v628_v37, %v591_v53  ;;  %v669_v54 = vsel %vm660_vm7, %v667_v58, %v668_v1  ;;  %v594_v55 = vadd.f32 %v578_v40, %v1510_v47  ;;  %v1522_v34 = vadd.f32 %v1409_v16, %v494_v11 }
 0x165   : > { %v770_v52 = vsub.f32 %v754_v41, %v1422_v56  ;;  %v771_v8 = vsub.f32 %v755_v21, %v1430_v5  ;;  %v739_v7 = vrot.slane %v722_v9, 7  ;;  %v670_v6 = vrot.slane %v593_v15, 2 }
 0x166   : > { %v695_v4 = vadd.f32 %v669_v54, %v654_v50  ;;  %v630_v23 = vrot.slane %v594_v55, 1  ;;  %v671_v49 = vrot.slane %v594_v55, 2  ;;  %v1528_v56 = vadd.f32 %v1510_v47, %v560_v63 }
 0x167   : > { %v1054_v44 = vpack.c.bf16 %v770_v52, %v770_v52  ;;  %v1055_v53 = vpack.c.bf16 %v771_v8, %v771_v8  ;;  %v756_v1 = vadd.f32 %v739_v7, %v1195_v13  ;;  %v757_v58 = vadd.f32 %v739_v7, %v1197_v14 }
 0x168   : > { %v723_v38 = vmul.f32 %v1475_v12, %v695_v4  ;;  %v631_v5 = vsel %vm619_vm6, %v629_v48, %v630_v23  ;;  %v469_v32 = vmul.f32 %v1111_v3, %v1350_v22  ;;  %v1535_v21 = vmul.f32 %v1413_v42, %v1522_v34 }
 0x169   : > { %v838_v40 = vshrl.u32 %v1054_v44, 16  ;;  %v841_v11 = vshll.u32 %v1054_v44, 16  ;;  %v772_v41 = vsub.f32 %v756_v1, %v1434_v28  ;;  %v773_v13 = vsub.f32 %v757_v58, %v1444_v57 }
 0x16a   : > { %v740_v14 = vrot.slane %v723_v38, 7  ;;  %v655_v9 = vadd.f32 %v631_v5, %v593_v15  ;;  %v672_v37 = vsel %vm660_vm7, %v670_v6, %v671_v49  ;;  %v847_v54 = vshll.u32 %v1055_v53, 16 }
 0x16b   : > { %v840_v63 = vrot.slane %v838_v40, 4  ;;  %v843_v50 = vrot.slane %v841_v11, 5  ;;  %v1056_v48 = vpack.c.bf16 %v772_v41, %v772_v41  ;;  %v1057_v22 = vpack.c.bf16 %v773_v13, %v773_v13 }
 0x16c   : > { %v758_v3 = vadd.f32 %v740_v14, %v1204_v18  ;;  %v759_v28 = vadd.f32 %v740_v14, %v1206_v19  ;;  %v696_v55 = vadd.f32 %v672_v37, %v655_v9  ;;  %v1544_v57 = vadd.f32 %v1535_v21, %v1491_v33 }
 0x16d   : > { %v844_v52 = vor.u32 %v843_v50, %v840_v63  ;;  %v852_v8 = vshrl.u32 %v1056_v48, 16  ;;  %v855_v7 = vshll.u32 %v1056_v48, 16  ;;  %v861_v4 = vshll.u32 %v1057_v22, 16 }
 0x16e   : > { %v774_v6 = vsub.f32 %v758_v3, %v1448_v2  ;;  %v775_v18 = vsub.f32 %v759_v28, %v1460_v27  ;;  %v724_v19 = vmul.f32 %v1475_v12, %v696_v55  ;;  %v849_v23 = vrot.slane %v847_v54, 5 }
 0x16f   : > { %v845_v33 = vrot.slane %v844_v52, 4  ;;  %v854_v49 = vrot.slane %v852_v8, 4  ;;  %v857_v44 = vrot.slane %v855_v7, 5  ;;  %v595_v2 = vadd.f32 %v1506_v51, %v1535_v21 }
 0x170   : > { %v1058_v53 = vpack.c.bf16 %v774_v6, %v774_v6  ;;  %v1059_v1 = vpack.c.bf16 %v775_v18, %v775_v18  ;;  %v741_v58 = vrot.slane %v724_v19, 7  ;;  %v863_v5 = vrot.slane %v861_v4, 5 }
 0x171   : > { %v850_v27 = vsel %vm1548_vm11, %v845_v33, %v849_v23  ;;  %v858_v38 = vor.u32 %v857_v44, %v854_v49  ;;  %v495_v40 = vmul.f32 %v1402_v45, %v469_v32  ;;  %v470_v63 = vmul.f32 %v1495_v10, %v1359_v39  ;;  %v392_v44 = vpop.xlane.xlu0 %391 }
 0x172   : > { %958 = vst.msk [vmem:[%s1558_s25] sm:$0xf] %vm957_vm10, %v850_v27  ;;  %v866_v11 = vshrl.u32 %v1058_v53, 16  ;;  %v869_v41 = vshll.u32 %v1058_v53, 16  ;;  %v875_v13 = vshll.u32 %v1059_v1, 16  ;;  %v760_v14 = vadd.f32 %v741_v58, %v1214_v24 }
 0x173   : > { %v859_v9 = vrot.slane %v858_v38, 4  ;;  %v761_v37 = vadd.f32 %v741_v58, %v1216_v25  ;;  %v1570_v51 = vadd.f32 %v1409_v16, %v495_v40  ;;  %v632_v48 = vrot.slane %v595_v2, 1 }
 0x174   : > { %v868_v50 = vrot.slane %v866_v11, 4  ;;  %v871_v54 = vrot.slane %v869_v41, 5  ;;  %v776_v32 = vsub.f32 %v760_v14, %v1464_v31  ;;  %v496_v25 = vmul.f32 %v1402_v45, %v470_v63  ;;  %v389_v31 = vpop.xlane.xlu1 %388 }
 0x175   : > { %v864_v22 = vsel %vm1548_vm11, %v859_v9, %v863_v5  ;;  %v777_v3 = vsub.f32 %v761_v37, %v1480_v0  ;;  %v1580_v24 = vmul.f32 %v1417_v60, %v1570_v51  ;;  %v471_v10 = vmul.f32 %v1503_v17, %v1362_v43 }
 0x176   : > { %959 = vst.msk [vmem:[%s1558_s25 + $0x4] sm:$0xf] %vm957_vm10, %v864_v22  ;;  %v872_v28 = vor.u32 %v871_v54, %v868_v50  ;;  %v1060_v39 = vpack.c.bf16 %v776_v32, %v776_v32  ;;  %1116 = vrsqrt.f32 %v1457_v26  ;;  %v877_v55 = vrot.slane %v875_v13, 5 }
 0x177   : > { %v1061_v52 = vpack.c.bf16 %v777_v3, %v777_v3  ;;  %v596_v0 = vadd.f32 %v1528_v56, %v1580_v24  ;;  %v1591_v8 = vadd.f32 %v1409_v16, %v496_v25  ;;  %v497_v18 = vmul.f32 %v1402_v45, %v471_v10 }
 0x178   : > { %v873_v7 = vrot.slane %v872_v28, 4  ;;  %v880_v4 = vshrl.u32 %v1060_v39, 16  ;;  %v883_v6 = vshll.u32 %v1060_v39, 16  ;;  %v673_v53 = vrot.slane %v595_v2, 2  ;;  %v395_v11 = vpop.xlane.xlu1 %394 }
 0x179   : > { %v889_v19 = vshll.u32 %v1061_v52, 16  ;;  %v633_v33 = vrot.slane %v596_v0, 1  ;;  %v674_v43 = vrot.slane %v596_v0, 2  ;;  %v1596_v17 = vmul.f32 %v1413_v42, %v1591_v8 }
 0x17a   : > { %v878_v26 = vsel %vm1548_vm11, %v873_v7, %v877_v55  ;;  %v882_v23 = vrot.slane %v880_v4, 4  ;;  %v885_v56 = vrot.slane %v883_v6, 5  ;;  %v1601_v49 = vadd.f32 %v1409_v16, %v497_v18 }
 0x17b   : > { %960 = vst.msk [vmem:[%s1558_s25 + $0x8] sm:$0xf] %vm957_vm10, %v878_v26  ;;  %v634_v1 = vsel %vm619_vm6, %v632_v48, %v633_v33  ;;  %v597_v58 = vadd.f32 %v1544_v57, %v1596_v17  ;;  %v582_v38 = vadd.f32 %v1580_v24, %v1510_v47  ;;  %v675_v41 = vsel %vm660_vm7, %v673_v53, %v674_v43 }
 0x17c   : > { %v886_v27 = vor.u32 %v885_v56, %v882_v23  ;;  %v656_v5 = vadd.f32 %v634_v1, %v595_v2  ;;  %v1612_v40 = vmul.f32 %v1417_v60, %v1601_v49  ;;  %v413_v13 = vmul.f32 0.125, %v389_v31 }
 0x17d   : > { %v414_v14 = vmul.f32 0.125, %v392_v44  ;;  %v891_v37 = vrot.slane %v889_v19, 5  ;;  %v635_v50 = vrot.slane %v597_v58, 1  ;;  %v415_v47 = vmul.f32 0.125, %v395_v11 }
 0x17e   : > { %v887_v9 = vrot.slane %v886_v27, 4  ;;  %v697_v63 = vadd.f32 %v675_v41, %v656_v5  ;;  %v598_v57 = vadd.f32 %v582_v38, %v1612_v40  ;;  %v433_v54 = vadd.f32 1e-06, %v413_v13 }
 0x17f   : > { %v434_v32 = vadd.f32 1e-06, %v414_v14  ;;  %v435_v25 = vadd.f32 1e-06, %v415_v47  ;;  %v676_v39 = vrot.slane %v597_v58, 2  ;;  %v1706_v47 = vld [vmem:[#allocation7_spill] sm:$0xff] }
 0x180   : > { %v892_v2 = vsel %vm1548_vm11, %v887_v9, %v891_v37  ;;  %v725_v48 = vmul.f32 %v1475_v12, %v697_v63  ;;  %v636_v22 = vrot.slane %v598_v57, 1  ;;  %v677_v3 = vrot.slane %v598_v57, 2  ;;  %v1705_v37 = vld [vmem:[#allocation6_spill] sm:$0xff] }
 0x181   : > { %961 = vst.msk [vmem:[%s1558_s25 + $0xc] sm:$0xf] %vm957_vm10, %v892_v2  ;;  %1118 = vrsqrt.f32 %v433_v54 }
 0x182   : > { %v742_v28 = vrot.slane %v725_v48, 7  ;;  %v637_v10 = vsel %vm619_vm6, %v635_v50, %v636_v22  ;;  %1120 = vrsqrt.f32 %v434_v32  ;;  %v678_v7 = vsel %vm660_vm7, %v676_v39, %v677_v3 }
 0x183   : > { %v1117_v31 = vpop.eup %1116  ;;  %v657_v55 = vadd.f32 %v637_v10, %v597_v58  ;;  %1122 = vrsqrt.f32 %v435_v25  ;;  %v583_v32 = vadd.f32 %v1596_v17, %v1535_v21  ;;  %v584_v21 = vadd.f32 %v1612_v40, %v1580_v24 }
 0x184   : > { %v762_v52 = vadd.f32 %v742_v28, %v1223_v29  ;;  %v763_v0 = vadd.f32 %v742_v28, %v1225_v30  ;;  %v472_v6 = vmul.f32 %v1117_v31, %v1371_v61 }
 0x185   : > { %v698_v4 = vadd.f32 %v678_v7, %v657_v55 }
 0x186   : > { %v778_v18 = vsub.f32 %v762_v52, %v1483_v46  ;;  %v779_v19 = vsub.f32 %v763_v0, %v1500_v59  ;;  %v498_v56 = vmul.f32 %v1402_v45, %v472_v6 }
 0x187   : > { %v726_v33 = vmul.f32 %v1475_v12, %v698_v4 }
 0x188   : > { %v1062_v43 = vpack.c.bf16 %v778_v18, %v778_v18  ;;  %v1063_v26 = vpack.c.bf16 %v779_v19, %v779_v19  ;;  %v1635_v27 = vadd.f32 %v1409_v16, %v498_v56 }
 0x189   : > { %v743_v23 = vrot.slane %v726_v33, 7 }
 0x18a   : > { %v894_v44 = vshrl.u32 %v1062_v43, 16  ;;  %v897_v29 = vshll.u32 %v1062_v43, 16  ;;  %v903_v61 = vshll.u32 %v1063_v26, 16 }
 0x18b   : > { %v764_v30 = vadd.f32 %v743_v23, %v1233_v35  ;;  %v765_v53 = vadd.f32 %v743_v23, %v1235_v36 }
 0x18c   : > { %v896_v1 = vrot.slane %v894_v44, 4  ;;  %v899_v58 = vrot.slane %v897_v29, 5  ;;  %v905_v9 = vrot.slane %v903_v61, 5 }
 0x18d   : > { %v780_v46 = vsub.f32 %v764_v30, %v1522_v34  ;;  %v781_v59 = vsub.f32 %v765_v53, %v1570_v51  ;;  %v567_v51 = vmul.f32 %v1413_v42, %v1635_v27 }
 0x18e   : > { %v1119_v38 = vpop.eup %1118  ;;  %v900_v5 = vor.u32 %v899_v58, %v896_v1 }
 0x18f   : > { %v1121_v11 = vpop.eup %1120  ;;  %v1064_v41 = vpack.c.bf16 %v780_v46, %v780_v46  ;;  %v1065_v13 = vpack.c.bf16 %v781_v59, %v781_v59  ;;  %v473_v35 = vmul.f32 %v1119_v38, %v1374_v62  ;;  %v599_v10 = vadd.f32 %v583_v32, %v567_v51 }
 0x190   : > { %v1123_v14 = vpop.eup %1122  ;;  %v901_v36 = vrot.slane %v900_v5, 4  ;;  %v474_v63 = vmul.f32 %v1121_v11, %v1705_v37  ;;  %v585_v55 = vadd.f32 %v567_v51, %v1596_v17  ;;  %v1707_v11 = vld [vmem:[#allocation2_spill] sm:$0xff]  ;;  %v1709_v37 = vld [vmem:[#allocation4_spill] sm:$0xff] }
 0x191   : > { %v908_v57 = vshrl.u32 %v1064_v41, 16  ;;  %v911_v34 = vshll.u32 %v1064_v41, 16  ;;  %v499_v50 = vmul.f32 %v1402_v45, %v473_v35  ;;  %v475_v2 = vmul.f32 %v1123_v14, %v1706_v47 }
 0x192   : > { %v906_v54 = vsel %vm1548_vm11, %v901_v36, %v905_v9  ;;  %v500_v62 = vmul.f32 %v1402_v45, %v474_v63  ;;  %v917_v3 = vshll.u32 %v1065_v13, 16  ;;  %v638_v43 = vrot.slane %v599_v10, 1  ;;  %v1708_v13 = vld [vmem:[#allocation3_spill] sm:$0xff] }
 0x193   : > { %962 = vst.msk [vmem:[%s1558_s25 + $0x10] sm:$0xf] %vm957_vm10, %v906_v54  ;;  %v910_v48 = vrot.slane %v908_v57, 4  ;;  %v913_v22 = vrot.slane %v911_v34, 5  ;;  %v525_v25 = vadd.f32 %v1409_v16, %v499_v50  ;;  %v501_v28 = vmul.f32 %v1402_v45, %v475_v2  ;;  %v1710_v57 = vld [vmem:[#allocation5_spill] sm:$0xff] }
 0x194   : > { %v526_v42 = vadd.f32 %v1409_v16, %v500_v62  ;;  %v919_v4 = vrot.slane %v917_v3, 5  ;;  %v679_v17 = vrot.slane %v599_v10, 2 }
 0x195   : > { %v914_v39 = vor.u32 %v913_v22, %v910_v48  ;;  %v568_v31 = vmul.f32 %v1417_v60, %v525_v25  ;;  %v527_v0 = vadd.f32 %v1409_v16, %v501_v28 }
 0x196   : > { %v569_v52 = vmul.f32 0.0, %v526_v42 }
 0x197   : > { %v915_v7 = vrot.slane %v914_v39, 4  ;;  %v600_v6 = vadd.f32 %v584_v21, %v568_v31  ;;  %v586_v19 = vadd.f32 %v568_v31, %v1612_v40  ;;  %v570_v45 = vmul.f32 0.0, %v527_v0 }
 0x198   : > { %v601_v18 = vadd.f32 %v585_v55, %v569_v52 }
 0x199   : > { %v920_v33 = vsel %vm1548_vm11, %v915_v7, %v919_v4  ;;  %v639_v26 = vrot.slane %v600_v6, 1  ;;  %v680_v24 = vrot.slane %v600_v6, 2  ;;  %v602_v60 = vadd.f32 %v586_v19, %v570_v45 }
 0x19a   : > { %963 = vst.msk [vmem:[%s1558_s25 + $0x14] sm:$0xf] %vm957_vm10, %v920_v33  ;;  %v641_v56 = vrot.slane %v601_v18, 1  ;;  %v682_v53 = vrot.slane %v601_v18, 2 }
 0x19b   : > { %v640_v23 = vsel %vm619_vm6, %v638_v43, %v639_v26  ;;  %v642_v44 = vrot.slane %v602_v60, 1  ;;  %v683_v29 = vrot.slane %v602_v60, 2  ;;  %v681_v30 = vsel %vm660_vm7, %v679_v17, %v680_v24 }
 0x19c   : > { %v658_v16 = vadd.f32 %v640_v23, %v599_v10 }
 0x19d   : > { %v643_v1 = vsel %vm619_vm6, %v641_v56, %v642_v44  ;;  %v684_v46 = vsel %vm660_vm7, %v682_v53, %v683_v29 }
 0x19e   : > { %v699_v40 = vadd.f32 %v681_v30, %v658_v16  ;;  %v659_v58 = vadd.f32 %v643_v1, %v601_v18 }
 0x1a0   : > { %v727_v61 = vmul.f32 %v1475_v12, %v699_v40  ;;  %v700_v59 = vadd.f32 %v684_v46, %v659_v58 }
 0x1a2   : > { %v744_v38 = vrot.slane %v727_v61, 7  ;;  %v729_v5 = vmul.f32 %v1467_v20, %v700_v59 }
 0x1a4   : > { %v766_v41 = vadd.f32 %v744_v38, %v1707_v11  ;;  %v767_v35 = vadd.f32 %v744_v38, %v1708_v13  ;;  %v745_v14 = vrot.slane %v729_v5, 7 }
 0x1a6   : > { %v782_v36 = vsub.f32 %v766_v41, %v1591_v8  ;;  %v783_v9 = vsub.f32 %v767_v35, %v1601_v49  ;;  %v768_v63 = vadd.f32 %v745_v14, %v1709_v37  ;;  %v769_v34 = vadd.f32 %v745_v14, %v1710_v57 }
 0x1a8   : > { %v1066_v12 = vpack.c.bf16 %v782_v36, %v782_v36  ;;  %v1067_v51 = vpack.c.bf16 %v783_v9, %v783_v9  ;;  %v784_v50 = vsub.f32 %v768_v63, %v1635_v27  ;;  %v785_v54 = vsub.f32 %v769_v34, %v525_v25 }
 0x1aa   : > { %v922_v32 = vshrl.u32 %v1066_v12, 16  ;;  %v925_v20 = vshll.u32 %v1066_v12, 16  ;;  %v1068_v62 = vpack.c.bf16 %v784_v50, %v784_v50  ;;  %v1069_v47 = vpack.c.bf16 %v785_v54, %v785_v54 }
 0x1ab   : > { %v931_v8 = vshll.u32 %v1067_v51, 16 }
 0x1ac   : > { %v924_v2 = vrot.slane %v922_v32, 4  ;;  %v927_v48 = vrot.slane %v925_v20, 5  ;;  %v936_v22 = vshrl.u32 %v1068_v62, 16  ;;  %v939_v49 = vshll.u32 %v1068_v62, 16 }
 0x1ad   : > { %v945_v39 = vshll.u32 %v1069_v47, 16  ;;  %v933_v21 = vrot.slane %v931_v8, 5 }
 0x1ae   : > { %v928_v3 = vor.u32 %v927_v48, %v924_v2  ;;  %v938_v42 = vrot.slane %v936_v22, 4  ;;  %v941_v28 = vrot.slane %v939_v49, 5 }
 0x1af   : > { %v947_v55 = vrot.slane %v945_v39, 5 }
 0x1b0   : > { %v929_v10 = vrot.slane %v928_v3, 4  ;;  %v942_v31 = vor.u32 %v941_v28, %v938_v42 }
 0x1b2   : > { %v934_v27 = vsel %vm1548_vm11, %v929_v10, %v933_v21  ;;  %v943_v25 = vrot.slane %v942_v31, 4 }
 0x1b3   : > { %964 = vst.msk [vmem:[%s1558_s25 + $0x18] sm:$0xf] %vm957_vm10, %v934_v27 }
 0x1b4   : > { %v948_v52 = vsel %vm1548_vm11, %v943_v25, %v947_v55 }
 0x1b5   : > { %965 = vst.msk [vmem:[%s1558_s25 + $0x1c] sm:$0xf] %vm957_vm10, %v948_v52 }
 0x1b6 PF: > { %s13_s12 = sadd.s32 1, %s1130_s12  }
 0x1b7   : > { %p10_p4 = scmp.ge.s32.totalorder %s13_s12, 4  }
 0x1b9   :  { %12 = sbr.rel (!%p10_p4) target bundleno = 1 (0x1), region = 62 }

// kernel: poolformer_forward.21
= control target key start
LH: loop header
LB: loop body
LE: loop exit
PB: predicated region body
PF: predicated region fallthrough
CT: control target
= control target key end

     0   :  { %vm85_vm0 = vcmask 1043456   ;;  %vm78_vm1 = vcmask 588800   ;;  %vm140_vm2 = vcmask 130048   ;;  %vm230_vm3 = vcmask 125952   ;;  %s380_s1 = inlined_call_operand.vmem [shape: bf16[72,16], index: 1, kind: input, shape index: {}]   ;;  %s381_s0 = inlined_call_operand.vmem [shape: bf16[32,72], index: 0, kind: input, shape index: {}]   ;;  %s382_s2 = inlined_call_operand.vmem [shape: f32[1,16], index: 2, kind: input, shape index: {}]   ;;  %s383_s3 = inlined_call_operand.vmem [shape: f32[1,16], index: 3, kind: input, shape index: {}]   ;;  %s384_s4 = inlined_call_operand.vmem [shape: f32[1,16], index: 4, kind: input, shape index: {}]   ;;  %s385_s5 = inlined_call_operand.vmem [shape: bf16[32,16], index: 5, kind: output, shape index: {}]  }
   0x1   :  { %v281_v0 = vld [vmem:[%s380_s1 + $0x20] ss:$0 sps:$4 sm:$0xff]   ;;  %v282_v1 = vld [vmem:[%s380_s1 + $0x18] sm:$0xff]   ;;  %v283_v3 = vld [vmem:[%s380_s1 + $0x10] sm:$0xff]  }
   0x2   :  { %280 = vmatprep.subr.msk.bf16.mxu0 %vm85_vm0, %v281_v0  ;;  %v87_v2 = vsel %vm85_vm0, %v281_v0, 0  ;;  %v286_v4 = vld [vmem:[%s381_s0] sm:$0xff]   ;;  %v284_v5 = vld [vmem:[%s380_s1 + $0x8] sm:$0xff]  }
   0x3   :  { %267 = vmatpush3.bf16.msra.mxu0 %v87_v2  ;;  %276 = vmatprep.mubr.msk.bf16.mxu0 %vm78_vm1, %v286_v4  ;;  %v285_v6 = vld [vmem:[%s380_s1] sm:$0xff]   ;;  %v287_v7 = vld [vmem:[%s381_s0 + $0x8] sm:$0xff]  }
   0x4   :  { %268 = vmatprep.subr.bf16.mxu0 %v282_v1  ;;  %v239_v8 = vld [vmem:[%s382_s2] ss:$0 sm:$0xff] }
   0x5   :  { %v249_v54 = vld [vmem:[%s383_s3] ss:$0 sm:$0xff] }
   0x6   :  { %v250_v56 = vld [vmem:[%s384_s4] ss:$0 sm:$0xff] }
   0x7   :  { %269 = vmatpush3.bf16.msra.mxu0 %v282_v1 }
   0x8   :  { %270 = vmatprep.subr.bf16.mxu0 %v283_v3 }
   0xb   :  { %271 = vmatpush3.bf16.msra.mxu0 %v283_v3 }
   0xc   :  { %272 = vmatprep.subr.bf16.mxu0 %v284_v5 }
   0xf   :  { %273 = vmatpush3.bf16.msra.mxu0 %v284_v5 }
  0x10   :  { %274 = vmatprep.subr.bf16.mxu0 %v285_v6 }
  0x13   :  { %275 = vmatpush3.bf16.msra.mxu0 %v285_v6 }
  0x16   :  { %277 = vmatmul.mubr.msk.bf16.vlgmr.msra.gmra.mxu0 %vm78_vm1, %v287_v7 }
  0xd6   :  { %v278_v9 = vpop.f32.mrf.mxu0 }
  0xd7   :  { %v132_v10 = vadd.f32 %v278_v9, %v239_v8 }
  0xd8   :  { %v123_v11 = vpop.f32.mrf.mxu0 }
  0xd9   :  { %v124_v12 = vadd.f32 %v239_v8, %v123_v11  ;;  %v147_v13 = vsel %vm140_vm2, %v132_v10, 0.0 }
  0xda   :  { %148 = vadd.xlane.f32.xlu1 %v147_v13  ;;  %v279_v14 = vpop.f32.mrf.mxu0 }
  0xdb   :  { %v135_v15 = vadd.f32 %v279_v14, %v239_v8  ;;  %v141_v16 = vsel %vm140_vm2, %v124_v12, 0.0 }
  0xdc   :  { %v126_v17 = vpop.f32.mrf.mxu0  ;;  %142 = vadd.xlane.f32.xlu0 %v141_v16 }
  0xdd   :  { %v127_v18 = vadd.f32 %v239_v8, %v126_v17  ;;  %v150_v19 = vsel %vm140_vm2, %v135_v15, 0.0 }
  0xde   :  { %151 = vadd.xlane.f32.xlu1 %v150_v19 }
  0xdf   :  { %v144_v20 = vsel %vm140_vm2, %v127_v18, 0.0 }
  0xe0   :  { %145 = vadd.xlane.f32.xlu0 %v144_v20 }
 0x163   :  { %v149_v21 = vpop.xlane.xlu1 %148 }
 0x164   :  { %v156_v22 = vmul.f32 0.0625, %v149_v21 }
 0x165   :  { %v143_v23 = vpop.xlane.xlu0 %142 }
 0x166   :  { %v154_v24 = vmul.f32 0.0625, %v143_v23  ;;  %v160_v26 = vsub.f32 %v132_v10, %v156_v22 }
 0x167   :  { %v152_v25 = vpop.xlane.xlu1 %151 }
 0x168   :  { %v158_v27 = vsub.f32 %v124_v12, %v154_v24  ;;  %v157_v28 = vmul.f32 0.0625, %v152_v25  ;;  %v164_v35 = vmul.f32 %v160_v26, %v160_v26 }
 0x169   :  { %v146_v29 = vpop.xlane.xlu0 %145 }
 0x16a   :  { %v155_v30 = vmul.f32 0.0625, %v146_v29  ;;  %v162_v31 = vmul.f32 %v158_v27, %v158_v27  ;;  %v161_v32 = vsub.f32 %v135_v15, %v157_v28  ;;  %v172_v37 = vsel %vm140_vm2, %v164_v35, 0.0 }
 0x16c   :  { %v159_v33 = vsub.f32 %v127_v18, %v155_v30  ;;  %v166_v34 = vsel %vm140_vm2, %v162_v31, 0.0  ;;  %v165_v39 = vmul.f32 %v161_v32, %v161_v32 }
 0x16d   :  { %167 = vadd.xlane.f32.xlu0 %v166_v34 }
 0x16e   :  { %v163_v36 = vmul.f32 %v159_v33, %v159_v33  ;;  %v175_v40 = vsel %vm140_vm2, %v165_v39, 0.0 }
 0x170   :  { %v169_v38 = vsel %vm140_vm2, %v163_v36, 0.0 }
 0x171   :  { %173 = vadd.xlane.f32.xlu0 %v172_v37  ;;  %170 = vadd.xlane.f32.xlu1 %v169_v38 }
 0x175   :  { %176 = vadd.xlane.f32.xlu1 %v175_v40 }
 0x1f6   :  { %v168_v41 = vpop.xlane.xlu0 %167 }
 0x1f7   :  { %v178_v42 = vmul.f32 0.0625, %v168_v41 }
 0x1f9   :  { %v182_v43 = vadd.f32 1e-06, %v178_v42 }
 0x1fa   :  { %v171_v44 = vpop.xlane.xlu1 %170  ;;  %v174_v45 = vpop.xlane.xlu0 %173 }
 0x1fb   :  { %288 = vrsqrt.f32 %v182_v43  ;;  %v179_v46 = vmul.f32 0.0625, %v171_v44  ;;  %v180_v47 = vmul.f32 0.0625, %v174_v45 }
 0x1fd   :  { %v183_v48 = vadd.f32 1e-06, %v179_v46  ;;  %v184_v49 = vadd.f32 1e-06, %v180_v47 }
 0x1fe   :  { %v177_v50 = vpop.xlane.xlu1 %176 }
 0x1ff   :  { %290 = vrsqrt.f32 %v183_v48  ;;  %v181_v51 = vmul.f32 0.0625, %v177_v50 }
 0x200   :  { %292 = vrsqrt.f32 %v184_v49 }
 0x201   :  { %v185_v52 = vadd.f32 1e-06, %v181_v51 }
 0x203   :  { %294 = vrsqrt.f32 %v185_v52 }
 0x208   :  { %v289_v53 = vpop.eup %288 }
 0x209   :  { %v190_v55 = vmul.f32 %v289_v53, %v158_v27 }
 0x20b   :  { %v200_v57 = vmul.f32 %v249_v54, %v190_v55 }
 0x20c   :  { %v291_v58 = vpop.eup %290 }
 0x20d   :  { %v293_v59 = vpop.eup %292  ;;  %v210_v60 = vadd.f32 %v250_v56, %v200_v57  ;;  %v191_v61 = vmul.f32 %v291_v58, %v159_v33 }
 0x20e   :  { %v192_v62 = vmul.f32 %v293_v59, %v160_v26 }
 0x20f   :  { %v255_v63 = vpack.c.bf16 %v210_v60, %v210_v60  ;;  %v201_v0 = vmul.f32 %v249_v54, %v191_v61 }
 0x210   :  { %v295_v1 = vpop.eup %294  ;;  %v202_v2 = vmul.f32 %v249_v54, %v192_v62 }
 0x211   :  { %231 = vst.msk [vmem:[%s385_s5] sm:$0xf] %vm230_vm3, %v255_v63  ;;  %v211_v3 = vadd.f32 %v250_v56, %v201_v0  ;;  %v193_v4 = vmul.f32 %v295_v1, %v161_v32 }
 0x212   :  { %v212_v5 = vadd.f32 %v250_v56, %v202_v2 }
 0x213   :  { %v256_v6 = vpack.c.bf16 %v211_v3, %v211_v3  ;;  %v203_v7 = vmul.f32 %v249_v54, %v193_v4 }
 0x214   :  { %v257_v8 = vpack.c.bf16 %v212_v5, %v212_v5 }
 0x215   :  { %232 = vst.msk [vmem:[%s385_s5 + $0x4] sm:$0xf] %vm230_vm3, %v256_v6  ;;  %v213_v9 = vadd.f32 %v250_v56, %v203_v7 }
 0x216   :  { %233 = vst.msk [vmem:[%s385_s5 + $0x8] sm:$0xf] %vm230_vm3, %v257_v8 }
 0x217   :  { %v258_v10 = vpack.c.bf16 %v213_v9, %v213_v9 }
 0x219   :  { %234 = vst.msk [vmem:[%s385_s5 + $0xc] sm:$0xf] %vm230_vm3, %v258_v10 }

// kernel: poolformer_forward.23
= control target key start
LH: loop header
LB: loop body
LE: loop exit
PB: predicated region body
PF: predicated region fallthrough
CT: control target
= control target key end

     0   :  { %vm31_vm0 = vcmask 130048   ;;  %vm213_vm1 = vcmask 519168   ;;  %s345_s0 = inlined_call_operand.vmem [shape: bf16[32,16], index: 0, kind: input, shape index: {}]   ;;  %s346_s3 = inlined_call_operand.vmem [shape: bf16[16,64], index: 3, kind: input, shape index: {}]   ;;  %s347_s1 = inlined_call_operand.vmem [shape: f32[1,16], index: 1, kind: input, shape index: {}]   ;;  %s348_s2 = inlined_call_operand.vmem [shape: f32[1,16], index: 2, kind: input, shape index: {}]   ;;  %s349_s4 = inlined_call_operand.vmem [shape: f32[1,64], index: 4, kind: input, shape index: {}]   ;;  %s350_s5 = inlined_call_operand.vmem [shape: bf16[32,64], index: 5, kind: output, shape index: {}]  }
   0x1   :  { %v237_v0 = vld [vmem:[%s345_s0] sm:$0xff]   ;;  %v244_v1 = vld [vmem:[%s345_s0 + $0x8] sm:$0xff]  }
   0x2   :  { %v238_v2 = vunpack.c.l.bf16 %v237_v0  ;;  %v242_v3 = vunpack.c.l.bf16 %v244_v1  ;;  %v239_v4 = vunpack.c.h.bf16 %v237_v0  ;;  %v243_v5 = vunpack.c.h.bf16 %v244_v1  ;;  %v254_v30 = vld [vmem:[%s346_s3] sm:$0xff]  }
   0x3   :  { %248 = vmatprep.subr.bf16.mxu0 %v254_v30  ;;  %v222_v45 = vld [vmem:[%s347_s1] ss:$0 sm:$0xff] }
   0x4   :  { %v32_v6 = vsel %vm31_vm0, %v238_v2, 0.0  ;;  %v38_v7 = vsel %vm31_vm0, %v242_v3, 0.0  ;;  %v35_v8 = vsel %vm31_vm0, %v239_v4, 0.0  ;;  %v41_v9 = vsel %vm31_vm0, %v243_v5, 0.0  ;;  %249 = vmatpush3.bf16.msra.mxu0 %v254_v30  ;;  %v223_v50 = vld [vmem:[%s348_s2] ss:$0 sm:$0xff] }
   0x5   :  { %33 = vadd.xlane.f32.xlu0 %v32_v6  ;;  %39 = vadd.xlane.f32.xlu1 %v38_v7  ;;  %v224_v63 = vld [vmem:[%s349_s4] ss:$0 sm:$0xff] }
   0x9   :  { %36 = vadd.xlane.f32.xlu0 %v35_v8  ;;  %42 = vadd.xlane.f32.xlu1 %v41_v9 }
  0x8e   :  { %v34_v10 = vpop.xlane.xlu0 %33  ;;  %v40_v11 = vpop.xlane.xlu1 %39 }
  0x8f   :  { %v45_v12 = vmul.f32 0.0625, %v34_v10  ;;  %v47_v13 = vmul.f32 0.0625, %v40_v11 }
  0x91   :  { %v49_v14 = vsub.f32 %v238_v2, %v45_v12  ;;  %v51_v15 = vsub.f32 %v242_v3, %v47_v13 }
  0x92   :  { %v37_v16 = vpop.xlane.xlu0 %36  ;;  %v43_v17 = vpop.xlane.xlu1 %42 }
  0x93   :  { %v46_v18 = vmul.f32 0.0625, %v37_v16  ;;  %v48_v19 = vmul.f32 0.0625, %v43_v17  ;;  %v53_v20 = vmul.f32 %v49_v14, %v49_v14  ;;  %v55_v21 = vmul.f32 %v51_v15, %v51_v15 }
  0x95   :  { %v50_v22 = vsub.f32 %v239_v4, %v46_v18  ;;  %v52_v23 = vsub.f32 %v243_v5, %v48_v19  ;;  %v57_v24 = vsel %vm31_vm0, %v53_v20, 0.0  ;;  %v63_v25 = vsel %vm31_vm0, %v55_v21, 0.0 }
  0x96   :  { %58 = vadd.xlane.f32.xlu0 %v57_v24 }
  0x97   :  { %v54_v26 = vmul.f32 %v50_v22, %v50_v22  ;;  %v56_v27 = vmul.f32 %v52_v23, %v52_v23 }
  0x99   :  { %v60_v28 = vsel %vm31_vm0, %v54_v26, 0.0  ;;  %v66_v29 = vsel %vm31_vm0, %v56_v27, 0.0 }
  0x9a   :  { %64 = vadd.xlane.f32.xlu0 %v63_v25  ;;  %61 = vadd.xlane.f32.xlu1 %v60_v28 }
  0x9e   :  { %67 = vadd.xlane.f32.xlu1 %v66_v29 }
 0x11f   :  { %v59_v31 = vpop.xlane.xlu0 %58 }
 0x120   :  { %v69_v32 = vmul.f32 0.0625, %v59_v31 }
 0x122   :  { %v73_v33 = vadd.f32 1e-06, %v69_v32 }
 0x123   :  { %v62_v34 = vpop.xlane.xlu1 %61  ;;  %v65_v35 = vpop.xlane.xlu0 %64 }
 0x124   :  { %255 = vrsqrt.f32 %v73_v33  ;;  %v70_v36 = vmul.f32 0.0625, %v62_v34  ;;  %v71_v37 = vmul.f32 0.0625, %v65_v35 }
 0x126   :  { %v74_v38 = vadd.f32 1e-06, %v70_v36  ;;  %v75_v39 = vadd.f32 1e-06, %v71_v37 }
 0x127   :  { %v68_v40 = vpop.xlane.xlu1 %67 }
 0x128   :  { %257 = vrsqrt.f32 %v74_v38  ;;  %v72_v41 = vmul.f32 0.0625, %v68_v40 }
 0x129   :  { %259 = vrsqrt.f32 %v75_v39 }
 0x12a   :  { %v76_v42 = vadd.f32 1e-06, %v72_v41 }
 0x12c   :  { %261 = vrsqrt.f32 %v76_v42 }
 0x131   :  { %v256_v43 = vpop.eup %255 }
 0x132   :  { %v81_v44 = vmul.f32 %v256_v43, %v49_v14 }
 0x134   :  { %v91_v49 = vmul.f32 %v222_v45, %v81_v44 }
 0x135   :  { %v258_v46 = vpop.eup %257 }
 0x136   :  { %v260_v47 = vpop.eup %259  ;;  %v82_v48 = vmul.f32 %v258_v46, %v50_v22  ;;  %v101_v54 = vadd.f32 %v223_v50, %v91_v49 }
 0x137   :  { %v83_v51 = vmul.f32 %v260_v47, %v51_v15 }
 0x138   :  { %v92_v52 = vmul.f32 %v222_v45, %v82_v48 }
 0x139   :  { %v262_v53 = vpop.eup %261  ;;  %v93_v57 = vmul.f32 %v222_v45, %v83_v51 }
 0x13a   :  { %v102_v55 = vadd.f32 %v223_v50, %v92_v52  ;;  %v84_v56 = vmul.f32 %v262_v53, %v52_v23 }
 0x13b   :  { %v103_v60 = vadd.f32 %v223_v50, %v93_v57 }
 0x13c   :  { %v105_v58 = vpack.c.bf16 %v102_v55, %v101_v54  ;;  %v94_v59 = vmul.f32 %v222_v45, %v84_v56 }
 0x13e   :  { %250 = vmatprep.mubr.msk.bf16.mxu0 %vm31_vm0, %v105_v58  ;;  %v104_v61 = vadd.f32 %v223_v50, %v94_v59 }
 0x140   :  { %v106_v62 = vpack.c.bf16 %v104_v61, %v103_v60 }
 0x142   :  { %251 = vmatmul.mubr.msk.bf16.vlgmr.msra.gmra.mxu0 %vm31_vm0, %v106_v62 }
 0x202   :  { %v252_v0 = vpop.f32.mrf.mxu0 }
 0x203   :  { %v171_v1 = vadd.f32 %v252_v0, %v224_v63 }
 0x204   :  { %v162_v2 = vpop.f32.mrf.mxu0 }
 0x205   :  { %v183_v3 = vmul.f32 0.70710677, %v171_v1  ;;  %v163_v4 = vadd.f32 %v224_v63, %v162_v2  ;;  %v179_v13 = vmul.f32 0.5, %v171_v1 }
 0x206   :  { %v253_v5 = vpop.f32.mrf.mxu0 }
 0x207   :  { %263 = verf.f32 %v183_v3  ;;  %v181_v6 = vmul.f32 0.70710677, %v163_v4  ;;  %v174_v7 = vadd.f32 %v253_v5, %v224_v63  ;;  %v177_v17 = vmul.f32 0.5, %v163_v4 }
 0x208   :  { %v165_v8 = vpop.f32.mrf.mxu0 }
 0x209   :  { %265 = verf.f32 %v181_v6  ;;  %v184_v9 = vmul.f32 0.70710677, %v174_v7  ;;  %v166_v10 = vadd.f32 %v224_v63, %v165_v8  ;;  %v180_v22 = vmul.f32 0.5, %v174_v7 }
 0x20b   :  { %267 = verf.f32 %v184_v9  ;;  %v182_v11 = vmul.f32 0.70710677, %v166_v10  ;;  %v178_v27 = vmul.f32 0.5, %v166_v10 }
 0x20d   :  { %269 = verf.f32 %v182_v11 }
 0x214   :  { %v264_v12 = vpop.eup %263 }
 0x215   :  { %v191_v14 = vadd.f32 1.0, %v264_v12 }
 0x216   :  { %v266_v15 = vpop.eup %265 }
 0x217   :  { %v195_v16 = vmul.f32 %v191_v14, %v179_v13  ;;  %v189_v18 = vadd.f32 1.0, %v266_v15 }
 0x218   :  { %v268_v19 = vpop.eup %267 }
 0x219   :  { %v234_v20 = vpack.c.bf16 %v195_v16, %v195_v16  ;;  %v193_v21 = vmul.f32 %v189_v18, %v177_v17  ;;  %v192_v23 = vadd.f32 1.0, %v268_v19 }
 0x21a   :  { %v270_v24 = vpop.eup %269 }
 0x21b   :  { %216 = vst.msk [vmem:[%s350_s5 + $0x8] sm:$0xf] %vm213_vm1, %v234_v20  ;;  %v232_v25 = vpack.c.bf16 %v193_v21, %v193_v21  ;;  %v196_v26 = vmul.f32 %v192_v23, %v180_v22  ;;  %v190_v28 = vadd.f32 1.0, %v270_v24 }
 0x21d   :  { %214 = vst.msk [vmem:[%s350_s5] sm:$0xf] %vm213_vm1, %v232_v25  ;;  %v235_v29 = vpack.c.bf16 %v196_v26, %v196_v26  ;;  %v194_v30 = vmul.f32 %v190_v28, %v178_v27 }
 0x21f   :  { %217 = vst.msk [vmem:[%s350_s5 + $0xc] sm:$0xf] %vm213_vm1, %v235_v29  ;;  %v233_v31 = vpack.c.bf16 %v194_v30, %v194_v30 }
 0x221   :  { %215 = vst.msk [vmem:[%s350_s5 + $0x4] sm:$0xf] %vm213_vm1, %v233_v31 }

// kernel: poolformer_forward.22
= control target key start
LH: loop header
LB: loop body
LE: loop exit
PB: predicated region body
PF: predicated region fallthrough
CT: control target
= control target key end

     0   :  { %s628_s12 = smov 0   ;;  %s745_s0 = inlined_call_operand.vmem [shape: bf16[2,6,6,16], index: 0, kind: input, shape index: {}]   ;;  %s746_s1 = inlined_call_operand.vmem [shape: f32[1,16], index: 1, kind: input, shape index: {}]   ;;  %s747_s2 = inlined_call_operand.vmem [shape: f32[1,16], index: 2, kind: input, shape index: {}]   ;;  %s748_s3 = inlined_call_operand.vmem [shape: bf16[2,4,4,16], index: 3, kind: output, shape index: {}]  }
   0x1 LB: > { %s555_s13 = sadd.s32 4294967295, %s604_s12   ;;  %p559_p0 = scmp.ge.s32.totalorder %s604_s12, 1  ;;  %s604_s12 = sphi %s628_s12, %s13_s12  }
   0x2   : > { %p137_p1 = scmp.lt.s32.totalorder %s604_s12, 3 }
   0x4   : > { %p138_p2 = pnand %p559_p0, %p137_p1 }
   0x5   : > { %p161_p3 = scmp.lt.s32.totalorder (!%p138_p2), %s555_s13, 1 }
   0x6   : > { %141 = sbr.rel (%p138_p2) target bundleno = 373 (0x175), region = 32 }
   0xb   : > { %s752_s13 = smov (!%p161_p3, %s555_s13), 1  ;;  %vm185_vm0 = vcmask 128000   ;;  %v289_v48 = vlaneseq  ;;  %v606_v63 = vmov 0.0   ;;  %vm428_vm6 = vsmask.f32 1280 }
   0xc   : > { %s571_s14 = smul.u32 24, %s752_s13  ;;  %vm429_vm7 = vsmask.f32 3336  ;;  %vm431_vm9 = vsmask.f32 5392  ;;  %s570_s22 = sshll.u32 %s752_s13, 3 }
   0xd   : > { %v694_v52 = vshrl.u32 %v289_v48, 7  ;;  %vm430_vm8 = vmor %vm428_vm6, %vm429_vm7  ;;  %vm433_vm10 = vsmask.f32 7448  ;;  %vm495_vm12 = vcmask 123904   ;;  %s170_s25 = scalar_lea.vmem %s748_s3, %s570_s22 }
   0xe   : > { %s165_s17 = scalar_lea.vmem %s745_s0, %s571_s14  ;;  %vm432_vm11 = vmor %vm430_vm8, %vm431_vm9 }
   0xf   : > { %v171_v0 = vld [vmem:[%s165_s17] sm:$0x7]  ;;  %v173_v1 = vld [vmem:[%s165_s17 + $0x8] sm:$0x7]  ;;  %v172_v2 = vld [vmem:[%s165_s17 + $0x4] sm:$0x7] }
  0x10   : > { %v177_v3 = vunpack.c.l.bf16 %v171_v0  ;;  %v642_v4 = vunpack.c.l.bf16 %v173_v1  ;;  %v644_v5 = vunpack.c.l.bf16 %v172_v2  ;;  %v174_v6 = vld [vmem:[%s165_s17 + $0xc] sm:$0x7]  ;;  %v175_v8 = vld [vmem:[%s165_s17 + $0x10] sm:$0x7]  ;;  %v176_v9 = vld [vmem:[%s165_s17 + $0x14] sm:$0x7] }
  0x11   : > { %v646_v7 = vunpack.c.l.bf16 %v174_v6  ;;  %v655_v14 = vunpack.c.l.bf16 %v175_v8  ;;  %v182_v15 = vunpack.c.l.bf16 %v176_v9  ;;  %vm350_vm1 = vcmp.eq.s32.totalorder %v694_v52, 0  ;;  %vm723_vm13 = vmor %vm432_vm11, %vm433_vm10 }
  0x12   : > { %v186_v10 = vsel %vm185_vm0, %v177_v3, 0.0  ;;  %v192_v11 = vsel %vm185_vm0, %v642_v4, 0.0  ;;  %v189_v12 = vsel %vm185_vm0, %v644_v5, 0.0  ;;  %v566_v0 = vsel %vm350_vm1, 1.0, %v606_v63 }
  0x13   : > { %187 = vadd.xlane.f32.xlu0 %v186_v10  ;;  %193 = vadd.xlane.f32.xlu1 %v192_v11  ;;  %v195_v13 = vsel %vm185_vm0, %v646_v7, 0.0  ;;  %v198_v16 = vsel %vm185_vm0, %v655_v14, 0.0  ;;  %v201_v17 = vsel %vm185_vm0, %v182_v15, 0.0  ;;  %vm354_vm2 = vcmp.eq.s32.totalorder %v694_v52, 3 }
  0x14   : > { %v353_v6 = vsub.f32 3.0, %v566_v0  ;;  %v567_v9 = vsel %vm354_vm2, 1.0, %v606_v63  ;;  %vm291_vm3 = vcmp.ge.s32.totalorder %v694_v52, 1  ;;  %vm294_vm4 = vcmp.le.s32.totalorder %v694_v52, 4 }
  0x15   : > { %vm296_vm5 = vmand %vm291_vm3, %vm294_vm4 }
  0x16   : > { %v357_v11 = vsub.f32 %v353_v6, %v567_v9 }
  0x17   : > { %190 = vadd.xlane.f32.xlu0 %v189_v12  ;;  %196 = vadd.xlane.f32.xlu1 %v195_v13  ;;  %v563_v13 = vld [vmem:[%s746_s1] ss:$0 sm:$0xff] }
  0x1b   : > { %199 = vadd.xlane.f32.xlu0 %v198_v16  ;;  %202 = vadd.xlane.f32.xlu1 %v201_v17  ;;  %v358_v17 = vmul.f32 2.0, %v357_v11 }
  0x9c   : > { %v188_v18 = vpop.xlane.xlu0 %187  ;;  %v194_v19 = vpop.xlane.xlu1 %193 }
  0x9d   : > { %v205_v20 = vmul.f32 0.0625, %v188_v18  ;;  %v207_v21 = vmul.f32 0.0625, %v194_v19  ;;  %v564_v19 = vld [vmem:[%s747_s2] ss:$0 sm:$0xff] }
  0x9f   : > { %v660_v22 = vsub.f32 %v177_v3, %v205_v20  ;;  %v663_v23 = vsub.f32 %v642_v4, %v207_v21  ;;  %v359_v21 = vmul.f32 3.0, %v357_v11 }
  0xa0   : > { %v191_v24 = vpop.xlane.xlu0 %190  ;;  %v197_v25 = vpop.xlane.xlu1 %196 }
  0xa1   : > { %v206_v26 = vmul.f32 0.0625, %v191_v24  ;;  %v208_v27 = vmul.f32 0.0625, %v197_v25  ;;  %v217_v28 = vmul.f32 %v660_v22, %v660_v22  ;;  %v219_v29 = vmul.f32 %v663_v23, %v663_v23 }
  0xa3   : > { %v670_v30 = vsub.f32 %v644_v5, %v206_v26  ;;  %v673_v31 = vsub.f32 %v646_v7, %v208_v27  ;;  %v223_v32 = vsel %vm185_vm0, %v217_v28, 0.0  ;;  %v229_v35 = vsel %vm185_vm0, %v219_v29, 0.0 }
  0xa4   : > { %224 = vadd.xlane.f32.xlu0 %v223_v32  ;;  %v200_v33 = vpop.xlane.xlu0 %199  ;;  %v203_v34 = vpop.xlane.xlu1 %202  ;;  %v565_v28 = vsel %vm296_vm5, 1.0, %v606_v63 }
  0xa5   : > { %v209_v36 = vmul.f32 0.0625, %v200_v33  ;;  %v210_v37 = vmul.f32 0.0625, %v203_v34  ;;  %v218_v38 = vmul.f32 %v670_v30, %v670_v30  ;;  %v220_v39 = vmul.f32 %v673_v31, %v673_v31 }
  0xa7   : > { %v682_v40 = vsub.f32 %v655_v14, %v209_v36  ;;  %v684_v41 = vsub.f32 %v182_v15, %v210_v37  ;;  %v226_v42 = vsel %vm185_vm0, %v218_v38, 0.0  ;;  %v232_v43 = vsel %vm185_vm0, %v220_v39, 0.0 }
  0xa8   : > { %230 = vadd.xlane.f32.xlu0 %v229_v35  ;;  %227 = vadd.xlane.f32.xlu1 %v226_v42 }
  0xa9   : > { %v221_v44 = vmul.f32 %v682_v40, %v682_v40  ;;  %v222_v45 = vmul.f32 %v684_v41, %v684_v41 }
  0xab   : > { %v235_v46 = vsel %vm185_vm0, %v221_v44, 0.0  ;;  %v238_v47 = vsel %vm185_vm0, %v222_v45, 0.0 }
  0xac   : > { %233 = vadd.xlane.f32.xlu1 %v232_v43  ;;  %236 = vadd.xlane.f32.xlu0 %v235_v46 }
  0xb0   : > { %239 = vadd.xlane.f32.xlu1 %v238_v47 }
 0x12d   : > { %v225_v49 = vpop.xlane.xlu0 %224 }
 0x12e   : > { %v241_v50 = vmul.f32 0.0625, %v225_v49 }
 0x130   : > { %v247_v51 = vadd.f32 1e-06, %v241_v50 }
 0x131   : > { %v228_v53 = vpop.xlane.xlu1 %227  ;;  %v231_v54 = vpop.xlane.xlu0 %230 }
 0x132   : > { %582 = vrsqrt.f32 %v247_v51  ;;  %v242_v55 = vmul.f32 0.0625, %v228_v53  ;;  %v243_v56 = vmul.f32 0.0625, %v231_v54 }
 0x134   : > { %v248_v57 = vadd.f32 1e-06, %v242_v55  ;;  %v249_v58 = vadd.f32 1e-06, %v243_v56 }
 0x135   : > { %v234_v59 = vpop.xlane.xlu1 %233  ;;  %v237_v60 = vpop.xlane.xlu0 %236 }
 0x136   : > { %584 = vrsqrt.f32 %v248_v57  ;;  %v244_v61 = vmul.f32 0.0625, %v234_v59  ;;  %v245_v62 = vmul.f32 0.0625, %v237_v60  ;;  %v607_v60 = vmov 1983009808  }
 0x137   : > { %586 = vrsqrt.f32 %v249_v58 }
 0x138   : > { %v250_v1 = vadd.f32 1e-06, %v244_v61  ;;  %v251_v2 = vadd.f32 1e-06, %v245_v62  ;;  %v397_v61 = vunpack.c.l.s4 %v607_v60 }
 0x139   : > { %v240_v3 = vpop.xlane.xlu1 %239 }
 0x13a   : > { %588 = vrsqrt.f32 %v250_v1  ;;  %v246_v8 = vmul.f32 0.0625, %v240_v3 }
 0x13b   : > { %590 = vrsqrt.f32 %v251_v2 }
 0x13c   : > { %v252_v10 = vadd.f32 1e-06, %v246_v8 }
 0x13e   : > { %592 = vrsqrt.f32 %v252_v10 }
 0x13f   : > { %v583_v12 = vpop.eup %582  ;;  %594 = vrcp.f32 %v358_v17 }
 0x140   : > { %v259_v15 = vmul.f32 %v583_v12, %v660_v22  ;;  %596 = vrcp.f32 %v359_v21 }
 0x142   : > { %v271_v16 = vmul.f32 %v563_v13, %v259_v15 }
 0x143   : > { %v585_v18 = vpop.eup %584 }
 0x144   : > { %v587_v20 = vpop.eup %586  ;;  %v260_v24 = vmul.f32 %v585_v18, %v670_v30  ;;  %v283_v26 = vadd.f32 %v564_v19, %v271_v16 }
 0x145   : > { %v261_v25 = vmul.f32 %v587_v20, %v663_v23 }
 0x146   : > { %v272_v22 = vmul.f32 %v563_v13, %v260_v24  ;;  %v301_v37 = vmul.f32 0.0, %v283_v26 }
 0x147   : > { %v589_v27 = vpop.eup %588  ;;  %v273_v29 = vmul.f32 %v563_v13, %v261_v25 }
 0x148   : > { %v591_v32 = vpop.eup %590  ;;  %v284_v33 = vadd.f32 %v564_v19, %v272_v22  ;;  %v262_v34 = vmul.f32 %v589_v27, %v673_v31 }
 0x149   : > { %v285_v35 = vadd.f32 %v564_v19, %v273_v29  ;;  %v263_v36 = vmul.f32 %v591_v32, %v682_v40 }
 0x14a   : > { %v302_v38 = vmul.f32 %v565_v28, %v284_v33  ;;  %v274_v39 = vmul.f32 %v563_v13, %v262_v34 }
 0x14b   : > { %v593_v30 = vpop.eup %592  ;;  %v303_v42 = vmul.f32 %v565_v28, %v285_v35  ;;  %v275_v23 = vmul.f32 %v563_v13, %v263_v36 }
 0x14c   : > { %v307_v43 = vadd.f32 %v302_v38, %v301_v37  ;;  %v286_v44 = vadd.f32 %v564_v19, %v274_v39  ;;  %v264_v45 = vmul.f32 %v593_v30, %v684_v41  ;;  %v595_v59 = vpop.eup %594 }
 0x14d   : > { %v712_v46 = vadd.f32 %v564_v19, %v275_v23  ;;  %v308_v47 = vadd.f32 %v303_v42, %v302_v38  ;;  %v597_v3 = vpop.eup %596 }
 0x14e   : > { %v311_v48 = vadd.f32 %v307_v43, %v303_v42  ;;  %v304_v49 = vmul.f32 %v565_v28, %v286_v44  ;;  %v276_v50 = vmul.f32 %v563_v13, %v264_v45  ;;  %v398_v13 = vunpack.c.0.s8 %v397_v61 }
 0x14f   : > { %v305_v31 = vmul.f32 %v565_v28, %v712_v46 }
 0x150   : > { %v319_v51 = vrot.slane %v311_v48, 1  ;;  %v312_v40 = vadd.f32 %v308_v47, %v304_v49  ;;  %v309_v53 = vadd.f32 %v304_v49, %v303_v42  ;;  %v288_v54 = vadd.f32 %v564_v19, %v276_v50 }
 0x151   : > { %v331_v56 = vrot.slane %v311_v48, 2  ;;  %v310_v41 = vadd.f32 %v305_v31, %v304_v49  ;;  %v401_v26 = vsub.s32 %v398_v13, %v694_v52 }
 0x152   : > { %v327_v55 = vadd.f32 %v319_v51, %v311_v48  ;;  %v320_v57 = vrot.slane %v312_v40, 1  ;;  %v313_v58 = vadd.f32 %v309_v53, %v305_v31  ;;  %v306_v62 = vmul.f32 0.0, %v288_v54 }
 0x153   : > { %v332_v1 = vrot.slane %v312_v40, 2 }
 0x154   : > { %v339_v63 = vadd.f32 %v331_v56, %v327_v55  ;;  %v328_v0 = vadd.f32 %v320_v57, %v312_v40  ;;  %v321_v2 = vrot.slane %v313_v58, 1  ;;  %v314_v6 = vadd.f32 %v310_v41, %v306_v62 }
 0x155   : > { %v333_v11 = vrot.slane %v313_v58, 2 }
 0x156   : > { %v362_v8 = vmul.f32 %v595_v59, %v339_v63  ;;  %v340_v9 = vadd.f32 %v332_v1, %v328_v0  ;;  %v329_v10 = vadd.f32 %v321_v2, %v313_v58  ;;  %v322_v12 = vrot.slane %v314_v6, 1 }
 0x157   : > { %v334_v19 = vrot.slane %v314_v6, 2 }
 0x158   : > { %v372_v15 = vrot.slane %v362_v8, 7  ;;  %v364_v16 = vmul.f32 %v597_v3, %v340_v9  ;;  %v341_v17 = vadd.f32 %v333_v11, %v329_v10  ;;  %v330_v18 = vadd.f32 %v322_v12, %v314_v6 }
 0x15a   : > { %v380_v20 = vadd.f32 %v372_v15, %v644_v5  ;;  %v373_v21 = vrot.slane %v364_v16, 7  ;;  %v365_v24 = vmul.f32 %v597_v3, %v341_v17  ;;  %v342_v25 = vadd.f32 %v334_v19, %v330_v18 }
 0x15c   : > { %v384_v22 = vsub.f32 %v380_v20, %v284_v33  ;;  %v381_v27 = vadd.f32 %v373_v21, %v642_v4  ;;  %v374_v28 = vrot.slane %v365_v24, 7  ;;  %v367_v29 = vmul.f32 %v595_v59, %v342_v25 }
 0x15e   : > { %v388_v32 = vpack.c.bf16 %v384_v22, %v384_v22  ;;  %v385_v34 = vsub.f32 %v381_v27, %v285_v35  ;;  %v382_v36 = vadd.f32 %v374_v28, %v646_v7  ;;  %v375_v37 = vrot.slane %v367_v29, 7 }
 0x160   : > { %v402_v38 = vrot.slane %v388_v32, %v401_v26  ;;  %v389_v39 = vpack.c.bf16 %v385_v34, %v385_v34  ;;  %v386_v5 = vsub.f32 %v382_v36, %v286_v44  ;;  %v383_v52 = vadd.f32 %v375_v37, %v655_v14 }
 0x162   : > { %v403_v33 = vcombine.high %v402_v38, %v402_v38  ;;  %v436_v30 = vshrl.u32 %v402_v38, 16  ;;  %v439_v4 = vshll.u32 %v402_v38, 16  ;;  %v410_v42 = vrot.slane %v389_v39, %v401_v26 }
 0x163   : > { %v390_v23 = vpack.c.bf16 %v386_v5, %v386_v5  ;;  %v387_v35 = vsub.f32 %v383_v52, %v712_v46 }
 0x164   : > { %v438_v43 = vrot.slane %v436_v30, 6  ;;  %v441_v45 = vrot.slane %v439_v4, 7  ;;  %v445_v7 = vshll.u32 %v403_v33, 16  ;;  %v411_v47 = vcombine.high %v410_v42, %v410_v42 }
 0x165   : > { %v450_v44 = vshrl.u32 %v410_v42, 16  ;;  %v453_v48 = vshll.u32 %v410_v42, 16  ;;  %v418_v49 = vrot.slane %v390_v23, %v401_v26  ;;  %v391_v50 = vpack.c.bf16 %v387_v35, %v387_v35 }
 0x166   : > { %v442_v31 = vor.u32 %v441_v45, %v438_v43  ;;  %v459_v14 = vshll.u32 %v411_v47, 16  ;;  %v447_v56 = vrot.slane %v445_v7, 7 }
 0x167   : > { %v452_v51 = vrot.slane %v450_v44, 6  ;;  %v455_v40 = vrot.slane %v453_v48, 7  ;;  %v419_v46 = vcombine.high %v418_v49, %v418_v49  ;;  %v464_v54 = vshrl.u32 %v418_v49, 16 }
 0x168   : > { %v443_v55 = vrot.slane %v442_v31, 2  ;;  %v467_v57 = vshll.u32 %v418_v49, 16  ;;  %v426_v58 = vrot.slane %v391_v50, %v401_v26  ;;  %v461_v2 = vrot.slane %v459_v14, 7 }
 0x169   : > { %v456_v59 = vor.u32 %v455_v40, %v452_v51  ;;  %v466_v60 = vrot.slane %v464_v54, 6  ;;  %v473_v61 = vshll.u32 %v419_v46, 16 }
 0x16a   : > { %v448_v41 = vsel %vm723_vm13, %v443_v55, %v447_v56  ;;  %v469_v62 = vrot.slane %v467_v57, 7  ;;  %v427_v63 = vcombine.high %v426_v58, %v426_v58  ;;  %v478_v0 = vshrl.u32 %v426_v58, 16 }
 0x16b   : > { %v457_v1 = vrot.slane %v456_v59, 2  ;;  %496 = vst.msk [vmem:[%s170_s25] sm:$0x3] %vm495_vm12, %v448_v41  ;;  %v481_v3 = vshll.u32 %v426_v58, 16  ;;  %v475_v13 = vrot.slane %v473_v61, 7 }
 0x16c   : > { %v470_v6 = vor.u32 %v469_v62, %v466_v60  ;;  %v480_v8 = vrot.slane %v478_v0, 6  ;;  %v487_v11 = vshll.u32 %v427_v63, 16 }
 0x16d   : > { %v462_v9 = vsel %vm723_vm13, %v457_v1, %v461_v2  ;;  %v483_v10 = vrot.slane %v481_v3, 7 }
 0x16e   : > { %497 = vst.msk [vmem:[%s170_s25 + $0x2] sm:$0x3] %vm495_vm12, %v462_v9  ;;  %v471_v12 = vrot.slane %v470_v6, 2  ;;  %v489_v18 = vrot.slane %v487_v11, 7 }
 0x16f   : > { %v484_v15 = vor.u32 %v483_v10, %v480_v8 }
 0x170   : > { %v476_v16 = vsel %vm723_vm13, %v471_v12, %v475_v13 }
 0x171   : > { %498 = vst.msk [vmem:[%s170_s25 + $0x4] sm:$0x3] %vm495_vm12, %v476_v16  ;;  %v485_v17 = vrot.slane %v484_v15, 2 }
 0x173   : > { %v490_v19 = vsel %vm723_vm13, %v485_v17, %v489_v18 }
 0x174   : > { %499 = vst.msk [vmem:[%s170_s25 + $0x6] sm:$0x3] %vm495_vm12, %v490_v19 }
 0x175 PF: > { %s13_s12 = sadd.s32 1, %s604_s12  }
 0x176   : > { %p10_p4 = scmp.ge.s32.totalorder %s13_s12, 4  }
 0x178   :  { %12 = sbr.rel (!%p10_p4) target bundleno = 1 (0x1), region = 62 }

// kernel: poolformer_forward.24
= control target key start
LH: loop header
LB: loop body
LE: loop exit
PB: predicated region body
PF: predicated region fallthrough
CT: control target
= control target key end

     0   :  { %vm71_vm0 = vcmask 523264   ;;  %vm155_vm1 = vcmask 125952   ;;  %s282_s1 = inlined_call_operand.vmem [shape: bf16[64,16], index: 1, kind: input, shape index: {}]   ;;  %s283_s0 = inlined_call_operand.vmem [shape: bf16[32,64], index: 0, kind: input, shape index: {}]   ;;  %s284_s3 = inlined_call_operand.vmem [shape: bf16[32,16], index: 3, kind: input, shape index: {}]   ;;  %s285_s2 = inlined_call_operand.vmem [shape: f32[1,16], index: 2, kind: input, shape index: {}]   ;;  %s286_s4 = inlined_call_operand.vmem [shape: bf16[32,16], index: 4, kind: output, shape index: {}]  }
   0x1   :  { %v208_v0 = vld [vmem:[%s282_s1 + $0x18] sm:$0xff]   ;;  %v209_v1 = vld [vmem:[%s282_s1 + $0x10] sm:$0xff]   ;;  %v210_v2 = vld [vmem:[%s282_s1 + $0x8] sm:$0xff]  }
   0x2   :  { %196 = vmatprep.subr.bf16.mxu0 %v208_v0  ;;  %v212_v3 = vld [vmem:[%s283_s0] sm:$0xff]   ;;  %v213_v5 = vld [vmem:[%s283_s0 + $0x8] sm:$0xff]  }
   0x3   :  { %197 = vmatpush3.bf16.msra.mxu0 %v208_v0  ;;  %204 = vmatprep.mubr.msk.bf16.mxu0 %vm71_vm0, %v212_v3  ;;  %v211_v4 = vld [vmem:[%s282_s1] sm:$0xff]   ;;  %v189_v6 = vld [vmem:[%s284_s3 + $0x8] sm:$0xff]  }
   0x4   :  { %198 = vmatprep.subr.bf16.mxu0 %v209_v1  ;;  %v164_v7 = vld [vmem:[%s285_s2] ss:$0 sm:$0xff]  ;;  %v187_v9 = vunpack.c.l.bf16 %v189_v6  ;;  %v188_v16 = vunpack.c.h.bf16 %v189_v6 }
   0x5   :  { %v182_v8 = vld [vmem:[%s284_s3] sm:$0xff]  }
   0x6   :  { %v183_v12 = vunpack.c.l.bf16 %v182_v8  ;;  %v184_v21 = vunpack.c.h.bf16 %v182_v8 }
   0x7   :  { %199 = vmatpush3.bf16.msra.mxu0 %v209_v1 }
   0x8   :  { %200 = vmatprep.subr.bf16.mxu0 %v210_v2 }
   0xb   :  { %201 = vmatpush3.bf16.msra.mxu0 %v210_v2 }
   0xc   :  { %202 = vmatprep.subr.bf16.mxu0 %v211_v4 }
   0xf   :  { %203 = vmatpush3.bf16.msra.mxu0 %v211_v4 }
  0x12   :  { %205 = vmatmul.mubr.msk.bf16.vlgmr.msra.gmra.mxu0 %vm71_vm0, %v213_v5 }
  0xd2   :  { %v206_v10 = vpop.f32.mrf.mxu0 }
  0xd3   :  { %v121_v11 = vadd.f32 %v206_v10, %v164_v7 }
  0xd4   :  { %v112_v13 = vpop.f32.mrf.mxu0 }
  0xd5   :  { %v137_v14 = vadd.f32 %v187_v9, %v121_v11  ;;  %v113_v15 = vadd.f32 %v164_v7, %v112_v13 }
  0xd6   :  { %v207_v17 = vpop.f32.mrf.mxu0 }
  0xd7   :  { %v179_v18 = vpack.c.bf16 %v137_v14, %v137_v14  ;;  %v135_v19 = vadd.f32 %v183_v12, %v113_v15  ;;  %v124_v20 = vadd.f32 %v207_v17, %v164_v7 }
  0xd8   :  { %v115_v22 = vpop.f32.mrf.mxu0 }
  0xd9   :  { %158 = vst.msk [vmem:[%s286_s4 + $0x8] sm:$0xf] %vm155_vm1, %v179_v18  ;;  %v177_v23 = vpack.c.bf16 %v135_v19, %v135_v19  ;;  %v138_v24 = vadd.f32 %v188_v16, %v124_v20  ;;  %v116_v25 = vadd.f32 %v164_v7, %v115_v22 }
  0xdb   :  { %156 = vst.msk [vmem:[%s286_s4] sm:$0xf] %vm155_vm1, %v177_v23  ;;  %v180_v26 = vpack.c.bf16 %v138_v24, %v138_v24  ;;  %v136_v27 = vadd.f32 %v184_v21, %v116_v25 }
  0xdd   :  { %159 = vst.msk [vmem:[%s286_s4 + $0xc] sm:$0xf] %vm155_vm1, %v180_v26  ;;  %v178_v28 = vpack.c.bf16 %v136_v27, %v136_v27 }
  0xdf   :  { %157 = vst.msk [vmem:[%s286_s4 + $0x4] sm:$0xf] %vm155_vm1, %v178_v28 }

// kernel: poolformer_forward.25
= control target key start
LH: loop header
LB: loop body
LE: loop exit
PB: predicated region body
PF: predicated region fallthrough
CT: control target
= control target key end

     0   :  { %v218_v0 = vmov 0   ;;  %vm107_vm0 = vcmask 130048   ;;  %vm153_vm1 = vcmask 261120   ;;  %vm183_vm2 = vcmask 257024   ;;  %s291_s1 = inlined_call_operand.vmem [shape: bf16[144,32], index: 1, kind: input, shape index: {}]   ;;  %s292_s0 = inlined_call_operand.vmem [shape: bf16[8,144], index: 0, kind: input, shape index: {}]   ;;  %s293_s2 = inlined_call_operand.vmem [shape: f32[1,32], index: 2, kind: input, shape index: {}]   ;;  %s294_s3 = inlined_call_operand.vmem [shape: f32[1,32], index: 3, kind: input, shape index: {}]   ;;  %s295_s4 = inlined_call_operand.vmem [shape: f32[1,32], index: 4, kind: input, shape index: {}]   ;;  %s296_s5 = inlined_call_operand.vmem [shape: bf16[8,32], index: 5, kind: output, shape index: {}]  }
   0x1   :  { %111 = vmatprep.subr.bf16.mxu0 %v218_v0  ;;  %v205_v1 = vld [vmem:[%s291_s1 + $0x38] sm:$0xff]   ;;  %v206_v2 = vld [vmem:[%s291_s1 + $0x30] sm:$0xff]   ;;  %v207_v3 = vld [vmem:[%s291_s1 + $0x28] sm:$0xff]  }
   0x2   :  { %112 = vmatpush1.bf16.msra.mxu0 %v205_v1  ;;  %v21_v4 = vld [vmem:[%s292_s0] sm:$0xff]  ;;  %v209_v7 = vld [vmem:[%s291_s1 + $0x18] sm:$0xff]   ;;  %v210_v8 = vld [vmem:[%s291_s1 + $0x10] sm:$0xff]  }
   0x3   :  { %113 = vmatprep.subr.bf16.mxu0 %v218_v0  ;;  %v208_v5 = vld [vmem:[%s291_s1 + $0x20] sm:$0xff]   ;;  %v191_v6 = vcombine.high %v21_v4, %v21_v4  ;;  %v211_v9 = vld [vmem:[%s291_s1 + $0x8] sm:$0xff]   ;;  %v190_v12 = vcombine.low %v21_v4, %v21_v4 }
   0x4   :  { %v212_v10 = vld [vmem:[%s291_s1] sm:$0xff]  }
   0x5   :  { %201 = vmatprep.mubr.msk.bf16.mxu0 %vm107_vm0, %v191_v6  ;;  %v213_v11 = vld [vmem:[%s291_s1 + $0x40] sm:$0xff]  }
   0x6   :  { %114 = vmatpush1.bf16.msra.mxu0 %v206_v2  ;;  %v189_v13 = vld [vmem:[%s293_s2] ss:$0 sm:$0xff] }
   0x7   :  { %115 = vmatprep.subr.bf16.mxu0 %v218_v0  ;;  %v202_v29 = vld [vmem:[%s294_s3] ss:$0 sm:$0xff] }
   0x8   :  { %v203_v31 = vld [vmem:[%s295_s4] ss:$0 sm:$0xff] }
   0xa   :  { %116 = vmatpush1.bf16.msra.mxu0 %v207_v3 }
   0xb   :  { %117 = vmatprep.subr.bf16.mxu0 %v218_v0 }
   0xe   :  { %118 = vmatpush1.bf16.msra.mxu0 %v208_v5 }
   0xf   :  { %119 = vmatprep.subr.bf16.mxu0 %v218_v0 }
  0x12   :  { %120 = vmatpush1.bf16.msra.mxu0 %v209_v7 }
  0x13   :  { %121 = vmatprep.subr.bf16.mxu0 %v218_v0 }
  0x16   :  { %122 = vmatpush1.bf16.msra.mxu0 %v210_v8 }
  0x17   :  { %123 = vmatprep.subr.bf16.mxu0 %v218_v0 }
  0x1a   :  { %124 = vmatpush1.bf16.msra.mxu0 %v211_v9 }
  0x1b   :  { %125 = vmatprep.subr.bf16.mxu0 %v218_v0 }
  0x1e   :  { %126 = vmatpush1.bf16.msra.mxu0 %v212_v10 }
  0x1f   :  { %141 = vmatprep.subr.bf16.mxu0 %v218_v0 }
  0x22   :  { %142 = vmatpush2.bf16.msra.mxu0 %v213_v11 }
  0x25   :  { %144 = vmatmul.mubr.bf16.vlgmr.msra.gmra.mxu0 %v190_v12 }
  0xe5   :  { %v145_v14 = vpop.f32.mrf.mxu0 }
  0xe6   :  { %v146_v15 = vadd.f32 %v189_v13, %v145_v14 }
  0xe7   :  { %v147_v16 = vpop.f32.mrf.mxu0 }
  0xe8   :  { %v154_v17 = vsel %vm153_vm1, %v146_v15, 0.0 }
  0xe9   :  { %v148_v18 = vpop.f32.mrf.mxu0  ;;  %155 = vadd.xlane.f32.xlu0 %v154_v17 }
  0xeb   :  { %v149_v19 = vpop.f32.mrf.mxu0 }
 0x172   :  { %v156_v20 = vpop.xlane.xlu0 %155 }
 0x173   :  { %v158_v21 = vmul.f32 0.03125, %v156_v20 }
 0x175   :  { %v159_v22 = vsub.f32 %v146_v15, %v158_v21 }
 0x177   :  { %v160_v23 = vmul.f32 %v159_v22, %v159_v22 }
 0x179   :  { %v161_v24 = vsel %vm153_vm1, %v160_v23, 0.0 }
 0x17a   :  { %162 = vadd.xlane.f32.xlu0 %v161_v24 }
 0x203   :  { %v163_v25 = vpop.xlane.xlu0 %162 }
 0x204   :  { %v164_v26 = vmul.f32 0.03125, %v163_v25 }
 0x206   :  { %v165_v27 = vadd.f32 1e-06, %v164_v26 }
 0x208   :  { %216 = vrsqrt.f32 %v165_v27 }
 0x215   :  { %v217_v28 = vpop.eup %216 }
 0x216   :  { %v167_v30 = vmul.f32 %v217_v28, %v159_v22 }
 0x218   :  { %v174_v32 = vmul.f32 %v202_v29, %v167_v30 }
 0x21a   :  { %v181_v33 = vadd.f32 %v203_v31, %v174_v32 }
 0x21c   :  { %v182_v34 = vpack.c.bf16 %v181_v33, %v181_v33 }
 0x21e   :  { %184 = vst.msk [vmem:[%s296_s5] sm:$0xf] %vm183_vm2, %v182_v34 }

// kernel: poolformer_forward.27
= control target key start
LH: loop header
LB: loop body
LE: loop exit
PB: predicated region body
PF: predicated region fallthrough
CT: control target
= control target key end

     0   :  { %vm25_vm0 = vcmask 261120   ;;  %v157_v8 = vmov 0.0   ;;  %vm158_vm1 = vmmov 0   ;;  %s213_s0 = inlined_call_operand.vmem [shape: bf16[8,32], index: 0, kind: input, shape index: {}]   ;;  %s214_s3 = inlined_call_operand.vmem [shape: bf16[32,128], index: 3, kind: input, shape index: {}]   ;;  %s215_s1 = inlined_call_operand.vmem [shape: f32[1,32], index: 1, kind: input, shape index: {}]   ;;  %s216_s2 = inlined_call_operand.vmem [shape: f32[1,32], index: 2, kind: input, shape index: {}]   ;;  %s217_s4 = inlined_call_operand.vmem [shape: f32[1,128], index: 4, kind: input, shape index: {}]   ;;  %s218_s5 = inlined_call_operand.vmem [shape: bf16[8,128], index: 5, kind: output, shape index: {}]  }
   0x1   :  { %v21_v0 = vld [vmem:[%s213_s0] sm:$0xf]  ;;  %141 = vmatprep.subr.bf16.mxu0 %v157_v8  ;;  %v151_v9 = vld [vmem:[%s214_s3 + $0x8] sm:$0xff]   ;;  %145 = vmatprep.mubr.msk.bf16.mxu0 %vm158_vm1, %v157_v8 }
   0x2   :  { %v22_v1 = vunpack.c.l.bf16 %v21_v0  ;;  %142 = vmatpush3.bf16.msra.mxu0 %v151_v9  ;;  %v152_v10 = vld [vmem:[%s214_s3] sm:$0xff]  }
   0x3   :  { %143 = vmatprep.subr.bf16.mxu0 %v157_v8  ;;  %v132_v15 = vld [vmem:[%s215_s1] ss:$0 sm:$0xff] }
   0x4   :  { %v26_v2 = vsel %vm25_vm0, %v22_v1, 0.0  ;;  %v133_v17 = vld [vmem:[%s216_s2] ss:$0 sm:$0xff] }
   0x5   :  { %27 = vadd.xlane.f32.xlu0 %v26_v2  ;;  %v134_v21 = vld [vmem:[%s217_s4] ss:$0 sm:$0xff] }
   0x6   :  { %144 = vmatpush3.bf16.msra.mxu0 %v152_v10 }
  0x8e   :  { %v28_v3 = vpop.xlane.xlu0 %27 }
  0x8f   :  { %v30_v4 = vmul.f32 0.03125, %v28_v3 }
  0x91   :  { %v31_v5 = vsub.f32 %v22_v1, %v30_v4 }
  0x93   :  { %v32_v6 = vmul.f32 %v31_v5, %v31_v5 }
  0x95   :  { %v33_v7 = vsel %vm25_vm0, %v32_v6, 0.0 }
  0x96   :  { %34 = vadd.xlane.f32.xlu0 %v33_v7 }
 0x11f   :  { %v35_v11 = vpop.xlane.xlu0 %34 }
 0x120   :  { %v36_v12 = vmul.f32 0.03125, %v35_v11 }
 0x122   :  { %v37_v13 = vadd.f32 1e-06, %v36_v12 }
 0x124   :  { %153 = vrsqrt.f32 %v37_v13 }
 0x131   :  { %v154_v14 = vpop.eup %153 }
 0x132   :  { %v39_v16 = vmul.f32 %v154_v14, %v31_v5 }
 0x134   :  { %v46_v18 = vmul.f32 %v132_v15, %v39_v16 }
 0x136   :  { %v53_v19 = vadd.f32 %v133_v17, %v46_v18 }
 0x138   :  { %v54_v20 = vpack.c.bf16 %v53_v19, %v53_v19 }
 0x13a   :  { %146 = vmatmul.mubr.msk.bf16.vlgmr.msra.gmra.mxu0 %vm25_vm0, %v54_v20 }
 0x1fa   :  { %v115_v22 = vpop.f32.mrf.mxu0 }
 0x1fb   :  { %v116_v23 = vadd.f32 %v134_v21, %v115_v22 }
 0x1fc   :  { %v147_v24 = vpop.f32.mrf.mxu0 }
 0x1fd   :  { %v122_v25 = vmul.f32 0.70710677, %v116_v23  ;;  %v121_v29 = vmul.f32 0.5, %v116_v23 }
 0x1fe   :  { %v118_v26 = vpop.f32.mrf.mxu0 }
 0x1ff   :  { %155 = verf.f32 %v122_v25 }
 0x200   :  { %v148_v27 = vpop.f32.mrf.mxu0 }
 0x20c   :  { %v156_v28 = vpop.eup %155 }
 0x20d   :  { %v124_v30 = vadd.f32 1.0, %v156_v28 }
 0x20f   :  { %v125_v31 = vmul.f32 %v124_v30, %v121_v29 }
 0x211   :  { %v126_v32 = vpack.c.bf16 %v125_v31, %v125_v31 }
 0x213   :  { %127 = vst [vmem:[%s218_s5] sm:$0xf] %v126_v32 }

// kernel: poolformer_forward.26
= control target key start
LH: loop header
LB: loop body
LE: loop exit
PB: predicated region body
PF: predicated region fallthrough
CT: control target
= control target key end

     0   :  { %s532_s12 = smov 0   ;;  %s584_s0 = inlined_call_operand.vmem [shape: bf16[2,4,4,32], index: 0, kind: input, shape index: {}]   ;;  %s585_s1 = inlined_call_operand.vmem [shape: f32[1,32], index: 1, kind: input, shape index: {}]   ;;  %s586_s2 = inlined_call_operand.vmem [shape: f32[1,32], index: 2, kind: input, shape index: {}]   ;;  %s587_s3 = inlined_call_operand.vmem [shape: bf16[2,2,2,32], index: 3, kind: output, shape index: {}]  }
   0x1 LB: > { %s460_s13 = sadd.s32 4294967295, %s508_s12   ;;  %p464_p0 = scmp.ge.s32.totalorder %s508_s12, 1  ;;  %s508_s12 = sphi %s532_s12, %s13_s12  }
   0x2   : > { %p137_p1 = scmp.lt.s32.totalorder %s508_s12, 3 }
   0x4   : > { %p138_p2 = pnand %p464_p0, %p137_p1 }
   0x5   : > { %p160_p3 = scmp.lt.s32.totalorder (!%p138_p2), %s460_s13, 1 }
   0x6   : > { %141 = sbr.rel (%p138_p2) target bundleno = 363 (0x16b), region = 32 }
   0xb   : > { %s589_s13 = smov (!%p160_p3, %s460_s13), 1  ;;  %vm179_vm0 = vcmask 257024   ;;  %v253_v32 = vlaneseq  ;;  %v510_v45 = vmov 0.0   ;;  %v468_v52 = vld [vmem:[%s585_s1] ss:$0 sm:$0xff] }
   0xc   : > { %s481_s14 = sshll.u32 %s589_s13, 3  ;;  %v469_v57 = vld [vmem:[%s586_s2] ss:$0 sm:$0xff]  ;;  %vm369_vm6 = vsmask.f32 256  ;;  %s467_s22 = sshll.u32 %s589_s13, 1 }
   0xd   : > { %s164_s17 = scalar_lea.vmem %s584_s0, %s481_s14  ;;  %v562_v36 = vshrl.u32 %v253_v32, 7  ;;  %vm370_vm7 = vsmask.f32 1284  ;;  %vm372_vm9 = vsmask.f32 2312  ;;  %s168_s25 = scalar_lea.vmem %s587_s3, %s467_s22 }
   0xe   : > { %v169_v0 = vld [vmem:[%s164_s17] sm:$0x3]  ;;  %v171_v1 = vld [vmem:[%s164_s17 + $0x4] sm:$0x3]  ;;  %v170_v2 = vld [vmem:[%s164_s17 + $0x2] sm:$0x3] }
   0xf   : > { %v173_v3 = vunpack.c.l.bf16 %v169_v0  ;;  %v546_v4 = vunpack.c.l.bf16 %v171_v1  ;;  %v548_v5 = vunpack.c.l.bf16 %v170_v2  ;;  %v172_v6 = vld [vmem:[%s164_s17 + $0x6] sm:$0x3]  ;;  %vm297_vm1 = vcmp.eq.s32.totalorder %v562_v36, 0  ;;  %vm371_vm8 = vmor %vm369_vm6, %vm370_vm7 }
  0x10   : > { %v176_v7 = vunpack.c.l.bf16 %v172_v6  ;;  %v475_v46 = vsel %vm297_vm1, 1.0, %v510_v45  ;;  %vm301_vm2 = vcmp.eq.s32.totalorder %v562_v36, 1  ;;  %vm255_vm3 = vcmp.ge.s32.totalorder %v562_v36, 1  ;;  %vm373_vm10 = vmor %vm371_vm8, %vm372_vm9 }
  0x11   : > { %v180_v8 = vsel %vm179_vm0, %v173_v3, 0.0  ;;  %v186_v9 = vsel %vm179_vm0, %v546_v4, 0.0  ;;  %v183_v10 = vsel %vm179_vm0, %v548_v5, 0.0  ;;  %v300_v48 = vsub.f32 3.0, %v475_v46 }
  0x12   : > { %181 = vadd.xlane.f32.xlu0 %v180_v8  ;;  %187 = vadd.xlane.f32.xlu1 %v186_v9  ;;  %v189_v11 = vsel %vm179_vm0, %v176_v7, 0.0  ;;  %v476_v49 = vsel %vm301_vm2, 1.0, %v510_v45  ;;  %vm258_vm4 = vcmp.le.s32.totalorder %v562_v36, 2  ;;  %vm374_vm11 = vsmask.f32 3340 }
  0x13   : > { %v304_v50 = vsub.f32 %v300_v48, %v476_v49  ;;  %vm260_vm5 = vmand %vm255_vm3, %vm258_vm4  ;;  %vm376_vm13 = vsmask.f32 4368  ;;  %vm378_vm15 = vsmask.f32 5396  ;;  %vm380_vm1 = vsmask.f32 6424 }
  0x14   : > { %v470_v0 = vsel %vm260_vm5, 1.0, %v510_v45  ;;  %vm375_vm12 = vmor %vm373_vm10, %vm374_vm11  ;;  %vm382_vm3 = vsmask.f32 7452  ;;  %vm404_vm5 = vcmask 253952  }
  0x15   : > { %v305_v55 = vmul.f32 2.0, %v304_v50  ;;  %vm377_vm14 = vmor %vm375_vm12, %vm376_vm13 }
  0x16   : > { %184 = vadd.xlane.f32.xlu0 %v183_v10  ;;  %190 = vadd.xlane.f32.xlu1 %v189_v11 }
  0x9b   : > { %v182_v12 = vpop.xlane.xlu0 %181  ;;  %v188_v13 = vpop.xlane.xlu1 %187 }
  0x9c   : > { %v193_v14 = vmul.f32 0.03125, %v182_v12  ;;  %v195_v15 = vmul.f32 0.03125, %v188_v13 }
  0x9e   : > { %v197_v16 = vsub.f32 %v173_v3, %v193_v14  ;;  %v199_v17 = vsub.f32 %v546_v4, %v195_v15 }
  0x9f   : > { %v185_v18 = vpop.xlane.xlu0 %184  ;;  %v191_v19 = vpop.xlane.xlu1 %190 }
  0xa0   : > { %v194_v20 = vmul.f32 0.03125, %v185_v18  ;;  %v196_v21 = vmul.f32 0.03125, %v191_v19  ;;  %v201_v22 = vmul.f32 %v197_v16, %v197_v16  ;;  %v203_v23 = vmul.f32 %v199_v17, %v199_v17 }
  0xa2   : > { %v198_v24 = vsub.f32 %v548_v5, %v194_v20  ;;  %v200_v25 = vsub.f32 %v176_v7, %v196_v21  ;;  %v205_v26 = vsel %vm179_vm0, %v201_v22, 0.0  ;;  %v211_v27 = vsel %vm179_vm0, %v203_v23, 0.0 }
  0xa3   : > { %206 = vadd.xlane.f32.xlu0 %v205_v26  ;;  %v511_v22 = vmov 1966171168  }
  0xa4   : > { %v202_v28 = vmul.f32 %v198_v24, %v198_v24  ;;  %v204_v29 = vmul.f32 %v200_v25, %v200_v25  ;;  %v326_v23 = vunpack.c.l.s4 %v511_v22 }
  0xa6   : > { %v208_v30 = vsel %vm179_vm0, %v202_v28, 0.0  ;;  %v214_v31 = vsel %vm179_vm0, %v204_v29, 0.0  ;;  %v327_v29 = vunpack.c.0.s8 %v326_v23  ;;  %vm379_vm0 = vmor %vm377_vm14, %vm378_vm15 }
  0xa7   : > { %212 = vadd.xlane.f32.xlu0 %v211_v27  ;;  %209 = vadd.xlane.f32.xlu1 %v208_v30  ;;  %vm381_vm2 = vmor %vm379_vm0, %vm380_vm1 }
  0xa8   : > { %vm383_vm4 = vmor %vm381_vm2, %vm382_vm3 }
  0xab   : > { %215 = vadd.xlane.f32.xlu1 %v214_v31 }
 0x12c   : > { %v207_v33 = vpop.xlane.xlu0 %206 }
 0x12d   : > { %v217_v34 = vmul.f32 0.03125, %v207_v33 }
 0x12f   : > { %v221_v35 = vadd.f32 1e-06, %v217_v34  ;;  %v330_v34 = vsub.s32 %v327_v29, %v562_v36 }
 0x130   : > { %v210_v37 = vpop.xlane.xlu1 %209  ;;  %v213_v38 = vpop.xlane.xlu0 %212 }
 0x131   : > { %492 = vrsqrt.f32 %v221_v35  ;;  %v218_v39 = vmul.f32 0.03125, %v210_v37  ;;  %v219_v40 = vmul.f32 0.03125, %v213_v38 }
 0x133   : > { %v222_v41 = vadd.f32 1e-06, %v218_v39  ;;  %v223_v42 = vadd.f32 1e-06, %v219_v40 }
 0x134   : > { %v216_v43 = vpop.xlane.xlu1 %215 }
 0x135   : > { %494 = vrsqrt.f32 %v222_v41  ;;  %v220_v44 = vmul.f32 0.03125, %v216_v43 }
 0x136   : > { %496 = vrsqrt.f32 %v223_v42 }
 0x137   : > { %v224_v47 = vadd.f32 1e-06, %v220_v44 }
 0x139   : > { %498 = vrsqrt.f32 %v224_v47 }
 0x13a   : > { %500 = vrcp.f32 %v305_v55 }
 0x13e   : > { %v493_v51 = vpop.eup %492 }
 0x13f   : > { %v229_v53 = vmul.f32 %v493_v51, %v197_v16 }
 0x141   : > { %v239_v54 = vmul.f32 %v468_v52, %v229_v53 }
 0x142   : > { %v495_v56 = vpop.eup %494 }
 0x143   : > { %v497_v58 = vpop.eup %496  ;;  %v230_v59 = vmul.f32 %v495_v56, %v198_v24  ;;  %v249_v61 = vadd.f32 %v469_v57, %v239_v54 }
 0x144   : > { %v231_v60 = vmul.f32 %v497_v58, %v199_v17 }
 0x145   : > { %v240_v62 = vmul.f32 %v468_v52, %v230_v59  ;;  %v265_v7 = vmul.f32 0.0, %v249_v61 }
 0x146   : > { %v499_v63 = vpop.eup %498  ;;  %v241_v1 = vmul.f32 %v468_v52, %v231_v60 }
 0x147   : > { %v250_v2 = vadd.f32 %v469_v57, %v240_v62  ;;  %v232_v3 = vmul.f32 %v499_v63, %v200_v25  ;;  %v501_v21 = vpop.eup %500 }
 0x148   : > { %v251_v6 = vadd.f32 %v469_v57, %v241_v1 }
 0x149   : > { %v266_v8 = vmul.f32 %v470_v0, %v250_v2  ;;  %v242_v9 = vmul.f32 %v468_v52, %v232_v3 }
 0x14a   : > { %v267_v10 = vmul.f32 %v470_v0, %v251_v6 }
 0x14b   : > { %v269_v11 = vadd.f32 %v266_v8, %v265_v7  ;;  %v252_v12 = vadd.f32 %v469_v57, %v242_v9 }
 0x14c   : > { %v270_v13 = vadd.f32 %v267_v10, %v266_v8 }
 0x14d   : > { %v271_v14 = vadd.f32 %v269_v11, %v267_v10  ;;  %v268_v15 = vmul.f32 0.0, %v252_v12 }
 0x14f   : > { %v471_v16 = vrot.slane %v271_v14, 9  ;;  %v272_v17 = vadd.f32 %v270_v13, %v268_v15  ;;  %v473_v19 = vrot.slane %v271_v14, 10 }
 0x151   : > { %v281_v18 = vadd.f32 %v471_v16, %v271_v14  ;;  %v472_v20 = vrot.slane %v272_v17, 9  ;;  %v474_v26 = vrot.slane %v272_v17, 10 }
 0x153   : > { %v289_v24 = vadd.f32 %v473_v19, %v281_v18  ;;  %v282_v25 = vadd.f32 %v472_v20, %v272_v17 }
 0x155   : > { %v308_v27 = vmul.f32 %v501_v21, %v289_v24  ;;  %v290_v28 = vadd.f32 %v474_v26, %v282_v25 }
 0x157   : > { %v313_v30 = vrot.slane %v308_v27, 7  ;;  %v310_v31 = vmul.f32 %v501_v21, %v290_v28 }
 0x159   : > { %v317_v32 = vadd.f32 %v313_v30, %v548_v5  ;;  %v314_v33 = vrot.slane %v310_v31, 7 }
 0x15b   : > { %v319_v35 = vsub.f32 %v317_v32, %v250_v2  ;;  %v318_v37 = vadd.f32 %v314_v33, %v546_v4 }
 0x15d   : > { %v321_v38 = vpack.c.bf16 %v319_v35, %v319_v35  ;;  %v320_v39 = vsub.f32 %v318_v37, %v251_v6 }
 0x15f   : > { %v331_v40 = vrot.slane %v321_v38, %v330_v34  ;;  %v322_v41 = vpack.c.bf16 %v320_v39, %v320_v39 }
 0x161   : > { %v332_v42 = vcombine.high %v331_v40, %v331_v40  ;;  %v339_v43 = vrot.slane %v331_v40, %v330_v34  ;;  %v353_v5 = vrot.slane %v322_v41, %v330_v34 }
 0x163   : > { %v346_v44 = vrot.slane %v332_v42, %v330_v34  ;;  %v354_v36 = vcombine.high %v353_v5, %v353_v5  ;;  %v361_v45 = vrot.slane %v353_v5, %v330_v34  ;;  %v385_v4 = vshrl.u32 %v339_v43, 16 }
 0x165   : > { %v390_v46 = vshll.u32 %v346_v44, 16  ;;  %v368_v47 = vrot.slane %v354_v36, %v330_v34  ;;  %v394_v49 = vshrl.u32 %v361_v45, 16 }
 0x167   : > { %v392_v48 = vsel %vm383_vm4, %v385_v4, %v390_v46  ;;  %v399_v50 = vshll.u32 %v368_v47, 16 }
 0x168   : > { %405 = vst.msk [vmem:[%s168_s25] sm:$0x1] %vm404_vm5, %v392_v48 }
 0x169   : > { %v401_v51 = vsel %vm383_vm4, %v394_v49, %v399_v50 }
 0x16a   : > { %406 = vst.msk [vmem:[%s168_s25 + $0x1] sm:$0x1] %vm404_vm5, %v401_v51 }
 0x16b PF: > { %s13_s12 = sadd.s32 1, %s508_s12  }
 0x16c   : > { %p10_p4 = scmp.ge.s32.totalorder %s13_s12, 4  }
 0x16e   :  { %12 = sbr.rel (!%p10_p4) target bundleno = 1 (0x1), region = 62 }

// kernel: poolformer_forward.28
= control target key start
LH: loop header
LB: loop body
LE: loop exit
PB: predicated region body
PF: predicated region fallthrough
CT: control target
= control target key end

     0   :  { %v188_v0 = vmov 0.0   ;;  %vm189_vm0 = vmmov 0   ;;  %vm134_vm1 = vcmask 257024   ;;  %s251_s1 = inlined_call_operand.vmem [shape: bf16[128,32], index: 1, kind: input, shape index: {}]   ;;  %s252_s0 = inlined_call_operand.vmem [shape: bf16[8,128], index: 0, kind: input, shape index: {}]   ;;  %s253_s3 = inlined_call_operand.vmem [shape: bf16[8,32], index: 3, kind: input, shape index: {}]   ;;  %s254_s2 = inlined_call_operand.vmem [shape: f32[1,32], index: 2, kind: input, shape index: {}]   ;;  %s255_s4 = inlined_call_operand.vmem [shape: bf16[8,32], index: 4, kind: output, shape index: {}]  }
   0x1   :  { %158 = vmatprep.subr.bf16.mxu0 %v188_v0  ;;  %v180_v1 = vld [vmem:[%s251_s1 + $0x38] sm:$0xff]   ;;  %174 = vmatprep.mubr.msk.bf16.mxu0 %vm189_vm0, %v188_v0  ;;  %v181_v2 = vld [vmem:[%s251_s1 + $0x30] sm:$0xff]   ;;  %v182_v3 = vld [vmem:[%s251_s1 + $0x28] sm:$0xff]  }
   0x2   :  { %159 = vmatpush3.bf16.msra.mxu0 %v180_v1  ;;  %v183_v4 = vld [vmem:[%s251_s1 + $0x20] sm:$0xff]   ;;  %v184_v5 = vld [vmem:[%s251_s1 + $0x18] sm:$0xff]   ;;  %v185_v6 = vld [vmem:[%s251_s1 + $0x10] sm:$0xff]  }
   0x3   :  { %160 = vmatprep.subr.bf16.mxu0 %v188_v0  ;;  %v186_v7 = vld [vmem:[%s251_s1 + $0x8] sm:$0xff]   ;;  %v187_v8 = vld [vmem:[%s251_s1] sm:$0xff]  }
   0x4   :  { %v18_v9 = vld [vmem:[%s252_s0] sm:$0xf] }
   0x5   :  { %v130_v10 = vld [vmem:[%s253_s3] sm:$0xf] }
   0x6   :  { %161 = vmatpush3.bf16.msra.mxu0 %v181_v2  ;;  %v140_v11 = vld [vmem:[%s254_s2] ss:$0 sm:$0xff]  ;;  %v131_v12 = vunpack.c.l.bf16 %v130_v10 }
   0x7   :  { %162 = vmatprep.subr.bf16.mxu0 %v188_v0 }
   0xa   :  { %163 = vmatpush3.bf16.msra.mxu0 %v182_v3 }
   0xb   :  { %164 = vmatprep.subr.bf16.mxu0 %v188_v0 }
   0xe   :  { %165 = vmatpush3.bf16.msra.mxu0 %v183_v4 }
   0xf   :  { %166 = vmatprep.subr.bf16.mxu0 %v188_v0 }
  0x12   :  { %167 = vmatpush3.bf16.msra.mxu0 %v184_v5 }
  0x13   :  { %168 = vmatprep.subr.bf16.mxu0 %v188_v0 }
  0x16   :  { %169 = vmatpush3.bf16.msra.mxu0 %v185_v6 }
  0x17   :  { %170 = vmatprep.subr.bf16.mxu0 %v188_v0 }
  0x1a   :  { %171 = vmatpush3.bf16.msra.mxu0 %v186_v7 }
  0x1b   :  { %172 = vmatprep.subr.bf16.mxu0 %v188_v0 }
  0x1e   :  { %173 = vmatpush3.bf16.msra.mxu0 %v187_v8 }
  0x21   :  { %175 = vmatmul.mubr.bf16.vlgmr.msra.gmra.mxu0 %v18_v9 }
  0xe1   :  { %v124_v13 = vpop.f32.mrf.mxu0 }
  0xe2   :  { %v125_v14 = vadd.f32 %v140_v11, %v124_v13 }
  0xe3   :  { %v176_v15 = vpop.f32.mrf.mxu0 }
  0xe4   :  { %v132_v16 = vadd.f32 %v131_v12, %v125_v14 }
  0xe5   :  { %v127_v17 = vpop.f32.mrf.mxu0 }
  0xe6   :  { %v133_v18 = vpack.c.bf16 %v132_v16, %v132_v16 }
  0xe7   :  { %v177_v19 = vpop.f32.mrf.mxu0 }
  0xe8   :  { %135 = vst.msk [vmem:[%s255_s4] sm:$0xf] %vm134_vm1, %v133_v18 }

// kernel: poolformer_forward.29
= control target key start
LH: loop header
LB: loop body
LE: loop exit
PB: predicated region body
PF: predicated region fallthrough
CT: control target
= control target key end

     0   :  { %v400_v1 = vmov 0.0   ;;  %vm401_vm0 = vmmov 0   ;;  %v402_v7 = vmov 1966171168   ;;  %v77_v9 = vlaneseq  ;;  %s502_s1 = inlined_call_operand.vmem [shape: bf16[288,64], index: 1, kind: input, shape index: {}]   ;;  %s503_s0 = inlined_call_operand.vmem [shape: bf16[2,288], index: 0, kind: input, shape index: {}]   ;;  %s504_s2 = inlined_call_operand.vmem [shape: f32[1,64], index: 2, kind: input, shape index: {}]   ;;  %s505_s3 = inlined_call_operand.vmem [shape: f32[1,64], index: 3, kind: input, shape index: {}]   ;;  %s506_s4 = inlined_call_operand.vmem [shape: f32[1,64], index: 4, kind: input, shape index: {}]   ;;  %s507_s5 = inlined_call_operand.vmem [shape: bf16[2,64], index: 5, kind: output, shape index: {}]  }
   0x1   :  { %v380_v0 = vld [vmem:[%s502_s1 + $0x78] sm:$0xff]   ;;  %369 = vmatprep.subr.bf16.mxu1 %v400_v1  ;;  %373 = vmatprep.mubr.msk.bf16.mxu1 %vm401_vm0, %v400_v1  ;;  %v382_v3 = vld [vmem:[%s502_s1 + $0x70] sm:$0xff]   ;;  %v384_v5 = vld [vmem:[%s502_s1 + $0x68] sm:$0xff]   ;;  %v75_v8 = vunpack.c.l.s4 %v402_v7  ;;  %vm199_vm1 = vcmask 261120   ;;  %vm285_vm2 = vcmask 517120   ;;  %vm315_vm3 = vcmask 516096  }
   0x2   :  { %v381_v2 = vld [vmem:[%s502_s1 + $0x38] sm:$0xff]   ;;  %344 = vmatprep.subr.bf16.mxu0 %v380_v0  ;;  %v383_v4 = vld [vmem:[%s502_s1 + $0x30] sm:$0xff]   ;;  %v385_v6 = vld [vmem:[%s502_s1 + $0x28] sm:$0xff]   ;;  %v78_v13 = vshrl.u32 %v77_v9, 7 }
   0x3   :  { %345 = vmatpush3.bf16.msra.mxu0 %v381_v2  ;;  %v386_v10 = vld [vmem:[%s502_s1 + $0x60] sm:$0xff]   ;;  %v76_v12 = vunpack.c.0.s8 %v75_v8  ;;  %v388_v14 = vld [vmem:[%s502_s1 + $0x58] sm:$0xff]   ;;  %v394_v15 = vld [vmem:[%s502_s1 + $0x88] sm:$0xff]  }
   0x4   :  { %346 = vmatprep.subr.bf16.mxu0 %v382_v3  ;;  %v387_v11 = vld [vmem:[%s502_s1 + $0x20] sm:$0xff]   ;;  %v389_v16 = vld [vmem:[%s502_s1 + $0x18] sm:$0xff]   ;;  %v390_v18 = vld [vmem:[%s502_s1 + $0x50] sm:$0xff]   ;;  %370 = vmatpush3.bf16.msra.mxu1 %v394_v15 }
   0x5   :  { %v79_v17 = vsub.s32 %v76_v12, %v78_v13  ;;  %371 = vmatprep.subr.bf16.mxu1 %v400_v1  ;;  %v397_v19 = vld [vmem:[%s502_s1 + $0x80] sm:$0xff]   ;;  %v391_v21 = vld [vmem:[%s502_s1 + $0x10] sm:$0xff]   ;;  %v392_v24 = vld [vmem:[%s502_s1 + $0x48] sm:$0xff]  }
   0x6   :  { %v322_v20 = vld.sshfl [vmem:[%s503_s0] sm:$0x13 pattern:$0x75316420]  ;;  %v393_v27 = vld [vmem:[%s502_s1 + $0x8] sm:$0xff]  }
   0x7   :  { %347 = vmatpush3.bf16.msra.mxu0 %v383_v4  ;;  %v73_v22 = vcombine.high %v322_v20, %v322_v20  ;;  %v80_v23 = vrot.slane %v322_v20, %v79_v17  ;;  %v395_v28 = vld [vmem:[%s502_s1 + $0x40] sm:$0xff]  }
   0x8   :  { %348 = vmatprep.subr.bf16.mxu0 %v384_v5  ;;  %372 = vmatpush3.bf16.msra.mxu1 %v397_v19  ;;  %v396_v29 = vld [vmem:[%s502_s1] sm:$0xff]  }
   0x9   :  { %v87_v25 = vrot.slane %v73_v22, %v79_v17  ;;  %v88_v26 = vcombine.high %v80_v23, %v80_v23  ;;  %v321_v35 = vld [vmem:[%s504_s2] ss:$0 sm:$0xff] }
   0xa   :  { %v342_v52 = vld [vmem:[%s505_s3] ss:$0 sm:$0xff] }
   0xb   :  { %349 = vmatpush3.bf16.msra.mxu0 %v385_v6  ;;  %235 = vmatprep.mubr.bf16.mxu0 %v87_v25  ;;  %v343_v54 = vld [vmem:[%s506_s4] ss:$0 sm:$0xff] }
   0xc   :  { %350 = vmatprep.subr.bf16.mxu0 %v386_v10  ;;  %374 = vmatmul.mubr.msk.bf16.vlgmr.msra.gmra.mxu1 %vm199_vm1, %v88_v26 }
   0xf   :  { %351 = vmatpush3.bf16.msra.mxu0 %v387_v11 }
  0x10   :  { %352 = vmatprep.subr.bf16.mxu0 %v388_v14 }
  0x13   :  { %353 = vmatpush3.bf16.msra.mxu0 %v389_v16 }
  0x14   :  { %354 = vmatprep.subr.bf16.mxu0 %v390_v18 }
  0x17   :  { %355 = vmatpush3.bf16.msra.mxu0 %v391_v21 }
  0x18   :  { %356 = vmatprep.subr.bf16.mxu0 %v392_v24 }
  0x1b   :  { %357 = vmatpush3.bf16.msra.mxu0 %v393_v27 }
  0x1c   :  { %358 = vmatprep.subr.bf16.mxu0 %v395_v28 }
  0x1f   :  { %359 = vmatpush3.bf16.msra.mxu0 %v396_v29 }
  0x22   :  { %236 = vmatmul.mubr.bf16.vlgmr.msra.gmra.mxu0 %v80_v23 }
  0xcc   :  { %v277_v30 = vpop.f32.mrf.mxu1 }
  0xce   :  { %v375_v31 = vpop.f32.mrf.mxu1 }
  0xd0   :  { %v280_v32 = vpop.f32.mrf.mxu1 }
  0xd2   :  { %v376_v33 = vpop.f32.mrf.mxu1 }
  0xe2   :  { %v360_v34 = vpop.f32.mrf.mxu0 }
  0xe4   :  { %v361_v36 = vpop.f32.mrf.mxu0 }
  0xe5   :  { %v362_v37 = vadd.f32 %v361_v36, %v360_v34 }
  0xe6   :  { %v363_v38 = vpop.f32.mrf.mxu0 }
  0xe7   :  { %v238_v39 = vadd.f32 %v362_v37, %v321_v35 }
  0xe8   :  { %v364_v40 = vpop.f32.mrf.mxu0 }
  0xe9   :  { %v278_v41 = vadd.f32 %v277_v30, %v238_v39 }
  0xeb   :  { %v286_v42 = vsel %vm285_vm2, %v278_v41, 0.0 }
  0xec   :  { %287 = vadd.xlane.f32.xlu0 %v286_v42 }
 0x175   :  { %v288_v43 = vpop.xlane.xlu0 %287 }
 0x176   :  { %v290_v44 = vmul.f32 0.015625, %v288_v43 }
 0x178   :  { %v291_v45 = vsub.f32 %v278_v41, %v290_v44 }
 0x17a   :  { %v292_v46 = vmul.f32 %v291_v45, %v291_v45 }
 0x17c   :  { %v293_v47 = vsel %vm285_vm2, %v292_v46, 0.0 }
 0x17d   :  { %294 = vadd.xlane.f32.xlu0 %v293_v47 }
 0x206   :  { %v295_v48 = vpop.xlane.xlu0 %294 }
 0x207   :  { %v296_v49 = vmul.f32 0.015625, %v295_v48 }
 0x209   :  { %v297_v50 = vadd.f32 1e-06, %v296_v49 }
 0x20b   :  { %398 = vrsqrt.f32 %v297_v50 }
 0x218   :  { %v399_v51 = vpop.eup %398 }
 0x219   :  { %v299_v53 = vmul.f32 %v399_v51, %v291_v45 }
 0x21b   :  { %v306_v55 = vmul.f32 %v342_v52, %v299_v53 }
 0x21d   :  { %v313_v56 = vadd.f32 %v343_v54, %v306_v55 }
 0x21f   :  { %v314_v57 = vpack.c.bf16 %v313_v56, %v313_v56 }
 0x221   :  { %316 = vst.msk [vmem:[%s507_s5] sm:$0x1] %vm315_vm3, %v314_v57 }

// kernel: poolformer_forward.31
= control target key start
LH: loop header
LB: loop body
LE: loop exit
PB: predicated region body
PF: predicated region fallthrough
CT: control target
= control target key end

     0   :  { %vm25_vm0 = vcmask 517120   ;;  %v228_v9 = vmov 0   ;;  %vm115_vm1 = vcmask 523264   ;;  %v65_v27 = vlaneseq  ;;  %s299_s0 = inlined_call_operand.vmem [shape: bf16[2,64], index: 0, kind: input, shape index: {}]   ;;  %s300_s3 = inlined_call_operand.vmem [shape: bf16[64,256], index: 3, kind: input, shape index: {}]   ;;  %s301_s1 = inlined_call_operand.vmem [shape: f32[1,64], index: 1, kind: input, shape index: {}]   ;;  %s302_s2 = inlined_call_operand.vmem [shape: f32[1,64], index: 2, kind: input, shape index: {}]   ;;  %s303_s4 = inlined_call_operand.vmem [shape: f32[1,256], index: 4, kind: input, shape index: {}]   ;;  %s304_s5 = inlined_call_operand.vmem [shape: bf16[2,256], index: 5, kind: output, shape index: {}]  }
   0x1   :  { %v21_v0 = vld [vmem:[%s299_s0] sm:$0x1]  ;;  %v210_v8 = vld [vmem:[%s300_s3 + $0x34] ss:$8 sps:$4 sm:$0xff]   ;;  %151 = vmatprep.mubr.bf16.mxu0 %v228_v9  ;;  %v212_v10 = vld [vmem:[%s300_s3 + $0x30] ss:$8 sps:$4 sm:$0xff]  }
   0x2   :  { %v22_v1 = vunpack.c.l.bf16 %v21_v0  ;;  %127 = vmatprep.subr.bf16.mxu0 %v210_v8  ;;  %v213_v11 = vld [vmem:[%s300_s3 + $0x24] ss:$8 sps:$4 sm:$0xff]   ;;  %v215_v12 = vld [vmem:[%s300_s3 + $0x20] ss:$8 sps:$4 sm:$0xff]   ;;  %v216_v13 = vld [vmem:[%s300_s3 + $0x14] ss:$8 sps:$4 sm:$0xff]  }
   0x3   :  { %128 = vmatpush1.bf16.msra.mxu0 %v212_v10  ;;  %v218_v14 = vld [vmem:[%s300_s3 + $0x10] ss:$8 sps:$4 sm:$0xff]   ;;  %v219_v15 = vld [vmem:[%s300_s3 + $0x4] ss:$8 sps:$4 sm:$0xff]   ;;  %v221_v16 = vld [vmem:[%s300_s3] ss:$8 sps:$4 sm:$0xff]  }
   0x4   :  { %v26_v2 = vsel %vm25_vm0, %v22_v1, 0.0  ;;  %129 = vmatprep.subr.bf16.mxu0 %v213_v11  ;;  %v195_v21 = vld [vmem:[%s301_s1] ss:$0 sm:$0xff]  ;;  %v66_v28 = vshrl.u32 %v65_v27, 7  ;;  %v229_v42 = vmov 1966171168  }
   0x5   :  { %27 = vadd.xlane.f32.xlu0 %v26_v2  ;;  %v196_v23 = vld [vmem:[%s302_s2] ss:$0 sm:$0xff]  ;;  %v176_v43 = vunpack.c.l.s4 %v229_v42 }
   0x6   :  { %v67_v29 = vsub.s32 0, %v66_v28  ;;  %v63_v30 = vld [vmem:[%s303_s4] sm:$0x3]  ;;  %v71_v31 = vsub.s32 1, %v66_v28 }
   0x7   :  { %130 = vmatpush1.bf16.msra.mxu0 %v215_v12  ;;  %v177_v46 = vunpack.c.0.s8 %v176_v43 }
   0x8   :  { %131 = vmatprep.subr.bf16.mxu0 %v216_v13  ;;  %v68_v32 = vrot.slane %v63_v30, %v67_v29  ;;  %v72_v33 = vrot.slane %v63_v30, %v71_v31 }
   0x9   :  { %v180_v53 = vsub.s32 %v177_v46, %v66_v28 }
   0xb   :  { %132 = vmatpush1.bf16.msra.mxu0 %v218_v14 }
   0xc   :  { %133 = vmatprep.subr.bf16.mxu0 %v219_v15 }
   0xf   :  { %134 = vmatpush1.bf16.msra.mxu0 %v221_v16 }
  0x8e   :  { %v28_v3 = vpop.xlane.xlu0 %27 }
  0x8f   :  { %v30_v4 = vmul.f32 0.015625, %v28_v3 }
  0x91   :  { %v31_v5 = vsub.f32 %v22_v1, %v30_v4 }
  0x93   :  { %v32_v6 = vmul.f32 %v31_v5, %v31_v5 }
  0x95   :  { %v33_v7 = vsel %vm25_vm0, %v32_v6, 0.0 }
  0x96   :  { %34 = vadd.xlane.f32.xlu0 %v33_v7 }
 0x11f   :  { %v35_v17 = vpop.xlane.xlu0 %34 }
 0x120   :  { %v36_v18 = vmul.f32 0.015625, %v35_v17 }
 0x122   :  { %v37_v19 = vadd.f32 1e-06, %v36_v18 }
 0x124   :  { %222 = vrsqrt.f32 %v37_v19 }
 0x131   :  { %v223_v20 = vpop.eup %222 }
 0x132   :  { %v39_v22 = vmul.f32 %v223_v20, %v31_v5 }
 0x134   :  { %v46_v24 = vmul.f32 %v195_v21, %v39_v22 }
 0x136   :  { %v53_v25 = vadd.f32 %v196_v23, %v46_v24 }
 0x138   :  { %v54_v26 = vpack.c.bf16 %v53_v25, %v53_v25 }
 0x13a   :  { %205 = vmatmul.mubr.msk.bf16.vlgmr.msra.gmra.mxu0 %vm115_vm1, %v54_v26 }
 0x1fa   :  { %v153_v34 = vpop.f32.mrf.mxu0 }
 0x1fb   :  { %v154_v35 = vadd.f32 %v153_v34, %v68_v32 }
 0x1fc   :  { %v155_v36 = vpop.f32.mrf.mxu0 }
 0x1fd   :  { %v162_v37 = vmul.f32 0.70710677, %v154_v35  ;;  %v156_v38 = vadd.f32 %v155_v36, %v72_v33  ;;  %v160_v48 = vmul.f32 0.5, %v154_v35 }
 0x1fe   :  { %v157_v39 = vpop.f32.mrf.mxu0 }
 0x1ff   :  { %224 = verf.f32 %v162_v37  ;;  %v163_v40 = vmul.f32 0.70710677, %v156_v38  ;;  %v161_v49 = vmul.f32 0.5, %v156_v38 }
 0x200   :  { %v158_v41 = vpop.f32.mrf.mxu0 }
 0x201   :  { %226 = verf.f32 %v163_v40 }
 0x20c   :  { %v225_v44 = vpop.eup %224 }
 0x20d   :  { %v166_v45 = vadd.f32 1.0, %v225_v44 }
 0x20e   :  { %v227_v47 = vpop.eup %226 }
 0x20f   :  { %v167_v50 = vadd.f32 1.0, %v227_v47  ;;  %v168_v51 = vmul.f32 %v166_v45, %v160_v48 }
 0x211   :  { %v169_v52 = vmul.f32 %v167_v50, %v161_v49 }
 0x213   :  { %v206_v54 = vpack.c.bf16 %v169_v52, %v168_v51 }
 0x215   :  { %v181_v55 = vrot.slane %v206_v54, %v180_v53 }
 0x217   :  { %207 = vst.sshfl [vmem:[%s304_s5] sm:$0x5 pattern:$0x73625140] %v181_v55 }

// kernel: poolformer_forward.30
= control target key start
LH: loop header
LB: loop body
LE: loop exit
PB: predicated region body
PF: predicated region fallthrough
CT: control target
= control target key end

     0   :  { %s415_s12 = smov 0   ;;  %s453_s0 = inlined_call_operand.vmem [shape: bf16[2,3,3,64], index: 0, kind: input, shape index: {}]   ;;  %s454_s1 = inlined_call_operand.vmem [shape: f32[1,64], index: 1, kind: input, shape index: {}]   ;;  %s455_s2 = inlined_call_operand.vmem [shape: f32[1,64], index: 2, kind: input, shape index: {}]   ;;  %s456_s3 = inlined_call_operand.vmem [shape: bf16[2,1,1,64], index: 3, kind: output, shape index: {}]  }
   0x1 LB: > { %s351_s13 = sadd.s32 4294967295, %s391_s12   ;;  %p355_p0 = scmp.ge.s32.totalorder %s391_s12, 1  ;;  %s391_s12 = sphi %s415_s12, %s13_s12  }
   0x2   : > { %p137_p1 = scmp.lt.s32.totalorder %s391_s12, 3 }
   0x4   : > { %p138_p2 = pnand %p355_p0, %p137_p1 }
   0x5   : > { %p159_p3 = scmp.lt.s32.totalorder (!%p138_p2), %s351_s13, 1 }
   0x6   : > { %141 = sbr.rel (%p138_p2) target bundleno = 361 (0x169), region = 32 }
   0xb   : > { %s458_s13 = smov (!%p159_p3, %s351_s13), 1  ;;  %vm175_vm0 = vcmask 518144   ;;  %v234_v28 = vlaneseq  ;;  %v393_v35 = vmov 0.0   ;;  %v357_v39 = vld [vmem:[%s454_s1] ss:$0 sm:$0xff]  ;;  %vm298_vm5 = vcmask 516096  }
   0xc   : > { %s366_s14 = smul.u32 6, %s458_s13  ;;  %v358_v45 = vld [vmem:[%s455_s2] ss:$0 sm:$0xff]  ;;  %v394_v63 = vmov 1966171168   ;;  %s166_s24 = scalar_lea.vmem %s456_s3, %s458_s13 }
   0xd   : > { %v235_v34 = vshrl.u32 %v234_v28, 7  ;;  %vm299_vm6 = vsmask.f32 256 }
   0xe   : > { %s163_s17 = scalar_lea.vmem %s453_s0, %s366_s14  ;;  %vm300_vm7 = vmand %vm298_vm5, %vm299_vm6 }
   0xf   : > { %v167_v0 = vld [vmem:[%s163_s17] sm:$0x3]  ;;  %v169_v1 = vld [vmem:[%s163_s17 + $0x4] sm:$0x3]  ;;  %v168_v2 = vld [vmem:[%s163_s17 + $0x2] sm:$0x3] }
  0x10   : > { %v170_v3 = vunpack.c.l.bf16 %v167_v0  ;;  %v172_v4 = vunpack.c.l.bf16 %v169_v1  ;;  %v429_v5 = vunpack.c.l.bf16 %v168_v2  ;;  %vm263_vm1 = vcmp.eq.s32.totalorder %v235_v34, 0 }
  0x11   : > { %v362_v36 = vsel %vm263_vm1, 1.0, %v393_v35  ;;  %vm236_vm2 = vcmp.ge.s32.totalorder %v235_v34, 1  ;;  %vm239_vm3 = vcmp.le.s32.totalorder %v235_v34, 1  ;;  %v279_v0 = vunpack.c.l.s4 %v394_v63 }
  0x12   : > { %v176_v6 = vsel %vm175_vm0, %v170_v3, 0.0  ;;  %v182_v7 = vsel %vm175_vm0, %v172_v4, 0.0  ;;  %v179_v8 = vsel %vm175_vm0, %v429_v5, 0.0  ;;  %v266_v38 = vsub.f32 3.0, %v362_v36  ;;  %vm241_vm4 = vmand %vm236_vm2, %vm239_vm3 }
  0x13   : > { %177 = vadd.xlane.f32.xlu0 %v176_v6  ;;  %183 = vadd.xlane.f32.xlu1 %v182_v7  ;;  %v359_v51 = vsel %vm241_vm4, 1.0, %v393_v35 }
  0x14   : > { %v267_v43 = vsub.f32 %v266_v38, %v362_v36 }
  0x17   : > { %180 = vadd.xlane.f32.xlu0 %v179_v8 }
  0x9c   : > { %v178_v9 = vpop.xlane.xlu0 %177  ;;  %v184_v10 = vpop.xlane.xlu1 %183 }
  0x9d   : > { %v186_v11 = vmul.f32 0.015625, %v178_v9  ;;  %v188_v12 = vmul.f32 0.015625, %v184_v10 }
  0x9f   : > { %v189_v13 = vsub.f32 %v170_v3, %v186_v11  ;;  %v191_v14 = vsub.f32 %v172_v4, %v188_v12  ;;  %v280_v3 = vunpack.c.0.s8 %v279_v0  ;;  %v301_v12 = vld [vmem:[%s166_s24] sm:$0x1] }
  0xa0   : > { %v181_v15 = vpop.xlane.xlu0 %180 }
  0xa1   : > { %v187_v16 = vmul.f32 0.015625, %v181_v15  ;;  %v192_v17 = vmul.f32 %v189_v13, %v189_v13  ;;  %v194_v18 = vmul.f32 %v191_v14, %v191_v14  ;;  %v283_v7 = vsub.s32 %v280_v3, %v235_v34 }
  0xa3   : > { %v190_v19 = vsub.f32 %v429_v5, %v187_v16  ;;  %v195_v20 = vsel %vm175_vm0, %v192_v17, 0.0  ;;  %v201_v21 = vsel %vm175_vm0, %v194_v18, 0.0 }
  0xa4   : > { %196 = vadd.xlane.f32.xlu1 %v195_v20 }
  0xa5   : > { %v193_v22 = vmul.f32 %v190_v19, %v190_v19 }
  0xa7   : > { %v198_v23 = vsel %vm175_vm0, %v193_v22, 0.0 }
  0xa8   : > { %202 = vadd.xlane.f32.xlu1 %v201_v21  ;;  %199 = vadd.xlane.f32.xlu0 %v198_v23 }
 0x12d   : > { %v197_v24 = vpop.xlane.xlu1 %196 }
 0x12e   : > { %v204_v25 = vmul.f32 0.015625, %v197_v24 }
 0x130   : > { %v207_v26 = vadd.f32 1e-06, %v204_v25 }
 0x131   : > { %v203_v27 = vpop.xlane.xlu1 %202  ;;  %v200_v29 = vpop.xlane.xlu0 %199 }
 0x132   : > { %377 = vrsqrt.f32 %v207_v26  ;;  %v206_v30 = vmul.f32 0.015625, %v203_v27  ;;  %v205_v31 = vmul.f32 0.015625, %v200_v29 }
 0x134   : > { %v209_v32 = vadd.f32 1e-06, %v206_v30  ;;  %v208_v33 = vadd.f32 1e-06, %v205_v31 }
 0x136   : > { %379 = vrsqrt.f32 %v209_v32 }
 0x137   : > { %381 = vrsqrt.f32 %v208_v33 }
 0x138   : > { %383 = vrcp.f32 %v267_v43 }
 0x13f   : > { %v378_v37 = vpop.eup %377 }
 0x140   : > { %v213_v40 = vmul.f32 %v378_v37, %v189_v13 }
 0x142   : > { %v222_v42 = vmul.f32 %v357_v39, %v213_v40 }
 0x143   : > { %v380_v41 = vpop.eup %379 }
 0x144   : > { %v382_v44 = vpop.eup %381  ;;  %v215_v46 = vmul.f32 %v380_v41, %v191_v14  ;;  %v231_v49 = vadd.f32 %v358_v45, %v222_v42 }
 0x145   : > { %v214_v47 = vmul.f32 %v382_v44, %v190_v19  ;;  %v384_v62 = vpop.eup %383 }
 0x146   : > { %v224_v48 = vmul.f32 %v357_v39, %v215_v46  ;;  %v246_v54 = vmul.f32 0.0, %v231_v49 }
 0x147   : > { %v223_v50 = vmul.f32 %v357_v39, %v214_v47 }
 0x148   : > { %v233_v52 = vadd.f32 %v358_v45, %v224_v48 }
 0x149   : > { %v232_v53 = vadd.f32 %v358_v45, %v223_v50 }
 0x14a   : > { %v248_v56 = vmul.f32 0.0, %v233_v52 }
 0x14b   : > { %v247_v55 = vmul.f32 %v359_v51, %v232_v53 }
 0x14d   : > { %v249_v57 = vadd.f32 %v247_v55, %v246_v54 }
 0x14f   : > { %v250_v58 = vadd.f32 %v249_v57, %v248_v56 }
 0x151   : > { %v360_v59 = vrot.slane %v250_v58, 9  ;;  %v361_v61 = vrot.slane %v250_v58, 10 }
 0x153   : > { %v255_v60 = vadd.f32 %v360_v59, %v250_v58 }
 0x155   : > { %v259_v1 = vadd.f32 %v361_v61, %v255_v60 }
 0x157   : > { %v270_v2 = vmul.f32 %v384_v62, %v259_v1 }
 0x159   : > { %v272_v4 = vrot.slane %v270_v2, 7 }
 0x15b   : > { %v274_v6 = vadd.f32 %v272_v4, %v429_v5 }
 0x15d   : > { %v275_v8 = vsub.f32 %v274_v6, %v232_v53 }
 0x15f   : > { %v276_v9 = vpack.c.bf16 %v275_v8, %v275_v8 }
 0x161   : > { %v284_v10 = vrot.slane %v276_v9, %v283_v7 }
 0x163   : > { %v291_v11 = vrot.slane %v284_v10, %v283_v7 }
 0x165   : > { %v293_v13 = vshrl.u32 %v291_v11, 16 }
 0x167   : > { %v302_v14 = vsel %vm300_vm7, %v293_v13, %v301_v12 }
 0x168   : > { %303 = vst [vmem:[%s166_s24] sm:$0x1] %v302_v14 }
 0x169 PF: > { %s13_s12 = sadd.s32 1, %s391_s12  }
 0x16a   : > { %p10_p4 = scmp.ge.s32.totalorder %s13_s12, 4  }
 0x16c   :  { %12 = sbr.rel (!%p10_p4) target bundleno = 1 (0x1), region = 62 }

// kernel: poolformer_forward.32
= control target key start
LH: loop header
LB: loop body
LE: loop exit
PB: predicated region body
PF: predicated region fallthrough
CT: control target
= control target key end

     0   :  { %v286_v6 = vmov 1966171168   ;;  %v70_v8 = vlaneseq  ;;  %vm223_vm0 = vcmask 516096   ;;  %s372_s1 = inlined_call_operand.vmem [shape: bf16[256,64], index: 1, kind: input, shape index: {}]   ;;  %s373_s0 = inlined_call_operand.vmem [shape: bf16[2,256], index: 0, kind: input, shape index: {}]   ;;  %s374_s3 = inlined_call_operand.vmem [shape: bf16[2,64], index: 3, kind: input, shape index: {}]   ;;  %s375_s2 = inlined_call_operand.vmem [shape: f32[1,64], index: 2, kind: input, shape index: {}]   ;;  %s376_s4 = inlined_call_operand.vmem [shape: bf16[2,64], index: 4, kind: output, shape index: {}]  }
   0x1   :  { %v270_v0 = vld [vmem:[%s372_s1 + $0x78] sm:$0xff]   ;;  %v272_v2 = vld [vmem:[%s372_s1 + $0x70] sm:$0xff]   ;;  %v274_v4 = vld [vmem:[%s372_s1 + $0x68] sm:$0xff]   ;;  %v68_v7 = vunpack.c.l.s4 %v286_v6 }
   0x2   :  { %v271_v1 = vld [vmem:[%s372_s1 + $0x38] sm:$0xff]   ;;  %247 = vmatprep.subr.bf16.mxu0 %v270_v0  ;;  %v273_v3 = vld [vmem:[%s372_s1 + $0x30] sm:$0xff]   ;;  %v275_v5 = vld [vmem:[%s372_s1 + $0x28] sm:$0xff]   ;;  %v71_v12 = vshrl.u32 %v70_v8, 7 }
   0x3   :  { %248 = vmatpush3.bf16.msra.mxu0 %v271_v1  ;;  %v276_v9 = vld [vmem:[%s372_s1 + $0x60] sm:$0xff]   ;;  %v69_v11 = vunpack.c.0.s8 %v68_v7  ;;  %v278_v13 = vld [vmem:[%s372_s1 + $0x58] sm:$0xff]   ;;  %v280_v16 = vld [vmem:[%s372_s1 + $0x50] sm:$0xff]  }
   0x4   :  { %249 = vmatprep.subr.bf16.mxu0 %v272_v2  ;;  %v277_v10 = vld [vmem:[%s372_s1 + $0x20] sm:$0xff]   ;;  %v279_v14 = vld [vmem:[%s372_s1 + $0x18] sm:$0xff]   ;;  %v281_v19 = vld [vmem:[%s372_s1 + $0x10] sm:$0xff]  }
   0x5   :  { %v72_v15 = vsub.s32 %v69_v11, %v71_v12  ;;  %v230_v17 = vld.sshfl [vmem:[%s373_s0] sm:$0x11 pattern:$0x75316420]  ;;  %v282_v21 = vld [vmem:[%s372_s1 + $0x48] sm:$0xff]  }
   0x6   :  { %v66_v18 = vcombine.high %v230_v17, %v230_v17  ;;  %v283_v22 = vld [vmem:[%s372_s1 + $0x8] sm:$0xff]   ;;  %v284_v23 = vld [vmem:[%s372_s1 + $0x40] sm:$0xff]  }
   0x7   :  { %250 = vmatpush3.bf16.msra.mxu0 %v273_v3  ;;  %v285_v24 = vld [vmem:[%s372_s1] sm:$0xff]   ;;  %v73_v25 = vrot.slane %v230_v17, %v72_v15 }
   0x8   :  { %251 = vmatprep.subr.bf16.mxu0 %v274_v4  ;;  %v80_v20 = vrot.slane %v66_v18, %v72_v15  ;;  %v219_v27 = vld [vmem:[%s374_s3] sm:$0x1] }
   0x9   :  { %v229_v28 = vld [vmem:[%s375_s2] ss:$0 sm:$0xff]  ;;  %v220_v31 = vunpack.c.l.bf16 %v219_v27 }
   0xa   :  { %211 = vmatprep.mubr.bf16.mxu0 %v80_v20 }
   0xb   :  { %252 = vmatpush3.bf16.msra.mxu0 %v275_v5 }
   0xc   :  { %253 = vmatprep.subr.bf16.mxu0 %v276_v9 }
   0xf   :  { %254 = vmatpush3.bf16.msra.mxu0 %v277_v10 }
  0x10   :  { %255 = vmatprep.subr.bf16.mxu0 %v278_v13 }
  0x13   :  { %256 = vmatpush3.bf16.msra.mxu0 %v279_v14 }
  0x14   :  { %257 = vmatprep.subr.bf16.mxu0 %v280_v16 }
  0x17   :  { %258 = vmatpush3.bf16.msra.mxu0 %v281_v19 }
  0x18   :  { %259 = vmatprep.subr.bf16.mxu0 %v282_v21 }
  0x1b   :  { %260 = vmatpush3.bf16.msra.mxu0 %v283_v22 }
  0x1c   :  { %261 = vmatprep.subr.bf16.mxu0 %v284_v23 }
  0x1f   :  { %262 = vmatpush3.bf16.msra.mxu0 %v285_v24 }
  0x22   :  { %212 = vmatmul.mubr.bf16.vlgmr.msra.gmra.mxu0 %v73_v25 }
  0xe2   :  { %v263_v26 = vpop.f32.mrf.mxu0 }
  0xe4   :  { %v264_v29 = vpop.f32.mrf.mxu0 }
  0xe5   :  { %v265_v30 = vadd.f32 %v264_v29, %v263_v26 }
  0xe6   :  { %v266_v32 = vpop.f32.mrf.mxu0 }
  0xe7   :  { %v214_v33 = vadd.f32 %v265_v30, %v229_v28 }
  0xe8   :  { %v267_v34 = vpop.f32.mrf.mxu0 }
  0xe9   :  { %v221_v35 = vadd.f32 %v220_v31, %v214_v33 }
  0xeb   :  { %v222_v36 = vpack.c.bf16 %v221_v35, %v221_v35 }
  0xed   :  { %224 = vst.msk [vmem:[%s376_s4] sm:$0x1] %vm223_vm0, %v222_v36 }

// kernel: poolformer_forward.33
= control target key start
LH: loop header
LB: loop body
LE: loop exit
PB: predicated region body
PF: predicated region fallthrough
CT: control target
= control target key end

     0   :  { %v187_v1 = vmov 0.0   ;;  %vm188_vm0 = vmmov 0   ;;  %s234_s0 = inlined_call_operand.vmem [shape: bf16[2,1,64], index: 0, kind: input, shape index: {}]   ;;  %s235_s1 = inlined_call_operand.vmem [shape: bf16[64,10], index: 1, kind: input, shape index: {}]   ;;  %s236_s2 = inlined_call_operand.vmem [shape: f32[1,10], index: 2, kind: input, shape index: {}]   ;;  %s237_s3 = inlined_call_operand.hbm [shape: f32[2,10], index: 3, kind: output, shape index: {}]  }
   0x1   :  { %v159_v0 = vld [vmem:[%s235_s1 + $0x18] sm:$0xff]   ;;  %144 = vmatprep.subr.bf16.mxu0 %v187_v1  ;;  %v160_v2 = vld [vmem:[%s235_s1 + $0x10] sm:$0xff]   ;;  %152 = vmatprep.mubr.msk.bf16.mxu0 %vm188_vm0, %v187_v1  ;;  %v163_v3 = vld [vmem:[%s234_s0] ss:$0 sps:$4 sm:$0x11]  }
   0x2   :  { %145 = vmatpush3.bf16.msra.mxu0 %v159_v0  ;;  %v164_v4 = vld [vmem:[%s234_s0 + $0x1] ss:$0 sps:$4 sm:$0x11]   ;;  %v161_v5 = vld [vmem:[%s235_s1 + $0x8] sm:$0xff]  }
   0x3   :  { %146 = vmatprep.subr.bf16.mxu0 %v187_v1 }
   0x6   :  { %147 = vmatpush3.bf16.msra.mxu0 %v160_v2 }
   0x7   :  { %8 = vsyncpa [#allocation3], 0  ;;  %148 = vmatprep.subr.bf16.mxu0 %v187_v1  ;;  %v41_v6 = vunpack.c.l.b16 %v163_v3  ;;  %v42_v7 = vunpack.c.l.b16 %v164_v4  ;;  %vm44_vm1 = vcmask 1041409   ;;  %v162_v9 = vld [vmem:[%s235_s1] sm:$0xff]   ;;  %vm71_vm2 = vcmask 523264   ;;  %s189_s25 = smov [#allocation2]  }
   0x8   :  { %v133_v12 = vld [vmem:[%s236_s2] ss:$0 sm:$0xff]  ;;  %s123_s26 = sshll.u32 %s189_s25, 4  ;;  %vm115_vm3 = vcmask 74752   ;;  %s124_s26 = int_to_ptr.vmem [resolvable:$true] %s123_s26 }
   0x9   :  { %v43_v8 = vrot.slane %v42_v7, 7  ;;  %s165_s1 = scalar_lea.vmem %s124_s26, 32  ;;  %p170_p1 = scmp.lt.s32.totalorder %s124_s26, %s124_s26 }
   0xa   :  { %149 = vmatpush3.bf16.msra.mxu0 %v161_v5  ;;  %p166_p0 = scmp.ne.s32.totalorder %s124_s26, %s165_s1  ;;  %p171_p2 = scmp.lt.s32.totalorder %s165_s1, %s165_s1 }
   0xb   :  { %150 = vmatprep.subr.bf16.mxu0 %v187_v1  ;;  %v45_v10 = vsel %vm44_vm1, %v43_v8, %v41_v6 }
   0xc   :  { %v46_v11 = vpack.c.b16 %v45_v10, %v45_v10  ;;  %p172_p3 = por %p171_p2, %p170_p1 }
   0xe   :  { %151 = vmatpush3.bf16.msra.mxu0 %v162_v9  ;;  %p173_p4 = pnand %p172_p3, %p166_p0 }
  0x11   :  { %153 = vmatmul.mubr.msk.bf16.vlgmr.msra.gmra.mxu0 %vm71_vm2, %v46_v11 }
  0xd1   :  { %v109_v13 = vpop.f32.mrf.mxu0 }
  0xd2   :  { %v110_v14 = vadd.f32 %v133_v12, %v109_v13 }
  0xd3   :  { %v154_v15 = vpop.f32.mrf.mxu0 }
  0xd4   :  { %116 = vst.msk [vmem:[#allocation2] sm:$0x3] %vm115_vm3, %v110_v14 }
  0xd5   :  { %v112_v16 = vpop.f32.mrf.mxu0 }
  0xd6   :  { %176 = shalt.err (!%p173_p4)
}
  0xd7   :  { %126 = dma.vmem_to_hbm [thread:$0]  %s124_s26, 32, %s237_s3, [#allocation3]   ;;  %v155_v17 = vpop.f32.mrf.mxu0 }
  0xd8   :  { %185 = dma.done.wait [#allocation3], 32  }
  0xd9   :  { %186 = vsyncadd [#allocation3], 4294967264 }
  0xda   :  { %130 = vsyncpa [#allocation3], 1 }

</bundles_post_ra>
